<compile_context>
chip_gen: v7x
topology: tpu7x:2x2x1
jax: 0.10.0
libtpu: 0.0.40
codegen_flags: <defaults>
</compile_context>

<pallas_src>
import functools

import jax
import jax.numpy as jnp
from jax.experimental import pallas as pl
from jax.experimental.pallas import tpu as pltpu

LEAK = 0.2
EPS = 1e-5


# ----------------------------------------------------------------------------- #
# Pallas kernel: K-tiled matmul + fused (BN) + activation epilogue
# ----------------------------------------------------------------------------- #
def _conv_fused_kernel(p_ref, w_ref, a_ref, b_ref, o_ref, acc_ref,
                       *, act, bn, inv_m):
    """patches (Mp, tk) @ weights (tk, OCp) accumulated in f32.

    Last K step:
      bn=True : per-channel batch mean/var from the accumulator, then
                y = (acc - mean)/sqrt(var+eps) * gamma + beta   (a=gamma, b=beta)
      bn=False: y = acc + bias                                   (b=bias)
      followed by LeakyReLU(0.2) or Sigmoid.
    Padded M rows are all-zero patches -> contribute 0 to sum / sum-of-squares,
    so dividing by the true row count (inv_m) keeps the statistics exact.
    """
    k = pl.program_id(0)

    @pl.when(k == 0)
    def _():
        acc_ref[...] = jnp.zeros_like(acc_ref)

    acc_ref[...] += jnp.dot(p_ref[...], w_ref[...],
                            preferred_element_type=jnp.float32)

    @pl.when(k == pl.num_programs(0) - 1)
    def _():
        y = acc_ref[...]
        if bn:
            s = jnp.sum(y, axis=0, keepdims=True)
            q = jnp.sum(y * y, axis=0, keepdims=True)
            mean = s * inv_m
            var = jnp.maximum(q * inv_m - mean * mean, 0.0)  # biased batch var
            scale = a_ref[...] * jax.lax.rsqrt(var + EPS)
            shift = b_ref[...] - mean * scale
            y = y * scale + shift
        else:
            y = y + b_ref[...]
        if act == "leaky":
            y = jnp.where(y >= 0.0, y, LEAK * y)
        elif act == "sigmoid":
            y = pl.reciprocal(1.0 + jnp.exp(-y), approx=True)
        o_ref[...] = y


# ----------------------------------------------------------------------------- #
# im2col from NHWC (channels stay on the lane axis; K order = (kh, kw, C))
# ----------------------------------------------------------------------------- #
def _im2col_nhwc(x, ksize, stride, pad):
    N, H, W, C = x.shape
    OH = (H + 2 * pad - ksize) // stride + 1
    OW = (W + 2 * pad - ksize) // stride + 1
    xp = jnp.pad(x, ((0, 0), (pad, pad), (pad, pad), (0, 0)))
    cols = []
    for kh in range(ksize):
        for kw in range(ksize):
            cols.append(xp[:, kh:kh + stride * (OH - 1) + 1:stride,
                           kw:kw + stride * (OW - 1) + 1:stride, :])
    p = jnp.concatenate(cols, axis=-1)               # (N, OH, OW, KH*KW*C)
    return p.reshape(N * OH * OW, ksize * ksize * C), OH, OW


# ----------------------------------------------------------------------------- #
# One conv (+ optional BN) + activation layer, fully inside one pallas_call
# ----------------------------------------------------------------------------- #
def conv_layer(x_nhwc, w, bias, gamma, beta, stride, act, bn):
    N = x_nhwc.shape[0]
    OC, C, KH, KW = w.shape
    patches, OH, OW = _im2col_nhwc(x_nhwc, KH, stride, pad=1)
    M, K = patches.shape

    Mp = ((M + 7) // 8) * 8                          # sublane-aligned rows
    if Mp != M:
        patches = jnp.pad(patches, ((0, Mp - M), (0, 0)))
    OCp = ((OC + 127) // 128) * 128                  # lane-dense output

    # weight rows ordered (kh, kw, c) to match the im2col K ordering
    wmat = w.transpose(2, 3, 1, 0).reshape(K, OC)
    if bn:
        a = gamma.reshape(1, OC).astype(jnp.float32)
        b = beta.reshape(1, OC).astype(jnp.float32)
    else:
        a = jnp.ones((1, OC), jnp.float32)           # unused in the kernel
        b = bias.reshape(1, OC).astype(jnp.float32)
    if OCp != OC:
        wmat = jnp.pad(wmat, ((0, 0), (0, OCp - OC)))
        a = jnp.pad(a, ((0, 0), (0, OCp - OC)))
        b = jnp.pad(b, ((0, 0), (0, OCp - OC)))

    # bf16 MXU inputs, f32 accumulation / epilogue
    patches = patches.astype(jnp.bfloat16)
    wmat = wmat.astype(jnp.bfloat16)

    # Large K tiles: full K when it fits cleanly, else 2048-wide slabs.
    tk = 2048 if (K > 2048 and K % 2048 == 0) else K
    kt = K // tk

    kernel = functools.partial(_conv_fused_kernel, act=act, bn=bn,
                               inv_m=1.0 / float(M))
    y = pl.pallas_call(
        kernel,
        out_shape=jax.ShapeDtypeStruct((Mp, OCp), jnp.float32),
        grid=(kt,),
        in_specs=[pl.BlockSpec((Mp, tk), lambda k: (0, k)),
                  pl.BlockSpec((tk, OCp), lambda k: (k, 0)),
                  pl.BlockSpec((1, OCp), lambda k: (0, 0)),
                  pl.BlockSpec((1, OCp), lambda k: (0, 0))],
        out_specs=pl.BlockSpec((Mp, OCp), lambda k: (0, 0)),
        scratch_shapes=[pltpu.VMEM((Mp, OCp), jnp.float32)],
        compiler_params=pltpu.CompilerParams(
            dimension_semantics=("arbitrary",)),
    )(patches, wmat, a, b)

    return y[:M, :OC].reshape(N, OH, OW, OC)


# ----------------------------------------------------------------------------- #
# Full Discriminator forward (activations stay NHWC between layers)
# ----------------------------------------------------------------------------- #
def discriminator_forward(grayscale, colorized, params):
    x = jnp.concatenate([grayscale, colorized], axis=1)     # NCHW, C = 4
    x = x.transpose(0, 2, 3, 1)                             # -> NHWC

    x = conv_layer(x, params["w1"], params["b1"], None, None, 2, "leaky", False)
    x = conv_layer(x, params["w2"], None, params["g2"], params["bt2"], 2,
                   "leaky", True)
    x = conv_layer(x, params["w3"], None, params["g3"], params["bt3"], 2,
                   "leaky", True)
    x = conv_layer(x, params["w4"], None, params["g4"], params["bt4"], 1,
                   "leaky", True)
    x = conv_layer(x, params["w5"], params["b5"], None, None, 1, "sigmoid",
                   False)

    return x.transpose(0, 3, 1, 2)                          # -> NCHW


# ----------------------------------------------------------------------------- #
# Pure-JAX reference (for correctness check)
# ----------------------------------------------------------------------------- #
def ref_forward(grayscale, colorized, params):
    x = jnp.concatenate([grayscale, colorized], axis=1)

    def conv(x, w, b, stride):
        y = jax.lax.conv_general_dilated(
            x, w, (stride, stride), ((1, 1), (1, 1)),
            dimension_numbers=("NCHW", "OIHW", "NCHW"))
        return y + b.reshape(1, -1, 1, 1)

    def bnorm(x, g, bt):
        mean = jnp.mean(x, axis=(0, 2, 3), keepdims=True)
        var = jnp.mean((x - mean) ** 2, axis=(0, 2, 3), keepdims=True)
        return (x - mean) / jnp.sqrt(var + EPS) * g.reshape(1, -1, 1, 1) \
            + bt.reshape(1, -1, 1, 1)

    leaky = lambda v: jnp.where(v >= 0.0, v, LEAK * v)

    x = leaky(conv(x, params["w1"], params["b1"], 2))
    x = leaky(bnorm(conv(x, params["w2"], params["b2"], 2), params["g2"], params["bt2"]))
    x = leaky(bnorm(conv(x, params["w3"], params["b3"], 2), params["g3"], params["bt3"]))
    x = leaky(bnorm(conv(x, params["w4"], params["b4"], 1), params["g4"], params["bt4"]))
    x = jax.nn.sigmoid(conv(x, params["w5"], params["b5"], 1))
    return x


# ----------------------------------------------------------------------------- #
# Deterministic parameter init (synthetic; matches nn.Module shapes)
# ----------------------------------------------------------------------------- #
def init_params(key):
    convs = [("1", 4, 64), ("2", 64, 128), ("3", 128, 256),
             ("4", 256, 512), ("5", 512, 1)]
    params = {}
    for name, cin, cout in convs:
        key, kw, kb = jax.random.split(key, 3)
        fan_in = float(cin * 4 * 4)
        params["w" + name] = (jax.random.normal(kw, (cout, cin, 4, 4), jnp.float32)
                              / (fan_in ** 0.5))
        params["b" + name] = 0.05 * jax.random.normal(kb, (cout,), jnp.float32)
    for name, c in [("2", 128), ("3", 256), ("4", 512)]:
        key, kg, kb = jax.random.split(key, 3)
        params["g" + name] = 1.0 + 0.1 * jax.random.normal(kg, (c,), jnp.float32)
        params["bt" + name] = 0.1 * jax.random.normal(kb, (c,), jnp.float32)
    return params


# ----------------------------------------------------------------------------- #
if __name__ == "__main__":
    key = jax.random.PRNGKey(0)
    kp, kg, kc = jax.random.split(key, 3)
    params = init_params(kp)

    N, H, W = 2, 32, 32
    grayscale = jax.random.normal(kg, (N, 1, H, W), jnp.float32)
    colorized = jax.random.normal(kc, (N, 3, H, W), jnp.float32)

    fwd = jax.jit(discriminator_forward)
    out = fwd(grayscale, colorized, params)
    out = jax.block_until_ready(out)

    assert out.shape == (N, 1, 2, 2), out.shape

    ref = ref_forward(grayscale, colorized, params)
    err = float(jnp.max(jnp.abs(out - ref)))
    assert err < 2e-2, f"max abs error vs reference: {err}"

    print("KERNEL_OK")
</pallas_src>

<mosaic_0001>
module attributes {stable_mosaic.version = 11 : i64} {
  func.func @_conv_fused_kernel(%arg0: i32, %arg1: memref<512x64xbf16, #tpu.memory_space<vmem>>, %arg2: memref<64x128xbf16, #tpu.memory_space<vmem>>, %arg3: memref<1x128xf32, #tpu.memory_space<vmem>>, %arg4: memref<1x128xf32, #tpu.memory_space<vmem>>, %arg5: memref<512x128xf32, #tpu.memory_space<vmem>>, %arg6: memref<512x128xf32, #tpu.memory_space<vmem>>) attributes {dimension_semantics = [#tpu.dimension_semantics<arbitrary>], iteration_bounds = array<i64: 1>, scalar_prefetch = 0 : i64, scratch_operands = 1 : i64, tpu.core_type = #tpu.core_type<tc>, window_params = [{transform_indices = @transform_0, window_bounds = array<i64: 512, 64>}, {transform_indices = @transform_1, window_bounds = array<i64: 64, 128>}, {pipeline_mode = #tpu.pipeline_mode<synchronous>, transform_indices = @transform_2, window_bounds = array<i64: 1, 128>}, {pipeline_mode = #tpu.pipeline_mode<synchronous>, transform_indices = @transform_3, window_bounds = array<i64: 1, 128>}, {pipeline_mode = #tpu.pipeline_mode<synchronous>, transform_indices = @transform_4, window_bounds = array<i64: 512, 128>}]} {
    %c0_i32 = arith.constant 0 : i32
    %0 = arith.cmpi eq, %arg0, %c0_i32 : i32
    %1 = arith.extui %0 : i1 to i32
    %c0_i32_0 = arith.constant 0 : i32
    %2 = arith.cmpi ne, %1, %c0_i32_0 : i32
    scf.if %2 {
      %cst_10 = arith.constant 0.000000e+00 : f32
      %12 = vector.broadcast %cst_10 : f32 to vector<512x128xf32>
      %c0_11 = arith.constant 0 : index
      %c0_12 = arith.constant 0 : index
      %13 = vector.load %arg6[%c0_11, %c0_12] : memref<512x128xf32, #tpu.memory_space<vmem>>, vector<512x128xf32>
      tpu.vector_store %arg6[%c0_11, %c0_12], %12 {strides = array<i32>} : memref<512x128xf32, #tpu.memory_space<vmem>>, vector<512x128xf32>,
    } else {
    }
    %c0 = arith.constant 0 : index
    %c0_1 = arith.constant 0 : index
    %3 = vector.load %arg6[%c0, %c0_1] : memref<512x128xf32, #tpu.memory_space<vmem>>, vector<512x128xf32>
    %c0_2 = arith.constant 0 : index
    %c0_3 = arith.constant 0 : index
    %4 = vector.load %arg1[%c0_2, %c0_3] : memref<512x64xbf16, #tpu.memory_space<vmem>>, vector<512x64xbf16>
    %c0_4 = arith.constant 0 : index
    %c0_5 = arith.constant 0 : index
    %5 = vector.load %arg2[%c0_4, %c0_5] : memref<64x128xbf16, #tpu.memory_space<vmem>>, vector<64x128xbf16>
    %cst = arith.constant dense<0.000000e+00> : vector<512x128xf32>
    %6 = tpu.matmul %4, %5, %cst {dimension_numbers = #tpu.dot_dimension_numbers<[1], [0], [0], [1], [0, 0, 1, 1], [], []>} : vector<512x64xbf16>, vector<64x128xbf16>, vector<512x128xf32> -> vector<512x128xf32>
    %7 = arith.addf %3, %6 : vector<512x128xf32>
    %c0_6 = arith.constant 0 : index
    %c0_7 = arith.constant 0 : index
    %8 = vector.load %arg6[%c0_6, %c0_7] : memref<512x128xf32, #tpu.memory_space<vmem>>, vector<512x128xf32>
    tpu.vector_store %arg6[%c0_6, %c0_7], %7 {strides = array<i32>} : memref<512x128xf32, #tpu.memory_space<vmem>>, vector<512x128xf32>,
    %c0_i32_8 = arith.constant 0 : i32
    %9 = arith.cmpi eq, %arg0, %c0_i32_8 : i32
    %10 = arith.extui %9 : i1 to i32
    %c0_i32_9 = arith.constant 0 : i32
    %11 = arith.cmpi ne, %10, %c0_i32_9 : i32
    scf.if %11 {
      %c0_10 = arith.constant 0 : index
      %c0_11 = arith.constant 0 : index
      %12 = vector.load %arg6[%c0_10, %c0_11] : memref<512x128xf32, #tpu.memory_space<vmem>>, vector<512x128xf32>
      %c0_12 = arith.constant 0 : index
      %c0_13 = arith.constant 0 : index
      %13 = vector.load %arg4[%c0_12, %c0_13] : memref<1x128xf32, #tpu.memory_space<vmem>>, vector<1x128xf32>
      %14 = vector.broadcast %13 : vector<1x128xf32> to vector<512x128xf32>
      %15 = arith.addf %12, %14 : vector<512x128xf32>
      %cst_14 = arith.constant 0.000000e+00 : f32
      %16 = vector.broadcast %cst_14 : f32 to vector<512x128xf32>
      %17 = arith.cmpf oge, %15, %16 : vector<512x128xf32>
      %cst_15 = arith.constant 2.000000e-01 : f32
      %18 = vector.broadcast %cst_15 : f32 to vector<512x128xf32>
      %19 = arith.mulf %18, %15 : vector<512x128xf32>
      %20 = arith.select %17, %15, %19 : vector<512x128xi1>, vector<512x128xf32>
      %c0_16 = arith.constant 0 : index
      %c0_17 = arith.constant 0 : index
      %21 = vector.load %arg5[%c0_16, %c0_17] : memref<512x128xf32, #tpu.memory_space<vmem>>, vector<512x128xf32>
      tpu.vector_store %arg5[%c0_16, %c0_17], %20 {strides = array<i32>} : memref<512x128xf32, #tpu.memory_space<vmem>>, vector<512x128xf32>,
    } else {
    }
    return
  }
  func.func @transform_0(%arg0: i32) -> (i32, i32) {
    %c0_i32 = arith.constant 0 : i32
    %c0_i32_0 = arith.constant 0 : i32
    return %c0_i32, %arg0 : i32, i32
  }
  func.func @transform_1(%arg0: i32) -> (i32, i32) {
    %c0_i32 = arith.constant 0 : i32
    %c0_i32_0 = arith.constant 0 : i32
    return %arg0, %c0_i32 : i32, i32
  }
  func.func @transform_2(%arg0: i32) -> (i32, i32) {
    %c0_i32 = arith.constant 0 : i32
    %c0_i32_0 = arith.constant 0 : i32
    %c0_i32_1 = arith.constant 0 : i32
    return %c0_i32, %c0_i32_0 : i32, i32
  }
  func.func @transform_3(%arg0: i32) -> (i32, i32) {
    %c0_i32 = arith.constant 0 : i32
    %c0_i32_0 = arith.constant 0 : i32
    %c0_i32_1 = arith.constant 0 : i32
    return %c0_i32, %c0_i32_0 : i32, i32
  }
  func.func @transform_4(%arg0: i32) -> (i32, i32) {
    %c0_i32 = arith.constant 0 : i32
    %c0_i32_0 = arith.constant 0 : i32
    %c0_i32_1 = arith.constant 0 : i32
    return %c0_i32, %c0_i32_0 : i32, i32
  }
}

module attributes {stable_mosaic.version = 11 : i64} {
  func.func @_conv_fused_kernel(%arg0: i32, %arg1: memref<128x1024xbf16, #tpu.memory_space<vmem>>, %arg2: memref<1024x128xbf16, #tpu.memory_space<vmem>>, %arg3: memref<1x128xf32, #tpu.memory_space<vmem>>, %arg4: memref<1x128xf32, #tpu.memory_space<vmem>>, %arg5: memref<128x128xf32, #tpu.memory_space<vmem>>, %arg6: memref<128x128xf32, #tpu.memory_space<vmem>>) attributes {dimension_semantics = [#tpu.dimension_semantics<arbitrary>], iteration_bounds = array<i64: 1>, scalar_prefetch = 0 : i64, scratch_operands = 1 : i64, tpu.core_type = #tpu.core_type<tc>, window_params = [{transform_indices = @transform_0, window_bounds = array<i64: 128, 1024>}, {transform_indices = @transform_1, window_bounds = array<i64: 1024, 128>}, {pipeline_mode = #tpu.pipeline_mode<synchronous>, transform_indices = @transform_2, window_bounds = array<i64: 1, 128>}, {pipeline_mode = #tpu.pipeline_mode<synchronous>, transform_indices = @transform_3, window_bounds = array<i64: 1, 128>}, {pipeline_mode = #tpu.pipeline_mode<synchronous>, transform_indices = @transform_4, window_bounds = array<i64: 128, 128>}]} {
    %c0_i32 = arith.constant 0 : i32
    %0 = arith.cmpi eq, %arg0, %c0_i32 : i32
    %1 = arith.extui %0 : i1 to i32
    %c0_i32_0 = arith.constant 0 : i32
    %2 = arith.cmpi ne, %1, %c0_i32_0 : i32
    scf.if %2 {
      %cst_10 = arith.constant 0.000000e+00 : f32
      %12 = vector.broadcast %cst_10 : f32 to vector<128x128xf32>
      %c0_11 = arith.constant 0 : index
      %c0_12 = arith.constant 0 : index
      %13 = vector.load %arg6[%c0_11, %c0_12] : memref<128x128xf32, #tpu.memory_space<vmem>>, vector<128x128xf32>
      tpu.vector_store %arg6[%c0_11, %c0_12], %12 {strides = array<i32>} : memref<128x128xf32, #tpu.memory_space<vmem>>, vector<128x128xf32>,
    } else {
    }
    %c0 = arith.constant 0 : index
    %c0_1 = arith.constant 0 : index
    %3 = vector.load %arg6[%c0, %c0_1] : memref<128x128xf32, #tpu.memory_space<vmem>>, vector<128x128xf32>
    %c0_2 = arith.constant 0 : index
    %c0_3 = arith.constant 0 : index
    %4 = vector.load %arg1[%c0_2, %c0_3] : memref<128x1024xbf16, #tpu.memory_space<vmem>>, vector<128x1024xbf16>
    %c0_4 = arith.constant 0 : index
    %c0_5 = arith.constant 0 : index
    %5 = vector.load %arg2[%c0_4, %c0_5] : memref<1024x128xbf16, #tpu.memory_space<vmem>>, vector<1024x128xbf16>
    %cst = arith.constant dense<0.000000e+00> : vector<128x128xf32>
    %6 = tpu.matmul %4, %5, %cst {dimension_numbers = #tpu.dot_dimension_numbers<[1], [0], [0], [1], [0, 0, 1, 1], [], []>} : vector<128x1024xbf16>, vector<1024x128xbf16>, vector<128x128xf32> -> vector<128x128xf32>
    %7 = arith.addf %3, %6 : vector<128x128xf32>
    %c0_6 = arith.constant 0 : index
    %c0_7 = arith.constant 0 : index
    %8 = vector.load %arg6[%c0_6, %c0_7] : memref<128x128xf32, #tpu.memory_space<vmem>>, vector<128x128xf32>
    tpu.vector_store %arg6[%c0_6, %c0_7], %7 {strides = array<i32>} : memref<128x128xf32, #tpu.memory_space<vmem>>, vector<128x128xf32>,
    %c0_i32_8 = arith.constant 0 : i32
    %9 = arith.cmpi eq, %arg0, %c0_i32_8 : i32
    %10 = arith.extui %9 : i1 to i32
    %c0_i32_9 = arith.constant 0 : i32
    %11 = arith.cmpi ne, %10, %c0_i32_9 : i32
    scf.if %11 {
      %c0_10 = arith.constant 0 : index
      %c0_11 = arith.constant 0 : index
      %12 = vector.load %arg6[%c0_10, %c0_11] : memref<128x128xf32, #tpu.memory_space<vmem>>, vector<128x128xf32>
      %cst_12 = arith.constant dense<0.000000e+00> : vector<128xf32>
      %13 = vector.multi_reduction <add>, %12, %cst_12 [0] : vector<128x128xf32> to vector<128xf32>
      %14 = vector.shape_cast %13 : vector<128xf32> to vector<1x128xf32>
      %15 = arith.mulf %12, %12 : vector<128x128xf32>
      %cst_13 = arith.constant dense<0.000000e+00> : vector<128xf32>
      %16 = vector.multi_reduction <add>, %15, %cst_13 [0] : vector<128x128xf32> to vector<128xf32>
      %17 = vector.shape_cast %16 : vector<128xf32> to vector<1x128xf32>
      %cst_14 = arith.constant 7.812500e-03 : f32
      %18 = vector.broadcast %cst_14 : f32 to vector<1x128xf32>
      %19 = arith.mulf %14, %18 : vector<1x128xf32>
      %cst_15 = arith.constant 7.812500e-03 : f32
      %20 = vector.broadcast %cst_15 : f32 to vector<1x128xf32>
      %21 = arith.mulf %17, %20 : vector<1x128xf32>
      %22 = arith.mulf %19, %19 : vector<1x128xf32>
      %23 = arith.subf %21, %22 : vector<1x128xf32>
      %cst_16 = arith.constant 0.000000e+00 : f32
      %24 = vector.broadcast %cst_16 : f32 to vector<1x128xf32>
      %25 = arith.maximumf %23, %24 : vector<1x128xf32>
      %c0_17 = arith.constant 0 : index
      %c0_18 = arith.constant 0 : index
      %26 = vector.load %arg3[%c0_17, %c0_18] : memref<1x128xf32, #tpu.memory_space<vmem>>, vector<1x128xf32>
      %cst_19 = arith.constant 9.99999974E-6 : f32
      %27 = vector.broadcast %cst_19 : f32 to vector<1x128xf32>
      %28 = arith.addf %25, %27 : vector<1x128xf32>
      %29 = math.rsqrt %28 : vector<1x128xf32>
      %30 = arith.mulf %26, %29 : vector<1x128xf32>
      %c0_20 = arith.constant 0 : index
      %c0_21 = arith.constant 0 : index
      %31 = vector.load %arg4[%c0_20, %c0_21] : memref<1x128xf32, #tpu.memory_space<vmem>>, vector<1x128xf32>
      %32 = arith.mulf %19, %30 : vector<1x128xf32>
      %33 = arith.subf %31, %32 : vector<1x128xf32>
      %34 = vector.broadcast %30 : vector<1x128xf32> to vector<128x128xf32>
      %35 = arith.mulf %12, %34 : vector<128x128xf32>
      %36 = vector.broadcast %33 : vector<1x128xf32> to vector<128x128xf32>
      %37 = arith.addf %35, %36 : vector<128x128xf32>
      %cst_22 = arith.constant 0.000000e+00 : f32
      %38 = vector.broadcast %cst_22 : f32 to vector<128x128xf32>
      %39 = arith.cmpf oge, %37, %38 : vector<128x128xf32>
      %cst_23 = arith.constant 2.000000e-01 : f32
      %40 = vector.broadcast %cst_23 : f32 to vector<128x128xf32>
      %41 = arith.mulf %40, %37 : vector<128x128xf32>
      %42 = arith.select %39, %37, %41 : vector<128x128xi1>, vector<128x128xf32>
      %c0_24 = arith.constant 0 : index
      %c0_25 = arith.constant 0 : index
      %43 = vector.load %arg5[%c0_24, %c0_25] : memref<128x128xf32, #tpu.memory_space<vmem>>, vector<128x128xf32>
      tpu.vector_store %arg5[%c0_24, %c0_25], %42 {strides = array<i32>} : memref<128x128xf32, #tpu.memory_space<vmem>>, vector<128x128xf32>,
    } else {
    }
    return
  }
  func.func @transform_0(%arg0: i32) -> (i32, i32) {
    %c0_i32 = arith.constant 0 : i32
    %c0_i32_0 = arith.constant 0 : i32
    return %c0_i32, %arg0 : i32, i32
  }
  func.func @transform_1(%arg0: i32) -> (i32, i32) {
    %c0_i32 = arith.constant 0 : i32
    %c0_i32_0 = arith.constant 0 : i32
    return %arg0, %c0_i32 : i32, i32
  }
  func.func @transform_2(%arg0: i32) -> (i32, i32) {
    %c0_i32 = arith.constant 0 : i32
    %c0_i32_0 = arith.constant 0 : i32
    %c0_i32_1 = arith.constant 0 : i32
    return %c0_i32, %c0_i32_0 : i32, i32
  }
  func.func @transform_3(%arg0: i32) -> (i32, i32) {
    %c0_i32 = arith.constant 0 : i32
    %c0_i32_0 = arith.constant 0 : i32
    %c0_i32_1 = arith.constant 0 : i32
    return %c0_i32, %c0_i32_0 : i32, i32
  }
  func.func @transform_4(%arg0: i32) -> (i32, i32) {
    %c0_i32 = arith.constant 0 : i32
    %c0_i32_0 = arith.constant 0 : i32
    %c0_i32_1 = arith.constant 0 : i32
    return %c0_i32, %c0_i32_0 : i32, i32
  }
}

module attributes {stable_mosaic.version = 11 : i64} {
  func.func @_conv_fused_kernel(%arg0: i32, %arg1: memref<32x2048xbf16, #tpu.memory_space<vmem>>, %arg2: memref<2048x256xbf16, #tpu.memory_space<vmem>>, %arg3: memref<1x256xf32, #tpu.memory_space<vmem>>, %arg4: memref<1x256xf32, #tpu.memory_space<vmem>>, %arg5: memref<32x256xf32, #tpu.memory_space<vmem>>, %arg6: memref<32x256xf32, #tpu.memory_space<vmem>>) attributes {dimension_semantics = [#tpu.dimension_semantics<arbitrary>], iteration_bounds = array<i64: 1>, scalar_prefetch = 0 : i64, scratch_operands = 1 : i64, tpu.core_type = #tpu.core_type<tc>, window_params = [{transform_indices = @transform_0, window_bounds = array<i64: 32, 2048>}, {transform_indices = @transform_1, window_bounds = array<i64: 2048, 256>}, {pipeline_mode = #tpu.pipeline_mode<synchronous>, transform_indices = @transform_2, window_bounds = array<i64: 1, 256>}, {pipeline_mode = #tpu.pipeline_mode<synchronous>, transform_indices = @transform_3, window_bounds = array<i64: 1, 256>}, {pipeline_mode = #tpu.pipeline_mode<synchronous>, transform_indices = @transform_4, window_bounds = array<i64: 32, 256>}]} {
    %c0_i32 = arith.constant 0 : i32
    %0 = arith.cmpi eq, %arg0, %c0_i32 : i32
    %1 = arith.extui %0 : i1 to i32
    %c0_i32_0 = arith.constant 0 : i32
    %2 = arith.cmpi ne, %1, %c0_i32_0 : i32
    scf.if %2 {
      %cst_10 = arith.constant 0.000000e+00 : f32
      %12 = vector.broadcast %cst_10 : f32 to vector<32x256xf32>
      %c0_11 = arith.constant 0 : index
      %c0_12 = arith.constant 0 : index
      %13 = vector.load %arg6[%c0_11, %c0_12] : memref<32x256xf32, #tpu.memory_space<vmem>>, vector<32x256xf32>
      tpu.vector_store %arg6[%c0_11, %c0_12], %12 {strides = array<i32>} : memref<32x256xf32, #tpu.memory_space<vmem>>, vector<32x256xf32>,
    } else {
    }
    %c0 = arith.constant 0 : index
    %c0_1 = arith.constant 0 : index
    %3 = vector.load %arg6[%c0, %c0_1] : memref<32x256xf32, #tpu.memory_space<vmem>>, vector<32x256xf32>
    %c0_2 = arith.constant 0 : index
    %c0_3 = arith.constant 0 : index
    %4 = vector.load %arg1[%c0_2, %c0_3] : memref<32x2048xbf16, #tpu.memory_space<vmem>>, vector<32x2048xbf16>
    %c0_4 = arith.constant 0 : index
    %c0_5 = arith.constant 0 : index
    %5 = vector.load %arg2[%c0_4, %c0_5] : memref<2048x256xbf16, #tpu.memory_space<vmem>>, vector<2048x256xbf16>
    %cst = arith.constant dense<0.000000e+00> : vector<32x256xf32>
    %6 = tpu.matmul %4, %5, %cst {dimension_numbers = #tpu.dot_dimension_numbers<[1], [0], [0], [1], [0, 0, 1, 1], [], []>} : vector<32x2048xbf16>, vector<2048x256xbf16>, vector<32x256xf32> -> vector<32x256xf32>
    %7 = arith.addf %3, %6 : vector<32x256xf32>
    %c0_6 = arith.constant 0 : index
    %c0_7 = arith.constant 0 : index
    %8 = vector.load %arg6[%c0_6, %c0_7] : memref<32x256xf32, #tpu.memory_space<vmem>>, vector<32x256xf32>
    tpu.vector_store %arg6[%c0_6, %c0_7], %7 {strides = array<i32>} : memref<32x256xf32, #tpu.memory_space<vmem>>, vector<32x256xf32>,
    %c0_i32_8 = arith.constant 0 : i32
    %9 = arith.cmpi eq, %arg0, %c0_i32_8 : i32
    %10 = arith.extui %9 : i1 to i32
    %c0_i32_9 = arith.constant 0 : i32
    %11 = arith.cmpi ne, %10, %c0_i32_9 : i32
    scf.if %11 {
      %c0_10 = arith.constant 0 : index
      %c0_11 = arith.constant 0 : index
      %12 = vector.load %arg6[%c0_10, %c0_11] : memref<32x256xf32, #tpu.memory_space<vmem>>, vector<32x256xf32>
      %cst_12 = arith.constant dense<0.000000e+00> : vector<256xf32>
      %13 = vector.multi_reduction <add>, %12, %cst_12 [0] : vector<32x256xf32> to vector<256xf32>
      %14 = vector.shape_cast %13 : vector<256xf32> to vector<1x256xf32>
      %15 = arith.mulf %12, %12 : vector<32x256xf32>
      %cst_13 = arith.constant dense<0.000000e+00> : vector<256xf32>
      %16 = vector.multi_reduction <add>, %15, %cst_13 [0] : vector<32x256xf32> to vector<256xf32>
      %17 = vector.shape_cast %16 : vector<256xf32> to vector<1x256xf32>
      %cst_14 = arith.constant 3.125000e-02 : f32
      %18 = vector.broadcast %cst_14 : f32 to vector<1x256xf32>
      %19 = arith.mulf %14, %18 : vector<1x256xf32>
      %cst_15 = arith.constant 3.125000e-02 : f32
      %20 = vector.broadcast %cst_15 : f32 to vector<1x256xf32>
      %21 = arith.mulf %17, %20 : vector<1x256xf32>
      %22 = arith.mulf %19, %19 : vector<1x256xf32>
      %23 = arith.subf %21, %22 : vector<1x256xf32>
      %cst_16 = arith.constant 0.000000e+00 : f32
      %24 = vector.broadcast %cst_16 : f32 to vector<1x256xf32>
      %25 = arith.maximumf %23, %24 : vector<1x256xf32>
      %c0_17 = arith.constant 0 : index
      %c0_18 = arith.constant 0 : index
      %26 = vector.load %arg3[%c0_17, %c0_18] : memref<1x256xf32, #tpu.memory_space<vmem>>, vector<1x256xf32>
      %cst_19 = arith.constant 9.99999974E-6 : f32
      %27 = vector.broadcast %cst_19 : f32 to vector<1x256xf32>
      %28 = arith.addf %25, %27 : vector<1x256xf32>
      %29 = math.rsqrt %28 : vector<1x256xf32>
      %30 = arith.mulf %26, %29 : vector<1x256xf32>
      %c0_20 = arith.constant 0 : index
      %c0_21 = arith.constant 0 : index
      %31 = vector.load %arg4[%c0_20, %c0_21] : memref<1x256xf32, #tpu.memory_space<vmem>>, vector<1x256xf32>
      %32 = arith.mulf %19, %30 : vector<1x256xf32>
      %33 = arith.subf %31, %32 : vector<1x256xf32>
      %34 = vector.broadcast %30 : vector<1x256xf32> to vector<32x256xf32>
      %35 = arith.mulf %12, %34 : vector<32x256xf32>
      %36 = vector.broadcast %33 : vector<1x256xf32> to vector<32x256xf32>
      %37 = arith.addf %35, %36 : vector<32x256xf32>
      %cst_22 = arith.constant 0.000000e+00 : f32
      %38 = vector.broadcast %cst_22 : f32 to vector<32x256xf32>
      %39 = arith.cmpf oge, %37, %38 : vector<32x256xf32>
      %cst_23 = arith.constant 2.000000e-01 : f32
      %40 = vector.broadcast %cst_23 : f32 to vector<32x256xf32>
      %41 = arith.mulf %40, %37 : vector<32x256xf32>
      %42 = arith.select %39, %37, %41 : vector<32x256xi1>, vector<32x256xf32>
      %c0_24 = arith.constant 0 : index
      %c0_25 = arith.constant 0 : index
      %43 = vector.load %arg5[%c0_24, %c0_25] : memref<32x256xf32, #tpu.memory_space<vmem>>, vector<32x256xf32>
      tpu.vector_store %arg5[%c0_24, %c0_25], %42 {strides = array<i32>} : memref<32x256xf32, #tpu.memory_space<vmem>>, vector<32x256xf32>,
    } else {
    }
    return
  }
  func.func @transform_0(%arg0: i32) -> (i32, i32) {
    %c0_i32 = arith.constant 0 : i32
    %c0_i32_0 = arith.constant 0 : i32
    return %c0_i32, %arg0 : i32, i32
  }
  func.func @transform_1(%arg0: i32) -> (i32, i32) {
    %c0_i32 = arith.constant 0 : i32
    %c0_i32_0 = arith.constant 0 : i32
    return %arg0, %c0_i32 : i32, i32
  }
  func.func @transform_2(%arg0: i32) -> (i32, i32) {
    %c0_i32 = arith.constant 0 : i32
    %c0_i32_0 = arith.constant 0 : i32
    %c0_i32_1 = arith.constant 0 : i32
    return %c0_i32, %c0_i32_0 : i32, i32
  }
  func.func @transform_3(%arg0: i32) -> (i32, i32) {
    %c0_i32 = arith.constant 0 : i32
    %c0_i32_0 = arith.constant 0 : i32
    %c0_i32_1 = arith.constant 0 : i32
    return %c0_i32, %c0_i32_0 : i32, i32
  }
  func.func @transform_4(%arg0: i32) -> (i32, i32) {
    %c0_i32 = arith.constant 0 : i32
    %c0_i32_0 = arith.constant 0 : i32
    %c0_i32_1 = arith.constant 0 : i32
    return %c0_i32, %c0_i32_0 : i32, i32
  }
}

module attributes {stable_mosaic.version = 11 : i64} {
  func.func @_conv_fused_kernel(%arg0: i32, %arg1: memref<24x2048xbf16, #tpu.memory_space<vmem>>, %arg2: memref<2048x512xbf16, #tpu.memory_space<vmem>>, %arg3: memref<1x512xf32, #tpu.memory_space<vmem>>, %arg4: memref<1x512xf32, #tpu.memory_space<vmem>>, %arg5: memref<24x512xf32, #tpu.memory_space<vmem>>, %arg6: memref<24x512xf32, #tpu.memory_space<vmem>>) attributes {dimension_semantics = [#tpu.dimension_semantics<arbitrary>], iteration_bounds = array<i64: 2>, scalar_prefetch = 0 : i64, scratch_operands = 1 : i64, tpu.core_type = #tpu.core_type<tc>, window_params = [{transform_indices = @transform_0, window_bounds = array<i64: 24, 2048>}, {transform_indices = @transform_1, window_bounds = array<i64: 2048, 512>}, {pipeline_mode = #tpu.pipeline_mode<synchronous>, transform_indices = @transform_2, window_bounds = array<i64: 1, 512>}, {pipeline_mode = #tpu.pipeline_mode<synchronous>, transform_indices = @transform_3, window_bounds = array<i64: 1, 512>}, {pipeline_mode = #tpu.pipeline_mode<synchronous>, transform_indices = @transform_4, window_bounds = array<i64: 24, 512>}]} {
    %c0_i32 = arith.constant 0 : i32
    %0 = arith.cmpi eq, %arg0, %c0_i32 : i32
    %1 = arith.extui %0 : i1 to i32
    %c0_i32_0 = arith.constant 0 : i32
    %2 = arith.cmpi ne, %1, %c0_i32_0 : i32
    scf.if %2 {
      %cst_9 = arith.constant 0.000000e+00 : f32
      %12 = vector.broadcast %cst_9 : f32 to vector<24x512xf32>
      %c0_10 = arith.constant 0 : index
      %c0_11 = arith.constant 0 : index
      %13 = vector.load %arg6[%c0_10, %c0_11] : memref<24x512xf32, #tpu.memory_space<vmem>>, vector<24x512xf32>
      tpu.vector_store %arg6[%c0_10, %c0_11], %12 {strides = array<i32>} : memref<24x512xf32, #tpu.memory_space<vmem>>, vector<24x512xf32>,
    } else {
    }
    %c0 = arith.constant 0 : index
    %c0_1 = arith.constant 0 : index
    %3 = vector.load %arg6[%c0, %c0_1] : memref<24x512xf32, #tpu.memory_space<vmem>>, vector<24x512xf32>
    %c0_2 = arith.constant 0 : index
    %c0_3 = arith.constant 0 : index
    %4 = vector.load %arg1[%c0_2, %c0_3] : memref<24x2048xbf16, #tpu.memory_space<vmem>>, vector<24x2048xbf16>
    %c0_4 = arith.constant 0 : index
    %c0_5 = arith.constant 0 : index
    %5 = vector.load %arg2[%c0_4, %c0_5] : memref<2048x512xbf16, #tpu.memory_space<vmem>>, vector<2048x512xbf16>
    %cst = arith.constant dense<0.000000e+00> : vector<24x512xf32>
    %6 = tpu.matmul %4, %5, %cst {dimension_numbers = #tpu.dot_dimension_numbers<[1], [0], [0], [1], [0, 0, 1, 1], [], []>} : vector<24x2048xbf16>, vector<2048x512xbf16>, vector<24x512xf32> -> vector<24x512xf32>
    %7 = arith.addf %3, %6 : vector<24x512xf32>
    %c0_6 = arith.constant 0 : index
    %c0_7 = arith.constant 0 : index
    %8 = vector.load %arg6[%c0_6, %c0_7] : memref<24x512xf32, #tpu.memory_space<vmem>>, vector<24x512xf32>
    tpu.vector_store %arg6[%c0_6, %c0_7], %7 {strides = array<i32>} : memref<24x512xf32, #tpu.memory_space<vmem>>, vector<24x512xf32>,
    %c1_i32 = arith.constant 1 : i32
    %9 = arith.cmpi eq, %arg0, %c1_i32 : i32
    %10 = arith.extui %9 : i1 to i32
    %c0_i32_8 = arith.constant 0 : i32
    %11 = arith.cmpi ne, %10, %c0_i32_8 : i32
    scf.if %11 {
      %c0_9 = arith.constant 0 : index
      %c0_10 = arith.constant 0 : index
      %12 = vector.load %arg6[%c0_9, %c0_10] : memref<24x512xf32, #tpu.memory_space<vmem>>, vector<24x512xf32>
      %cst_11 = arith.constant dense<0.000000e+00> : vector<512xf32>
      %13 = vector.multi_reduction <add>, %12, %cst_11 [0] : vector<24x512xf32> to vector<512xf32>
      %14 = vector.shape_cast %13 : vector<512xf32> to vector<1x512xf32>
      %15 = arith.mulf %12, %12 : vector<24x512xf32>
      %cst_12 = arith.constant dense<0.000000e+00> : vector<512xf32>
      %16 = vector.multi_reduction <add>, %15, %cst_12 [0] : vector<24x512xf32> to vector<512xf32>
      %17 = vector.shape_cast %16 : vector<512xf32> to vector<1x512xf32>
      %cst_13 = arith.constant 0.055555556 : f32
      %18 = vector.broadcast %cst_13 : f32 to vector<1x512xf32>
      %19 = arith.mulf %14, %18 : vector<1x512xf32>
      %cst_14 = arith.constant 0.055555556 : f32
      %20 = vector.broadcast %cst_14 : f32 to vector<1x512xf32>
      %21 = arith.mulf %17, %20 : vector<1x512xf32>
      %22 = arith.mulf %19, %19 : vector<1x512xf32>
      %23 = arith.subf %21, %22 : vector<1x512xf32>
      %cst_15 = arith.constant 0.000000e+00 : f32
      %24 = vector.broadcast %cst_15 : f32 to vector<1x512xf32>
      %25 = arith.maximumf %23, %24 : vector<1x512xf32>
      %c0_16 = arith.constant 0 : index
      %c0_17 = arith.constant 0 : index
      %26 = vector.load %arg3[%c0_16, %c0_17] : memref<1x512xf32, #tpu.memory_space<vmem>>, vector<1x512xf32>
      %cst_18 = arith.constant 9.99999974E-6 : f32
      %27 = vector.broadcast %cst_18 : f32 to vector<1x512xf32>
      %28 = arith.addf %25, %27 : vector<1x512xf32>
      %29 = math.rsqrt %28 : vector<1x512xf32>
      %30 = arith.mulf %26, %29 : vector<1x512xf32>
      %c0_19 = arith.constant 0 : index
      %c0_20 = arith.constant 0 : index
      %31 = vector.load %arg4[%c0_19, %c0_20] : memref<1x512xf32, #tpu.memory_space<vmem>>, vector<1x512xf32>
      %32 = arith.mulf %19, %30 : vector<1x512xf32>
      %33 = arith.subf %31, %32 : vector<1x512xf32>
      %34 = vector.broadcast %30 : vector<1x512xf32> to vector<24x512xf32>
      %35 = arith.mulf %12, %34 : vector<24x512xf32>
      %36 = vector.broadcast %33 : vector<1x512xf32> to vector<24x512xf32>
      %37 = arith.addf %35, %36 : vector<24x512xf32>
      %cst_21 = arith.constant 0.000000e+00 : f32
      %38 = vector.broadcast %cst_21 : f32 to vector<24x512xf32>
      %39 = arith.cmpf oge, %37, %38 : vector<24x512xf32>
      %cst_22 = arith.constant 2.000000e-01 : f32
      %40 = vector.broadcast %cst_22 : f32 to vector<24x512xf32>
      %41 = arith.mulf %40, %37 : vector<24x512xf32>
      %42 = arith.select %39, %37, %41 : vector<24x512xi1>, vector<24x512xf32>
      %c0_23 = arith.constant 0 : index
      %c0_24 = arith.constant 0 : index
      %43 = vector.load %arg5[%c0_23, %c0_24] : memref<24x512xf32, #tpu.memory_space<vmem>>, vector<24x512xf32>
      tpu.vector_store %arg5[%c0_23, %c0_24], %42 {strides = array<i32>} : memref<24x512xf32, #tpu.memory_space<vmem>>, vector<24x512xf32>,
    } else {
    }
    return
  }
  func.func @transform_0(%arg0: i32) -> (i32, i32) {
    %c0_i32 = arith.constant 0 : i32
    %c0_i32_0 = arith.constant 0 : i32
    return %c0_i32, %arg0 : i32, i32
  }
  func.func @transform_1(%arg0: i32) -> (i32, i32) {
    %c0_i32 = arith.constant 0 : i32
    %c0_i32_0 = arith.constant 0 : i32
    return %arg0, %c0_i32 : i32, i32
  }
  func.func @transform_2(%arg0: i32) -> (i32, i32) {
    %c0_i32 = arith.constant 0 : i32
    %c0_i32_0 = arith.constant 0 : i32
    %c0_i32_1 = arith.constant 0 : i32
    return %c0_i32, %c0_i32_0 : i32, i32
  }
  func.func @transform_3(%arg0: i32) -> (i32, i32) {
    %c0_i32 = arith.constant 0 : i32
    %c0_i32_0 = arith.constant 0 : i32
    %c0_i32_1 = arith.constant 0 : i32
    return %c0_i32, %c0_i32_0 : i32, i32
  }
  func.func @transform_4(%arg0: i32) -> (i32, i32) {
    %c0_i32 = arith.constant 0 : i32
    %c0_i32_0 = arith.constant 0 : i32
    %c0_i32_1 = arith.constant 0 : i32
    return %c0_i32, %c0_i32_0 : i32, i32
  }
}

module attributes {stable_mosaic.version = 11 : i64} {
  func.func @_conv_fused_kernel(%arg0: i32, %arg1: memref<8x2048xbf16, #tpu.memory_space<vmem>>, %arg2: memref<2048x128xbf16, #tpu.memory_space<vmem>>, %arg3: memref<1x128xf32, #tpu.memory_space<vmem>>, %arg4: memref<1x128xf32, #tpu.memory_space<vmem>>, %arg5: memref<8x128xf32, #tpu.memory_space<vmem>>, %arg6: memref<8x128xf32, #tpu.memory_space<vmem>>) attributes {dimension_semantics = [#tpu.dimension_semantics<arbitrary>], iteration_bounds = array<i64: 4>, scalar_prefetch = 0 : i64, scratch_operands = 1 : i64, tpu.core_type = #tpu.core_type<tc>, window_params = [{transform_indices = @transform_0, window_bounds = array<i64: 8, 2048>}, {transform_indices = @transform_1, window_bounds = array<i64: 2048, 128>}, {pipeline_mode = #tpu.pipeline_mode<synchronous>, transform_indices = @transform_2, window_bounds = array<i64: 1, 128>}, {pipeline_mode = #tpu.pipeline_mode<synchronous>, transform_indices = @transform_3, window_bounds = array<i64: 1, 128>}, {pipeline_mode = #tpu.pipeline_mode<synchronous>, transform_indices = @transform_4, window_bounds = array<i64: 8, 128>}]} {
    %c0_i32 = arith.constant 0 : i32
    %0 = arith.cmpi eq, %arg0, %c0_i32 : i32
    %1 = arith.extui %0 : i1 to i32
    %c0_i32_0 = arith.constant 0 : i32
    %2 = arith.cmpi ne, %1, %c0_i32_0 : i32
    scf.if %2 {
      %cst_9 = arith.constant 0.000000e+00 : f32
      %12 = vector.broadcast %cst_9 : f32 to vector<8x128xf32>
      %c0_10 = arith.constant 0 : index
      %c0_11 = arith.constant 0 : index
      %13 = vector.load %arg6[%c0_10, %c0_11] : memref<8x128xf32, #tpu.memory_space<vmem>>, vector<8x128xf32>
      tpu.vector_store %arg6[%c0_10, %c0_11], %12 {strides = array<i32>} : memref<8x128xf32, #tpu.memory_space<vmem>>, vector<8x128xf32>,
    } else {
    }
    %c0 = arith.constant 0 : index
    %c0_1 = arith.constant 0 : index
    %3 = vector.load %arg6[%c0, %c0_1] : memref<8x128xf32, #tpu.memory_space<vmem>>, vector<8x128xf32>
    %c0_2 = arith.constant 0 : index
    %c0_3 = arith.constant 0 : index
    %4 = vector.load %arg1[%c0_2, %c0_3] : memref<8x2048xbf16, #tpu.memory_space<vmem>>, vector<8x2048xbf16>
    %c0_4 = arith.constant 0 : index
    %c0_5 = arith.constant 0 : index
    %5 = vector.load %arg2[%c0_4, %c0_5] : memref<2048x128xbf16, #tpu.memory_space<vmem>>, vector<2048x128xbf16>
    %cst = arith.constant dense<0.000000e+00> : vector<8x128xf32>
    %6 = tpu.matmul %4, %5, %cst {dimension_numbers = #tpu.dot_dimension_numbers<[1], [0], [0], [1], [0, 0, 1, 1], [], []>} : vector<8x2048xbf16>, vector<2048x128xbf16>, vector<8x128xf32> -> vector<8x128xf32>
    %7 = arith.addf %3, %6 : vector<8x128xf32>
    %c0_6 = arith.constant 0 : index
    %c0_7 = arith.constant 0 : index
    %8 = vector.load %arg6[%c0_6, %c0_7] : memref<8x128xf32, #tpu.memory_space<vmem>>, vector<8x128xf32>
    tpu.vector_store %arg6[%c0_6, %c0_7], %7 {strides = array<i32>} : memref<8x128xf32, #tpu.memory_space<vmem>>, vector<8x128xf32>,
    %c3_i32 = arith.constant 3 : i32
    %9 = arith.cmpi eq, %arg0, %c3_i32 : i32
    %10 = arith.extui %9 : i1 to i32
    %c0_i32_8 = arith.constant 0 : i32
    %11 = arith.cmpi ne, %10, %c0_i32_8 : i32
    scf.if %11 {
      %c0_9 = arith.constant 0 : index
      %c0_10 = arith.constant 0 : index
      %12 = vector.load %arg6[%c0_9, %c0_10] : memref<8x128xf32, #tpu.memory_space<vmem>>, vector<8x128xf32>
      %c0_11 = arith.constant 0 : index
      %c0_12 = arith.constant 0 : index
      %13 = vector.load %arg4[%c0_11, %c0_12] : memref<1x128xf32, #tpu.memory_space<vmem>>, vector<1x128xf32>
      %14 = vector.broadcast %13 : vector<1x128xf32> to vector<8x128xf32>
      %15 = arith.addf %12, %14 : vector<8x128xf32>
      %cst_13 = arith.constant 0.000000e+00 : f32
      %16 = vector.broadcast %cst_13 : f32 to vector<8x128xf32>
      %17 = arith.subf %16, %15 : vector<8x128xf32>
      %18 = math.exp %17 : vector<8x128xf32>
      %cst_14 = arith.constant 1.000000e+00 : f32
      %19 = vector.broadcast %cst_14 : f32 to vector<8x128xf32>
      %20 = arith.addf %19, %18 : vector<8x128xf32>
      %21 = tpu.reciprocal %20 {approx = true} : vector<8x128xf32> -> vector<8x128xf32>
      %c0_15 = arith.constant 0 : index
      %c0_16 = arith.constant 0 : index
      %22 = vector.load %arg5[%c0_15, %c0_16] : memref<8x128xf32, #tpu.memory_space<vmem>>, vector<8x128xf32>
      tpu.vector_store %arg5[%c0_15, %c0_16], %21 {strides = array<i32>} : memref<8x128xf32, #tpu.memory_space<vmem>>, vector<8x128xf32>,
    } else {
    }
    return
  }
  func.func @transform_0(%arg0: i32) -> (i32, i32) {
    %c0_i32 = arith.constant 0 : i32
    %c0_i32_0 = arith.constant 0 : i32
    return %c0_i32, %arg0 : i32, i32
  }
  func.func @transform_1(%arg0: i32) -> (i32, i32) {
    %c0_i32 = arith.constant 0 : i32
    %c0_i32_0 = arith.constant 0 : i32
    return %arg0, %c0_i32 : i32, i32
  }
  func.func @transform_2(%arg0: i32) -> (i32, i32) {
    %c0_i32 = arith.constant 0 : i32
    %c0_i32_0 = arith.constant 0 : i32
    %c0_i32_1 = arith.constant 0 : i32
    return %c0_i32, %c0_i32_0 : i32, i32
  }
  func.func @transform_3(%arg0: i32) -> (i32, i32) {
    %c0_i32 = arith.constant 0 : i32
    %c0_i32_0 = arith.constant 0 : i32
    %c0_i32_1 = arith.constant 0 : i32
    return %c0_i32, %c0_i32_0 : i32, i32
  }
  func.func @transform_4(%arg0: i32) -> (i32, i32) {
    %c0_i32 = arith.constant 0 : i32
    %c0_i32_0 = arith.constant 0 : i32
    %c0_i32_1 = arith.constant 0 : i32
    return %c0_i32, %c0_i32_0 : i32, i32
  }
}

</mosaic_0001>

<bundles_post_ra>
// kernel: discriminator_forward.5
= control target key start
LH: loop header
LB: loop body
LE: loop exit
PB: predicated region body
PF: predicated region fallthrough
CT: control target
= control target key end

     0   :  { %vm406_vm0 = vcmask 523264   ;;  %s1965_s1 = inlined_call_operand.vmem [shape: bf16[64,128], index: 1, kind: input, shape index: {}]   ;;  %s1966_s2 = inlined_call_operand.vmem [shape: f32[1,128], index: 2, kind: input, shape index: {}]   ;;  %s1967_s0 = inlined_call_operand.vmem [shape: bf16[512,64], index: 0, kind: input, shape index: {}]   ;;  %s1968_s3 = inlined_call_operand.vmem [shape: f32[1,128], index: 3, kind: input, shape index: {}]   ;;  %s1969_s4 = inlined_call_operand.vmem [shape: f32[512,128], index: 4, kind: output, shape index: {}]  }
   0x1   :  { %v1503_v0 = vld [vmem:[%s1965_s1] sm:$0xff]   ;;  %v1504_v1 = vld [vmem:[%s1965_s1 + $0x8] sm:$0xff]   ;;  %v1505_v2 = vld [vmem:[%s1965_s1 + $0x10] sm:$0xff]  }
   0x2   :  { %1423 = vmatprep.subr.bf16.mxu0 %v1503_v0  ;;  %1495 = vmatprep.subr.bf16.mxu1 %v1503_v0  ;;  %v1507_v3 = vld [vmem:[%s1967_s0] sm:$0xff]   ;;  %v1506_v5 = vld [vmem:[%s1965_s1 + $0x18] sm:$0xff]   ;;  %v1509_v6 = vld [vmem:[%s1967_s0 + $0x8] sm:$0xff]  }
   0x3   :  { %1424 = vmatpush3.bf16.msra.mxu0 %v1503_v0  ;;  %1499 = vmatpush3.bf16.msra.mxu1 %v1503_v0  ;;  %v1508_v4 = vld [vmem:[%s1967_s0 + $0x80] sm:$0xff]   ;;  %v1510_v7 = vld [vmem:[%s1967_s0 + $0x88] sm:$0xff]   ;;  %v1511_v8 = vld [vmem:[%s1967_s0 + $0x10] sm:$0xff]  }
   0x4   :  { %1425 = vmatprep.subr.bf16.mxu0 %v1504_v1  ;;  %1496 = vmatprep.subr.bf16.mxu1 %v1504_v1  ;;  %v1512_v9 = vld [vmem:[%s1967_s0 + $0x90] sm:$0xff]   ;;  %v1513_v10 = vld [vmem:[%s1967_s0 + $0x18] sm:$0xff]   ;;  %v1515_v12 = vld [vmem:[%s1967_s0 + $0x20] sm:$0xff]  }
   0x5   :  { %1431 = vmatprep.mubr.msk.bf16.mxu0 %vm406_vm0, %v1507_v3  ;;  %1463 = vmatprep.mubr.msk.bf16.mxu1 %vm406_vm0, %v1508_v4  ;;  %v1514_v11 = vld [vmem:[%s1967_s0 + $0x98] sm:$0xff]   ;;  %v1516_v13 = vld [vmem:[%s1967_s0 + $0xa0] sm:$0xff]   ;;  %v1517_v14 = vld [vmem:[%s1967_s0 + $0x28] sm:$0xff]  }
   0x6   :  { %v1518_v15 = vld [vmem:[%s1967_s0 + $0xa8] sm:$0xff]   ;;  %v1519_v16 = vld [vmem:[%s1967_s0 + $0x30] sm:$0xff]   ;;  %v1521_v18 = vld [vmem:[%s1967_s0 + $0x38] sm:$0xff]  }
   0x7   :  { %1426 = vmatpush3.bf16.msra.mxu0 %v1504_v1  ;;  %1500 = vmatpush3.bf16.msra.mxu1 %v1504_v1  ;;  %v1520_v17 = vld [vmem:[%s1967_s0 + $0xb0] sm:$0xff]   ;;  %v1522_v19 = vld [vmem:[%s1967_s0 + $0xb8] sm:$0xff]   ;;  %v1523_v20 = vld [vmem:[%s1967_s0 + $0x40] sm:$0xff]  }
   0x8   :  { %1427 = vmatprep.subr.bf16.mxu0 %v1505_v2  ;;  %1497 = vmatprep.subr.bf16.mxu1 %v1505_v2  ;;  %v1524_v21 = vld [vmem:[%s1967_s0 + $0xc0] sm:$0xff]   ;;  %v1525_v22 = vld [vmem:[%s1967_s0 + $0x48] sm:$0xff]   ;;  %v1527_v24 = vld [vmem:[%s1967_s0 + $0x50] sm:$0xff]  }
   0x9   :  { %v1526_v23 = vld [vmem:[%s1967_s0 + $0xc8] sm:$0xff]   ;;  %v1528_v25 = vld [vmem:[%s1967_s0 + $0xd0] sm:$0xff]   ;;  %v1529_v26 = vld [vmem:[%s1967_s0 + $0x58] sm:$0xff]  }
   0xa   :  { %v1530_v27 = vld [vmem:[%s1967_s0 + $0xd8] sm:$0xff]   ;;  %v1531_v28 = vld [vmem:[%s1967_s0 + $0x60] sm:$0xff]   ;;  %v1533_v30 = vld [vmem:[%s1967_s0 + $0x68] sm:$0xff]  }
   0xb   :  { %1428 = vmatpush3.bf16.msra.mxu0 %v1505_v2  ;;  %1501 = vmatpush3.bf16.msra.mxu1 %v1505_v2  ;;  %v1532_v29 = vld [vmem:[%s1967_s0 + $0xe0] sm:$0xff]   ;;  %v1534_v31 = vld [vmem:[%s1967_s0 + $0xe8] sm:$0xff]   ;;  %v1535_v32 = vld [vmem:[%s1967_s0 + $0x70] sm:$0xff]  }
   0xc   :  { %1429 = vmatprep.subr.bf16.mxu0 %v1506_v5  ;;  %1498 = vmatprep.subr.bf16.mxu1 %v1506_v5  ;;  %v1536_v33 = vld [vmem:[%s1967_s0 + $0xf0] sm:$0xff]   ;;  %v1537_v34 = vld [vmem:[%s1967_s0 + $0x78] sm:$0xff]   ;;  %v1707_v36 = vld [vmem:[%s1968_s3] ss:$0 sm:$0xff] }
   0xd   :  { %v1538_v35 = vld [vmem:[%s1967_s0 + $0xf8] sm:$0xff]  }
   0xf   :  { %1430 = vmatpush3.bf16.msra.mxu0 %v1506_v5  ;;  %1502 = vmatpush3.bf16.msra.mxu1 %v1506_v5 }
  0x12   :  { %1432 = vmatmul.mubr.msk.bf16.vlgmr.msra.gmra.mrb[0].mxu0 %vm406_vm0, %v1509_v6  ;;  %1464 = vmatmul.mubr.msk.bf16.vlgmr.msra.gmra.mrb[0].mxu1 %vm406_vm0, %v1510_v7 }
  0x13   :  { %1435 = vmatprep.mubr.msk.bf16.mxu0 %vm406_vm0, %v1511_v8  ;;  %1467 = vmatprep.mubr.msk.bf16.mxu1 %vm406_vm0, %v1512_v9 }
  0x1a   :  { %1436 = vmatmul.mubr.msk.bf16.gmra.mrb[4].mxu0 %vm406_vm0, %v1513_v10  ;;  %1468 = vmatmul.mubr.msk.bf16.gmra.mrb[4].mxu1 %vm406_vm0, %v1514_v11 }
  0x1b   :  { %1439 = vmatprep.mubr.msk.bf16.mxu0 %vm406_vm0, %v1515_v12  ;;  %1471 = vmatprep.mubr.msk.bf16.mxu1 %vm406_vm0, %v1516_v13 }
  0x22   :  { %1440 = vmatmul.mubr.msk.bf16.gmra.mrb[8].mxu0 %vm406_vm0, %v1517_v14  ;;  %1472 = vmatmul.mubr.msk.bf16.gmra.mrb[8].mxu1 %vm406_vm0, %v1518_v15 }
  0x23   :  { %1443 = vmatprep.mubr.msk.bf16.mxu0 %vm406_vm0, %v1519_v16  ;;  %1475 = vmatprep.mubr.msk.bf16.mxu1 %vm406_vm0, %v1520_v17 }
  0x2a   :  { %1444 = vmatmul.mubr.msk.bf16.gmra.mrb[12].mxu0 %vm406_vm0, %v1521_v18  ;;  %1476 = vmatmul.mubr.msk.bf16.gmra.mrb[12].mxu1 %vm406_vm0, %v1522_v19 }
  0x2b   :  { %1447 = vmatprep.mubr.msk.bf16.mxu0 %vm406_vm0, %v1523_v20  ;;  %1479 = vmatprep.mubr.msk.bf16.mxu1 %vm406_vm0, %v1524_v21 }
  0x32   :  { %1448 = vmatmul.mubr.msk.bf16.gmra.mrb[16].mxu0 %vm406_vm0, %v1525_v22  ;;  %1480 = vmatmul.mubr.msk.bf16.gmra.mrb[16].mxu1 %vm406_vm0, %v1526_v23 }
  0x33   :  { %1451 = vmatprep.mubr.msk.bf16.mxu0 %vm406_vm0, %v1527_v24  ;;  %1483 = vmatprep.mubr.msk.bf16.mxu1 %vm406_vm0, %v1528_v25 }
  0x3a   :  { %1452 = vmatmul.mubr.msk.bf16.gmra.mrb[20].mxu0 %vm406_vm0, %v1529_v26  ;;  %1484 = vmatmul.mubr.msk.bf16.gmra.mrb[20].mxu1 %vm406_vm0, %v1530_v27 }
  0x3b   :  { %1455 = vmatprep.mubr.msk.bf16.mxu0 %vm406_vm0, %v1531_v28  ;;  %1487 = vmatprep.mubr.msk.bf16.mxu1 %vm406_vm0, %v1532_v29 }
  0x42   :  { %1456 = vmatmul.mubr.msk.bf16.gmra.mrb[24].mxu0 %vm406_vm0, %v1533_v30  ;;  %1488 = vmatmul.mubr.msk.bf16.gmra.mrb[24].mxu1 %vm406_vm0, %v1534_v31 }
  0x43   :  { %1459 = vmatprep.mubr.msk.bf16.mxu0 %vm406_vm0, %v1535_v32  ;;  %1491 = vmatprep.mubr.msk.bf16.mxu1 %vm406_vm0, %v1536_v33 }
  0x4a   :  { %1460 = vmatmul.mubr.msk.bf16.gmra.mrb[28].mxu0 %vm406_vm0, %v1537_v34  ;;  %1492 = vmatmul.mubr.msk.bf16.gmra.mrb[28].mxu1 %vm406_vm0, %v1538_v35 }
  0xe5   :  { %v1433_v37 = vpop.f32.mrb[0].mxu0  ;;  %v1465_v38 = vpop.f32.mrb[0].mxu1 }
  0xe6   :  { %v996_v39 = vadd.f32 %v1433_v37, %v1707_v36  ;;  %v1028_v40 = vadd.f32 %v1465_v38, %v1707_v36  ;;  %v537_v41 = vpop.f32.mrb[1].mxu0  ;;  %v665_v42 = vpop.f32.mrb[1].mxu1 }
  0xe7   :  { %v994_v43 = vadd.f32 %v1707_v36, %v537_v41  ;;  %v1026_v44 = vadd.f32 %v1707_v36, %v665_v42  ;;  %v1434_v45 = vpop.f32.mrb[2].mxu0  ;;  %v1466_v46 = vpop.f32.mrb[2].mxu1 }
  0xe8   :  { %vm1060_vm1 = vcmp.ge.f32.partialorder %v996_v39, 0.0  ;;  %v1124_v47 = vmul.f32 0.2, %v996_v39  ;;  %vm1092_vm2 = vcmp.ge.f32.partialorder %v1028_v40, 0.0  ;;  %v1156_v48 = vmul.f32 0.2, %v1028_v40 }
  0xe9   :  { %vm1058_vm3 = vcmp.ge.f32.partialorder %v994_v43, 0.0  ;;  %v1122_v49 = vmul.f32 0.2, %v994_v43  ;;  %vm1090_vm4 = vcmp.ge.f32.partialorder %v1026_v44, 0.0  ;;  %v1154_v50 = vmul.f32 0.2, %v1026_v44 }
  0xea   :  { %v1188_v51 = vsel %vm1060_vm1, %v996_v39, %v1124_v47  ;;  %v1220_v52 = vsel %vm1092_vm2, %v1028_v40, %v1156_v48  ;;  %v997_v53 = vadd.f32 %v1434_v45, %v1707_v36  ;;  %v1029_v54 = vadd.f32 %v1466_v46, %v1707_v36  ;;  %v540_v55 = vpop.f32.mrb[3].mxu0  ;;  %v668_v56 = vpop.f32.mrb[3].mxu1 }
  0xeb   :  { %1252 = vst [vmem:[%s1969_s4 + $0x10] sm:$0xff] %v1188_v51  ;;  %1284 = vst [vmem:[%s1969_s4 + $0x110] sm:$0xff] %v1220_v52  ;;  %v1186_v57 = vsel %vm1058_vm3, %v994_v43, %v1122_v49  ;;  %v1218_v58 = vsel %vm1090_vm4, %v1026_v44, %v1154_v50  ;;  %v995_v59 = vadd.f32 %v1707_v36, %v540_v55 }
  0xec   :  { %v1027_v60 = vadd.f32 %v1707_v36, %v668_v56  ;;  %1250 = vst [vmem:[%s1969_s4] sm:$0xff] %v1186_v57  ;;  %1282 = vst [vmem:[%s1969_s4 + $0x100] sm:$0xff] %v1218_v58  ;;  %vm1061_vm5 = vcmp.ge.f32.partialorder %v997_v53, 0.0  ;;  %v1125_v61 = vmul.f32 0.2, %v997_v53  ;;  %vm1093_vm6 = vcmp.ge.f32.partialorder %v1029_v54, 0.0 }
  0xed   :  { %v1157_v62 = vmul.f32 0.2, %v1029_v54  ;;  %vm1059_vm7 = vcmp.ge.f32.partialorder %v995_v59, 0.0  ;;  %v1123_v63 = vmul.f32 0.2, %v995_v59  ;;  %v1437_v3 = vpop.f32.mrb[4].mxu0 }
  0xee   :  { %vm1091_vm8 = vcmp.ge.f32.partialorder %v1027_v60, 0.0  ;;  %v1155_v0 = vmul.f32 0.2, %v1027_v60  ;;  %v1189_v1 = vsel %vm1061_vm5, %v997_v53, %v1125_v61  ;;  %v1469_v4 = vpop.f32.mrb[4].mxu1  ;;  %v1000_v7 = vadd.f32 %v1437_v3, %v1707_v36  ;;  %v553_v9 = vpop.f32.mrb[5].mxu0 }
  0xef   :  { %v1221_v2 = vsel %vm1093_vm6, %v1029_v54, %v1157_v62  ;;  %1253 = vst [vmem:[%s1969_s4 + $0x18] sm:$0xff] %v1189_v1  ;;  %v1187_v5 = vsel %vm1059_vm7, %v995_v59, %v1123_v63  ;;  %v1032_v8 = vadd.f32 %v1469_v4, %v1707_v36  ;;  %v681_v10 = vpop.f32.mrb[5].mxu1  ;;  %v998_v11 = vadd.f32 %v1707_v36, %v553_v9  ;;  %v1438_v13 = vpop.f32.mrb[6].mxu0 }
  0xf0   :  { %1285 = vst [vmem:[%s1969_s4 + $0x118] sm:$0xff] %v1221_v2  ;;  %v1219_v6 = vsel %vm1091_vm8, %v1027_v60, %v1155_v0  ;;  %1251 = vst [vmem:[%s1969_s4 + $0x8] sm:$0xff] %v1187_v5  ;;  %v1030_v12 = vadd.f32 %v1707_v36, %v681_v10  ;;  %v1470_v14 = vpop.f32.mrb[6].mxu1  ;;  %vm1064_vm9 = vcmp.ge.f32.partialorder %v1000_v7, 0.0  ;;  %v1128_v15 = vmul.f32 0.2, %v1000_v7 }
  0xf1   :  { %1283 = vst [vmem:[%s1969_s4 + $0x108] sm:$0xff] %v1219_v6  ;;  %vm1096_vm10 = vcmp.ge.f32.partialorder %v1032_v8, 0.0  ;;  %v1160_v16 = vmul.f32 0.2, %v1032_v8  ;;  %vm1062_vm11 = vcmp.ge.f32.partialorder %v998_v11, 0.0  ;;  %v1001_v21 = vadd.f32 %v1438_v13, %v1707_v36  ;;  %v556_v23 = vpop.f32.mrb[7].mxu0 }
  0xf2   :  { %v1126_v17 = vmul.f32 0.2, %v998_v11  ;;  %vm1094_vm12 = vcmp.ge.f32.partialorder %v1030_v12, 0.0  ;;  %v1158_v18 = vmul.f32 0.2, %v1030_v12  ;;  %v1192_v19 = vsel %vm1064_vm9, %v1000_v7, %v1128_v15  ;;  %v684_v24 = vpop.f32.mrb[7].mxu1 }
  0xf3   :  { %v1224_v20 = vsel %vm1096_vm10, %v1032_v8, %v1160_v16  ;;  %v1033_v22 = vadd.f32 %v1470_v14, %v1707_v36  ;;  %1256 = vst [vmem:[%s1969_s4 + $0x30] sm:$0xff] %v1192_v19  ;;  %v999_v27 = vadd.f32 %v1707_v36, %v556_v23  ;;  %v1031_v28 = vadd.f32 %v1707_v36, %v684_v24 }
  0xf4   :  { %1288 = vst [vmem:[%s1969_s4 + $0x130] sm:$0xff] %v1224_v20  ;;  %v1190_v25 = vsel %vm1062_vm11, %v998_v11, %v1126_v17  ;;  %v1222_v26 = vsel %vm1094_vm12, %v1030_v12, %v1158_v18  ;;  %vm1065_vm13 = vcmp.ge.f32.partialorder %v1001_v21, 0.0  ;;  %v1129_v29 = vmul.f32 0.2, %v1001_v21 }
  0xf5   :  { %1254 = vst [vmem:[%s1969_s4 + $0x20] sm:$0xff] %v1190_v25  ;;  %1286 = vst [vmem:[%s1969_s4 + $0x120] sm:$0xff] %v1222_v26  ;;  %vm1097_vm14 = vcmp.ge.f32.partialorder %v1033_v22, 0.0  ;;  %v1161_v30 = vmul.f32 0.2, %v1033_v22  ;;  %vm1063_vm15 = vcmp.ge.f32.partialorder %v999_v27, 0.0 }
  0xf6   :  { %v1127_v31 = vmul.f32 0.2, %v999_v27  ;;  %vm1095_vm0 = vcmp.ge.f32.partialorder %v1031_v28, 0.0  ;;  %v1159_v32 = vmul.f32 0.2, %v1031_v28  ;;  %v1193_v33 = vsel %vm1065_vm13, %v1001_v21, %v1129_v29  ;;  %v1441_v35 = vpop.f32.mrb[8].mxu0 }
  0xf7   :  { %v1225_v34 = vsel %vm1097_vm14, %v1033_v22, %v1161_v30  ;;  %v1473_v37 = vpop.f32.mrb[8].mxu1  ;;  %1257 = vst [vmem:[%s1969_s4 + $0x38] sm:$0xff] %v1193_v33  ;;  %v1004_v40 = vadd.f32 %v1441_v35, %v1707_v36  ;;  %v569_v42 = vpop.f32.mrb[9].mxu0 }
  0xf8   :  { %1289 = vst [vmem:[%s1969_s4 + $0x138] sm:$0xff] %v1225_v34  ;;  %v1191_v38 = vsel %vm1063_vm15, %v999_v27, %v1127_v31  ;;  %v1223_v39 = vsel %vm1095_vm0, %v1031_v28, %v1159_v32  ;;  %v1036_v41 = vadd.f32 %v1473_v37, %v1707_v36  ;;  %v697_v43 = vpop.f32.mrb[9].mxu1  ;;  %v1002_v44 = vadd.f32 %v1707_v36, %v569_v42  ;;  %v1442_v46 = vpop.f32.mrb[10].mxu0 }
  0xf9   :  { %1255 = vst [vmem:[%s1969_s4 + $0x28] sm:$0xff] %v1191_v38  ;;  %1287 = vst [vmem:[%s1969_s4 + $0x128] sm:$0xff] %v1223_v39  ;;  %v1034_v45 = vadd.f32 %v1707_v36, %v697_v43  ;;  %v1474_v47 = vpop.f32.mrb[10].mxu1  ;;  %vm1068_vm1 = vcmp.ge.f32.partialorder %v1004_v40, 0.0  ;;  %v1132_v48 = vmul.f32 0.2, %v1004_v40  ;;  %v1005_v54 = vadd.f32 %v1442_v46, %v1707_v36 }
  0xfa   :  { %vm1100_vm2 = vcmp.ge.f32.partialorder %v1036_v41, 0.0  ;;  %v1164_v49 = vmul.f32 0.2, %v1036_v41  ;;  %vm1066_vm3 = vcmp.ge.f32.partialorder %v1002_v44, 0.0  ;;  %v1130_v50 = vmul.f32 0.2, %v1002_v44 }
  0xfb   :  { %vm1098_vm4 = vcmp.ge.f32.partialorder %v1034_v45, 0.0  ;;  %v1162_v51 = vmul.f32 0.2, %v1034_v45  ;;  %v1196_v52 = vsel %vm1068_vm1, %v1004_v40, %v1132_v48  ;;  %v1037_v55 = vadd.f32 %v1474_v47, %v1707_v36  ;;  %v572_v56 = vpop.f32.mrb[11].mxu0  ;;  %v700_v57 = vpop.f32.mrb[11].mxu1 }
  0xfc   :  { %v1228_v53 = vsel %vm1100_vm2, %v1036_v41, %v1164_v49  ;;  %1260 = vst [vmem:[%s1969_s4 + $0x50] sm:$0xff] %v1196_v52  ;;  %v1194_v58 = vsel %vm1066_vm3, %v1002_v44, %v1130_v50  ;;  %v1003_v60 = vadd.f32 %v1707_v36, %v572_v56  ;;  %v1035_v61 = vadd.f32 %v1707_v36, %v700_v57 }
  0xfd   :  { %1292 = vst [vmem:[%s1969_s4 + $0x150] sm:$0xff] %v1228_v53  ;;  %v1226_v59 = vsel %vm1098_vm4, %v1034_v45, %v1162_v51  ;;  %v1445_v62 = vpop.f32.mrb[12].mxu0  ;;  %v1477_v63 = vpop.f32.mrb[12].mxu1  ;;  %1258 = vst [vmem:[%s1969_s4 + $0x40] sm:$0xff] %v1194_v58  ;;  %vm1069_vm5 = vcmp.ge.f32.partialorder %v1005_v54, 0.0  ;;  %vm1101_vm6 = vcmp.ge.f32.partialorder %v1037_v55, 0.0 }
  0xfe   :  { %1290 = vst [vmem:[%s1969_s4 + $0x140] sm:$0xff] %v1226_v59  ;;  %v1133_v0 = vmul.f32 0.2, %v1005_v54  ;;  %v1165_v1 = vmul.f32 0.2, %v1037_v55  ;;  %vm1067_vm7 = vcmp.ge.f32.partialorder %v1003_v60, 0.0  ;;  %v1008_v6 = vadd.f32 %v1445_v62, %v1707_v36 }
  0xff   :  { %v1131_v2 = vmul.f32 0.2, %v1003_v60  ;;  %vm1099_vm8 = vcmp.ge.f32.partialorder %v1035_v61, 0.0  ;;  %v1163_v3 = vmul.f32 0.2, %v1035_v61  ;;  %v1040_v7 = vadd.f32 %v1477_v63, %v1707_v36  ;;  %v585_v8 = vpop.f32.mrb[13].mxu0 }
 0x100   :  { %v1197_v4 = vsel %vm1069_vm5, %v1005_v54, %v1133_v0  ;;  %v1229_v5 = vsel %vm1101_vm6, %v1037_v55, %v1165_v1  ;;  %v713_v9 = vpop.f32.mrb[13].mxu1  ;;  %v1006_v12 = vadd.f32 %v1707_v36, %v585_v8  ;;  %v1446_v14 = vpop.f32.mrb[14].mxu0  ;;  %vm1072_vm9 = vcmp.ge.f32.partialorder %v1008_v6, 0.0 }
 0x101   :  { %1261 = vst [vmem:[%s1969_s4 + $0x58] sm:$0xff] %v1197_v4  ;;  %1293 = vst [vmem:[%s1969_s4 + $0x158] sm:$0xff] %v1229_v5  ;;  %v1195_v10 = vsel %vm1067_vm7, %v1003_v60, %v1131_v2  ;;  %v1227_v11 = vsel %vm1099_vm8, %v1035_v61, %v1163_v3  ;;  %v1038_v13 = vadd.f32 %v1707_v36, %v713_v9  ;;  %v1478_v15 = vpop.f32.mrb[14].mxu1  ;;  %v1136_v16 = vmul.f32 0.2, %v1008_v6  ;;  %v588_v24 = vpop.f32.mrb[15].mxu0 }
 0x102   :  { %1259 = vst [vmem:[%s1969_s4 + $0x48] sm:$0xff] %v1195_v10  ;;  %1291 = vst [vmem:[%s1969_s4 + $0x148] sm:$0xff] %v1227_v11  ;;  %vm1104_vm10 = vcmp.ge.f32.partialorder %v1040_v7, 0.0  ;;  %v1168_v17 = vmul.f32 0.2, %v1040_v7  ;;  %vm1070_vm11 = vcmp.ge.f32.partialorder %v1006_v12, 0.0  ;;  %v1009_v22 = vadd.f32 %v1446_v14, %v1707_v36 }
 0x103   :  { %v1134_v18 = vmul.f32 0.2, %v1006_v12  ;;  %vm1102_vm12 = vcmp.ge.f32.partialorder %v1038_v13, 0.0  ;;  %v1166_v19 = vmul.f32 0.2, %v1038_v13  ;;  %v1200_v20 = vsel %vm1072_vm9, %v1008_v6, %v1136_v16  ;;  %v716_v25 = vpop.f32.mrb[15].mxu1 }
 0x104   :  { %v1232_v21 = vsel %vm1104_vm10, %v1040_v7, %v1168_v17  ;;  %v1041_v23 = vadd.f32 %v1478_v15, %v1707_v36  ;;  %1264 = vst [vmem:[%s1969_s4 + $0x70] sm:$0xff] %v1200_v20  ;;  %v1007_v28 = vadd.f32 %v1707_v36, %v588_v24  ;;  %v1039_v29 = vadd.f32 %v1707_v36, %v716_v25 }
 0x105   :  { %1296 = vst [vmem:[%s1969_s4 + $0x170] sm:$0xff] %v1232_v21  ;;  %v1198_v26 = vsel %vm1070_vm11, %v1006_v12, %v1134_v18  ;;  %v1230_v27 = vsel %vm1102_vm12, %v1038_v13, %v1166_v19  ;;  %v1449_v30 = vpop.f32.mrb[16].mxu0  ;;  %v1481_v31 = vpop.f32.mrb[16].mxu1  ;;  %vm1073_vm13 = vcmp.ge.f32.partialorder %v1009_v22, 0.0  ;;  %v1137_v32 = vmul.f32 0.2, %v1009_v22 }
 0x106   :  { %1262 = vst [vmem:[%s1969_s4 + $0x60] sm:$0xff] %v1198_v26  ;;  %1294 = vst [vmem:[%s1969_s4 + $0x160] sm:$0xff] %v1230_v27  ;;  %vm1105_vm14 = vcmp.ge.f32.partialorder %v1041_v23, 0.0  ;;  %v1169_v33 = vmul.f32 0.2, %v1041_v23  ;;  %vm1071_vm15 = vcmp.ge.f32.partialorder %v1007_v28, 0.0  ;;  %v1012_v39 = vadd.f32 %v1449_v30, %v1707_v36 }
 0x107   :  { %v1135_v34 = vmul.f32 0.2, %v1007_v28  ;;  %vm1103_vm0 = vcmp.ge.f32.partialorder %v1039_v29, 0.0  ;;  %v1167_v35 = vmul.f32 0.2, %v1039_v29  ;;  %v1201_v37 = vsel %vm1073_vm13, %v1009_v22, %v1137_v32  ;;  %v601_v41 = vpop.f32.mrb[17].mxu0 }
 0x108   :  { %v1233_v38 = vsel %vm1105_vm14, %v1041_v23, %v1169_v33  ;;  %v1044_v40 = vadd.f32 %v1481_v31, %v1707_v36  ;;  %v729_v42 = vpop.f32.mrb[17].mxu1  ;;  %1265 = vst [vmem:[%s1969_s4 + $0x78] sm:$0xff] %v1201_v37  ;;  %v1010_v45 = vadd.f32 %v1707_v36, %v601_v41  ;;  %v1450_v47 = vpop.f32.mrb[18].mxu0  ;;  %vm1076_vm1 = vcmp.ge.f32.partialorder %v1012_v39, 0.0 }
 0x109   :  { %1297 = vst [vmem:[%s1969_s4 + $0x178] sm:$0xff] %v1233_v38  ;;  %v1199_v43 = vsel %vm1071_vm15, %v1007_v28, %v1135_v34  ;;  %v1231_v44 = vsel %vm1103_vm0, %v1039_v29, %v1167_v35  ;;  %v1042_v46 = vadd.f32 %v1707_v36, %v729_v42  ;;  %v1482_v48 = vpop.f32.mrb[18].mxu1  ;;  %v1140_v49 = vmul.f32 0.2, %v1012_v39  ;;  %v604_v57 = vpop.f32.mrb[19].mxu0 }
 0x10a   :  { %1263 = vst [vmem:[%s1969_s4 + $0x68] sm:$0xff] %v1199_v43  ;;  %1295 = vst [vmem:[%s1969_s4 + $0x168] sm:$0xff] %v1231_v44  ;;  %vm1108_vm2 = vcmp.ge.f32.partialorder %v1044_v40, 0.0  ;;  %v1172_v50 = vmul.f32 0.2, %v1044_v40  ;;  %vm1074_vm3 = vcmp.ge.f32.partialorder %v1010_v45, 0.0  ;;  %v1013_v55 = vadd.f32 %v1450_v47, %v1707_v36 }
 0x10b   :  { %v1138_v51 = vmul.f32 0.2, %v1010_v45  ;;  %vm1106_vm4 = vcmp.ge.f32.partialorder %v1042_v46, 0.0  ;;  %v1170_v52 = vmul.f32 0.2, %v1042_v46  ;;  %v1204_v53 = vsel %vm1076_vm1, %v1012_v39, %v1140_v49  ;;  %v732_v58 = vpop.f32.mrb[19].mxu1 }
 0x10c   :  { %v1236_v54 = vsel %vm1108_vm2, %v1044_v40, %v1172_v50  ;;  %v1045_v56 = vadd.f32 %v1482_v48, %v1707_v36  ;;  %1268 = vst [vmem:[%s1969_s4 + $0x90] sm:$0xff] %v1204_v53  ;;  %v1011_v61 = vadd.f32 %v1707_v36, %v604_v57  ;;  %v1043_v62 = vadd.f32 %v1707_v36, %v732_v58 }
 0x10d   :  { %1300 = vst [vmem:[%s1969_s4 + $0x190] sm:$0xff] %v1236_v54  ;;  %v1202_v59 = vsel %vm1074_vm3, %v1010_v45, %v1138_v51  ;;  %v1234_v60 = vsel %vm1106_vm4, %v1042_v46, %v1170_v52  ;;  %v1453_v63 = vpop.f32.mrb[20].mxu0  ;;  %v1485_v0 = vpop.f32.mrb[20].mxu1  ;;  %vm1077_vm5 = vcmp.ge.f32.partialorder %v1013_v55, 0.0  ;;  %v1141_v1 = vmul.f32 0.2, %v1013_v55 }
 0x10e   :  { %1266 = vst [vmem:[%s1969_s4 + $0x80] sm:$0xff] %v1202_v59  ;;  %1298 = vst [vmem:[%s1969_s4 + $0x180] sm:$0xff] %v1234_v60  ;;  %vm1109_vm6 = vcmp.ge.f32.partialorder %v1045_v56, 0.0  ;;  %v1173_v2 = vmul.f32 0.2, %v1045_v56  ;;  %vm1075_vm7 = vcmp.ge.f32.partialorder %v1011_v61, 0.0  ;;  %v1016_v7 = vadd.f32 %v1453_v63, %v1707_v36 }
 0x10f   :  { %v1139_v3 = vmul.f32 0.2, %v1011_v61  ;;  %vm1107_vm8 = vcmp.ge.f32.partialorder %v1043_v62, 0.0  ;;  %v1171_v4 = vmul.f32 0.2, %v1043_v62  ;;  %v1205_v5 = vsel %vm1077_vm5, %v1013_v55, %v1141_v1  ;;  %v617_v9 = vpop.f32.mrb[21].mxu0 }
 0x110   :  { %v1237_v6 = vsel %vm1109_vm6, %v1045_v56, %v1173_v2  ;;  %v1048_v8 = vadd.f32 %v1485_v0, %v1707_v36  ;;  %v745_v10 = vpop.f32.mrb[21].mxu1  ;;  %1269 = vst [vmem:[%s1969_s4 + $0x98] sm:$0xff] %v1205_v5  ;;  %v1014_v13 = vadd.f32 %v1707_v36, %v617_v9  ;;  %v1454_v15 = vpop.f32.mrb[22].mxu0  ;;  %vm1080_vm9 = vcmp.ge.f32.partialorder %v1016_v7, 0.0 }
 0x111   :  { %1301 = vst [vmem:[%s1969_s4 + $0x198] sm:$0xff] %v1237_v6  ;;  %v1203_v11 = vsel %vm1075_vm7, %v1011_v61, %v1139_v3  ;;  %v1235_v12 = vsel %vm1107_vm8, %v1043_v62, %v1171_v4  ;;  %v1046_v14 = vadd.f32 %v1707_v36, %v745_v10  ;;  %v1486_v16 = vpop.f32.mrb[22].mxu1  ;;  %v1144_v17 = vmul.f32 0.2, %v1016_v7  ;;  %v620_v25 = vpop.f32.mrb[23].mxu0 }
 0x112   :  { %1267 = vst [vmem:[%s1969_s4 + $0x88] sm:$0xff] %v1203_v11  ;;  %1299 = vst [vmem:[%s1969_s4 + $0x188] sm:$0xff] %v1235_v12  ;;  %vm1112_vm10 = vcmp.ge.f32.partialorder %v1048_v8, 0.0  ;;  %v1176_v18 = vmul.f32 0.2, %v1048_v8  ;;  %vm1078_vm11 = vcmp.ge.f32.partialorder %v1014_v13, 0.0  ;;  %v1017_v23 = vadd.f32 %v1454_v15, %v1707_v36 }
 0x113   :  { %v1142_v19 = vmul.f32 0.2, %v1014_v13  ;;  %vm1110_vm12 = vcmp.ge.f32.partialorder %v1046_v14, 0.0  ;;  %v1174_v20 = vmul.f32 0.2, %v1046_v14  ;;  %v1208_v21 = vsel %vm1080_vm9, %v1016_v7, %v1144_v17  ;;  %v748_v26 = vpop.f32.mrb[23].mxu1 }
 0x114   :  { %v1240_v22 = vsel %vm1112_vm10, %v1048_v8, %v1176_v18  ;;  %v1049_v24 = vadd.f32 %v1486_v16, %v1707_v36  ;;  %1272 = vst [vmem:[%s1969_s4 + $0xb0] sm:$0xff] %v1208_v21  ;;  %v1015_v29 = vadd.f32 %v1707_v36, %v620_v25  ;;  %v1047_v30 = vadd.f32 %v1707_v36, %v748_v26 }
 0x115   :  { %1304 = vst [vmem:[%s1969_s4 + $0x1b0] sm:$0xff] %v1240_v22  ;;  %v1206_v27 = vsel %vm1078_vm11, %v1014_v13, %v1142_v19  ;;  %v1238_v28 = vsel %vm1110_vm12, %v1046_v14, %v1174_v20  ;;  %v1457_v31 = vpop.f32.mrb[24].mxu0  ;;  %v1489_v32 = vpop.f32.mrb[24].mxu1  ;;  %vm1081_vm13 = vcmp.ge.f32.partialorder %v1017_v23, 0.0  ;;  %v1145_v33 = vmul.f32 0.2, %v1017_v23 }
 0x116   :  { %1270 = vst [vmem:[%s1969_s4 + $0xa0] sm:$0xff] %v1206_v27  ;;  %1302 = vst [vmem:[%s1969_s4 + $0x1a0] sm:$0xff] %v1238_v28  ;;  %vm1113_vm14 = vcmp.ge.f32.partialorder %v1049_v24, 0.0  ;;  %v1177_v34 = vmul.f32 0.2, %v1049_v24  ;;  %vm1079_vm15 = vcmp.ge.f32.partialorder %v1015_v29, 0.0  ;;  %v1020_v40 = vadd.f32 %v1457_v31, %v1707_v36 }
 0x117   :  { %v1143_v35 = vmul.f32 0.2, %v1015_v29  ;;  %vm1111_vm0 = vcmp.ge.f32.partialorder %v1047_v30, 0.0  ;;  %v1175_v37 = vmul.f32 0.2, %v1047_v30  ;;  %v1209_v38 = vsel %vm1081_vm13, %v1017_v23, %v1145_v33  ;;  %v633_v42 = vpop.f32.mrb[25].mxu0 }
 0x118   :  { %v1241_v39 = vsel %vm1113_vm14, %v1049_v24, %v1177_v34  ;;  %v1052_v41 = vadd.f32 %v1489_v32, %v1707_v36  ;;  %v761_v43 = vpop.f32.mrb[25].mxu1  ;;  %1273 = vst [vmem:[%s1969_s4 + $0xb8] sm:$0xff] %v1209_v38  ;;  %v1018_v46 = vadd.f32 %v1707_v36, %v633_v42  ;;  %v1458_v48 = vpop.f32.mrb[26].mxu0  ;;  %vm1084_vm1 = vcmp.ge.f32.partialorder %v1020_v40, 0.0 }
 0x119   :  { %1305 = vst [vmem:[%s1969_s4 + $0x1b8] sm:$0xff] %v1241_v39  ;;  %v1207_v44 = vsel %vm1079_vm15, %v1015_v29, %v1143_v35  ;;  %v1239_v45 = vsel %vm1111_vm0, %v1047_v30, %v1175_v37  ;;  %v1050_v47 = vadd.f32 %v1707_v36, %v761_v43  ;;  %v1490_v49 = vpop.f32.mrb[26].mxu1  ;;  %v1148_v50 = vmul.f32 0.2, %v1020_v40  ;;  %v636_v58 = vpop.f32.mrb[27].mxu0 }
 0x11a   :  { %1271 = vst [vmem:[%s1969_s4 + $0xa8] sm:$0xff] %v1207_v44  ;;  %1303 = vst [vmem:[%s1969_s4 + $0x1a8] sm:$0xff] %v1239_v45  ;;  %vm1116_vm2 = vcmp.ge.f32.partialorder %v1052_v41, 0.0  ;;  %v1180_v51 = vmul.f32 0.2, %v1052_v41  ;;  %vm1082_vm3 = vcmp.ge.f32.partialorder %v1018_v46, 0.0  ;;  %v1021_v56 = vadd.f32 %v1458_v48, %v1707_v36 }
 0x11b   :  { %v1146_v52 = vmul.f32 0.2, %v1018_v46  ;;  %vm1114_vm4 = vcmp.ge.f32.partialorder %v1050_v47, 0.0  ;;  %v1178_v53 = vmul.f32 0.2, %v1050_v47  ;;  %v1212_v54 = vsel %vm1084_vm1, %v1020_v40, %v1148_v50  ;;  %v764_v59 = vpop.f32.mrb[27].mxu1 }
 0x11c   :  { %v1244_v55 = vsel %vm1116_vm2, %v1052_v41, %v1180_v51  ;;  %v1053_v57 = vadd.f32 %v1490_v49, %v1707_v36  ;;  %1276 = vst [vmem:[%s1969_s4 + $0xd0] sm:$0xff] %v1212_v54  ;;  %v1019_v62 = vadd.f32 %v1707_v36, %v636_v58  ;;  %v1051_v63 = vadd.f32 %v1707_v36, %v764_v59 }
 0x11d   :  { %1308 = vst [vmem:[%s1969_s4 + $0x1d0] sm:$0xff] %v1244_v55  ;;  %v1210_v60 = vsel %vm1082_vm3, %v1018_v46, %v1146_v52  ;;  %v1242_v61 = vsel %vm1114_vm4, %v1050_v47, %v1178_v53  ;;  %v1461_v0 = vpop.f32.mrb[28].mxu0  ;;  %v1493_v1 = vpop.f32.mrb[28].mxu1  ;;  %vm1085_vm5 = vcmp.ge.f32.partialorder %v1021_v56, 0.0  ;;  %v1149_v2 = vmul.f32 0.2, %v1021_v56 }
 0x11e   :  { %1274 = vst [vmem:[%s1969_s4 + $0xc0] sm:$0xff] %v1210_v60  ;;  %1306 = vst [vmem:[%s1969_s4 + $0x1c0] sm:$0xff] %v1242_v61  ;;  %vm1117_vm6 = vcmp.ge.f32.partialorder %v1053_v57, 0.0  ;;  %v1181_v3 = vmul.f32 0.2, %v1053_v57  ;;  %vm1083_vm7 = vcmp.ge.f32.partialorder %v1019_v62, 0.0  ;;  %v1024_v8 = vadd.f32 %v1461_v0, %v1707_v36 }
 0x11f   :  { %v1147_v4 = vmul.f32 0.2, %v1019_v62  ;;  %vm1115_vm8 = vcmp.ge.f32.partialorder %v1051_v63, 0.0  ;;  %v1179_v5 = vmul.f32 0.2, %v1051_v63  ;;  %v1213_v6 = vsel %vm1085_vm5, %v1021_v56, %v1149_v2  ;;  %v649_v10 = vpop.f32.mrb[29].mxu0 }
 0x120   :  { %v1245_v7 = vsel %vm1117_vm6, %v1053_v57, %v1181_v3  ;;  %v1056_v9 = vadd.f32 %v1493_v1, %v1707_v36  ;;  %v777_v11 = vpop.f32.mrb[29].mxu1  ;;  %1277 = vst [vmem:[%s1969_s4 + $0xd8] sm:$0xff] %v1213_v6  ;;  %v1022_v14 = vadd.f32 %v1707_v36, %v649_v10  ;;  %v1462_v16 = vpop.f32.mrb[30].mxu0  ;;  %vm1088_vm9 = vcmp.ge.f32.partialorder %v1024_v8, 0.0 }
 0x121   :  { %1309 = vst [vmem:[%s1969_s4 + $0x1d8] sm:$0xff] %v1245_v7  ;;  %v1211_v12 = vsel %vm1083_vm7, %v1019_v62, %v1147_v4  ;;  %v1243_v13 = vsel %vm1115_vm8, %v1051_v63, %v1179_v5  ;;  %v1054_v15 = vadd.f32 %v1707_v36, %v777_v11  ;;  %v1494_v17 = vpop.f32.mrb[30].mxu1  ;;  %v1152_v18 = vmul.f32 0.2, %v1024_v8  ;;  %v652_v26 = vpop.f32.mrb[31].mxu0 }
 0x122   :  { %1275 = vst [vmem:[%s1969_s4 + $0xc8] sm:$0xff] %v1211_v12  ;;  %1307 = vst [vmem:[%s1969_s4 + $0x1c8] sm:$0xff] %v1243_v13  ;;  %vm1120_vm10 = vcmp.ge.f32.partialorder %v1056_v9, 0.0  ;;  %v1184_v19 = vmul.f32 0.2, %v1056_v9  ;;  %vm1086_vm11 = vcmp.ge.f32.partialorder %v1022_v14, 0.0  ;;  %v1025_v24 = vadd.f32 %v1462_v16, %v1707_v36 }
 0x123   :  { %v1150_v20 = vmul.f32 0.2, %v1022_v14  ;;  %vm1118_vm12 = vcmp.ge.f32.partialorder %v1054_v15, 0.0  ;;  %v1182_v21 = vmul.f32 0.2, %v1054_v15  ;;  %v1216_v22 = vsel %vm1088_vm9, %v1024_v8, %v1152_v18  ;;  %v780_v27 = vpop.f32.mrb[31].mxu1 }
 0x124   :  { %v1248_v23 = vsel %vm1120_vm10, %v1056_v9, %v1184_v19  ;;  %v1057_v25 = vadd.f32 %v1494_v17, %v1707_v36  ;;  %1280 = vst [vmem:[%s1969_s4 + $0xf0] sm:$0xff] %v1216_v22  ;;  %v1023_v30 = vadd.f32 %v1707_v36, %v652_v26  ;;  %v1055_v31 = vadd.f32 %v1707_v36, %v780_v27 }
 0x125   :  { %1312 = vst [vmem:[%s1969_s4 + $0x1f0] sm:$0xff] %v1248_v23  ;;  %v1214_v28 = vsel %vm1086_vm11, %v1022_v14, %v1150_v20  ;;  %v1246_v29 = vsel %vm1118_vm12, %v1054_v15, %v1182_v21  ;;  %vm1089_vm13 = vcmp.ge.f32.partialorder %v1025_v24, 0.0  ;;  %v1153_v32 = vmul.f32 0.2, %v1025_v24 }
 0x126   :  { %1278 = vst [vmem:[%s1969_s4 + $0xe0] sm:$0xff] %v1214_v28  ;;  %1310 = vst [vmem:[%s1969_s4 + $0x1e0] sm:$0xff] %v1246_v29  ;;  %vm1121_vm14 = vcmp.ge.f32.partialorder %v1057_v25, 0.0  ;;  %v1185_v33 = vmul.f32 0.2, %v1057_v25  ;;  %vm1087_vm15 = vcmp.ge.f32.partialorder %v1023_v30, 0.0 }
 0x127   :  { %v1151_v34 = vmul.f32 0.2, %v1023_v30  ;;  %vm1119_vm0 = vcmp.ge.f32.partialorder %v1055_v31, 0.0  ;;  %v1183_v35 = vmul.f32 0.2, %v1055_v31  ;;  %v1217_v37 = vsel %vm1089_vm13, %v1025_v24, %v1153_v32 }
 0x128   :  { %v1249_v38 = vsel %vm1121_vm14, %v1057_v25, %v1185_v33  ;;  %1281 = vst [vmem:[%s1969_s4 + $0xf8] sm:$0xff] %v1217_v37 }
 0x129   :  { %1313 = vst [vmem:[%s1969_s4 + $0x1f8] sm:$0xff] %v1249_v38  ;;  %v1215_v36 = vsel %vm1087_vm15, %v1023_v30, %v1151_v34  ;;  %v1247_v39 = vsel %vm1119_vm0, %v1055_v31, %v1183_v35 }
 0x12a   :  { %1279 = vst [vmem:[%s1969_s4 + $0xe8] sm:$0xff] %v1215_v36  ;;  %1311 = vst [vmem:[%s1969_s4 + $0x1e8] sm:$0xff] %v1247_v39 }

// kernel: discriminator_forward.6
= control target key start
LH: loop header
LB: loop body
LE: loop exit
PB: predicated region body
PF: predicated region fallthrough
CT: control target
= control target key end

     0   :  { %s2632_s1 = inlined_call_operand.vmem [shape: bf16[1024,128], index: 1, kind: input, shape index: {}]   ;;  %s2633_s0 = inlined_call_operand.vmem [shape: bf16[128,1024], index: 0, kind: input, shape index: {}]   ;;  %s2634_s2 = inlined_call_operand.vmem [shape: f32[1,128], index: 2, kind: input, shape index: {}]   ;;  %s2635_s3 = inlined_call_operand.vmem [shape: f32[1,128], index: 3, kind: input, shape index: {}]   ;;  %s2636_s4 = inlined_call_operand.vmem [shape: f32[128,128], index: 4, kind: output, shape index: {}]  }
   0x1   :  { %v1955_v0 = vld [vmem:[%s2632_s1 + $0x40] sm:$0xff]   ;;  %v1959_v4 = vld [vmem:[%s2632_s1 + $0x48] sm:$0xff]   ;;  %v1963_v8 = vld [vmem:[%s2632_s1 + $0x50] sm:$0xff]  }
   0x2   :  { %v1956_v1 = vld [vmem:[%s2632_s1 + $0xc0] sm:$0xff]   ;;  %1699 = vmatprep.subr.bf16.mxu0 %v1955_v0  ;;  %v1960_v5 = vld [vmem:[%s2632_s1 + $0xc8] sm:$0xff]   ;;  %v1964_v9 = vld [vmem:[%s2632_s1 + $0xd0] sm:$0xff]  }
   0x3   :  { %v1957_v2 = vld [vmem:[%s2632_s1] sm:$0xff]   ;;  %1763 = vmatprep.subr.bf16.mxu1 %v1956_v1  ;;  %v1961_v6 = vld [vmem:[%s2632_s1 + $0x8] sm:$0xff]   ;;  %v1965_v10 = vld [vmem:[%s2632_s1 + $0x10] sm:$0xff]  }
   0x4   :  { %v1958_v3 = vld [vmem:[%s2632_s1 + $0x80] sm:$0xff]   ;;  %1700 = vmatpush3.bf16.msra.mxu0 %v1957_v2  ;;  %v1962_v7 = vld [vmem:[%s2632_s1 + $0x88] sm:$0xff]   ;;  %v1966_v11 = vld [vmem:[%s2632_s1 + $0x90] sm:$0xff]  }
   0x5   :  { %1764 = vmatpush3.bf16.msra.mxu1 %v1958_v3  ;;  %1701 = vmatprep.subr.bf16.mxu0 %v1959_v4  ;;  %v1967_v12 = vld [vmem:[%s2632_s1 + $0x58] sm:$0xff]   ;;  %v1971_v16 = vld [vmem:[%s2632_s1 + $0x60] sm:$0xff]   ;;  %v1975_v20 = vld [vmem:[%s2632_s1 + $0x68] sm:$0xff]  }
   0x6   :  { %1765 = vmatprep.subr.bf16.mxu1 %v1960_v5  ;;  %v1968_v13 = vld [vmem:[%s2632_s1 + $0xd8] sm:$0xff]   ;;  %v1972_v17 = vld [vmem:[%s2632_s1 + $0xe0] sm:$0xff]   ;;  %v1976_v21 = vld [vmem:[%s2632_s1 + $0xe8] sm:$0xff]  }
   0x7   :  { %v1969_v14 = vld [vmem:[%s2632_s1 + $0x18] sm:$0xff]   ;;  %v1973_v18 = vld [vmem:[%s2632_s1 + $0x20] sm:$0xff]   ;;  %v1977_v22 = vld [vmem:[%s2632_s1 + $0x28] sm:$0xff]  }
   0x8   :  { %1702 = vmatpush3.bf16.msra.mxu0 %v1961_v6  ;;  %v1970_v15 = vld [vmem:[%s2632_s1 + $0x98] sm:$0xff]   ;;  %v1974_v19 = vld [vmem:[%s2632_s1 + $0xa0] sm:$0xff]   ;;  %v1978_v23 = vld [vmem:[%s2632_s1 + $0xa8] sm:$0xff]  }
   0x9   :  { %1766 = vmatpush3.bf16.msra.mxu1 %v1962_v7  ;;  %1703 = vmatprep.subr.bf16.mxu0 %v1963_v8  ;;  %v1979_v24 = vld [vmem:[%s2632_s1 + $0x70] sm:$0xff]   ;;  %v1983_v28 = vld [vmem:[%s2632_s1 + $0x78] sm:$0xff]   ;;  %v54_v32 = vld [vmem:[%s2633_s0] sm:$0xff] }
   0xa   :  { %1767 = vmatprep.subr.bf16.mxu1 %v1964_v9  ;;  %v1980_v25 = vld [vmem:[%s2632_s1 + $0xf0] sm:$0xff]   ;;  %v1984_v29 = vld [vmem:[%s2632_s1 + $0xf8] sm:$0xff]   ;;  %v58_v33 = vld [vmem:[%s2633_s0 + $0x20] sm:$0xff] }
   0xb   :  { %v1981_v26 = vld [vmem:[%s2632_s1 + $0x30] sm:$0xff]   ;;  %v1985_v30 = vld [vmem:[%s2632_s1 + $0x38] sm:$0xff]   ;;  %v55_v34 = vld [vmem:[%s2633_s0 + $0x8] sm:$0xff]  ;;  %v1571_v35 = vcombine.low %v54_v32, %v58_v33  ;;  %v1572_v36 = vcombine.high %v54_v32, %v58_v33 }
   0xc   :  { %1704 = vmatpush3.bf16.msra.mxu0 %v1965_v10  ;;  %v1982_v27 = vld [vmem:[%s2632_s1 + $0xb0] sm:$0xff]   ;;  %v1986_v31 = vld [vmem:[%s2632_s1 + $0xb8] sm:$0xff]   ;;  %v59_v37 = vld [vmem:[%s2633_s0 + $0x28] sm:$0xff] }
   0xd   :  { %1768 = vmatpush3.bf16.msra.mxu1 %v1966_v11  ;;  %1705 = vmatprep.subr.bf16.mxu0 %v1967_v12  ;;  %v1573_v38 = vcombine.low %v55_v34, %v59_v37  ;;  %v1574_v39 = vcombine.high %v55_v34, %v59_v37  ;;  %v1987_v40 = vld [vmem:[%s2632_s1 + $0x140] sm:$0xff]   ;;  %v63_v47 = vld [vmem:[%s2633_s0 + $0x48] sm:$0xff]  ;;  %v1995_v62 = vld [vmem:[%s2632_s1 + $0x150] sm:$0xff]  }
   0xe   :  { %1769 = vmatprep.subr.bf16.mxu1 %v1968_v13  ;;  %982 = vmatprep.mubr.bf16.mxu0 %v1572_v36  ;;  %v1988_v41 = vld [vmem:[%s2632_s1 + $0x100] sm:$0xff]   ;;  %v67_v48 = vld [vmem:[%s2633_s0 + $0x68] sm:$0xff]  ;;  %v1996_v63 = vld [vmem:[%s2632_s1 + $0x110] sm:$0xff]  }
   0xf   :  { %1079 = vmatprep.mubr.bf16.mxu1 %v1574_v39  ;;  %v1989_v42 = vld [vmem:[%s2632_s1 + $0x1c0] sm:$0xff]   ;;  %v1582_v49 = vcombine.high %v63_v47, %v67_v48  ;;  %v1991_v50 = vld [vmem:[%s2632_s1 + $0x148] sm:$0xff]   ;;  %v1581_v53 = vcombine.low %v63_v47, %v67_v48  ;;  %v1997_v0 = vld [vmem:[%s2632_s1 + $0x1d0] sm:$0xff]  }
  0x10   :  { %1706 = vmatpush3.bf16.msra.mxu0 %v1969_v14  ;;  %v1990_v43 = vld [vmem:[%s2632_s1 + $0x180] sm:$0xff]   ;;  %v1992_v52 = vld [vmem:[%s2632_s1 + $0x108] sm:$0xff]   ;;  %v1998_v1 = vld [vmem:[%s2632_s1 + $0x190] sm:$0xff]  }
  0x11   :  { %1770 = vmatpush3.bf16.msra.mxu1 %v1970_v15  ;;  %1707 = vmatprep.subr.bf16.mxu0 %v1971_v16  ;;  %v62_v44 = vld [vmem:[%s2633_s0 + $0x40] sm:$0xff]  ;;  %v1993_v54 = vld [vmem:[%s2632_s1 + $0x1c8] sm:$0xff]   ;;  %v1999_v10 = vld [vmem:[%s2632_s1 + $0x158] sm:$0xff]  }
  0x12   :  { %1771 = vmatprep.subr.bf16.mxu1 %v1972_v17  ;;  %v66_v45 = vld [vmem:[%s2633_s0 + $0x60] sm:$0xff]  ;;  %v1994_v55 = vld [vmem:[%s2632_s1 + $0x188] sm:$0xff]   ;;  %v2000_v11 = vld [vmem:[%s2632_s1 + $0x118] sm:$0xff]  }
  0x13   :  { %v1580_v46 = vcombine.high %v62_v44, %v66_v45  ;;  %v1579_v51 = vcombine.low %v62_v44, %v66_v45  ;;  %v70_v56 = vld [vmem:[%s2633_s0 + $0x80] sm:$0xff]  ;;  %v71_v58 = vld [vmem:[%s2633_s0 + $0x88] sm:$0xff]  ;;  %v2001_v12 = vld [vmem:[%s2632_s1 + $0x1d8] sm:$0xff]  }
  0x14   :  { %1708 = vmatpush3.bf16.msra.mxu0 %v1973_v18  ;;  %v74_v57 = vld [vmem:[%s2633_s0 + $0xa0] sm:$0xff]  ;;  %v75_v59 = vld [vmem:[%s2633_s0 + $0xa8] sm:$0xff]  ;;  %v2002_v13 = vld [vmem:[%s2632_s1 + $0x198] sm:$0xff]  }
  0x15   :  { %1772 = vmatpush3.bf16.msra.mxu1 %v1974_v19  ;;  %1709 = vmatprep.subr.bf16.mxu0 %v1975_v20  ;;  %v1588_v60 = vcombine.high %v70_v56, %v74_v57  ;;  %v1590_v61 = vcombine.high %v71_v58, %v75_v59  ;;  %v1587_v2 = vcombine.low %v70_v56, %v74_v57  ;;  %v78_v3 = vld [vmem:[%s2633_s0 + $0xc0] sm:$0xff]  ;;  %v79_v5 = vld [vmem:[%s2633_s0 + $0xc8] sm:$0xff]  ;;  %v2012_v39 = vld [vmem:[%s2632_s1 + $0x130] sm:$0xff]  }
  0x16   :  { %1773 = vmatprep.subr.bf16.mxu1 %v1976_v21  ;;  %v82_v4 = vld [vmem:[%s2633_s0 + $0xe0] sm:$0xff]  ;;  %v1589_v6 = vcombine.low %v71_v58, %v75_v59  ;;  %v83_v8 = vld [vmem:[%s2633_s0 + $0xe8] sm:$0xff]  ;;  %v2016_v48 = vld [vmem:[%s2632_s1 + $0x138] sm:$0xff]  }
  0x17   :  { %v1596_v7 = vcombine.high %v78_v3, %v82_v4  ;;  %v1598_v9 = vcombine.high %v79_v5, %v83_v8  ;;  %v86_v14 = vld [vmem:[%s2633_s0 + $0x100] sm:$0xff]  ;;  %v87_v16 = vld [vmem:[%s2633_s0 + $0x108] sm:$0xff]  ;;  %v1595_v19 = vcombine.low %v78_v3, %v82_v4  ;;  %v1597_v21 = vcombine.low %v79_v5, %v83_v8  ;;  %v65_v8 = vld [vmem:[%s2633_s0 + $0x58] sm:$0xff] }
  0x18   :  { %1710 = vmatpush3.bf16.msra.mxu0 %v1977_v22  ;;  %v90_v15 = vld [vmem:[%s2633_s0 + $0x120] sm:$0xff]  ;;  %v91_v17 = vld [vmem:[%s2633_s0 + $0x128] sm:$0xff] }
  0x19   :  { %1774 = vmatpush3.bf16.msra.mxu1 %v1978_v23  ;;  %1711 = vmatprep.subr.bf16.mxu0 %v1979_v24  ;;  %v2003_v18 = vld [vmem:[%s2632_s1 + $0x160] sm:$0xff]   ;;  %v1604_v22 = vcombine.high %v86_v14, %v90_v15  ;;  %v1606_v24 = vcombine.high %v87_v16, %v91_v17  ;;  %v2009_v32 = vld [vmem:[%s2632_s1 + $0x1e8] sm:$0xff]   ;;  %v1603_v34 = vcombine.low %v86_v14, %v90_v15  ;;  %v72_v14 = vld [vmem:[%s2633_s0 + $0x90] sm:$0xff] }
  0x1a   :  { %1775 = vmatprep.subr.bf16.mxu1 %v1980_v25  ;;  %v2004_v20 = vld [vmem:[%s2632_s1 + $0x120] sm:$0xff]   ;;  %v2010_v33 = vld [vmem:[%s2632_s1 + $0x1a8] sm:$0xff]   ;;  %v76_v15 = vld [vmem:[%s2633_s0 + $0xb0] sm:$0xff] }
  0x1b   :  { %v2005_v23 = vld [vmem:[%s2632_s1 + $0x1e0] sm:$0xff]   ;;  %v103_v44 = vld [vmem:[%s2633_s0 + $0x188] sm:$0xff] }
  0x1c   :  { %1712 = vmatpush3.bf16.msra.mxu0 %v1981_v26  ;;  %v2006_v25 = vld [vmem:[%s2632_s1 + $0x1a0] sm:$0xff]   ;;  %v107_v45 = vld [vmem:[%s2633_s0 + $0x1a8] sm:$0xff] }
  0x1d   :  { %1776 = vmatpush3.bf16.msra.mxu1 %v1982_v27  ;;  %1713 = vmatprep.subr.bf16.mxu0 %v1983_v28  ;;  %v94_v26 = vld [vmem:[%s2633_s0 + $0x140] sm:$0xff]  ;;  %v2007_v28 = vld [vmem:[%s2632_s1 + $0x168] sm:$0xff]   ;;  %v1621_v59 = vcombine.low %v103_v44, %v107_v45 }
  0x1e   :  { %1777 = vmatprep.subr.bf16.mxu1 %v1984_v29  ;;  %v98_v27 = vld [vmem:[%s2633_s0 + $0x160] sm:$0xff]  ;;  %v95_v29 = vld [vmem:[%s2633_s0 + $0x148] sm:$0xff] }
  0x1f   :  { %v1612_v36 = vcombine.high %v94_v26, %v98_v27  ;;  %v1611_v47 = vcombine.low %v94_v26, %v98_v27  ;;  %v111_v56 = vld [vmem:[%s2633_s0 + $0x1c8] sm:$0xff]  ;;  %v1591_v26 = vcombine.low %v72_v14, %v76_v15 }
  0x20   :  { %1714 = vmatpush3.bf16.msra.mxu0 %v1985_v30  ;;  %v99_v30 = vld [vmem:[%s2633_s0 + $0x168] sm:$0xff] }
  0x21   :  { %1778 = vmatpush3.bf16.msra.mxu1 %v1986_v31  ;;  %1827 = vmatprep.subr.bf16.mxu0 %v1987_v40  ;;  %v2008_v31 = vld [vmem:[%s2632_s1 + $0x128] sm:$0xff]   ;;  %v1614_v37 = vcombine.high %v95_v29, %v99_v30  ;;  %v2013_v40 = vld [vmem:[%s2632_s1 + $0x1f0] sm:$0xff]  }
  0x22   :  { %1891 = vmatprep.subr.bf16.mxu1 %v1989_v42  ;;  %v106_v42 = vld [vmem:[%s2633_s0 + $0x1a0] sm:$0xff]  ;;  %v115_v57 = vld [vmem:[%s2633_s0 + $0x1e8] sm:$0xff] }
  0x23   :  { %983 = vmatmul.mubr.bf16.vlgmr.msra.gmra.mrb[0].mxu0 %v1571_v35  ;;  %v1605_v35 = vcombine.low %v87_v16, %v91_v17  ;;  %v1629_v3 = vcombine.low %v111_v56, %v115_v57  ;;  %v73_v16 = vld [vmem:[%s2633_s0 + $0x98] sm:$0xff] }
  0x24   :  { %1080 = vmatmul.mubr.bf16.vlgmr.msra.gmra.mrb[0].mxu1 %v1573_v38  ;;  %1828 = vmatpush3.bf16.msra.mxu0 %v1988_v41  ;;  %v2011_v38 = vld [vmem:[%s2632_s1 + $0x170] sm:$0xff]   ;;  %v102_v41 = vld [vmem:[%s2633_s0 + $0x180] sm:$0xff]  ;;  %v77_v17 = vld [vmem:[%s2633_s0 + $0xb8] sm:$0xff] }
  0x25   :  { %1892 = vmatpush3.bf16.msra.mxu1 %v1990_v43  ;;  %990 = vmatprep.mubr.bf16.mxu0 %v1580_v46  ;;  %v2014_v43 = vld [vmem:[%s2632_s1 + $0x1b0] sm:$0xff]   ;;  %v2015_v46 = vld [vmem:[%s2632_s1 + $0x178] sm:$0xff]   ;;  %v1619_v58 = vcombine.low %v102_v41, %v106_v42  ;;  %v1593_v27 = vcombine.low %v73_v16, %v77_v17 }
  0x26   :  { %1087 = vmatprep.mubr.bf16.mxu1 %v1582_v49  ;;  %1829 = vmatprep.subr.bf16.mxu0 %v1991_v50  ;;  %v1613_v49 = vcombine.low %v95_v29, %v99_v30  ;;  %v1620_v50 = vcombine.high %v102_v41, %v106_v42  ;;  %v88_v30 = vld [vmem:[%s2633_s0 + $0x110] sm:$0xff]  ;;  %v101_v41 = vld [vmem:[%s2633_s0 + $0x178] sm:$0xff] }
  0x27   :  { %1893 = vmatprep.subr.bf16.mxu1 %v1993_v54  ;;  %v110_v54 = vld [vmem:[%s2633_s0 + $0x1c0] sm:$0xff] }
  0x28   :  { %1830 = vmatpush3.bf16.msra.mxu0 %v1992_v52  ;;  %v1622_v52 = vcombine.high %v103_v44, %v107_v45 }
  0x29   :  { %1894 = vmatpush3.bf16.msra.mxu1 %v1994_v55  ;;  %1831 = vmatprep.subr.bf16.mxu0 %v1995_v62  ;;  %v114_v55 = vld [vmem:[%s2633_s0 + $0x1e0] sm:$0xff]  ;;  %v56_v62 = vld [vmem:[%s2633_s0 + $0x10] sm:$0xff] }
  0x2a   :  { %1895 = vmatprep.subr.bf16.mxu1 %v1997_v0  ;;  %v57_v0 = vld [vmem:[%s2633_s0 + $0x18] sm:$0xff] }
  0x2b   :  { %991 = vmatmul.mubr.bf16.gmra.mrb[4].mxu0 %v1579_v51  ;;  %v2017_v51 = vld [vmem:[%s2632_s1 + $0x1f8] sm:$0xff]  }
  0x2c   :  { %1088 = vmatmul.mubr.bf16.gmra.mrb[4].mxu1 %v1581_v53  ;;  %998 = vmatprep.mubr.bf16.mxu0 %v1588_v60  ;;  %v2018_v53 = vld [vmem:[%s2632_s1 + $0x1b8] sm:$0xff]   ;;  %v1628_v60 = vcombine.high %v110_v54, %v114_v55 }
  0x2d   :  { %1095 = vmatprep.mubr.bf16.mxu1 %v1590_v61  ;;  %1832 = vmatpush3.bf16.msra.mxu0 %v1996_v63  ;;  %v1630_v61 = vcombine.high %v111_v56, %v115_v57  ;;  %v60_v63 = vld [vmem:[%s2633_s0 + $0x30] sm:$0xff]  ;;  %v113_v56 = vld [vmem:[%s2633_s0 + $0x1d8] sm:$0xff] }
  0x2e   :  { %1896 = vmatpush3.bf16.msra.mxu1 %v1998_v1  ;;  %1833 = vmatprep.subr.bf16.mxu0 %v1999_v10  ;;  %v61_v1 = vld [vmem:[%s2633_s0 + $0x38] sm:$0xff]  ;;  %v1576_v4 = vcombine.high %v56_v62, %v60_v63  ;;  %v1575_v10 = vcombine.low %v56_v62, %v60_v63 }
  0x2f   :  { %1897 = vmatprep.subr.bf16.mxu1 %v2001_v12  ;;  %v1578_v5 = vcombine.high %v57_v0, %v61_v1  ;;  %v117_v57 = vld [vmem:[%s2633_s0 + $0x1f8] sm:$0xff] }
  0x30   :  { %v1633_v63 = vcombine.low %v113_v56, %v117_v57 }
  0x31   :  { %1834 = vmatpush3.bf16.msra.mxu0 %v2000_v11  ;;  %v1577_v11 = vcombine.low %v57_v0, %v61_v1 }
  0x32   :  { %1898 = vmatpush3.bf16.msra.mxu1 %v2002_v13  ;;  %1835 = vmatprep.subr.bf16.mxu0 %v2003_v18 }
  0x33   :  { %999 = vmatmul.mubr.bf16.gmra.mrb[8].mxu0 %v1587_v2  ;;  %1899 = vmatprep.subr.bf16.mxu1 %v2005_v23  ;;  %v1627_v2 = vcombine.low %v110_v54, %v114_v55  ;;  %v84_v23 = vld [vmem:[%s2633_s0 + $0xf0] sm:$0xff] }
  0x34   :  { %1096 = vmatmul.mubr.bf16.gmra.mrb[8].mxu1 %v1589_v6  ;;  %1006 = vmatprep.mubr.bf16.mxu0 %v1596_v7  ;;  %v64_v6 = vld [vmem:[%s2633_s0 + $0x50] sm:$0xff] }
  0x35   :  { %1103 = vmatprep.mubr.bf16.mxu1 %v1598_v9  ;;  %1836 = vmatpush3.bf16.msra.mxu0 %v2004_v20  ;;  %v68_v7 = vld [vmem:[%s2633_s0 + $0x70] sm:$0xff]  ;;  %v69_v9 = vld [vmem:[%s2633_s0 + $0x78] sm:$0xff]  ;;  %v1592_v20 = vcombine.high %v72_v14, %v76_v15 }
  0x36   :  { %1900 = vmatpush3.bf16.msra.mxu1 %v2006_v25  ;;  %1837 = vmatprep.subr.bf16.mxu0 %v2007_v28  ;;  %v1584_v12 = vcombine.high %v64_v6, %v68_v7  ;;  %v1586_v13 = vcombine.high %v65_v8, %v69_v9  ;;  %v1583_v18 = vcombine.low %v64_v6, %v68_v7  ;;  %v85_v25 = vld [vmem:[%s2633_s0 + $0xf8] sm:$0xff]  ;;  %v112_v54 = vld [vmem:[%s2633_s0 + $0x1d0] sm:$0xff] }
  0x37   :  { %1901 = vmatprep.subr.bf16.mxu1 %v2009_v32  ;;  %v89_v32 = vld [vmem:[%s2633_s0 + $0x118] sm:$0xff]  ;;  %v116_v55 = vld [vmem:[%s2633_s0 + $0x1f0] sm:$0xff] }
  0x38   :  { %v1631_v62 = vcombine.low %v112_v54, %v116_v55 }
  0x39   :  { %1838 = vmatpush3.bf16.msra.mxu0 %v2008_v31  ;;  %v92_v31 = vld [vmem:[%s2633_s0 + $0x130] sm:$0xff] }
  0x3a   :  { %1902 = vmatpush3.bf16.msra.mxu1 %v2010_v33  ;;  %1839 = vmatprep.subr.bf16.mxu0 %v2011_v38  ;;  %v93_v33 = vld [vmem:[%s2633_s0 + $0x138] sm:$0xff]  ;;  %v96_v38 = vld [vmem:[%s2633_s0 + $0x150] sm:$0xff]  ;;  %v1607_v42 = vcombine.low %v88_v30, %v92_v31 }
  0x3b   :  { %1007 = vmatmul.mubr.bf16.gmra.mrb[12].mxu0 %v1595_v19  ;;  %1903 = vmatprep.subr.bf16.mxu1 %v2013_v40  ;;  %v1585_v19 = vcombine.low %v65_v8, %v69_v9  ;;  %v97_v40 = vld [vmem:[%s2633_s0 + $0x158] sm:$0xff] }
  0x3c   :  { %1104 = vmatmul.mubr.bf16.gmra.mrb[12].mxu1 %v1597_v21  ;;  %1014 = vmatprep.mubr.bf16.mxu0 %v1604_v22  ;;  %v1594_v21 = vcombine.high %v73_v16, %v77_v17  ;;  %v80_v22 = vld [vmem:[%s2633_s0 + $0xd0] sm:$0xff]  ;;  %v1618_v45 = vcombine.high %v97_v40, %v101_v41 }
  0x3d   :  { %1111 = vmatprep.mubr.bf16.mxu1 %v1606_v24  ;;  %1840 = vmatpush3.bf16.msra.mxu0 %v2012_v39  ;;  %v81_v24 = vld [vmem:[%s2633_s0 + $0xd8] sm:$0xff]  ;;  %v1600_v28 = vcombine.high %v80_v22, %v84_v23  ;;  %v100_v39 = vld [vmem:[%s2633_s0 + $0x170] sm:$0xff] }
  0x3e   :  { %1904 = vmatpush3.bf16.msra.mxu1 %v2014_v43  ;;  %1841 = vmatprep.subr.bf16.mxu0 %v2015_v46  ;;  %v1602_v29 = vcombine.high %v81_v24, %v85_v25  ;;  %v1609_v43 = vcombine.low %v89_v32, %v93_v33  ;;  %v1616_v44 = vcombine.high %v96_v38, %v100_v39  ;;  %v104_v46 = vld [vmem:[%s2633_s0 + $0x190] sm:$0xff] }
  0x3f   :  { %1905 = vmatprep.subr.bf16.mxu1 %v2017_v51  ;;  %v1617_v51 = vcombine.low %v97_v40, %v101_v41 }
  0x41   :  { %1842 = vmatpush3.bf16.msra.mxu0 %v2016_v48  ;;  %v105_v48 = vld [vmem:[%s2633_s0 + $0x198] sm:$0xff] }
  0x42   :  { %1906 = vmatpush3.bf16.msra.mxu1 %v2018_v53 }
  0x43   :  { %1015 = vmatmul.mubr.bf16.gmra.mrb[16].mxu0 %v1603_v34  ;;  %v1599_v34 = vcombine.low %v80_v22, %v84_v23 }
  0x44   :  { %1112 = vmatmul.mubr.bf16.gmra.mrb[16].mxu1 %v1605_v35  ;;  %1022 = vmatprep.mubr.bf16.mxu0 %v1612_v36  ;;  %v1601_v35 = vcombine.low %v81_v24, %v85_v25  ;;  %v1608_v36 = vcombine.high %v88_v30, %v92_v31 }
  0x45   :  { %1119 = vmatprep.mubr.bf16.mxu1 %v1614_v37  ;;  %v1610_v37 = vcombine.high %v89_v32, %v93_v33 }
  0x4b   :  { %1023 = vmatmul.mubr.bf16.gmra.mrb[20].mxu0 %v1611_v47  ;;  %v108_v47 = vld [vmem:[%s2633_s0 + $0x1b0] sm:$0xff] }
  0x4c   :  { %1120 = vmatmul.mubr.bf16.gmra.mrb[20].mxu1 %v1613_v49  ;;  %1030 = vmatprep.mubr.bf16.mxu0 %v1620_v50  ;;  %v109_v49 = vld [vmem:[%s2633_s0 + $0x1b8] sm:$0xff]  ;;  %v1615_v50 = vcombine.low %v96_v38, %v100_v39 }
  0x4d   :  { %1127 = vmatprep.mubr.bf16.mxu1 %v1622_v52  ;;  %v1624_v52 = vcombine.high %v104_v46, %v108_v47  ;;  %v1626_v53 = vcombine.high %v105_v48, %v109_v49 }
  0x53   :  { %1031 = vmatmul.mubr.bf16.gmra.mrb[24].mxu0 %v1619_v58  ;;  %v1623_v58 = vcombine.low %v104_v46, %v108_v47 }
  0x54   :  { %1128 = vmatmul.mubr.bf16.gmra.mrb[24].mxu1 %v1621_v59  ;;  %1038 = vmatprep.mubr.bf16.mxu0 %v1628_v60  ;;  %v1625_v59 = vcombine.low %v105_v48, %v109_v49  ;;  %v1632_v60 = vcombine.high %v112_v54, %v116_v55 }
  0x55   :  { %1135 = vmatprep.mubr.bf16.mxu1 %v1630_v61  ;;  %v1634_v61 = vcombine.high %v113_v56, %v117_v57 }
  0x5b   :  { %1039 = vmatmul.mubr.bf16.gmra.mrb[28].mxu0 %v1627_v2 }
  0x5c   :  { %1136 = vmatmul.mubr.bf16.gmra.mrb[28].mxu1 %v1629_v3  ;;  %1176 = vmatprep.mubr.bf16.mxu0 %v1576_v4 }
  0x5d   :  { %1273 = vmatprep.mubr.bf16.mxu1 %v1578_v5 }
  0x63   :  { %1177 = vmatmul.mubr.bf16.vlgmr.msra.gmra.mrb[32].mxu0 %v1575_v10 }
  0x64   :  { %1274 = vmatmul.mubr.bf16.vlgmr.msra.gmra.mrb[32].mxu1 %v1577_v11  ;;  %1184 = vmatprep.mubr.bf16.mxu0 %v1584_v12 }
  0x65   :  { %1281 = vmatprep.mubr.bf16.mxu1 %v1586_v13 }
  0x6b   :  { %1185 = vmatmul.mubr.bf16.gmra.mrb[36].mxu0 %v1583_v18 }
  0x6c   :  { %1282 = vmatmul.mubr.bf16.gmra.mrb[36].mxu1 %v1585_v19  ;;  %1192 = vmatprep.mubr.bf16.mxu0 %v1592_v20 }
  0x6d   :  { %1289 = vmatprep.mubr.bf16.mxu1 %v1594_v21 }
  0x73   :  { %1193 = vmatmul.mubr.bf16.gmra.mrb[40].mxu0 %v1591_v26 }
  0x74   :  { %1290 = vmatmul.mubr.bf16.gmra.mrb[40].mxu1 %v1593_v27  ;;  %1200 = vmatprep.mubr.bf16.mxu0 %v1600_v28 }
  0x75   :  { %1297 = vmatprep.mubr.bf16.mxu1 %v1602_v29 }
  0x7b   :  { %1201 = vmatmul.mubr.bf16.gmra.mrb[44].mxu0 %v1599_v34 }
  0x7c   :  { %1298 = vmatmul.mubr.bf16.gmra.mrb[44].mxu1 %v1601_v35  ;;  %1208 = vmatprep.mubr.bf16.mxu0 %v1608_v36 }
  0x7d   :  { %1305 = vmatprep.mubr.bf16.mxu1 %v1610_v37 }
  0x83   :  { %1209 = vmatmul.mubr.bf16.gmra.mrb[48].mxu0 %v1607_v42 }
  0x84   :  { %1306 = vmatmul.mubr.bf16.gmra.mrb[48].mxu1 %v1609_v43  ;;  %1216 = vmatprep.mubr.bf16.mxu0 %v1616_v44 }
  0x85   :  { %1313 = vmatprep.mubr.bf16.mxu1 %v1618_v45 }
  0x8b   :  { %1217 = vmatmul.mubr.bf16.gmra.mrb[52].mxu0 %v1615_v50 }
  0x8c   :  { %1314 = vmatmul.mubr.bf16.gmra.mrb[52].mxu1 %v1617_v51  ;;  %1224 = vmatprep.mubr.bf16.mxu0 %v1624_v52 }
  0x8d   :  { %1321 = vmatprep.mubr.bf16.mxu1 %v1626_v53 }
  0x93   :  { %1225 = vmatmul.mubr.bf16.gmra.mrb[56].mxu0 %v1623_v58 }
  0x94   :  { %1322 = vmatmul.mubr.bf16.gmra.mrb[56].mxu1 %v1625_v59  ;;  %1232 = vmatprep.mubr.bf16.mxu0 %v1632_v60 }
  0x95   :  { %1329 = vmatprep.mubr.bf16.mxu1 %v1634_v61 }
  0x9b   :  { %1233 = vmatmul.mubr.bf16.gmra.mrb[60].mxu0 %v1631_v62 }
  0x9c   :  { %1330 = vmatmul.mubr.bf16.gmra.mrb[60].mxu1 %v1633_v63 }
  0xf6   :  { %v1715_v0 = vpop.f32.mrb[0].mxu0 }
  0xf7   :  { %v1779_v1 = vpop.f32.mrb[0].mxu1  ;;  %v1716_v2 = vpop.f32.mrb[1].mxu0 }
  0xf8   :  { %v1717_v3 = vadd.f32 %v1716_v2, %v1715_v0  ;;  %v1780_v4 = vpop.f32.mrb[1].mxu1  ;;  %v1718_v5 = vpop.f32.mrb[2].mxu0 }
  0xf9   :  { %v1781_v6 = vadd.f32 %v1780_v4, %v1779_v1  ;;  %v1782_v7 = vpop.f32.mrb[2].mxu1  ;;  %v1719_v8 = vpop.f32.mrb[3].mxu0 }
  0xfa   :  { %v1720_v9 = vadd.f32 %v1719_v8, %v1718_v5  ;;  %v1783_v10 = vpop.f32.mrb[3].mxu1 }
  0xfb   :  { %v2430_v11 = vadd.f32 %v1781_v6, %v1717_v3  ;;  %v1784_v12 = vadd.f32 %v1783_v10, %v1782_v7 }
  0xfd   :  { %v2432_v13 = vadd.f32 %v1784_v12, %v1720_v9 }
  0xfe   :  { %v1721_v14 = vpop.f32.mrb[4].mxu0 }
  0xff   :  { %v1785_v15 = vpop.f32.mrb[4].mxu1  ;;  %v1722_v16 = vpop.f32.mrb[5].mxu0 }
 0x100   :  { %v1723_v17 = vadd.f32 %v1722_v16, %v1721_v14  ;;  %v1786_v18 = vpop.f32.mrb[5].mxu1  ;;  %v1724_v19 = vpop.f32.mrb[6].mxu0 }
 0x101   :  { %v1787_v20 = vadd.f32 %v1786_v18, %v1785_v15  ;;  %v1788_v21 = vpop.f32.mrb[6].mxu1  ;;  %v1725_v22 = vpop.f32.mrb[7].mxu0 }
 0x102   :  { %v1726_v23 = vadd.f32 %v1725_v22, %v1724_v19  ;;  %v1789_v24 = vpop.f32.mrb[7].mxu1 }
 0x103   :  { %v2434_v25 = vadd.f32 %v1787_v20, %v1723_v17  ;;  %v1790_v26 = vadd.f32 %v1789_v24, %v1788_v21 }
 0x105   :  { %v2436_v27 = vadd.f32 %v1790_v26, %v1726_v23 }
 0x106   :  { %v1727_v28 = vpop.f32.mrb[8].mxu0 }
 0x107   :  { %v1791_v29 = vpop.f32.mrb[8].mxu1  ;;  %v1728_v30 = vpop.f32.mrb[9].mxu0 }
 0x108   :  { %v1729_v31 = vadd.f32 %v1728_v30, %v1727_v28  ;;  %v1792_v32 = vpop.f32.mrb[9].mxu1  ;;  %v1730_v33 = vpop.f32.mrb[10].mxu0 }
 0x109   :  { %v1793_v34 = vadd.f32 %v1792_v32, %v1791_v29  ;;  %v1794_v35 = vpop.f32.mrb[10].mxu1  ;;  %v1731_v36 = vpop.f32.mrb[11].mxu0 }
 0x10a   :  { %v1732_v37 = vadd.f32 %v1731_v36, %v1730_v33  ;;  %v1795_v38 = vpop.f32.mrb[11].mxu1 }
 0x10b   :  { %v2438_v39 = vadd.f32 %v1793_v34, %v1729_v31  ;;  %v1796_v40 = vadd.f32 %v1795_v38, %v1794_v35 }
 0x10d   :  { %v2440_v41 = vadd.f32 %v1796_v40, %v1732_v37 }
 0x10e   :  { %v1733_v42 = vpop.f32.mrb[12].mxu0 }
 0x10f   :  { %v1797_v43 = vpop.f32.mrb[12].mxu1  ;;  %v1734_v44 = vpop.f32.mrb[13].mxu0 }
 0x110   :  { %v1735_v45 = vadd.f32 %v1734_v44, %v1733_v42  ;;  %v1798_v46 = vpop.f32.mrb[13].mxu1  ;;  %v1736_v47 = vpop.f32.mrb[14].mxu0 }
 0x111   :  { %v1799_v48 = vadd.f32 %v1798_v46, %v1797_v43  ;;  %v1800_v49 = vpop.f32.mrb[14].mxu1  ;;  %v1737_v50 = vpop.f32.mrb[15].mxu0 }
 0x112   :  { %v1738_v51 = vadd.f32 %v1737_v50, %v1736_v47  ;;  %v1801_v52 = vpop.f32.mrb[15].mxu1 }
 0x113   :  { %v2442_v53 = vadd.f32 %v1799_v48, %v1735_v45  ;;  %v1802_v54 = vadd.f32 %v1801_v52, %v1800_v49 }
 0x115   :  { %v2444_v55 = vadd.f32 %v1802_v54, %v1738_v51 }
 0x116   :  { %v1739_v56 = vpop.f32.mrb[16].mxu0 }
 0x117   :  { %v1803_v57 = vpop.f32.mrb[16].mxu1  ;;  %v1740_v58 = vpop.f32.mrb[17].mxu0 }
 0x118   :  { %v1741_v59 = vadd.f32 %v1740_v58, %v1739_v56  ;;  %v1804_v60 = vpop.f32.mrb[17].mxu1  ;;  %v1742_v61 = vpop.f32.mrb[18].mxu0 }
 0x119   :  { %v1805_v62 = vadd.f32 %v1804_v60, %v1803_v57  ;;  %v1806_v63 = vpop.f32.mrb[18].mxu1  ;;  %v1743_v0 = vpop.f32.mrb[19].mxu0 }
 0x11a   :  { %v1744_v1 = vadd.f32 %v1743_v0, %v1742_v61  ;;  %v1807_v2 = vpop.f32.mrb[19].mxu1 }
 0x11b   :  { %v2446_v3 = vadd.f32 %v1805_v62, %v1741_v59  ;;  %v1808_v4 = vadd.f32 %v1807_v2, %v1806_v63 }
 0x11d   :  { %v2448_v5 = vadd.f32 %v1808_v4, %v1744_v1 }
 0x11e   :  { %v1745_v6 = vpop.f32.mrb[20].mxu0 }
 0x11f   :  { %v1809_v7 = vpop.f32.mrb[20].mxu1  ;;  %v1746_v8 = vpop.f32.mrb[21].mxu0 }
 0x120   :  { %v1747_v9 = vadd.f32 %v1746_v8, %v1745_v6  ;;  %v1810_v10 = vpop.f32.mrb[21].mxu1  ;;  %v1748_v12 = vpop.f32.mrb[22].mxu0 }
 0x121   :  { %v1811_v14 = vadd.f32 %v1810_v10, %v1809_v7  ;;  %v1812_v15 = vpop.f32.mrb[22].mxu1  ;;  %v1749_v16 = vpop.f32.mrb[23].mxu0 }
 0x122   :  { %v1750_v17 = vadd.f32 %v1749_v16, %v1748_v12  ;;  %v1813_v18 = vpop.f32.mrb[23].mxu1 }
 0x123   :  { %v2450_v19 = vadd.f32 %v1811_v14, %v1747_v9  ;;  %v1814_v20 = vadd.f32 %v1813_v18, %v1812_v15 }
 0x125   :  { %v2452_v21 = vadd.f32 %v1814_v20, %v1750_v17 }
 0x126   :  { %v1751_v22 = vpop.f32.mrb[24].mxu0 }
 0x127   :  { %v1815_v23 = vpop.f32.mrb[24].mxu1  ;;  %v1752_v24 = vpop.f32.mrb[25].mxu0 }
 0x128   :  { %v1753_v26 = vadd.f32 %v1752_v24, %v1751_v22  ;;  %v1816_v28 = vpop.f32.mrb[25].mxu1  ;;  %v1754_v29 = vpop.f32.mrb[26].mxu0 }
 0x129   :  { %v1817_v30 = vadd.f32 %v1816_v28, %v1815_v23  ;;  %v1818_v31 = vpop.f32.mrb[26].mxu1  ;;  %v1755_v32 = vpop.f32.mrb[27].mxu0 }
 0x12a   :  { %v1756_v33 = vadd.f32 %v1755_v32, %v1754_v29  ;;  %v1819_v34 = vpop.f32.mrb[27].mxu1 }
 0x12b   :  { %v2454_v35 = vadd.f32 %v1817_v30, %v1753_v26  ;;  %v1820_v36 = vadd.f32 %v1819_v34, %v1818_v31 }
 0x12d   :  { %v2456_v37 = vadd.f32 %v1820_v36, %v1756_v33 }
 0x12e   :  { %v1757_v38 = vpop.f32.mrb[28].mxu0 }
 0x12f   :  { %v1821_v40 = vpop.f32.mrb[28].mxu1  ;;  %v1758_v42 = vpop.f32.mrb[29].mxu0 }
 0x130   :  { %v1759_v43 = vadd.f32 %v1758_v42, %v1757_v38  ;;  %v1822_v44 = vpop.f32.mrb[29].mxu1  ;;  %v1760_v45 = vpop.f32.mrb[30].mxu0 }
 0x131   :  { %v1823_v46 = vadd.f32 %v1822_v44, %v1821_v40  ;;  %v1824_v47 = vpop.f32.mrb[30].mxu1  ;;  %v1761_v48 = vpop.f32.mrb[31].mxu0 }
 0x132   :  { %v1762_v49 = vadd.f32 %v1761_v48, %v1760_v45  ;;  %v1825_v50 = vpop.f32.mrb[31].mxu1 }
 0x133   :  { %v2458_v51 = vadd.f32 %v1823_v46, %v1759_v43  ;;  %v1826_v52 = vadd.f32 %v1825_v50, %v1824_v47 }
 0x135   :  { %v2460_v54 = vadd.f32 %v1826_v52, %v1762_v49 }
 0x136   :  { %v1843_v56 = vpop.f32.mrb[32].mxu0 }
 0x137   :  { %v1907_v57 = vpop.f32.mrb[32].mxu1  ;;  %v1844_v58 = vpop.f32.mrb[33].mxu0 }
 0x138   :  { %v1845_v59 = vadd.f32 %v1844_v58, %v1843_v56  ;;  %v1908_v60 = vpop.f32.mrb[33].mxu1  ;;  %v1846_v61 = vpop.f32.mrb[34].mxu0 }
 0x139   :  { %v1909_v62 = vadd.f32 %v1908_v60, %v1907_v57  ;;  %v1910_v63 = vpop.f32.mrb[34].mxu1  ;;  %v1847_v0 = vpop.f32.mrb[35].mxu0 }
 0x13a   :  { %v1179_v1 = vadd.f32 %v1845_v59, %v2430_v11  ;;  %v1848_v2 = vadd.f32 %v1847_v0, %v1846_v61  ;;  %v1911_v4 = vpop.f32.mrb[35].mxu1 }
 0x13b   :  { %v1912_v6 = vadd.f32 %v1911_v4, %v1910_v63 }
 0x13c   :  { %v2463_v7 = vadd.f32 %v1909_v62, %v1179_v1  ;;  %v1182_v8 = vadd.f32 %v1848_v2, %v2432_v13 }
 0x13e   :  { %v2466_v9 = vadd.f32 %v1912_v6, %v1182_v8  ;;  %v1849_v10 = vpop.f32.mrb[36].mxu0  ;;  %v1410_v34 = vmul.f32 %v2463_v7, %v2463_v7 }
 0x13f   :  { %v1913_v12 = vpop.f32.mrb[36].mxu1  ;;  %v1850_v14 = vpop.f32.mrb[37].mxu0 }
 0x140   :  { %v1851_v15 = vadd.f32 %v1850_v14, %v1849_v10  ;;  %v1914_v16 = vpop.f32.mrb[37].mxu1  ;;  %v1852_v17 = vpop.f32.mrb[38].mxu0  ;;  %v1411_v29 = vmul.f32 %v2466_v9, %v2466_v9 }
 0x141   :  { %v1915_v18 = vadd.f32 %v1914_v16, %v1913_v12  ;;  %v1916_v20 = vpop.f32.mrb[38].mxu1  ;;  %v1853_v22 = vpop.f32.mrb[39].mxu0 }
 0x142   :  { %v1187_v11 = vadd.f32 %v1851_v15, %v2434_v25  ;;  %v1854_v23 = vadd.f32 %v1853_v22, %v1852_v17  ;;  %v1917_v24 = vpop.f32.mrb[39].mxu1  ;;  %v1389_v25 = vadd.f32 %v2466_v9, %v2463_v7  ;;  %v1426_v45 = vadd.f32 %v1411_v29, %v1410_v34 }
 0x143   :  { %v1918_v26 = vadd.f32 %v1917_v24, %v1916_v20 }
 0x144   :  { %v2469_v28 = vadd.f32 %v1915_v18, %v1187_v11  ;;  %v1190_v13 = vadd.f32 %v1854_v23, %v2436_v27 }
 0x146   :  { %v2474_v30 = vadd.f32 %v1918_v26, %v1190_v13  ;;  %v1855_v31 = vpop.f32.mrb[40].mxu0  ;;  %v1412_v36 = vmul.f32 %v2469_v28, %v2469_v28  ;;  %v1390_v46 = vadd.f32 %v1389_v25, %v2469_v28 }
 0x147   :  { %v1919_v32 = vpop.f32.mrb[40].mxu1  ;;  %v1856_v33 = vpop.f32.mrb[41].mxu0 }
 0x148   :  { %v1857_v38 = vadd.f32 %v1856_v33, %v1855_v31  ;;  %v1920_v40 = vpop.f32.mrb[41].mxu1  ;;  %v1858_v27 = vpop.f32.mrb[42].mxu0  ;;  %v1427_v52 = vadd.f32 %v1426_v45, %v1412_v36  ;;  %v1413_v56 = vmul.f32 %v2474_v30, %v2474_v30  ;;  %v1391_v59 = vadd.f32 %v1390_v46, %v2474_v30 }
 0x149   :  { %v1921_v42 = vadd.f32 %v1920_v40, %v1919_v32  ;;  %v1922_v43 = vpop.f32.mrb[42].mxu1  ;;  %v1859_v44 = vpop.f32.mrb[43].mxu0 }
 0x14a   :  { %v1195_v47 = vadd.f32 %v1857_v38, %v2438_v39  ;;  %v1860_v48 = vadd.f32 %v1859_v44, %v1858_v27  ;;  %v1923_v49 = vpop.f32.mrb[43].mxu1  ;;  %v1428_v0 = vadd.f32 %v1427_v52, %v1413_v56 }
 0x14b   :  { %v1924_v50 = vadd.f32 %v1923_v49, %v1922_v43 }
 0x14c   :  { %v2486_v57 = vadd.f32 %v1921_v42, %v1195_v47  ;;  %v1198_v58 = vadd.f32 %v1860_v48, %v2440_v41 }
 0x14e   :  { %v1414_v60 = vmul.f32 %v2486_v57, %v2486_v57  ;;  %v2492_v61 = vadd.f32 %v1924_v50, %v1198_v58  ;;  %v1861_v62 = vpop.f32.mrb[44].mxu0  ;;  %v1392_v1 = vadd.f32 %v1391_v59, %v2486_v57 }
 0x14f   :  { %v1925_v39 = vpop.f32.mrb[44].mxu1  ;;  %v1862_v63 = vpop.f32.mrb[45].mxu0 }
 0x150   :  { %v1863_v2 = vadd.f32 %v1862_v63, %v1861_v62  ;;  %v1926_v4 = vpop.f32.mrb[45].mxu1  ;;  %v1864_v6 = vpop.f32.mrb[46].mxu0  ;;  %v1429_v41 = vadd.f32 %v1428_v0, %v1414_v60  ;;  %v1415_v14 = vmul.f32 %v2492_v61, %v2492_v61  ;;  %v1393_v20 = vadd.f32 %v1392_v1, %v2492_v61 }
 0x151   :  { %v1927_v8 = vadd.f32 %v1926_v4, %v1925_v39  ;;  %v1928_v10 = vpop.f32.mrb[46].mxu1  ;;  %v1865_v12 = vpop.f32.mrb[47].mxu0 }
 0x152   :  { %v1203_v15 = vadd.f32 %v1863_v2, %v2442_v53  ;;  %v1866_v16 = vadd.f32 %v1865_v12, %v1864_v6  ;;  %v1929_v17 = vpop.f32.mrb[47].mxu1  ;;  %v1430_v23 = vadd.f32 %v1429_v41, %v1415_v14 }
 0x153   :  { %v1930_v18 = vadd.f32 %v1929_v17, %v1928_v10 }
 0x154   :  { %v2499_v22 = vadd.f32 %v1927_v8, %v1203_v15  ;;  %v1206_v11 = vadd.f32 %v1866_v16, %v2444_v55 }
 0x156   :  { %v1394_v24 = vadd.f32 %v1393_v20, %v2499_v22  ;;  %v1416_v26 = vmul.f32 %v2499_v22, %v2499_v22  ;;  %v2505_v13 = vadd.f32 %v1930_v18, %v1206_v11  ;;  %v1867_v29 = vpop.f32.mrb[48].mxu0 }
 0x157   :  { %v1931_v31 = vpop.f32.mrb[48].mxu1  ;;  %v1868_v53 = vpop.f32.mrb[49].mxu0 }
 0x158   :  { %v1431_v32 = vadd.f32 %v1430_v23, %v1416_v26  ;;  %v1395_v33 = vadd.f32 %v1394_v24, %v2505_v13  ;;  %v1417_v34 = vmul.f32 %v2505_v13, %v2505_v13  ;;  %v1869_v25 = vadd.f32 %v1868_v53, %v1867_v29  ;;  %v1932_v36 = vpop.f32.mrb[49].mxu1  ;;  %v1870_v55 = vpop.f32.mrb[50].mxu0 }
 0x159   :  { %v1933_v38 = vadd.f32 %v1932_v36, %v1931_v31  ;;  %v1934_v40 = vpop.f32.mrb[50].mxu1  ;;  %v1871_v27 = vpop.f32.mrb[51].mxu0 }
 0x15a   :  { %v1432_v42 = vadd.f32 %v1431_v32, %v1417_v34  ;;  %v1211_v43 = vadd.f32 %v1869_v25, %v2446_v3  ;;  %v1872_v44 = vadd.f32 %v1871_v27, %v1870_v55  ;;  %v1935_v45 = vpop.f32.mrb[51].mxu1 }
 0x15b   :  { %v1936_v46 = vadd.f32 %v1935_v45, %v1934_v40 }
 0x15c   :  { %v2511_v47 = vadd.f32 %v1933_v38, %v1211_v43  ;;  %v1214_v48 = vadd.f32 %v1872_v44, %v2448_v5 }
 0x15e   :  { %v1396_v49 = vadd.f32 %v1395_v33, %v2511_v47  ;;  %v1418_v50 = vmul.f32 %v2511_v47, %v2511_v47  ;;  %v2517_v52 = vadd.f32 %v1936_v46, %v1214_v48  ;;  %v1873_v56 = vpop.f32.mrb[52].mxu0 }
 0x15f   :  { %v1937_v58 = vpop.f32.mrb[52].mxu1  ;;  %v1874_v59 = vpop.f32.mrb[53].mxu0 }
 0x160   :  { %v1433_v60 = vadd.f32 %v1432_v42, %v1418_v50  ;;  %v1397_v3 = vadd.f32 %v1396_v49, %v2517_v52  ;;  %v1419_v62 = vmul.f32 %v2517_v52, %v2517_v52  ;;  %v1875_v39 = vadd.f32 %v1874_v59, %v1873_v56  ;;  %v1938_v63 = vpop.f32.mrb[53].mxu1  ;;  %v1876_v0 = vpop.f32.mrb[54].mxu0 }
 0x161   :  { %v1939_v5 = vadd.f32 %v1938_v63, %v1937_v58  ;;  %v1940_v1 = vpop.f32.mrb[54].mxu1  ;;  %v1877_v2 = vpop.f32.mrb[55].mxu0 }
 0x162   :  { %v1434_v4 = vadd.f32 %v1433_v60, %v1419_v62  ;;  %v1219_v6 = vadd.f32 %v1875_v39, %v2450_v19  ;;  %v1878_v8 = vadd.f32 %v1877_v2, %v1876_v0  ;;  %v1941_v10 = vpop.f32.mrb[55].mxu1 }
 0x163   :  { %v1942_v12 = vadd.f32 %v1941_v10, %v1940_v1 }
 0x164   :  { %v2523_v41 = vadd.f32 %v1939_v5, %v1219_v6  ;;  %v1222_v14 = vadd.f32 %v1878_v8, %v2452_v21 }
 0x166   :  { %v1398_v15 = vadd.f32 %v1397_v3, %v2523_v41  ;;  %v1420_v16 = vmul.f32 %v2523_v41, %v2523_v41  ;;  %v2529_v17 = vadd.f32 %v1942_v12, %v1222_v14  ;;  %v1879_v18 = vpop.f32.mrb[56].mxu0 }
 0x167   :  { %v1943_v20 = vpop.f32.mrb[56].mxu1  ;;  %v1880_v11 = vpop.f32.mrb[57].mxu0 }
 0x168   :  { %v1435_v23 = vadd.f32 %v1434_v4, %v1420_v16  ;;  %v1399_v19 = vadd.f32 %v1398_v15, %v2529_v17  ;;  %v1421_v24 = vmul.f32 %v2529_v17, %v2529_v17  ;;  %v1881_v26 = vadd.f32 %v1880_v11, %v1879_v18  ;;  %v1944_v29 = vpop.f32.mrb[57].mxu1  ;;  %v1882_v31 = vpop.f32.mrb[58].mxu0 }
 0x169   :  { %v1945_v21 = vadd.f32 %v1944_v29, %v1943_v20  ;;  %v1946_v53 = vpop.f32.mrb[58].mxu1  ;;  %v1883_v32 = vpop.f32.mrb[59].mxu0 }
 0x16a   :  { %v1436_v33 = vadd.f32 %v1435_v23, %v1421_v24  ;;  %v1227_v34 = vadd.f32 %v1881_v26, %v2454_v35  ;;  %v1884_v25 = vadd.f32 %v1883_v32, %v1882_v31  ;;  %v1947_v36 = vpop.f32.mrb[59].mxu1 }
 0x16b   :  { %v1948_v55 = vadd.f32 %v1947_v36, %v1946_v53 }
 0x16c   :  { %v2535_v38 = vadd.f32 %v1945_v21, %v1227_v34  ;;  %v1230_v40 = vadd.f32 %v1884_v25, %v2456_v37  ;;  %v1460_v25 = vlaneseq }
 0x16e   :  { %v1400_v27 = vadd.f32 %v1399_v19, %v2535_v38  ;;  %v1422_v42 = vmul.f32 %v2535_v38, %v2535_v38  ;;  %v2541_v43 = vadd.f32 %v1948_v55, %v1230_v40  ;;  %v1885_v44 = vpop.f32.mrb[60].mxu0  ;;  %v1461_v36 = vshrl.u32 %v1460_v25, 7  ;;  %v1452_v55 = vld [vmem:[%s2634_s2] sm:$0x1] }
 0x16f   :  { %v1949_v45 = vpop.f32.mrb[60].mxu1  ;;  %v1886_v46 = vpop.f32.mrb[61].mxu0 }
 0x170   :  { %v1437_v48 = vadd.f32 %v1436_v33, %v1422_v42  ;;  %v1401_v35 = vadd.f32 %v1400_v27, %v2541_v43  ;;  %v1423_v49 = vmul.f32 %v2541_v43, %v2541_v43  ;;  %v1887_v50 = vadd.f32 %v1886_v46, %v1885_v44  ;;  %v1950_v56 = vpop.f32.mrb[61].mxu1  ;;  %v1888_v58 = vpop.f32.mrb[62].mxu0  ;;  %v1456_v44 = vld [vmem:[%s2635_s3] sm:$0x1] }
 0x171   :  { %v1951_v37 = vadd.f32 %v1950_v56, %v1949_v45  ;;  %v1952_v59 = vpop.f32.mrb[62].mxu1  ;;  %v1889_v60 = vpop.f32.mrb[63].mxu0  ;;  %v1462_v40 = vsub.s32 0, %v1461_v36 }
 0x172   :  { %v1438_v3 = vadd.f32 %v1437_v48, %v1423_v49  ;;  %v1235_v62 = vadd.f32 %v1887_v50, %v2458_v51  ;;  %v1890_v39 = vadd.f32 %v1889_v60, %v1888_v58  ;;  %v1953_v63 = vpop.f32.mrb[63].mxu1 }
 0x173   :  { %v1954_v0 = vadd.f32 %v1953_v63, %v1952_v59 }
 0x174   :  { %v1332_v5 = vadd.f32 %v1951_v37, %v1235_v62  ;;  %v1238_v1 = vadd.f32 %v1890_v39, %v2460_v54 }
 0x176   :  { %v1402_v2 = vadd.f32 %v1401_v35, %v1332_v5  ;;  %v1424_v4 = vmul.f32 %v1332_v5, %v1332_v5  ;;  %v1335_v6 = vadd.f32 %v1954_v0, %v1238_v1 }
 0x178   :  { %v1439_v8 = vadd.f32 %v1438_v3, %v1424_v4  ;;  %v1403_v10 = vadd.f32 %v1402_v2, %v1335_v6  ;;  %v1425_v12 = vmul.f32 %v1335_v6, %v1335_v6 }
 0x17a   :  { %v1404_v14 = vrot.slane %v1403_v10, 4  ;;  %v1440_v15 = vadd.f32 %v1439_v8, %v1425_v12 }
 0x17c   :  { %v1405_v16 = vadd.f32 %v1404_v14, %v1403_v10  ;;  %v1441_v18 = vrot.slane %v1440_v15, 4 }
 0x17e   :  { %v1406_v20 = vrot.slane %v1405_v16, 2  ;;  %v1442_v11 = vadd.f32 %v1441_v18, %v1440_v15 }
 0x180   :  { %v1407_v23 = vadd.f32 %v1406_v20, %v1405_v16  ;;  %v1443_v51 = vrot.slane %v1442_v11, 2 }
 0x182   :  { %v1408_v19 = vrot.slane %v1407_v23, 1  ;;  %v1444_v24 = vadd.f32 %v1443_v51, %v1442_v11 }
 0x184   :  { %v1409_v26 = vadd.f32 %v1408_v19, %v1407_v23  ;;  %v1445_v29 = vrot.slane %v1444_v24, 1 }
 0x186   :  { %v1446_v31 = vadd.f32 %v1445_v29, %v1444_v24  ;;  %v1447_v54 = vmul.f32 0.0078125, %v1409_v26 }
 0x188   :  { %v1448_v21 = vmul.f32 0.0078125, %v1446_v31  ;;  %v1449_v53 = vmul.f32 %v1447_v54, %v1447_v54 }
 0x18a   :  { %v1450_v32 = vsub.f32 %v1448_v21, %v1449_v53 }
 0x18c   :  { %v1451_v33 = vmax.f32 %v1450_v32, 0.0 }
 0x18e   :  { %v1453_v34 = vadd.f32 1e-05, %v1451_v33 }
 0x190   :  { %2019 = vrsqrt.f32 %v1453_v34 }
 0x19a   :  { %v2020_v27 = vpop.eup %2019 }
 0x19b   :  { %v1455_v42 = vmul.f32 %v2020_v27, %v1452_v55 }
 0x19d   :  { %v1457_v45 = vmul.f32 %v1455_v42, %v1447_v54  ;;  %v1463_v46 = vrot.slane %v1455_v42, %v1462_v40 }
 0x19f   :  { %v1458_v48 = vsub.f32 %v1456_v44, %v1457_v45  ;;  %v1465_v35 = vmul.f32 %v1463_v46, %v2463_v7  ;;  %v1466_v49 = vmul.f32 %v1463_v46, %v2466_v9  ;;  %v1470_v50 = vmul.f32 %v1463_v46, %v2492_v61 }
 0x1a0   :  { %v1471_v56 = vmul.f32 %v1463_v46, %v2499_v22  ;;  %v1472_v58 = vmul.f32 %v1463_v46, %v2505_v13  ;;  %v1473_v37 = vmul.f32 %v1463_v46, %v2511_v47  ;;  %v1474_v59 = vmul.f32 %v1463_v46, %v2517_v52 }
 0x1a1   :  { %v1475_v60 = vmul.f32 %v1463_v46, %v2523_v41  ;;  %v1476_v3 = vmul.f32 %v1463_v46, %v2529_v17  ;;  %v1477_v62 = vmul.f32 %v1463_v46, %v2535_v38  ;;  %v1478_v7 = vmul.f32 %v1463_v46, %v2541_v43 }
 0x1a2   :  { %v1479_v39 = vmul.f32 %v1463_v46, %v1332_v5  ;;  %v1467_v9 = vmul.f32 %v1463_v46, %v2469_v28  ;;  %v1468_v61 = vmul.f32 %v1463_v46, %v2474_v30  ;;  %v1480_v22 = vmul.f32 %v1463_v46, %v1335_v6 }
 0x1a3   :  { %v1485_v63 = vrot.slane %v1458_v48, %v1462_v40  ;;  %v1469_v13 = vmul.f32 %v1463_v46, %v2486_v57 }
 0x1a5   :  { %v1487_v47 = vadd.f32 %v1485_v63, %v1465_v35  ;;  %v1488_v0 = vadd.f32 %v1485_v63, %v1466_v49  ;;  %v1489_v52 = vadd.f32 %v1485_v63, %v1467_v9  ;;  %v1490_v1 = vadd.f32 %v1485_v63, %v1468_v61 }
 0x1a6   :  { %v1491_v41 = vadd.f32 %v1485_v63, %v1469_v13  ;;  %v1492_v2 = vadd.f32 %v1485_v63, %v1470_v50  ;;  %v1493_v17 = vadd.f32 %v1485_v63, %v1471_v56  ;;  %v1494_v4 = vadd.f32 %v1485_v63, %v1472_v58 }
 0x1a7   :  { %v1495_v38 = vadd.f32 %v1485_v63, %v1473_v37  ;;  %v1496_v8 = vadd.f32 %v1485_v63, %v1474_v59  ;;  %v1497_v43 = vadd.f32 %v1485_v63, %v1475_v60  ;;  %v1498_v5 = vadd.f32 %v1485_v63, %v1476_v3 }
 0x1a8   :  { %v1499_v10 = vadd.f32 %v1485_v63, %v1477_v62  ;;  %v1500_v28 = vadd.f32 %v1485_v63, %v1478_v7  ;;  %v1501_v12 = vadd.f32 %v1485_v63, %v1479_v39  ;;  %v1502_v30 = vadd.f32 %v1485_v63, %v1480_v22 }
 0x1a9   :  { %vm1503_vm0 = vcmp.ge.f32.partialorder %v1487_v47, 0.0  ;;  %vm1504_vm1 = vcmp.ge.f32.partialorder %v1488_v0, 0.0  ;;  %vm1505_vm2 = vcmp.ge.f32.partialorder %v1489_v52, 0.0  ;;  %vm1506_vm3 = vcmp.ge.f32.partialorder %v1490_v1, 0.0 }
 0x1aa   :  { %vm1507_vm4 = vcmp.ge.f32.partialorder %v1491_v41, 0.0  ;;  %vm1508_vm5 = vcmp.ge.f32.partialorder %v1492_v2, 0.0  ;;  %vm1509_vm6 = vcmp.ge.f32.partialorder %v1493_v17, 0.0  ;;  %vm1510_vm7 = vcmp.ge.f32.partialorder %v1494_v4, 0.0 }
 0x1ab   :  { %vm1511_vm8 = vcmp.ge.f32.partialorder %v1495_v38, 0.0  ;;  %vm1512_vm9 = vcmp.ge.f32.partialorder %v1496_v8, 0.0  ;;  %vm1513_vm10 = vcmp.ge.f32.partialorder %v1497_v43, 0.0  ;;  %vm1514_vm11 = vcmp.ge.f32.partialorder %v1498_v5, 0.0 }
 0x1ac   :  { %vm1515_vm12 = vcmp.ge.f32.partialorder %v1499_v10, 0.0  ;;  %vm1516_vm13 = vcmp.ge.f32.partialorder %v1500_v28, 0.0  ;;  %vm1517_vm14 = vcmp.ge.f32.partialorder %v1501_v12, 0.0  ;;  %vm1518_vm15 = vcmp.ge.f32.partialorder %v1502_v30, 0.0 }
 0x1ad   :  { %v1519_v57 = vmul.f32 0.2, %v1487_v47  ;;  %v1520_v6 = vmul.f32 0.2, %v1488_v0  ;;  %v1521_v14 = vmul.f32 0.2, %v1489_v52 }
 0x1ae   :  { %v1522_v15 = vmul.f32 0.2, %v1490_v1  ;;  %v1523_v16 = vmul.f32 0.2, %v1491_v41  ;;  %v1524_v18 = vmul.f32 0.2, %v1492_v2 }
 0x1af   :  { %v1525_v20 = vmul.f32 0.2, %v1493_v17  ;;  %v1526_v11 = vmul.f32 0.2, %v1494_v4  ;;  %v1527_v23 = vmul.f32 0.2, %v1495_v38  ;;  %v1535_v51 = vsel %vm1503_vm0, %v1487_v47, %v1519_v57 }
 0x1b0   :  { %v1528_v19 = vmul.f32 0.2, %v1496_v8  ;;  %v1529_v24 = vmul.f32 0.2, %v1497_v43  ;;  %v1530_v26 = vmul.f32 0.2, %v1498_v5  ;;  %v1536_v29 = vsel %vm1504_vm1, %v1488_v0, %v1520_v6  ;;  %1551 = vst [vmem:[%s2636_s4] sm:$0xff] %v1535_v51 }
 0x1b1   :  { %v1531_v31 = vmul.f32 0.2, %v1499_v10  ;;  %v1532_v54 = vmul.f32 0.2, %v1500_v28  ;;  %v1533_v21 = vmul.f32 0.2, %v1501_v12  ;;  %v1537_v53 = vsel %vm1505_vm2, %v1489_v52, %v1521_v14 }
 0x1b2   :  { %1552 = vst [vmem:[%s2636_s4 + $0x8] sm:$0xff] %v1536_v29  ;;  %v1534_v32 = vmul.f32 0.2, %v1502_v30  ;;  %v1538_v33 = vsel %vm1506_vm3, %v1490_v1, %v1522_v15  ;;  %v1539_v34 = vsel %vm1507_vm4, %v1491_v41, %v1523_v16  ;;  %v1540_v25 = vsel %vm1508_vm5, %v1492_v2, %v1524_v18  ;;  %1553 = vst [vmem:[%s2636_s4 + $0x10] sm:$0xff] %v1537_v53 }
 0x1b3   :  { %v1541_v36 = vsel %vm1509_vm6, %v1493_v17, %v1525_v20  ;;  %v1542_v55 = vsel %vm1510_vm7, %v1494_v4, %v1526_v11  ;;  %v1543_v40 = vsel %vm1511_vm8, %v1495_v38, %v1527_v23  ;;  %v1544_v27 = vsel %vm1512_vm9, %v1496_v8, %v1528_v19  ;;  %1554 = vst [vmem:[%s2636_s4 + $0x18] sm:$0xff] %v1538_v33 }
 0x1b4   :  { %1555 = vst [vmem:[%s2636_s4 + $0x20] sm:$0xff] %v1539_v34  ;;  %1556 = vst [vmem:[%s2636_s4 + $0x28] sm:$0xff] %v1540_v25  ;;  %v1545_v42 = vsel %vm1513_vm10, %v1497_v43, %v1529_v24  ;;  %v1546_v44 = vsel %vm1514_vm11, %v1498_v5, %v1530_v26  ;;  %v1547_v45 = vsel %vm1515_vm12, %v1499_v10, %v1531_v31 }
 0x1b5   :  { %v1548_v46 = vsel %vm1516_vm13, %v1500_v28, %v1532_v54  ;;  %1557 = vst [vmem:[%s2636_s4 + $0x30] sm:$0xff] %v1541_v36  ;;  %1558 = vst [vmem:[%s2636_s4 + $0x38] sm:$0xff] %v1542_v55  ;;  %v1549_v48 = vsel %vm1517_vm14, %v1501_v12, %v1533_v21  ;;  %v1550_v35 = vsel %vm1518_vm15, %v1502_v30, %v1534_v32 }
 0x1b6   :  { %1559 = vst [vmem:[%s2636_s4 + $0x40] sm:$0xff] %v1543_v40  ;;  %1560 = vst [vmem:[%s2636_s4 + $0x48] sm:$0xff] %v1544_v27 }
 0x1b7   :  { %1561 = vst [vmem:[%s2636_s4 + $0x50] sm:$0xff] %v1545_v42  ;;  %1562 = vst [vmem:[%s2636_s4 + $0x58] sm:$0xff] %v1546_v44 }
 0x1b8   :  { %1563 = vst [vmem:[%s2636_s4 + $0x60] sm:$0xff] %v1547_v45  ;;  %1564 = vst [vmem:[%s2636_s4 + $0x68] sm:$0xff] %v1548_v46 }
 0x1b9   :  { %1565 = vst [vmem:[%s2636_s4 + $0x70] sm:$0xff] %v1549_v48  ;;  %1566 = vst [vmem:[%s2636_s4 + $0x78] sm:$0xff] %v1550_v35 }

// kernel: discriminator_forward.7
= control target key start
LH: loop header
LB: loop body
LE: loop exit
PB: predicated region body
PF: predicated region fallthrough
CT: control target
= control target key end

     0   :  { %s4147_s1 = inlined_call_operand.vmem [shape: bf16[2048,256], index: 1, kind: input, shape index: {}]   ;;  %s4148_s0 = inlined_call_operand.vmem [shape: bf16[32,2048], index: 0, kind: input, shape index: {}]   ;;  %s4149_s2 = inlined_call_operand.vmem [shape: f32[1,256], index: 2, kind: input, shape index: {}]   ;;  %s4150_s3 = inlined_call_operand.vmem [shape: f32[1,256], index: 3, kind: input, shape index: {}]   ;;  %s4151_s4 = inlined_call_operand.vmem [shape: f32[32,256], index: 4, kind: output, shape index: {}]  }
   0x1   :  { %v2735_v0 = vld [vmem:[%s4147_s1 + $0x4] ss:$8 sps:$4 sm:$0xff]   ;;  %v2739_v2 = vld [vmem:[%s4147_s1] ss:$8 sps:$4 sm:$0xff]   ;;  %v2741_v4 = vld [vmem:[%s4147_s1 + $0x14] ss:$8 sps:$4 sm:$0xff]  }
   0x2   :  { %v2737_v1 = vld [vmem:[%s4147_s1 + $0x404] ss:$8 sps:$4 sm:$0xff]   ;;  %1765 = vmatprep.subr.bf16.mxu1 %v2735_v0  ;;  %v2740_v3 = vld [vmem:[%s4147_s1 + $0x400] ss:$8 sps:$4 sm:$0xff]   ;;  %v2743_v5 = vld [vmem:[%s4147_s1 + $0x414] ss:$8 sps:$4 sm:$0xff]  }
   0x3   :  { %1977 = vmatprep.subr.bf16.mxu0 %v2737_v1  ;;  %1766 = vmatpush1.bf16.msra.mxu1 %v2739_v2  ;;  %v2745_v6 = vld [vmem:[%s4147_s1 + $0x10] ss:$8 sps:$4 sm:$0xff]   ;;  %v2747_v8 = vld [vmem:[%s4147_s1 + $0x24] ss:$8 sps:$4 sm:$0xff]   ;;  %v2751_v10 = vld [vmem:[%s4147_s1 + $0x20] ss:$8 sps:$4 sm:$0xff]  }
   0x4   :  { %1978 = vmatpush1.bf16.msra.mxu0 %v2740_v3  ;;  %1767 = vmatprep.subr.bf16.mxu1 %v2741_v4  ;;  %v2746_v7 = vld [vmem:[%s4147_s1 + $0x410] ss:$8 sps:$4 sm:$0xff]   ;;  %v2749_v9 = vld [vmem:[%s4147_s1 + $0x424] ss:$8 sps:$4 sm:$0xff]   ;;  %v2752_v11 = vld [vmem:[%s4147_s1 + $0x420] ss:$8 sps:$4 sm:$0xff]  }
   0x5   :  { %1979 = vmatprep.subr.bf16.mxu0 %v2743_v5  ;;  %v2753_v12 = vld [vmem:[%s4147_s1 + $0x34] ss:$8 sps:$4 sm:$0xff]   ;;  %v2757_v14 = vld [vmem:[%s4147_s1 + $0x30] ss:$8 sps:$4 sm:$0xff]   ;;  %v2759_v16 = vld [vmem:[%s4147_s1 + $0x44] ss:$8 sps:$4 sm:$0xff]  }
   0x6   :  { %v2755_v13 = vld [vmem:[%s4147_s1 + $0x434] ss:$8 sps:$4 sm:$0xff]   ;;  %v2758_v15 = vld [vmem:[%s4147_s1 + $0x430] ss:$8 sps:$4 sm:$0xff]   ;;  %v2761_v17 = vld [vmem:[%s4147_s1 + $0x444] ss:$8 sps:$4 sm:$0xff]  }
   0x7   :  { %1768 = vmatpush1.bf16.msra.mxu1 %v2745_v6  ;;  %v2763_v18 = vld [vmem:[%s4147_s1 + $0x40] ss:$8 sps:$4 sm:$0xff]   ;;  %v2765_v20 = vld [vmem:[%s4147_s1 + $0x54] ss:$8 sps:$4 sm:$0xff]   ;;  %v2769_v22 = vld [vmem:[%s4147_s1 + $0x50] ss:$8 sps:$4 sm:$0xff]  }
   0x8   :  { %1980 = vmatpush1.bf16.msra.mxu0 %v2746_v7  ;;  %1769 = vmatprep.subr.bf16.mxu1 %v2747_v8  ;;  %v2764_v19 = vld [vmem:[%s4147_s1 + $0x440] ss:$8 sps:$4 sm:$0xff]   ;;  %v2767_v21 = vld [vmem:[%s4147_s1 + $0x454] ss:$8 sps:$4 sm:$0xff]   ;;  %v2770_v23 = vld [vmem:[%s4147_s1 + $0x450] ss:$8 sps:$4 sm:$0xff]  }
   0x9   :  { %1981 = vmatprep.subr.bf16.mxu0 %v2749_v9  ;;  %v2771_v24 = vld [vmem:[%s4147_s1 + $0x64] ss:$8 sps:$4 sm:$0xff]   ;;  %v2775_v26 = vld [vmem:[%s4147_s1 + $0x60] ss:$8 sps:$4 sm:$0xff]   ;;  %v2777_v28 = vld [vmem:[%s4147_s1 + $0x74] ss:$8 sps:$4 sm:$0xff]  }
   0xa   :  { %v2773_v25 = vld [vmem:[%s4147_s1 + $0x464] ss:$8 sps:$4 sm:$0xff]   ;;  %v2776_v27 = vld [vmem:[%s4147_s1 + $0x460] ss:$8 sps:$4 sm:$0xff]   ;;  %v2779_v29 = vld [vmem:[%s4147_s1 + $0x474] ss:$8 sps:$4 sm:$0xff]  }
   0xb   :  { %1770 = vmatpush1.bf16.msra.mxu1 %v2751_v10  ;;  %v2781_v30 = vld [vmem:[%s4147_s1 + $0x70] ss:$8 sps:$4 sm:$0xff]   ;;  %v2783_v32 = vld [vmem:[%s4147_s1 + $0x84] ss:$8 sps:$4 sm:$0xff]   ;;  %v2787_v34 = vld [vmem:[%s4147_s1 + $0x80] ss:$8 sps:$4 sm:$0xff]  }
   0xc   :  { %1982 = vmatpush1.bf16.msra.mxu0 %v2752_v11  ;;  %1771 = vmatprep.subr.bf16.mxu1 %v2753_v12  ;;  %v2782_v31 = vld [vmem:[%s4147_s1 + $0x470] ss:$8 sps:$4 sm:$0xff]   ;;  %v2785_v33 = vld [vmem:[%s4147_s1 + $0x484] ss:$8 sps:$4 sm:$0xff]   ;;  %v2788_v35 = vld [vmem:[%s4147_s1 + $0x480] ss:$8 sps:$4 sm:$0xff]  }
   0xd   :  { %1983 = vmatprep.subr.bf16.mxu0 %v2755_v13  ;;  %v2789_v36 = vld [vmem:[%s4147_s1 + $0x94] ss:$8 sps:$4 sm:$0xff]   ;;  %v2793_v38 = vld [vmem:[%s4147_s1 + $0x90] ss:$8 sps:$4 sm:$0xff]   ;;  %v2795_v40 = vld [vmem:[%s4147_s1 + $0xa4] ss:$8 sps:$4 sm:$0xff]  }
   0xe   :  { %v2791_v37 = vld [vmem:[%s4147_s1 + $0x494] ss:$8 sps:$4 sm:$0xff]   ;;  %v2794_v39 = vld [vmem:[%s4147_s1 + $0x490] ss:$8 sps:$4 sm:$0xff]   ;;  %v2797_v41 = vld [vmem:[%s4147_s1 + $0x4a4] ss:$8 sps:$4 sm:$0xff]  }
   0xf   :  { %1772 = vmatpush1.bf16.msra.mxu1 %v2757_v14  ;;  %v2799_v42 = vld [vmem:[%s4147_s1 + $0xa0] ss:$8 sps:$4 sm:$0xff]   ;;  %v2801_v44 = vld [vmem:[%s4147_s1 + $0xb4] ss:$8 sps:$4 sm:$0xff]   ;;  %v2805_v46 = vld [vmem:[%s4147_s1 + $0xb0] ss:$8 sps:$4 sm:$0xff]  }
  0x10   :  { %1984 = vmatpush1.bf16.msra.mxu0 %v2758_v15  ;;  %1773 = vmatprep.subr.bf16.mxu1 %v2759_v16  ;;  %v2800_v43 = vld [vmem:[%s4147_s1 + $0x4a0] ss:$8 sps:$4 sm:$0xff]   ;;  %v2803_v45 = vld [vmem:[%s4147_s1 + $0x4b4] ss:$8 sps:$4 sm:$0xff]   ;;  %v2806_v47 = vld [vmem:[%s4147_s1 + $0x4b0] ss:$8 sps:$4 sm:$0xff]  }
  0x11   :  { %1985 = vmatprep.subr.bf16.mxu0 %v2761_v17  ;;  %v37_v48 = vld [vmem:[%s4148_s0] sm:$0xff]  ;;  %v2813_v58 = vld [vmem:[%s4147_s1 + $0xd4] ss:$8 sps:$4 sm:$0xff]   ;;  %v2817_v60 = vld [vmem:[%s4147_s1 + $0xd0] ss:$8 sps:$4 sm:$0xff]  }
  0x12   :  { %v45_v49 = vld [vmem:[%s4148_s0 + $0x40] sm:$0xff]  ;;  %v2815_v59 = vld [vmem:[%s4147_s1 + $0x4d4] ss:$8 sps:$4 sm:$0xff]   ;;  %v2818_v61 = vld [vmem:[%s4147_s1 + $0x4d0] ss:$8 sps:$4 sm:$0xff]  }
  0x13   :  { %1774 = vmatpush1.bf16.msra.mxu1 %v2763_v18  ;;  %v2807_v50 = vld [vmem:[%s4147_s1 + $0xc4] ss:$8 sps:$4 sm:$0xff]   ;;  %v2391_v52 = vcombine.high %v37_v48, %v45_v49  ;;  %v2811_v56 = vld [vmem:[%s4147_s1 + $0xc0] ss:$8 sps:$4 sm:$0xff]   ;;  %v2825_v2 = vld [vmem:[%s4147_s1 + $0xf4] ss:$8 sps:$4 sm:$0xff]   ;;  %v2390_v8 = vcombine.low %v37_v48, %v45_v49 }
  0x14   :  { %1986 = vmatpush1.bf16.msra.mxu0 %v2764_v19  ;;  %1775 = vmatprep.subr.bf16.mxu1 %v2765_v20  ;;  %v2809_v51 = vld [vmem:[%s4147_s1 + $0x4c4] ss:$8 sps:$4 sm:$0xff]   ;;  %v2812_v57 = vld [vmem:[%s4147_s1 + $0x4c0] ss:$8 sps:$4 sm:$0xff]   ;;  %v2827_v3 = vld [vmem:[%s4147_s1 + $0x4f4] ss:$8 sps:$4 sm:$0xff]  }
  0x15   :  { %1987 = vmatprep.subr.bf16.mxu0 %v2767_v21  ;;  %v41_v53 = vld [vmem:[%s4148_s0 + $0x20] sm:$0xff]  ;;  %1797 = vmatprep.mubr.bf16.mxu1 %v2391_v52  ;;  %v2829_v4 = vld [vmem:[%s4147_s1 + $0xf0] ss:$8 sps:$4 sm:$0xff]   ;;  %v2839_v12 = vld [vmem:[%s4147_s1 + $0x114] ss:$8 sps:$4 sm:$0xff]  }
  0x16   :  { %v49_v54 = vld [vmem:[%s4148_s0 + $0x60] sm:$0xff]  ;;  %v2830_v5 = vld [vmem:[%s4147_s1 + $0x4f0] ss:$8 sps:$4 sm:$0xff]   ;;  %v2842_v13 = vld [vmem:[%s4147_s1 + $0x514] ss:$8 sps:$4 sm:$0xff]  }
  0x17   :  { %1776 = vmatpush1.bf16.msra.mxu1 %v2769_v22  ;;  %v2399_v55 = vcombine.high %v41_v53, %v49_v54  ;;  %v2819_v62 = vld [vmem:[%s4147_s1 + $0xe4] ss:$8 sps:$4 sm:$0xff]   ;;  %v2823_v0 = vld [vmem:[%s4147_s1 + $0xe0] ss:$8 sps:$4 sm:$0xff]   ;;  %v2398_v10 = vcombine.low %v41_v53, %v49_v54  ;;  %v2837_v14 = vld [vmem:[%s4147_s1 + $0x110] ss:$8 sps:$4 sm:$0xff]  }
  0x18   :  { %1988 = vmatpush1.bf16.msra.mxu0 %v2770_v23  ;;  %1777 = vmatprep.subr.bf16.mxu1 %v2771_v24  ;;  %v2821_v63 = vld [vmem:[%s4147_s1 + $0x4e4] ss:$8 sps:$4 sm:$0xff]   ;;  %v2824_v1 = vld [vmem:[%s4147_s1 + $0x4e0] ss:$8 sps:$4 sm:$0xff]   ;;  %v2840_v15 = vld [vmem:[%s4147_s1 + $0x510] ss:$8 sps:$4 sm:$0xff]  }
  0x19   :  { %1989 = vmatprep.subr.bf16.mxu0 %v2773_v25  ;;  %2009 = vmatprep.mubr.bf16.mxu0 %v2399_v55  ;;  %v2833_v6 = vld [vmem:[%s4147_s1 + $0x104] ss:$8 sps:$4 sm:$0xff]   ;;  %v2831_v9 = vld [vmem:[%s4147_s1 + $0x100] ss:$8 sps:$4 sm:$0xff]   ;;  %v2851_v20 = vld [vmem:[%s4147_s1 + $0x134] ss:$8 sps:$4 sm:$0xff]  }
  0x1a   :  { %v2836_v7 = vld [vmem:[%s4147_s1 + $0x504] ss:$8 sps:$4 sm:$0xff]   ;;  %v2834_v11 = vld [vmem:[%s4147_s1 + $0x500] ss:$8 sps:$4 sm:$0xff]   ;;  %v2854_v21 = vld [vmem:[%s4147_s1 + $0x534] ss:$8 sps:$4 sm:$0xff]  }
  0x1b   :  { %1778 = vmatpush1.bf16.msra.mxu1 %v2775_v26  ;;  %v2845_v16 = vld [vmem:[%s4147_s1 + $0x124] ss:$8 sps:$4 sm:$0xff]   ;;  %v2843_v18 = vld [vmem:[%s4147_s1 + $0x120] ss:$8 sps:$4 sm:$0xff]   ;;  %v2849_v22 = vld [vmem:[%s4147_s1 + $0x130] ss:$8 sps:$4 sm:$0xff]  }
  0x1c   :  { %1990 = vmatpush1.bf16.msra.mxu0 %v2776_v27  ;;  %1779 = vmatprep.subr.bf16.mxu1 %v2777_v28  ;;  %v2848_v17 = vld [vmem:[%s4147_s1 + $0x524] ss:$8 sps:$4 sm:$0xff]   ;;  %v2846_v19 = vld [vmem:[%s4147_s1 + $0x520] ss:$8 sps:$4 sm:$0xff]   ;;  %v2852_v23 = vld [vmem:[%s4147_s1 + $0x530] ss:$8 sps:$4 sm:$0xff]  }
  0x1d   :  { %1991 = vmatprep.subr.bf16.mxu0 %v2779_v29  ;;  %v2857_v24 = vld [vmem:[%s4147_s1 + $0x144] ss:$8 sps:$4 sm:$0xff]   ;;  %v2855_v26 = vld [vmem:[%s4147_s1 + $0x140] ss:$8 sps:$4 sm:$0xff]   ;;  %v2863_v28 = vld [vmem:[%s4147_s1 + $0x154] ss:$8 sps:$4 sm:$0xff]  }
  0x1e   :  { %v2860_v25 = vld [vmem:[%s4147_s1 + $0x544] ss:$8 sps:$4 sm:$0xff]   ;;  %v2858_v27 = vld [vmem:[%s4147_s1 + $0x540] ss:$8 sps:$4 sm:$0xff]   ;;  %v2866_v29 = vld [vmem:[%s4147_s1 + $0x554] ss:$8 sps:$4 sm:$0xff]  }
  0x1f   :  { %1780 = vmatpush1.bf16.msra.mxu1 %v2781_v30  ;;  %v53_v30 = vld [vmem:[%s4148_s0 + $0x80] sm:$0xff]  ;;  %v3470_v49 = vld [vmem:[%s4148_s0 + $0x28] sm:$0xff]  ;;  %v2876_v52 = vld [vmem:[%s4147_s1 + $0x570] ss:$8 sps:$4 sm:$0xff]  }
  0x20   :  { %1992 = vmatpush1.bf16.msra.mxu0 %v2782_v31  ;;  %1781 = vmatprep.subr.bf16.mxu1 %v2783_v32  ;;  %v61_v31 = vld [vmem:[%s4148_s0 + $0xc0] sm:$0xff]  ;;  %v2861_v32 = vld [vmem:[%s4147_s1 + $0x150] ss:$8 sps:$4 sm:$0xff]  }
  0x21   :  { %1993 = vmatprep.subr.bf16.mxu0 %v2785_v33  ;;  %v2407_v33 = vcombine.high %v53_v30, %v61_v31  ;;  %v2881_v54 = vld [vmem:[%s4147_s1 + $0x184] ss:$8 sps:$4 sm:$0xff]  }
  0x22   :  { %v2884_v55 = vld [vmem:[%s4147_s1 + $0x584] ss:$8 sps:$4 sm:$0xff]  }
  0x23   :  { %1782 = vmatpush1.bf16.msra.mxu1 %v2787_v34  ;;  %v2864_v34 = vld [vmem:[%s4147_s1 + $0x550] ss:$8 sps:$4 sm:$0xff]  }
  0x24   :  { %1994 = vmatpush1.bf16.msra.mxu0 %v2788_v35  ;;  %1783 = vmatprep.subr.bf16.mxu1 %v2789_v36  ;;  %v57_v35 = vld [vmem:[%s4148_s0 + $0xa0] sm:$0xff] }
  0x25   :  { %1995 = vmatprep.subr.bf16.mxu0 %v2791_v37  ;;  %v65_v36 = vld [vmem:[%s4148_s0 + $0xe0] sm:$0xff]  ;;  %v2406_v37 = vcombine.low %v53_v30, %v61_v31  ;;  %v2935_v30 = vld [vmem:[%s4147_s1 + $0x214] ss:$8 sps:$4 sm:$0xff]  }
  0x26   :  { %v2938_v31 = vld [vmem:[%s4147_s1 + $0x614] ss:$8 sps:$4 sm:$0xff]  }
  0x27   :  { %1784 = vmatpush1.bf16.msra.mxu1 %v2793_v38  ;;  %v2869_v38 = vld [vmem:[%s4147_s1 + $0x164] ss:$8 sps:$4 sm:$0xff]  }
  0x28   :  { %1996 = vmatpush1.bf16.msra.mxu0 %v2794_v39  ;;  %1785 = vmatprep.subr.bf16.mxu1 %v2795_v40  ;;  %v2415_v39 = vcombine.high %v57_v35, %v65_v36  ;;  %v2414_v40 = vcombine.low %v57_v35, %v65_v36  ;;  %v2933_v36 = vld [vmem:[%s4147_s1 + $0x210] ss:$8 sps:$4 sm:$0xff]  }
  0x29   :  { %1997 = vmatprep.subr.bf16.mxu0 %v2797_v41  ;;  %v2872_v41 = vld [vmem:[%s4147_s1 + $0x564] ss:$8 sps:$4 sm:$0xff]  }
  0x2b   :  { %1786 = vmatpush1.bf16.msra.mxu1 %v2799_v42  ;;  %v2867_v42 = vld [vmem:[%s4147_s1 + $0x160] ss:$8 sps:$4 sm:$0xff]  }
  0x2c   :  { %1998 = vmatpush1.bf16.msra.mxu0 %v2800_v43  ;;  %1787 = vmatprep.subr.bf16.mxu1 %v2801_v44  ;;  %v2870_v43 = vld [vmem:[%s4147_s1 + $0x560] ss:$8 sps:$4 sm:$0xff]  }
  0x2d   :  { %1999 = vmatprep.subr.bf16.mxu0 %v2803_v45  ;;  %v3452_v44 = vld [vmem:[%s4148_s0 + $0x8] sm:$0xff] }
  0x2e   :  { %v3457_v45 = vld [vmem:[%s4148_s0 + $0x48] sm:$0xff] }
  0x2f   :  { %1788 = vmatpush1.bf16.msra.mxu1 %v2805_v46  ;;  %v2875_v46 = vld [vmem:[%s4147_s1 + $0x174] ss:$8 sps:$4 sm:$0xff]   ;;  %v2393_v48 = vcombine.high %v3452_v44, %v3457_v45 }
  0x30   :  { %2000 = vmatpush1.bf16.msra.mxu0 %v2806_v47  ;;  %1789 = vmatprep.subr.bf16.mxu1 %v2807_v50  ;;  %v2878_v47 = vld [vmem:[%s4147_s1 + $0x574] ss:$8 sps:$4 sm:$0xff]   ;;  %v3475_v50 = vld [vmem:[%s4148_s0 + $0x68] sm:$0xff] }
  0x31   :  { %2001 = vmatprep.subr.bf16.mxu0 %v2809_v51  ;;  %v2873_v51 = vld [vmem:[%s4147_s1 + $0x170] ss:$8 sps:$4 sm:$0xff]   ;;  %v2401_v53 = vcombine.high %v3470_v49, %v3475_v50 }
  0x33   :  { %1790 = vmatpush1.bf16.msra.mxu1 %v2811_v56  ;;  %v2879_v56 = vld [vmem:[%s4147_s1 + $0x180] ss:$8 sps:$4 sm:$0xff]  }
  0x34   :  { %2002 = vmatpush1.bf16.msra.mxu0 %v2812_v57  ;;  %1791 = vmatprep.subr.bf16.mxu1 %v2813_v58  ;;  %v2882_v57 = vld [vmem:[%s4147_s1 + $0x580] ss:$8 sps:$4 sm:$0xff]   ;;  %v2887_v58 = vld [vmem:[%s4147_s1 + $0x194] ss:$8 sps:$4 sm:$0xff]  }
  0x35   :  { %2003 = vmatprep.subr.bf16.mxu0 %v2815_v59  ;;  %v2890_v59 = vld [vmem:[%s4147_s1 + $0x594] ss:$8 sps:$4 sm:$0xff]  }
  0x37   :  { %1792 = vmatpush1.bf16.msra.mxu1 %v2817_v60  ;;  %v2885_v60 = vld [vmem:[%s4147_s1 + $0x190] ss:$8 sps:$4 sm:$0xff]  }
  0x38   :  { %2004 = vmatpush1.bf16.msra.mxu0 %v2818_v61  ;;  %1793 = vmatprep.subr.bf16.mxu1 %v2819_v62  ;;  %v2888_v61 = vld [vmem:[%s4147_s1 + $0x590] ss:$8 sps:$4 sm:$0xff]   ;;  %v2893_v62 = vld [vmem:[%s4147_s1 + $0x1a4] ss:$8 sps:$4 sm:$0xff]  }
  0x39   :  { %2005 = vmatprep.subr.bf16.mxu0 %v2821_v63  ;;  %v2896_v63 = vld [vmem:[%s4147_s1 + $0x5a4] ss:$8 sps:$4 sm:$0xff]  }
  0x3b   :  { %1794 = vmatpush1.bf16.msra.mxu1 %v2823_v0  ;;  %v2891_v0 = vld [vmem:[%s4147_s1 + $0x1a0] ss:$8 sps:$4 sm:$0xff]  }
  0x3c   :  { %2006 = vmatpush1.bf16.msra.mxu0 %v2824_v1  ;;  %1795 = vmatprep.subr.bf16.mxu1 %v2825_v2  ;;  %v2894_v1 = vld [vmem:[%s4147_s1 + $0x5a0] ss:$8 sps:$4 sm:$0xff]   ;;  %v2899_v2 = vld [vmem:[%s4147_s1 + $0x1b4] ss:$8 sps:$4 sm:$0xff]  }
  0x3d   :  { %2007 = vmatprep.subr.bf16.mxu0 %v2827_v3  ;;  %v2902_v3 = vld [vmem:[%s4147_s1 + $0x5b4] ss:$8 sps:$4 sm:$0xff]  }
  0x3f   :  { %1796 = vmatpush1.bf16.msra.mxu1 %v2829_v4  ;;  %v2897_v4 = vld [vmem:[%s4147_s1 + $0x1b0] ss:$8 sps:$4 sm:$0xff]  }
  0x40   :  { %2008 = vmatpush1.bf16.msra.mxu0 %v2830_v5  ;;  %1818 = vmatprep.subr.bf16.mxu1 %v2833_v6  ;;  %v2900_v5 = vld [vmem:[%s4147_s1 + $0x5b0] ss:$8 sps:$4 sm:$0xff]   ;;  %v2905_v6 = vld [vmem:[%s4147_s1 + $0x1c4] ss:$8 sps:$4 sm:$0xff]  }
  0x41   :  { %2030 = vmatprep.subr.bf16.mxu0 %v2836_v7  ;;  %v2908_v7 = vld [vmem:[%s4147_s1 + $0x5c4] ss:$8 sps:$4 sm:$0xff]  }
  0x42   :  { %1798 = vmatmul.mubr.bf16.vlgmr.msra.gmra.mrb[0].mxu1 %v2390_v8  ;;  %v2903_v8 = vld [vmem:[%s4147_s1 + $0x1c0] ss:$8 sps:$4 sm:$0xff]  }
  0x43   :  { %2010 = vmatmul.mubr.bf16.vlgmr.msra.gmra.mrb[0].mxu0 %v2398_v10  ;;  %1819 = vmatpush1.bf16.msra.mxu1 %v2831_v9  ;;  %v2906_v9 = vld [vmem:[%s4147_s1 + $0x5c0] ss:$8 sps:$4 sm:$0xff]   ;;  %v2911_v10 = vld [vmem:[%s4147_s1 + $0x1d4] ss:$8 sps:$4 sm:$0xff]  }
  0x44   :  { %2031 = vmatpush1.bf16.msra.mxu0 %v2834_v11  ;;  %1820 = vmatprep.subr.bf16.mxu1 %v2839_v12  ;;  %v2914_v11 = vld [vmem:[%s4147_s1 + $0x5d4] ss:$8 sps:$4 sm:$0xff]   ;;  %v2909_v12 = vld [vmem:[%s4147_s1 + $0x1d0] ss:$8 sps:$4 sm:$0xff]  }
  0x45   :  { %2032 = vmatprep.subr.bf16.mxu0 %v2842_v13  ;;  %1807 = vmatprep.mubr.bf16.mxu1 %v2407_v33  ;;  %v2912_v13 = vld [vmem:[%s4147_s1 + $0x5d0] ss:$8 sps:$4 sm:$0xff]   ;;  %v66_v33 = vld [vmem:[%s4148_s0 + $0xe8] sm:$0xff] }
  0x46   :  { %2019 = vmatprep.mubr.bf16.mxu0 %v2415_v39  ;;  %v2944_v39 = vld [vmem:[%s4147_s1 + $0x624] ss:$8 sps:$4 sm:$0xff]  }
  0x47   :  { %1821 = vmatpush1.bf16.msra.mxu1 %v2837_v14  ;;  %v2917_v14 = vld [vmem:[%s4147_s1 + $0x1e4] ss:$8 sps:$4 sm:$0xff]  }
  0x48   :  { %2033 = vmatpush1.bf16.msra.mxu0 %v2840_v15  ;;  %1822 = vmatprep.subr.bf16.mxu1 %v2845_v16  ;;  %v2920_v15 = vld [vmem:[%s4147_s1 + $0x5e4] ss:$8 sps:$4 sm:$0xff]   ;;  %v2915_v16 = vld [vmem:[%s4147_s1 + $0x1e0] ss:$8 sps:$4 sm:$0xff]  }
  0x49   :  { %2034 = vmatprep.subr.bf16.mxu0 %v2848_v17  ;;  %v2918_v17 = vld [vmem:[%s4147_s1 + $0x5e0] ss:$8 sps:$4 sm:$0xff]  }
  0x4a   :  { %1808 = vmatmul.mubr.bf16.gmra.mrb[4].mxu1 %v2406_v37  ;;  %v2936_v37 = vld [vmem:[%s4147_s1 + $0x610] ss:$8 sps:$4 sm:$0xff]  }
  0x4b   :  { %1823 = vmatpush1.bf16.msra.mxu1 %v2843_v18  ;;  %2020 = vmatmul.mubr.bf16.gmra.mrb[4].mxu0 %v2414_v40  ;;  %v2923_v18 = vld [vmem:[%s4147_s1 + $0x1f4] ss:$8 sps:$4 sm:$0xff]   ;;  %v2939_v40 = vld [vmem:[%s4147_s1 + $0x220] ss:$8 sps:$4 sm:$0xff]  }
  0x4c   :  { %2035 = vmatpush1.bf16.msra.mxu0 %v2846_v19  ;;  %1824 = vmatprep.subr.bf16.mxu1 %v2851_v20  ;;  %v2926_v19 = vld [vmem:[%s4147_s1 + $0x5f4] ss:$8 sps:$4 sm:$0xff]   ;;  %v2921_v20 = vld [vmem:[%s4147_s1 + $0x1f0] ss:$8 sps:$4 sm:$0xff]  }
  0x4d   :  { %2036 = vmatprep.subr.bf16.mxu0 %v2854_v21  ;;  %1850 = vmatprep.mubr.bf16.mxu1 %v2393_v48  ;;  %v2924_v21 = vld [vmem:[%s4147_s1 + $0x5f0] ss:$8 sps:$4 sm:$0xff]   ;;  %v2947_v48 = vld [vmem:[%s4147_s1 + $0x234] ss:$8 sps:$4 sm:$0xff]  }
  0x4e   :  { %2062 = vmatprep.mubr.bf16.mxu0 %v2401_v53  ;;  %v2948_v53 = vld [vmem:[%s4147_s1 + $0x630] ss:$8 sps:$4 sm:$0xff]  }
  0x4f   :  { %1825 = vmatpush1.bf16.msra.mxu1 %v2849_v22  ;;  %v2929_v22 = vld [vmem:[%s4147_s1 + $0x204] ss:$8 sps:$4 sm:$0xff]  }
  0x50   :  { %2037 = vmatpush1.bf16.msra.mxu0 %v2852_v23  ;;  %1826 = vmatprep.subr.bf16.mxu1 %v2857_v24  ;;  %v2932_v23 = vld [vmem:[%s4147_s1 + $0x604] ss:$8 sps:$4 sm:$0xff]   ;;  %v2927_v24 = vld [vmem:[%s4147_s1 + $0x200] ss:$8 sps:$4 sm:$0xff]  }
  0x51   :  { %2038 = vmatprep.subr.bf16.mxu0 %v2860_v25  ;;  %v2930_v25 = vld [vmem:[%s4147_s1 + $0x600] ss:$8 sps:$4 sm:$0xff]  }
  0x53   :  { %1827 = vmatpush1.bf16.msra.mxu1 %v2855_v26  ;;  %v54_v26 = vld [vmem:[%s4148_s0 + $0x88] sm:$0xff] }
  0x54   :  { %2039 = vmatpush1.bf16.msra.mxu0 %v2858_v27  ;;  %1828 = vmatprep.subr.bf16.mxu1 %v2863_v28  ;;  %v2392_v27 = vcombine.low %v3452_v44, %v3457_v45  ;;  %v2400_v28 = vcombine.low %v3470_v49, %v3475_v50  ;;  %v3641_v45 = vld [vmem:[%s4148_s0 + $0x50] sm:$0xff] }
  0x55   :  { %2040 = vmatprep.subr.bf16.mxu0 %v2866_v29  ;;  %v62_v29 = vld [vmem:[%s4148_s0 + $0xc8] sm:$0xff]  ;;  %v2950_v49 = vld [vmem:[%s4147_s1 + $0x634] ss:$8 sps:$4 sm:$0xff]  }
  0x57   :  { %1829 = vmatpush1.bf16.msra.mxu1 %v2861_v32  ;;  %v58_v32 = vld [vmem:[%s4148_s0 + $0xa8] sm:$0xff] }
  0x58   :  { %2041 = vmatpush1.bf16.msra.mxu0 %v2864_v34  ;;  %1830 = vmatprep.subr.bf16.mxu1 %v2869_v38  ;;  %v2409_v34 = vcombine.high %v54_v26, %v62_v29  ;;  %v2417_v35 = vcombine.high %v58_v32, %v66_v33  ;;  %v2941_v38 = vld [vmem:[%s4147_s1 + $0x224] ss:$8 sps:$4 sm:$0xff]   ;;  %v2416_v44 = vcombine.low %v58_v32, %v66_v33  ;;  %v3011_v32 = vld [vmem:[%s4147_s1 + $0x2e0] ss:$8 sps:$4 sm:$0xff]  }
  0x59   :  { %2042 = vmatprep.subr.bf16.mxu0 %v2872_v41  ;;  %v2942_v41 = vld [vmem:[%s4147_s1 + $0x620] ss:$8 sps:$4 sm:$0xff]  }
  0x5a   :  { %v3014_v33 = vld [vmem:[%s4147_s1 + $0x6e0] ss:$8 sps:$4 sm:$0xff]  }
  0x5b   :  { %1831 = vmatpush1.bf16.msra.mxu1 %v2867_v42  ;;  %v3636_v42 = vld [vmem:[%s4148_s0 + $0x10] sm:$0xff] }
  0x5c   :  { %2043 = vmatpush1.bf16.msra.mxu0 %v2870_v43  ;;  %1832 = vmatprep.subr.bf16.mxu1 %v2875_v46  ;;  %v2408_v43 = vcombine.low %v54_v26, %v62_v29  ;;  %v3646_v46 = vld [vmem:[%s4148_s0 + $0x30] sm:$0xff]  ;;  %v2395_v50 = vcombine.high %v3636_v42, %v3641_v45 }
  0x5d   :  { %2044 = vmatprep.subr.bf16.mxu0 %v2878_v47  ;;  %v3651_v47 = vld [vmem:[%s4148_s0 + $0x70] sm:$0xff] }
  0x5e   :  { %v3007_v26 = vld [vmem:[%s4147_s1 + $0x2d4] ss:$8 sps:$4 sm:$0xff]   ;;  %v3008_v29 = vld [vmem:[%s4147_s1 + $0x6d0] ss:$8 sps:$4 sm:$0xff]  }
  0x5f   :  { %1833 = vmatpush1.bf16.msra.mxu1 %v2873_v51  ;;  %v2403_v51 = vcombine.high %v3646_v46, %v3651_v47 }
  0x60   :  { %2045 = vmatpush1.bf16.msra.mxu0 %v2876_v52  ;;  %1834 = vmatprep.subr.bf16.mxu1 %v2881_v54  ;;  %v2945_v52 = vld [vmem:[%s4147_s1 + $0x230] ss:$8 sps:$4 sm:$0xff]   ;;  %v2953_v54 = vld [vmem:[%s4147_s1 + $0x244] ss:$8 sps:$4 sm:$0xff]  }
  0x61   :  { %2046 = vmatprep.subr.bf16.mxu0 %v2884_v55  ;;  %v2956_v55 = vld [vmem:[%s4147_s1 + $0x644] ss:$8 sps:$4 sm:$0xff]  }
  0x63   :  { %1835 = vmatpush1.bf16.msra.mxu1 %v2879_v56  ;;  %v2951_v56 = vld [vmem:[%s4147_s1 + $0x240] ss:$8 sps:$4 sm:$0xff]  }
  0x64   :  { %2047 = vmatpush1.bf16.msra.mxu0 %v2882_v57  ;;  %1836 = vmatprep.subr.bf16.mxu1 %v2887_v58  ;;  %v2954_v57 = vld [vmem:[%s4147_s1 + $0x640] ss:$8 sps:$4 sm:$0xff]   ;;  %v2959_v58 = vld [vmem:[%s4147_s1 + $0x254] ss:$8 sps:$4 sm:$0xff]  }
  0x65   :  { %2048 = vmatprep.subr.bf16.mxu0 %v2890_v59  ;;  %v2962_v59 = vld [vmem:[%s4147_s1 + $0x654] ss:$8 sps:$4 sm:$0xff]  }
  0x67   :  { %1837 = vmatpush1.bf16.msra.mxu1 %v2885_v60  ;;  %v2957_v60 = vld [vmem:[%s4147_s1 + $0x250] ss:$8 sps:$4 sm:$0xff]  }
  0x68   :  { %2049 = vmatpush1.bf16.msra.mxu0 %v2888_v61  ;;  %1838 = vmatprep.subr.bf16.mxu1 %v2893_v62  ;;  %v2960_v61 = vld [vmem:[%s4147_s1 + $0x650] ss:$8 sps:$4 sm:$0xff]   ;;  %v2965_v62 = vld [vmem:[%s4147_s1 + $0x264] ss:$8 sps:$4 sm:$0xff]  }
  0x69   :  { %2050 = vmatprep.subr.bf16.mxu0 %v2896_v63  ;;  %v2968_v63 = vld [vmem:[%s4147_s1 + $0x664] ss:$8 sps:$4 sm:$0xff]  }
  0x6b   :  { %1839 = vmatpush1.bf16.msra.mxu1 %v2891_v0  ;;  %v2963_v0 = vld [vmem:[%s4147_s1 + $0x260] ss:$8 sps:$4 sm:$0xff]  }
  0x6c   :  { %2051 = vmatpush1.bf16.msra.mxu0 %v2894_v1  ;;  %1840 = vmatprep.subr.bf16.mxu1 %v2899_v2  ;;  %v2966_v1 = vld [vmem:[%s4147_s1 + $0x660] ss:$8 sps:$4 sm:$0xff]   ;;  %v2971_v2 = vld [vmem:[%s4147_s1 + $0x274] ss:$8 sps:$4 sm:$0xff]  }
  0x6d   :  { %2052 = vmatprep.subr.bf16.mxu0 %v2902_v3  ;;  %v2974_v3 = vld [vmem:[%s4147_s1 + $0x674] ss:$8 sps:$4 sm:$0xff]  }
  0x6f   :  { %1841 = vmatpush1.bf16.msra.mxu1 %v2897_v4  ;;  %v2969_v4 = vld [vmem:[%s4147_s1 + $0x270] ss:$8 sps:$4 sm:$0xff]  }
  0x70   :  { %2053 = vmatpush1.bf16.msra.mxu0 %v2900_v5  ;;  %1842 = vmatprep.subr.bf16.mxu1 %v2905_v6  ;;  %v2972_v5 = vld [vmem:[%s4147_s1 + $0x670] ss:$8 sps:$4 sm:$0xff]   ;;  %v2977_v6 = vld [vmem:[%s4147_s1 + $0x284] ss:$8 sps:$4 sm:$0xff]  }
  0x71   :  { %2054 = vmatprep.subr.bf16.mxu0 %v2908_v7  ;;  %v2980_v7 = vld [vmem:[%s4147_s1 + $0x684] ss:$8 sps:$4 sm:$0xff]  }
  0x73   :  { %1843 = vmatpush1.bf16.msra.mxu1 %v2903_v8  ;;  %v2975_v8 = vld [vmem:[%s4147_s1 + $0x280] ss:$8 sps:$4 sm:$0xff]  }
  0x74   :  { %2055 = vmatpush1.bf16.msra.mxu0 %v2906_v9  ;;  %1844 = vmatprep.subr.bf16.mxu1 %v2911_v10  ;;  %v2978_v9 = vld [vmem:[%s4147_s1 + $0x680] ss:$8 sps:$4 sm:$0xff]   ;;  %v2983_v10 = vld [vmem:[%s4147_s1 + $0x294] ss:$8 sps:$4 sm:$0xff]  }
  0x75   :  { %2056 = vmatprep.subr.bf16.mxu0 %v2914_v11  ;;  %v2986_v11 = vld [vmem:[%s4147_s1 + $0x694] ss:$8 sps:$4 sm:$0xff]  }
  0x77   :  { %1845 = vmatpush1.bf16.msra.mxu1 %v2909_v12  ;;  %v2981_v12 = vld [vmem:[%s4147_s1 + $0x290] ss:$8 sps:$4 sm:$0xff]  }
  0x78   :  { %2057 = vmatpush1.bf16.msra.mxu0 %v2912_v13  ;;  %1846 = vmatprep.subr.bf16.mxu1 %v2917_v14  ;;  %v2984_v13 = vld [vmem:[%s4147_s1 + $0x690] ss:$8 sps:$4 sm:$0xff]   ;;  %v2989_v14 = vld [vmem:[%s4147_s1 + $0x2a4] ss:$8 sps:$4 sm:$0xff]  }
  0x79   :  { %2058 = vmatprep.subr.bf16.mxu0 %v2920_v15  ;;  %v2992_v15 = vld [vmem:[%s4147_s1 + $0x6a4] ss:$8 sps:$4 sm:$0xff]  }
  0x7b   :  { %1847 = vmatpush1.bf16.msra.mxu1 %v2915_v16  ;;  %v2987_v16 = vld [vmem:[%s4147_s1 + $0x2a0] ss:$8 sps:$4 sm:$0xff]  }
  0x7c   :  { %2059 = vmatpush1.bf16.msra.mxu0 %v2918_v17  ;;  %1848 = vmatprep.subr.bf16.mxu1 %v2923_v18  ;;  %v2990_v17 = vld [vmem:[%s4147_s1 + $0x6a0] ss:$8 sps:$4 sm:$0xff]   ;;  %v2995_v18 = vld [vmem:[%s4147_s1 + $0x2b4] ss:$8 sps:$4 sm:$0xff]  }
  0x7d   :  { %2060 = vmatprep.subr.bf16.mxu0 %v2926_v19  ;;  %v2998_v19 = vld [vmem:[%s4147_s1 + $0x6b4] ss:$8 sps:$4 sm:$0xff]  }
  0x7f   :  { %1849 = vmatpush1.bf16.msra.mxu1 %v2921_v20  ;;  %v2993_v20 = vld [vmem:[%s4147_s1 + $0x2b0] ss:$8 sps:$4 sm:$0xff]  }
  0x80   :  { %2061 = vmatpush1.bf16.msra.mxu0 %v2924_v21  ;;  %1871 = vmatprep.subr.bf16.mxu1 %v2929_v22  ;;  %v2996_v21 = vld [vmem:[%s4147_s1 + $0x6b0] ss:$8 sps:$4 sm:$0xff]   ;;  %v3001_v22 = vld [vmem:[%s4147_s1 + $0x2c4] ss:$8 sps:$4 sm:$0xff]  }
  0x81   :  { %2083 = vmatprep.subr.bf16.mxu0 %v2932_v23  ;;  %v3004_v23 = vld [vmem:[%s4147_s1 + $0x6c4] ss:$8 sps:$4 sm:$0xff]  }
  0x82   :  { %1851 = vmatmul.mubr.bf16.vlgmr.msra.gmra.mrb[0].mxu1 %v2392_v27  ;;  %v3010_v27 = vld [vmem:[%s4147_s1 + $0x6d4] ss:$8 sps:$4 sm:$0xff]  }
  0x83   :  { %2063 = vmatmul.mubr.bf16.vlgmr.msra.gmra.mrb[0].mxu0 %v2400_v28  ;;  %1872 = vmatpush1.bf16.msra.mxu1 %v2927_v24  ;;  %v2999_v24 = vld [vmem:[%s4147_s1 + $0x2c0] ss:$8 sps:$4 sm:$0xff]   ;;  %v3005_v28 = vld [vmem:[%s4147_s1 + $0x2d0] ss:$8 sps:$4 sm:$0xff]  }
  0x84   :  { %2084 = vmatpush1.bf16.msra.mxu0 %v2930_v25  ;;  %1873 = vmatprep.subr.bf16.mxu1 %v2935_v30  ;;  %v3002_v25 = vld [vmem:[%s4147_s1 + $0x6c0] ss:$8 sps:$4 sm:$0xff]   ;;  %v3013_v30 = vld [vmem:[%s4147_s1 + $0x2e4] ss:$8 sps:$4 sm:$0xff]  }
  0x85   :  { %2085 = vmatprep.subr.bf16.mxu0 %v2938_v31  ;;  %1860 = vmatprep.mubr.bf16.mxu1 %v2409_v34  ;;  %v3016_v31 = vld [vmem:[%s4147_s1 + $0x6e4] ss:$8 sps:$4 sm:$0xff]   ;;  %v3019_v34 = vld [vmem:[%s4147_s1 + $0x2f4] ss:$8 sps:$4 sm:$0xff]  }
  0x86   :  { %2072 = vmatprep.mubr.bf16.mxu0 %v2417_v35  ;;  %v3022_v35 = vld [vmem:[%s4147_s1 + $0x6f4] ss:$8 sps:$4 sm:$0xff]  }
  0x87   :  { %1874 = vmatpush1.bf16.msra.mxu1 %v2933_v36  ;;  %v3017_v36 = vld [vmem:[%s4147_s1 + $0x2f0] ss:$8 sps:$4 sm:$0xff]  }
  0x88   :  { %2086 = vmatpush1.bf16.msra.mxu0 %v2936_v37  ;;  %1875 = vmatprep.subr.bf16.mxu1 %v2941_v38  ;;  %v3020_v37 = vld [vmem:[%s4147_s1 + $0x6f0] ss:$8 sps:$4 sm:$0xff]   ;;  %v3025_v38 = vld [vmem:[%s4147_s1 + $0x304] ss:$8 sps:$4 sm:$0xff]  }
  0x89   :  { %2087 = vmatprep.subr.bf16.mxu0 %v2944_v39  ;;  %v3028_v39 = vld [vmem:[%s4147_s1 + $0x704] ss:$8 sps:$4 sm:$0xff]  }
  0x8a   :  { %1861 = vmatmul.mubr.bf16.gmra.mrb[4].mxu1 %v2408_v43  ;;  %v2402_v43 = vcombine.low %v3646_v46, %v3651_v47  ;;  %v3031_v46 = vld [vmem:[%s4147_s1 + $0x314] ss:$8 sps:$4 sm:$0xff]  }
  0x8b   :  { %2073 = vmatmul.mubr.bf16.gmra.mrb[4].mxu0 %v2416_v44  ;;  %1876 = vmatpush1.bf16.msra.mxu1 %v2939_v40  ;;  %v55_v40 = vld [vmem:[%s4148_s0 + $0x90] sm:$0xff] }
  0x8c   :  { %2088 = vmatpush1.bf16.msra.mxu0 %v2942_v41  ;;  %1877 = vmatprep.subr.bf16.mxu1 %v2947_v48  ;;  %v2394_v41 = vcombine.low %v3636_v42, %v3641_v45  ;;  %v63_v44 = vld [vmem:[%s4148_s0 + $0xd0] sm:$0xff]  ;;  %v3023_v42 = vld [vmem:[%s4147_s1 + $0x300] ss:$8 sps:$4 sm:$0xff]  }
  0x8d   :  { %2089 = vmatprep.subr.bf16.mxu0 %v2950_v49  ;;  %1903 = vmatprep.mubr.bf16.mxu1 %v2395_v50  ;;  %v59_v48 = vld [vmem:[%s4148_s0 + $0xb0] sm:$0xff]  ;;  %v3026_v45 = vld [vmem:[%s4147_s1 + $0x700] ss:$8 sps:$4 sm:$0xff]   ;;  %v2411_v50 = vcombine.high %v55_v40, %v63_v44 }
  0x8e   :  { %2115 = vmatprep.mubr.bf16.mxu0 %v2403_v51  ;;  %v67_v49 = vld [vmem:[%s4148_s0 + $0xf0] sm:$0xff] }
  0x8f   :  { %1878 = vmatpush1.bf16.msra.mxu1 %v2945_v52  ;;  %v3034_v47 = vld [vmem:[%s4147_s1 + $0x714] ss:$8 sps:$4 sm:$0xff]   ;;  %v2419_v51 = vcombine.high %v59_v48, %v67_v49  ;;  %v3029_v52 = vld [vmem:[%s4147_s1 + $0x310] ss:$8 sps:$4 sm:$0xff]  }
  0x90   :  { %2090 = vmatpush1.bf16.msra.mxu0 %v2948_v53  ;;  %1879 = vmatprep.subr.bf16.mxu1 %v2953_v54  ;;  %v3032_v53 = vld [vmem:[%s4147_s1 + $0x710] ss:$8 sps:$4 sm:$0xff]   ;;  %v3037_v54 = vld [vmem:[%s4147_s1 + $0x324] ss:$8 sps:$4 sm:$0xff]  }
  0x91   :  { %2091 = vmatprep.subr.bf16.mxu0 %v2956_v55  ;;  %v3040_v55 = vld [vmem:[%s4147_s1 + $0x724] ss:$8 sps:$4 sm:$0xff]  }
  0x93   :  { %1880 = vmatpush1.bf16.msra.mxu1 %v2951_v56  ;;  %v3862_v56 = vld [vmem:[%s4148_s0 + $0x18] sm:$0xff] }
  0x94   :  { %2092 = vmatpush1.bf16.msra.mxu0 %v2954_v57  ;;  %1881 = vmatprep.subr.bf16.mxu1 %v2959_v58  ;;  %v2410_v57 = vcombine.low %v55_v40, %v63_v44  ;;  %v2418_v58 = vcombine.low %v59_v48, %v67_v49  ;;  %v3095_v40 = vld [vmem:[%s4147_s1 + $0x3c0] ss:$8 sps:$4 sm:$0xff]   ;;  %v3106_v44 = vld [vmem:[%s4147_s1 + $0x7d4] ss:$8 sps:$4 sm:$0xff]   ;;  %v3101_v48 = vld [vmem:[%s4147_s1 + $0x3d0] ss:$8 sps:$4 sm:$0xff]  }
  0x95   :  { %2093 = vmatprep.subr.bf16.mxu0 %v2962_v59  ;;  %v3867_v59 = vld [vmem:[%s4148_s0 + $0x58] sm:$0xff] }
  0x96   :  { %v3104_v49 = vld [vmem:[%s4147_s1 + $0x7d0] ss:$8 sps:$4 sm:$0xff]  }
  0x97   :  { %1882 = vmatpush1.bf16.msra.mxu1 %v2957_v60  ;;  %v3872_v60 = vld [vmem:[%s4148_s0 + $0x38] sm:$0xff] }
  0x98   :  { %2094 = vmatpush1.bf16.msra.mxu0 %v2960_v61  ;;  %1883 = vmatprep.subr.bf16.mxu1 %v2965_v62  ;;  %v3877_v61 = vld [vmem:[%s4148_s0 + $0x78] sm:$0xff]  ;;  %v3035_v62 = vld [vmem:[%s4147_s1 + $0x320] ss:$8 sps:$4 sm:$0xff]  }
  0x99   :  { %2095 = vmatprep.subr.bf16.mxu0 %v2968_v63  ;;  %v3038_v63 = vld [vmem:[%s4147_s1 + $0x720] ss:$8 sps:$4 sm:$0xff]  }
  0x9b   :  { %1884 = vmatpush1.bf16.msra.mxu1 %v2963_v0  ;;  %v3043_v0 = vld [vmem:[%s4147_s1 + $0x334] ss:$8 sps:$4 sm:$0xff]  }
  0x9c   :  { %2096 = vmatpush1.bf16.msra.mxu0 %v2966_v1  ;;  %1885 = vmatprep.subr.bf16.mxu1 %v2971_v2  ;;  %v3046_v1 = vld [vmem:[%s4147_s1 + $0x734] ss:$8 sps:$4 sm:$0xff]   ;;  %v2397_v2 = vcombine.high %v3862_v56, %v3867_v59 }
  0x9d   :  { %2097 = vmatprep.subr.bf16.mxu0 %v2974_v3  ;;  %v2405_v3 = vcombine.high %v3872_v60, %v3877_v61 }
  0x9f   :  { %1886 = vmatpush1.bf16.msra.mxu1 %v2969_v4  ;;  %v3041_v4 = vld [vmem:[%s4147_s1 + $0x330] ss:$8 sps:$4 sm:$0xff]  }
  0xa0   :  { %2098 = vmatpush1.bf16.msra.mxu0 %v2972_v5  ;;  %1887 = vmatprep.subr.bf16.mxu1 %v2977_v6  ;;  %v3044_v5 = vld [vmem:[%s4147_s1 + $0x730] ss:$8 sps:$4 sm:$0xff]   ;;  %v3049_v6 = vld [vmem:[%s4147_s1 + $0x344] ss:$8 sps:$4 sm:$0xff]  }
  0xa1   :  { %2099 = vmatprep.subr.bf16.mxu0 %v2980_v7  ;;  %v3052_v7 = vld [vmem:[%s4147_s1 + $0x744] ss:$8 sps:$4 sm:$0xff]  }
  0xa3   :  { %1888 = vmatpush1.bf16.msra.mxu1 %v2975_v8  ;;  %v3047_v8 = vld [vmem:[%s4147_s1 + $0x340] ss:$8 sps:$4 sm:$0xff]  }
  0xa4   :  { %2100 = vmatpush1.bf16.msra.mxu0 %v2978_v9  ;;  %1889 = vmatprep.subr.bf16.mxu1 %v2983_v10  ;;  %v3050_v9 = vld [vmem:[%s4147_s1 + $0x740] ss:$8 sps:$4 sm:$0xff]   ;;  %v3055_v10 = vld [vmem:[%s4147_s1 + $0x354] ss:$8 sps:$4 sm:$0xff]  }
  0xa5   :  { %2101 = vmatprep.subr.bf16.mxu0 %v2986_v11  ;;  %v3058_v11 = vld [vmem:[%s4147_s1 + $0x754] ss:$8 sps:$4 sm:$0xff]  }
  0xa7   :  { %1890 = vmatpush1.bf16.msra.mxu1 %v2981_v12  ;;  %v3053_v12 = vld [vmem:[%s4147_s1 + $0x350] ss:$8 sps:$4 sm:$0xff]  }
  0xa8   :  { %2102 = vmatpush1.bf16.msra.mxu0 %v2984_v13  ;;  %1891 = vmatprep.subr.bf16.mxu1 %v2989_v14  ;;  %v3056_v13 = vld [vmem:[%s4147_s1 + $0x750] ss:$8 sps:$4 sm:$0xff]   ;;  %v3061_v14 = vld [vmem:[%s4147_s1 + $0x364] ss:$8 sps:$4 sm:$0xff]  }
  0xa9   :  { %2103 = vmatprep.subr.bf16.mxu0 %v2992_v15  ;;  %v3064_v15 = vld [vmem:[%s4147_s1 + $0x764] ss:$8 sps:$4 sm:$0xff]  }
  0xab   :  { %1892 = vmatpush1.bf16.msra.mxu1 %v2987_v16  ;;  %v3059_v16 = vld [vmem:[%s4147_s1 + $0x360] ss:$8 sps:$4 sm:$0xff]  }
  0xac   :  { %2104 = vmatpush1.bf16.msra.mxu0 %v2990_v17  ;;  %1893 = vmatprep.subr.bf16.mxu1 %v2995_v18  ;;  %v3062_v17 = vld [vmem:[%s4147_s1 + $0x760] ss:$8 sps:$4 sm:$0xff]   ;;  %v3067_v18 = vld [vmem:[%s4147_s1 + $0x374] ss:$8 sps:$4 sm:$0xff]  }
  0xad   :  { %2105 = vmatprep.subr.bf16.mxu0 %v2998_v19  ;;  %v3070_v19 = vld [vmem:[%s4147_s1 + $0x774] ss:$8 sps:$4 sm:$0xff]  }
  0xaf   :  { %1894 = vmatpush1.bf16.msra.mxu1 %v2993_v20  ;;  %v3065_v20 = vld [vmem:[%s4147_s1 + $0x370] ss:$8 sps:$4 sm:$0xff]  }
  0xb0   :  { %2106 = vmatpush1.bf16.msra.mxu0 %v2996_v21  ;;  %1895 = vmatprep.subr.bf16.mxu1 %v3001_v22  ;;  %v3068_v21 = vld [vmem:[%s4147_s1 + $0x770] ss:$8 sps:$4 sm:$0xff]   ;;  %v3073_v22 = vld [vmem:[%s4147_s1 + $0x384] ss:$8 sps:$4 sm:$0xff]  }
  0xb1   :  { %2107 = vmatprep.subr.bf16.mxu0 %v3004_v23  ;;  %v3076_v23 = vld [vmem:[%s4147_s1 + $0x784] ss:$8 sps:$4 sm:$0xff]  }
  0xb3   :  { %1896 = vmatpush1.bf16.msra.mxu1 %v2999_v24  ;;  %v3071_v24 = vld [vmem:[%s4147_s1 + $0x380] ss:$8 sps:$4 sm:$0xff]  }
  0xb4   :  { %2108 = vmatpush1.bf16.msra.mxu0 %v3002_v25  ;;  %1897 = vmatprep.subr.bf16.mxu1 %v3007_v26  ;;  %v3074_v25 = vld [vmem:[%s4147_s1 + $0x780] ss:$8 sps:$4 sm:$0xff]   ;;  %v3079_v26 = vld [vmem:[%s4147_s1 + $0x394] ss:$8 sps:$4 sm:$0xff]  }
  0xb5   :  { %2109 = vmatprep.subr.bf16.mxu0 %v3010_v27  ;;  %v3082_v27 = vld [vmem:[%s4147_s1 + $0x794] ss:$8 sps:$4 sm:$0xff]  }
  0xb7   :  { %1898 = vmatpush1.bf16.msra.mxu1 %v3005_v28  ;;  %v3077_v28 = vld [vmem:[%s4147_s1 + $0x390] ss:$8 sps:$4 sm:$0xff]  }
  0xb8   :  { %2110 = vmatpush1.bf16.msra.mxu0 %v3008_v29  ;;  %1899 = vmatprep.subr.bf16.mxu1 %v3013_v30  ;;  %v3080_v29 = vld [vmem:[%s4147_s1 + $0x790] ss:$8 sps:$4 sm:$0xff]   ;;  %v3085_v30 = vld [vmem:[%s4147_s1 + $0x3a4] ss:$8 sps:$4 sm:$0xff]  }
  0xb9   :  { %2111 = vmatprep.subr.bf16.mxu0 %v3016_v31  ;;  %v3088_v31 = vld [vmem:[%s4147_s1 + $0x7a4] ss:$8 sps:$4 sm:$0xff]  }
  0xbb   :  { %1900 = vmatpush1.bf16.msra.mxu1 %v3011_v32  ;;  %v3083_v32 = vld [vmem:[%s4147_s1 + $0x3a0] ss:$8 sps:$4 sm:$0xff]  }
  0xbc   :  { %2112 = vmatpush1.bf16.msra.mxu0 %v3014_v33  ;;  %1901 = vmatprep.subr.bf16.mxu1 %v3019_v34  ;;  %v3086_v33 = vld [vmem:[%s4147_s1 + $0x7a0] ss:$8 sps:$4 sm:$0xff]   ;;  %v3091_v34 = vld [vmem:[%s4147_s1 + $0x3b4] ss:$8 sps:$4 sm:$0xff]  }
  0xbd   :  { %2113 = vmatprep.subr.bf16.mxu0 %v3022_v35  ;;  %v3094_v35 = vld [vmem:[%s4147_s1 + $0x7b4] ss:$8 sps:$4 sm:$0xff]  }
  0xbf   :  { %1902 = vmatpush1.bf16.msra.mxu1 %v3017_v36  ;;  %v3089_v36 = vld [vmem:[%s4147_s1 + $0x3b0] ss:$8 sps:$4 sm:$0xff]  }
  0xc0   :  { %2114 = vmatpush1.bf16.msra.mxu0 %v3020_v37  ;;  %1924 = vmatprep.subr.bf16.mxu1 %v3025_v38  ;;  %v3092_v37 = vld [vmem:[%s4147_s1 + $0x7b0] ss:$8 sps:$4 sm:$0xff]   ;;  %v3097_v38 = vld [vmem:[%s4147_s1 + $0x3c4] ss:$8 sps:$4 sm:$0xff]  }
  0xc1   :  { %2136 = vmatprep.subr.bf16.mxu0 %v3028_v39  ;;  %v3100_v39 = vld [vmem:[%s4147_s1 + $0x7c4] ss:$8 sps:$4 sm:$0xff]  }
  0xc2   :  { %1904 = vmatmul.mubr.bf16.vlgmr.msra.gmra.mrb[0].mxu1 %v2394_v41  ;;  %v3098_v41 = vld [vmem:[%s4147_s1 + $0x7c0] ss:$8 sps:$4 sm:$0xff]  }
  0xc3   :  { %2116 = vmatmul.mubr.bf16.vlgmr.msra.gmra.mrb[0].mxu0 %v2402_v43  ;;  %1925 = vmatpush1.bf16.msra.mxu1 %v3023_v42  ;;  %v3103_v43 = vld [vmem:[%s4147_s1 + $0x3d4] ss:$8 sps:$4 sm:$0xff]   ;;  %v3109_v42 = vld [vmem:[%s4147_s1 + $0x3e4] ss:$8 sps:$4 sm:$0xff]  }
  0xc4   :  { %2137 = vmatpush1.bf16.msra.mxu0 %v3026_v45  ;;  %1926 = vmatprep.subr.bf16.mxu1 %v3031_v46  ;;  %v3112_v45 = vld [vmem:[%s4147_s1 + $0x7e4] ss:$8 sps:$4 sm:$0xff]   ;;  %v3107_v46 = vld [vmem:[%s4147_s1 + $0x3e0] ss:$8 sps:$4 sm:$0xff]  }
  0xc5   :  { %2138 = vmatprep.subr.bf16.mxu0 %v3034_v47  ;;  %1913 = vmatprep.mubr.bf16.mxu1 %v2411_v50  ;;  %v3110_v47 = vld [vmem:[%s4147_s1 + $0x7e0] ss:$8 sps:$4 sm:$0xff]   ;;  %v3115_v50 = vld [vmem:[%s4147_s1 + $0x3f4] ss:$8 sps:$4 sm:$0xff]  }
  0xc6   :  { %2125 = vmatprep.mubr.bf16.mxu0 %v2419_v51  ;;  %v3118_v51 = vld [vmem:[%s4147_s1 + $0x7f4] ss:$8 sps:$4 sm:$0xff]  }
  0xc7   :  { %1927 = vmatpush1.bf16.msra.mxu1 %v3029_v52  ;;  %v3113_v52 = vld [vmem:[%s4147_s1 + $0x3f0] ss:$8 sps:$4 sm:$0xff]  }
  0xc8   :  { %2139 = vmatpush1.bf16.msra.mxu0 %v3032_v53  ;;  %1928 = vmatprep.subr.bf16.mxu1 %v3037_v54  ;;  %v3116_v53 = vld [vmem:[%s4147_s1 + $0x7f0] ss:$8 sps:$4 sm:$0xff]  }
  0xc9   :  { %2140 = vmatprep.subr.bf16.mxu0 %v3040_v55  ;;  %v56_v54 = vld [vmem:[%s4148_s0 + $0x98] sm:$0xff] }
  0xca   :  { %1914 = vmatmul.mubr.bf16.gmra.mrb[4].mxu1 %v2410_v57  ;;  %v64_v55 = vld [vmem:[%s4148_s0 + $0xd8] sm:$0xff] }
  0xcb   :  { %2126 = vmatmul.mubr.bf16.gmra.mrb[4].mxu0 %v2418_v58  ;;  %1929 = vmatpush1.bf16.msra.mxu1 %v3035_v62  ;;  %v60_v57 = vld [vmem:[%s4148_s0 + $0xb8] sm:$0xff]  ;;  %v2396_v62 = vcombine.low %v3862_v56, %v3867_v59 }
  0xcc   :  { %2141 = vmatpush1.bf16.msra.mxu0 %v3038_v63  ;;  %1930 = vmatprep.subr.bf16.mxu1 %v3043_v0  ;;  %v68_v58 = vld [vmem:[%s4148_s0 + $0xf8] sm:$0xff]  ;;  %v2404_v63 = vcombine.low %v3872_v60, %v3877_v61  ;;  %v2413_v0 = vcombine.high %v56_v54, %v64_v55 }
  0xcd   :  { %2142 = vmatprep.subr.bf16.mxu0 %v3046_v1  ;;  %1956 = vmatprep.mubr.bf16.mxu1 %v2397_v2  ;;  %v2421_v1 = vcombine.high %v60_v57, %v68_v58  ;;  %v2412_v2 = vcombine.low %v56_v54, %v64_v55 }
  0xce   :  { %2168 = vmatprep.mubr.bf16.mxu0 %v2405_v3  ;;  %v2420_v3 = vcombine.low %v60_v57, %v68_v58 }
  0xcf   :  { %1931 = vmatpush1.bf16.msra.mxu1 %v3041_v4 }
  0xd0   :  { %2143 = vmatpush1.bf16.msra.mxu0 %v3044_v5  ;;  %1932 = vmatprep.subr.bf16.mxu1 %v3049_v6 }
  0xd1   :  { %2144 = vmatprep.subr.bf16.mxu0 %v3052_v7 }
  0xd3   :  { %1933 = vmatpush1.bf16.msra.mxu1 %v3047_v8 }
  0xd4   :  { %2145 = vmatpush1.bf16.msra.mxu0 %v3050_v9  ;;  %1934 = vmatprep.subr.bf16.mxu1 %v3055_v10 }
  0xd5   :  { %2146 = vmatprep.subr.bf16.mxu0 %v3058_v11 }
  0xd7   :  { %1935 = vmatpush1.bf16.msra.mxu1 %v3053_v12 }
  0xd8   :  { %2147 = vmatpush1.bf16.msra.mxu0 %v3056_v13  ;;  %1936 = vmatprep.subr.bf16.mxu1 %v3061_v14 }
  0xd9   :  { %2148 = vmatprep.subr.bf16.mxu0 %v3064_v15 }
  0xdb   :  { %1937 = vmatpush1.bf16.msra.mxu1 %v3059_v16 }
  0xdc   :  { %2149 = vmatpush1.bf16.msra.mxu0 %v3062_v17  ;;  %1938 = vmatprep.subr.bf16.mxu1 %v3067_v18 }
  0xdd   :  { %2150 = vmatprep.subr.bf16.mxu0 %v3070_v19 }
  0xdf   :  { %1939 = vmatpush1.bf16.msra.mxu1 %v3065_v20 }
  0xe0   :  { %2151 = vmatpush1.bf16.msra.mxu0 %v3068_v21  ;;  %1940 = vmatprep.subr.bf16.mxu1 %v3073_v22 }
  0xe1   :  { %2152 = vmatprep.subr.bf16.mxu0 %v3076_v23 }
  0xe3   :  { %1941 = vmatpush1.bf16.msra.mxu1 %v3071_v24 }
  0xe4   :  { %2153 = vmatpush1.bf16.msra.mxu0 %v3074_v25  ;;  %1942 = vmatprep.subr.bf16.mxu1 %v3079_v26 }
  0xe5   :  { %2154 = vmatprep.subr.bf16.mxu0 %v3082_v27 }
  0xe7   :  { %1943 = vmatpush1.bf16.msra.mxu1 %v3077_v28 }
  0xe8   :  { %2155 = vmatpush1.bf16.msra.mxu0 %v3080_v29  ;;  %1944 = vmatprep.subr.bf16.mxu1 %v3085_v30 }
  0xe9   :  { %2156 = vmatprep.subr.bf16.mxu0 %v3088_v31 }
  0xeb   :  { %1945 = vmatpush1.bf16.msra.mxu1 %v3083_v32 }
  0xec   :  { %2157 = vmatpush1.bf16.msra.mxu0 %v3086_v33  ;;  %1946 = vmatprep.subr.bf16.mxu1 %v3091_v34 }
  0xed   :  { %2158 = vmatprep.subr.bf16.mxu0 %v3094_v35 }
  0xef   :  { %1947 = vmatpush1.bf16.msra.mxu1 %v3089_v36 }
  0xf0   :  { %2159 = vmatpush1.bf16.msra.mxu0 %v3092_v37  ;;  %1948 = vmatprep.subr.bf16.mxu1 %v3097_v38 }
  0xf1   :  { %2160 = vmatprep.subr.bf16.mxu0 %v3100_v39 }
  0xf3   :  { %1949 = vmatpush1.bf16.msra.mxu1 %v3095_v40 }
  0xf4   :  { %2161 = vmatpush1.bf16.msra.mxu0 %v3098_v41  ;;  %1950 = vmatprep.subr.bf16.mxu1 %v3103_v43 }
  0xf5   :  { %2162 = vmatprep.subr.bf16.mxu0 %v3106_v44 }
  0xf7   :  { %1951 = vmatpush1.bf16.msra.mxu1 %v3101_v48 }
  0xf8   :  { %2163 = vmatpush1.bf16.msra.mxu0 %v3104_v49  ;;  %1952 = vmatprep.subr.bf16.mxu1 %v3109_v42 }
  0xf9   :  { %2164 = vmatprep.subr.bf16.mxu0 %v3112_v45 }
  0xfb   :  { %1953 = vmatpush1.bf16.msra.mxu1 %v3107_v46 }
  0xfc   :  { %2165 = vmatpush1.bf16.msra.mxu0 %v3110_v47  ;;  %1954 = vmatprep.subr.bf16.mxu1 %v3115_v50 }
  0xfd   :  { %2166 = vmatprep.subr.bf16.mxu0 %v3118_v51 }
  0xff   :  { %1955 = vmatpush1.bf16.msra.mxu1 %v3113_v52 }
 0x100   :  { %2167 = vmatpush1.bf16.msra.mxu0 %v3116_v53 }
 0x102   :  { %1957 = vmatmul.mubr.bf16.vlgmr.msra.gmra.mrb[0].mxu1 %v2396_v62 }
 0x103   :  { %2169 = vmatmul.mubr.bf16.vlgmr.msra.gmra.mrb[0].mxu0 %v2404_v63  ;;  %1966 = vmatprep.mubr.bf16.mxu1 %v2413_v0 }
 0x104   :  { %2178 = vmatprep.mubr.bf16.mxu0 %v2421_v1 }
 0x10a   :  { %1967 = vmatmul.mubr.bf16.gmra.mrb[4].mxu1 %v2412_v2 }
 0x10b   :  { %2179 = vmatmul.mubr.bf16.gmra.mrb[4].mxu0 %v2420_v3 }
 0x1d5   :  { %v1958_v4 = vpop.f32.mrb[0].mxu1 }
 0x1d6   :  { %v2170_v5 = vpop.f32.mrb[0].mxu0  ;;  %v1960_v56 = vpop.f32.mrb[1].mxu1 }
 0x1d7   :  { %v4061_v6 = vadd.f32 %v2170_v5, %v1958_v4  ;;  %v2172_v59 = vpop.f32.mrb[1].mxu0  ;;  %v1962_v60 = vpop.f32.mrb[2].mxu1 }
 0x1d8   :  { %v4063_v7 = vadd.f32 %v2172_v59, %v1960_v56  ;;  %v2174_v61 = vpop.f32.mrb[2].mxu0  ;;  %v1964_v9 = vpop.f32.mrb[3].mxu1 }
 0x1d9   :  { %v4065_v8 = vadd.f32 %v2174_v61, %v1962_v60  ;;  %v2176_v10 = vpop.f32.mrb[3].mxu0  ;;  %v2234_v12 = vmul.f32 %v4061_v6, %v4061_v6 }
 0x1da   :  { %v4067_v11 = vadd.f32 %v2176_v10, %v1964_v9  ;;  %v2235_v15 = vmul.f32 %v4063_v7, %v4063_v7 }
 0x1db   :  { %v2216_v13 = vadd.f32 %v4065_v8, %v4061_v6  ;;  %v2236_v14 = vmul.f32 %v4065_v8, %v4065_v8 }
 0x1dc   :  { %v2225_v16 = vadd.f32 %v4067_v11, %v4063_v7  ;;  %v2237_v17 = vmul.f32 %v4067_v11, %v4067_v11 }
 0x1dd   :  { %v2242_v18 = vadd.f32 %v2236_v14, %v2234_v12  ;;  %v1968_v20 = vpop.f32.mrb[4].mxu1 }
 0x1de   :  { %v2251_v19 = vadd.f32 %v2237_v17, %v2235_v15  ;;  %v2180_v21 = vpop.f32.mrb[4].mxu0  ;;  %v1970_v23 = vpop.f32.mrb[5].mxu1 }
 0x1df   :  { %v4081_v22 = vadd.f32 %v2180_v21, %v1968_v20  ;;  %v2182_v24 = vpop.f32.mrb[5].mxu0  ;;  %v1972_v26 = vpop.f32.mrb[6].mxu1  ;;  %v3123_v20 = vmov 1966171168  }
 0x1e0   :  { %v4083_v25 = vadd.f32 %v2182_v24, %v1970_v23  ;;  %v2184_v27 = vpop.f32.mrb[6].mxu0  ;;  %v1974_v31 = vpop.f32.mrb[7].mxu1  ;;  %v2279_v21 = vunpack.c.l.s4 %v3123_v20  ;;  %v2281_v23 = vlaneseq }
 0x1e1   :  { %v2217_v28 = vadd.f32 %v4081_v22, %v2216_v13  ;;  %v2238_v29 = vmul.f32 %v4081_v22, %v4081_v22  ;;  %v4088_v30 = vadd.f32 %v2184_v27, %v1972_v26  ;;  %v2186_v32 = vpop.f32.mrb[7].mxu0 }
 0x1e2   :  { %v2226_v33 = vadd.f32 %v4083_v25, %v2225_v16  ;;  %v2239_v34 = vmul.f32 %v4083_v25, %v4083_v25  ;;  %v4093_v35 = vadd.f32 %v2186_v32, %v1974_v31  ;;  %v2280_v24 = vunpack.c.0.s8 %v2279_v21 }
 0x1e3   :  { %v2243_v36 = vadd.f32 %v2242_v18, %v2238_v29  ;;  %v2218_v37 = vadd.f32 %v4088_v30, %v2217_v28  ;;  %v2240_v38 = vmul.f32 %v4088_v30, %v4088_v30  ;;  %v2282_v26 = vshrl.u32 %v2281_v23, 7 }
 0x1e4   :  { %v2252_v39 = vadd.f32 %v2251_v19, %v2239_v34  ;;  %v2227_v40 = vadd.f32 %v4093_v35, %v2226_v33  ;;  %v2241_v41 = vmul.f32 %v4093_v35, %v4093_v35  ;;  %v2270_v33 = vld [vmem:[%s4149_s2] sm:$0x3] }
 0x1e5   :  { %v2219_v43 = vrot.slane %v2218_v37, 4  ;;  %v2244_v44 = vadd.f32 %v2243_v36, %v2240_v38  ;;  %v2283_v28 = vsub.s32 %v2280_v24, %v2282_v26  ;;  %v2298_v36 = vsub.s32 0, %v2282_v26 }
 0x1e6   :  { %v2228_v48 = vrot.slane %v2227_v40, 4  ;;  %v2253_v49 = vadd.f32 %v2252_v39, %v2241_v41 }
 0x1e7   :  { %v2220_v42 = vadd.f32 %v2219_v43, %v2218_v37  ;;  %v2245_v45 = vrot.slane %v2244_v44, 4  ;;  %v2302_v37 = vsub.s32 1, %v2282_v26 }
 0x1e8   :  { %v2229_v46 = vadd.f32 %v2228_v48, %v2227_v40  ;;  %v2254_v47 = vrot.slane %v2253_v49, 4 }
 0x1e9   :  { %v2221_v50 = vrot.slane %v2220_v42, 2  ;;  %v2246_v51 = vadd.f32 %v2245_v45, %v2244_v44 }
 0x1ea   :  { %v2230_v52 = vrot.slane %v2229_v46, 2  ;;  %v2255_v53 = vadd.f32 %v2254_v47, %v2253_v49 }
 0x1eb   :  { %v2222_v54 = vadd.f32 %v2221_v50, %v2220_v42  ;;  %v2247_v55 = vrot.slane %v2246_v51, 2 }
 0x1ec   :  { %v2231_v57 = vadd.f32 %v2230_v52, %v2229_v46  ;;  %v2256_v58 = vrot.slane %v2255_v53, 2 }
 0x1ed   :  { %v2223_v62 = vrot.slane %v2222_v54, 1  ;;  %v2248_v63 = vadd.f32 %v2247_v55, %v2246_v51 }
 0x1ee   :  { %v2232_v0 = vrot.slane %v2231_v57, 1  ;;  %v2257_v1 = vadd.f32 %v2256_v58, %v2255_v53 }
 0x1ef   :  { %v2224_v2 = vadd.f32 %v2223_v62, %v2222_v54  ;;  %v2249_v3 = vrot.slane %v2248_v63, 1 }
 0x1f0   :  { %v2233_v4 = vadd.f32 %v2232_v0, %v2231_v57  ;;  %v2258_v5 = vrot.slane %v2257_v1, 1 }
 0x1f1   :  { %v2250_v56 = vadd.f32 %v2249_v3, %v2248_v63  ;;  %v2260_v59 = vmul.f32 0.03125, %v2224_v2 }
 0x1f2   :  { %v2259_v60 = vadd.f32 %v2258_v5, %v2257_v1  ;;  %v2261_v61 = vmul.f32 0.03125, %v2233_v4 }
 0x1f3   :  { %v2262_v9 = vmul.f32 0.03125, %v2250_v56  ;;  %v2264_v10 = vmul.f32 %v2260_v59, %v2260_v59 }
 0x1f4   :  { %v2263_v12 = vmul.f32 0.03125, %v2259_v60  ;;  %v2265_v13 = vmul.f32 %v2261_v61, %v2261_v61 }
 0x1f5   :  { %v2266_v14 = vsub.f32 %v2262_v9, %v2264_v10 }
 0x1f6   :  { %v2267_v15 = vsub.f32 %v2263_v12, %v2265_v13 }
 0x1f7   :  { %v2268_v16 = vmax.f32 %v2266_v14, 0.0 }
 0x1f8   :  { %v2269_v17 = vmax.f32 %v2267_v15, 0.0 }
 0x1f9   :  { %v2271_v18 = vadd.f32 1e-05, %v2268_v16 }
 0x1fa   :  { %v2272_v19 = vadd.f32 1e-05, %v2269_v17 }
 0x1fb   :  { %3119 = vrsqrt.f32 %v2271_v18 }
 0x1fc   :  { %3121 = vrsqrt.f32 %v2272_v19 }
 0x205   :  { %v3120_v27 = vpop.eup %3119 }
 0x206   :  { %v3122_v29 = vpop.eup %3121 }
 0x207   :  { %v2277_v31 = vcombine.low %v3120_v27, %v3122_v29 }
 0x209   :  { %v2284_v32 = vrot.slane %v2277_v31, %v2283_v28 }
 0x20b   :  { %v2291_v34 = vrot.slane %v2284_v32, %v2283_v28 }
 0x20d   :  { %v2293_v38 = vmul.f32 %v2291_v34, %v2270_v33 }
 0x20f   :  { %v2299_v39 = vrot.slane %v2293_v38, %v2298_v36  ;;  %v2303_v40 = vrot.slane %v2293_v38, %v2302_v37 }
 0x211   :  { %v2306_v41 = vmul.f32 %v2299_v39, %v2260_v59  ;;  %v2307_v43 = vmul.f32 %v2303_v40, %v2261_v61  ;;  %v2327_v44 = vmul.f32 %v4061_v6, %v2299_v39  ;;  %v2328_v48 = vmul.f32 %v4063_v7, %v2303_v40  ;;  %v2294_v6 = vld [vmem:[%s4150_s3] sm:$0x3] }
 0x212   :  { %v2329_v49 = vmul.f32 %v4065_v8, %v2299_v39  ;;  %v2330_v42 = vmul.f32 %v4067_v11, %v2303_v40  ;;  %v2331_v45 = vmul.f32 %v4081_v22, %v2299_v39  ;;  %v2332_v46 = vmul.f32 %v4083_v25, %v2303_v40 }
 0x213   :  { %v2310_v47 = vcombine.low %v2306_v41, %v2307_v43  ;;  %v2333_v50 = vmul.f32 %v4088_v30, %v2299_v39  ;;  %v2334_v51 = vmul.f32 %v4093_v35, %v2303_v40 }
 0x215   :  { %v2317_v52 = vrot.slane %v2310_v47, %v2283_v28 }
 0x217   :  { %v2324_v53 = vrot.slane %v2317_v52, %v2283_v28 }
 0x219   :  { %v2326_v7 = vsub.f32 %v2294_v6, %v2324_v53 }
 0x21b   :  { %v2339_v54 = vrot.slane %v2326_v7, %v2298_v36  ;;  %v2343_v8 = vrot.slane %v2326_v7, %v2302_v37 }
 0x21d   :  { %v2346_v55 = vadd.f32 %v2339_v54, %v2327_v44  ;;  %v2347_v11 = vadd.f32 %v2343_v8, %v2328_v48  ;;  %v2348_v57 = vadd.f32 %v2339_v54, %v2329_v49  ;;  %v2349_v22 = vadd.f32 %v2343_v8, %v2330_v42 }
 0x21e   :  { %v2350_v58 = vadd.f32 %v2339_v54, %v2331_v45  ;;  %v2351_v25 = vadd.f32 %v2343_v8, %v2332_v46  ;;  %v2352_v62 = vadd.f32 %v2339_v54, %v2333_v50  ;;  %v2353_v63 = vadd.f32 %v2343_v8, %v2334_v51 }
 0x21f   :  { %vm2354_vm0 = vcmp.ge.f32.partialorder %v2346_v55, 0.0  ;;  %vm2355_vm1 = vcmp.ge.f32.partialorder %v2347_v11, 0.0  ;;  %vm2356_vm2 = vcmp.ge.f32.partialorder %v2348_v57, 0.0  ;;  %vm2357_vm3 = vcmp.ge.f32.partialorder %v2349_v22, 0.0 }
 0x220   :  { %vm2358_vm4 = vcmp.ge.f32.partialorder %v2350_v58, 0.0  ;;  %vm2359_vm5 = vcmp.ge.f32.partialorder %v2351_v25, 0.0  ;;  %vm2360_vm6 = vcmp.ge.f32.partialorder %v2352_v62, 0.0  ;;  %vm2361_vm7 = vcmp.ge.f32.partialorder %v2353_v63, 0.0 }
 0x221   :  { %v2362_v30 = vmul.f32 0.2, %v2346_v55  ;;  %v2363_v35 = vmul.f32 0.2, %v2347_v11  ;;  %v2364_v0 = vmul.f32 0.2, %v2348_v57 }
 0x222   :  { %v2365_v1 = vmul.f32 0.2, %v2349_v22  ;;  %v2366_v2 = vmul.f32 0.2, %v2350_v58  ;;  %v2367_v3 = vmul.f32 0.2, %v2351_v25 }
 0x223   :  { %v2368_v4 = vmul.f32 0.2, %v2352_v62  ;;  %v2369_v5 = vmul.f32 0.2, %v2353_v63  ;;  %v2370_v56 = vsel %vm2354_vm0, %v2346_v55, %v2362_v30  ;;  %v2371_v59 = vsel %vm2355_vm1, %v2347_v11, %v2363_v35 }
 0x224   :  { %v2372_v60 = vsel %vm2356_vm2, %v2348_v57, %v2364_v0  ;;  %v2373_v61 = vsel %vm2357_vm3, %v2349_v22, %v2365_v1  ;;  %v2374_v9 = vsel %vm2358_vm4, %v2350_v58, %v2366_v2  ;;  %v2375_v10 = vsel %vm2359_vm5, %v2351_v25, %v2367_v3  ;;  %2378 = vst [vmem:[%s4151_s4] sm:$0xff] %v2370_v56 }
 0x225   :  { %2379 = vst [vmem:[%s4151_s4 + $0x8] sm:$0xff] %v2371_v59  ;;  %v2376_v12 = vsel %vm2360_vm6, %v2352_v62, %v2368_v4  ;;  %v2377_v13 = vsel %vm2361_vm7, %v2353_v63, %v2369_v5  ;;  %2380 = vst [vmem:[%s4151_s4 + $0x10] sm:$0xff] %v2372_v60 }
 0x226   :  { %2381 = vst [vmem:[%s4151_s4 + $0x18] sm:$0xff] %v2373_v61  ;;  %2382 = vst [vmem:[%s4151_s4 + $0x20] sm:$0xff] %v2374_v9 }
 0x227   :  { %2383 = vst [vmem:[%s4151_s4 + $0x28] sm:$0xff] %v2375_v10  ;;  %2384 = vst [vmem:[%s4151_s4 + $0x30] sm:$0xff] %v2376_v12 }
 0x228   :  { %2385 = vst [vmem:[%s4151_s4 + $0x38] sm:$0xff] %v2377_v13 }

// kernel: discriminator_forward.8
= control target key start
LH: loop header
LB: loop body
LE: loop exit
PB: predicated region body
PF: predicated region fallthrough
CT: control target
= control target key end

     0   :  { %s6207_s15 = smov 0   ;;  %s6209_s16 = smov 0   ;;  %s7072_s0 = inlined_call_operand.vmem [shape: bf16[24,4096], index: 0, kind: input, shape index: {}]   ;;  %s7073_s1 = inlined_call_operand.vmem [shape: bf16[4096,512], index: 1, kind: input, shape index: {}]   ;;  %s7074_s2 = inlined_call_operand.vmem [shape: f32[1,512], index: 2, kind: input, shape index: {}]   ;;  %s7075_s3 = inlined_call_operand.vmem [shape: f32[1,512], index: 3, kind: input, shape index: {}]   ;;  %s7076_s4 = inlined_call_operand.vmem [shape: f32[24,512], index: 4, kind: output, shape index: {}]  }
   0x1   :  { %s6211_s17 = smov 0  }
   0x2 LB: > { %s6223_s18 = sadd.s32 4294967295, %s6178_s17   ;;  %s6226_s19 = sadd.s32 1, %s6178_s17   ;;  %s6178_s17 = sphi %s6211_s17, %s7079_s17   ;;  %s6174_s16 = sphi %s6209_s16, %s7078_s16   ;;  %s6170_s15 = sphi %s6207_s15, %s7077_s15  }
   0x3   : > { %s18_s20 = ssub.s32 %s6178_s17, %s6226_s19  ;;  %s21_s21 = sadd.s32 1, %s6174_s16 }
   0x4   : > { %p19_p0 = scmp.eq.s32.totalorder %s18_s20, 0  ;;  %p28_p1 = scmp.ne.s32.totalorder %s6174_s16, %s6170_s15 }
   0x5   : > { %p29_p2 = scmp.eq.s32.totalorder %s6178_s17, 0  ;;  %p4723_p4 = scmp.ge.s32.totalorder %s6178_s17, 2 }
   0x6   : > { %s6235_s22 = scalar_select %p19_p0, %s6174_s16, %s21_s21  }
   0x7   : > { %p30_p3 = por %p29_p2, %p28_p1  ;;  %149 = sbr.rel (%p4723_p4) target bundleno = 31 (0x1f), region = 24 }
   0xe   : > { %152 = sbr.rel (!%p30_p3) target bundleno = 31 (0x1f), region = 28  ;;  %s154_s23 = sand.u32 (%p30_p3), 1, %s6174_s16  }
   0xf   : > { %s5278_s24 = sshll.u32 (%p30_p3), %s6178_s17, 6  ;;  %s5336_s25 = smul.u32 (%p30_p3), 192, %s154_s23 }
  0x10   : > { %s6243_s28 = scalar_lea.vmem (%p30_p3), %s7072_s0, %s5278_s24 }
  0x11   : > { %v172_v0 = vld [vmem:[%s6243_s28] sm:$0xff] (%p30_p3)  ;;  %v174_v1 = vld [vmem:[%s6243_s28 + $0x8] sm:$0xff] (%p30_p3)  ;;  %v176_v2 = vld [vmem:[%s6243_s28 + $0x10] sm:$0xff] (%p30_p3)  ;;  %s6251_s29 = scalar_lea.vmem (%p30_p3), [#allocation3], %s5336_s25 }
  0x12   : > { %v178_v3 = vld [vmem:[%s6243_s28 + $0x18] sm:$0xff] (%p30_p3)  ;;  %v180_v4 = vld [vmem:[%s6243_s28 + $0x20] sm:$0xff] (%p30_p3)  ;;  %v182_v5 = vld [vmem:[%s6243_s28 + $0x28] sm:$0xff] (%p30_p3)  ;;  %173 = vst [vmem:[%s6251_s29] sm:$0xff] (%p30_p3), %v172_v0 }
  0x13   : > { %175 = vst [vmem:[%s6251_s29 + $0x8] sm:$0xff] (%p30_p3), %v174_v1  ;;  %177 = vst [vmem:[%s6251_s29 + $0x10] sm:$0xff] (%p30_p3), %v176_v2  ;;  %v184_v6 = vld [vmem:[%s6243_s28 + $0x30] sm:$0xff] (%p30_p3)  ;;  %v186_v7 = vld [vmem:[%s6243_s28 + $0x38] sm:$0xff] (%p30_p3) }
  0x14   : > { %179 = vst [vmem:[%s6251_s29 + $0x18] sm:$0xff] (%p30_p3), %v178_v3  ;;  %181 = vst [vmem:[%s6251_s29 + $0x20] sm:$0xff] (%p30_p3), %v180_v4  ;;  %v188_v8 = vld [vmem:[%s6243_s28 + $0x80] sm:$0xff] (%p30_p3)  ;;  %v190_v9 = vld [vmem:[%s6243_s28 + $0x88] sm:$0xff] (%p30_p3) }
  0x15   : > { %183 = vst [vmem:[%s6251_s29 + $0x28] sm:$0xff] %v182_v5  ;;  %185 = vst [vmem:[%s6251_s29 + $0x30] sm:$0xff] %v184_v6  ;;  %v192_v10 = vld [vmem:[%s6243_s28 + $0x90] sm:$0xff]  ;;  %v194_v11 = vld [vmem:[%s6243_s28 + $0x98] sm:$0xff] }
  0x16   : > { %187 = vst [vmem:[%s6251_s29 + $0x38] sm:$0xff] %v186_v7  ;;  %189 = vst [vmem:[%s6251_s29 + $0x40] sm:$0xff] %v188_v8  ;;  %v196_v12 = vld [vmem:[%s6243_s28 + $0xa0] sm:$0xff]  ;;  %v198_v13 = vld [vmem:[%s6243_s28 + $0xa8] sm:$0xff] }
  0x17   : > { %191 = vst [vmem:[%s6251_s29 + $0x48] sm:$0xff] %v190_v9  ;;  %193 = vst [vmem:[%s6251_s29 + $0x50] sm:$0xff] %v192_v10  ;;  %v200_v14 = vld [vmem:[%s6243_s28 + $0xb0] sm:$0xff]  ;;  %v202_v15 = vld [vmem:[%s6243_s28 + $0xb8] sm:$0xff] }
  0x18   : > { %195 = vst [vmem:[%s6251_s29 + $0x58] sm:$0xff] %v194_v11  ;;  %197 = vst [vmem:[%s6251_s29 + $0x60] sm:$0xff] %v196_v12  ;;  %v204_v16 = vld [vmem:[%s6243_s28 + $0x100] sm:$0xff]  ;;  %v206_v17 = vld [vmem:[%s6243_s28 + $0x108] sm:$0xff] }
  0x19   : > { %199 = vst [vmem:[%s6251_s29 + $0x68] sm:$0xff] %v198_v13  ;;  %201 = vst [vmem:[%s6251_s29 + $0x70] sm:$0xff] %v200_v14  ;;  %v208_v18 = vld [vmem:[%s6243_s28 + $0x110] sm:$0xff]  ;;  %v210_v19 = vld [vmem:[%s6243_s28 + $0x118] sm:$0xff] }
  0x1a   : > { %203 = vst [vmem:[%s6251_s29 + $0x78] sm:$0xff] %v202_v15  ;;  %205 = vst [vmem:[%s6251_s29 + $0x80] sm:$0xff] %v204_v16  ;;  %v212_v20 = vld [vmem:[%s6243_s28 + $0x120] sm:$0xff]  ;;  %v214_v21 = vld [vmem:[%s6243_s28 + $0x128] sm:$0xff] }
  0x1b   : > { %207 = vst [vmem:[%s6251_s29 + $0x88] sm:$0xff] %v206_v17  ;;  %209 = vst [vmem:[%s6251_s29 + $0x90] sm:$0xff] %v208_v18  ;;  %v216_v22 = vld [vmem:[%s6243_s28 + $0x130] sm:$0xff]  ;;  %v218_v23 = vld [vmem:[%s6243_s28 + $0x138] sm:$0xff] }
  0x1c   : > { %211 = vst [vmem:[%s6251_s29 + $0x98] sm:$0xff] %v210_v19  ;;  %213 = vst [vmem:[%s6251_s29 + $0xa0] sm:$0xff] %v212_v20 }
  0x1d   : > { %215 = vst [vmem:[%s6251_s29 + $0xa8] sm:$0xff] %v214_v21  ;;  %217 = vst [vmem:[%s6251_s29 + $0xb0] sm:$0xff] %v216_v22 }
  0x1e   : > { %219 = vst [vmem:[%s6251_s29 + $0xb8] sm:$0xff] %v218_v23 }
  0x1f PF: > { %p4726_p5 = scmp.ge.s32.totalorder %s6178_s17, 1  ;;  %p234_p6 = scmp.lt.s32.totalorder %s6178_s17, 3 }
  0x21   : > { %p235_p7 = pnand %p4726_p5, %p234_p6 }
  0x22   : > { %s241_s30 = sand.u32 (!%p235_p7), 1, %s6170_s15   ;;  %s4727_s5 = sshll.u32 (!%p235_p7), %s6223_s18, 8 }
  0x23   : > { %238 = sbr.rel (%p235_p7) target bundleno = 874 (0x36a), region = 55  ;;  %p269_p8 = scmp.lt.s32.totalorder (!%p235_p7), %s4727_s5, 511 }
  0x24   : > { %s5337_s6 = smul.u32 (!%p235_p7), 192, %s241_s30  ;;  %p4730_p9 = scmp.ne.s32.totalorder (!%p235_p7), %s6223_s18, 0 }
  0x26   : > { %s6304_s11 = scalar_lea.vmem (!%p235_p7), [#allocation3], %s5337_s6 }
  0x2a   : > { %s7081_s5 = smov (!%p269_p8, %s4727_s5), 511  ;;  %278 = sbr.rel (%p4730_p9) target bundleno = 50 (0x32), region = 63 }
  0x2b   : > { %s5279_s7 = sshll.u32 %s7081_s5, 4  ;;  %v6180_v24 = vmov (!%p4730_p9), 0.0  }
  0x2c   : > { %s6302_s10 = scalar_lea.vmem %s7073_s1, %s5279_s7  ;;  %279 = vst [vmem:[#allocation2] sm:$0xff] (!%p4730_p9), %v6180_v24  ;;  %280 = vst [vmem:[#allocation2 + $0x8] sm:$0xff] (!%p4730_p9), %v6180_v24 }
  0x2d   : > { %281 = vst [vmem:[#allocation2 + $0x10] sm:$0xff] (!%p4730_p9), %v6180_v24  ;;  %282 = vst [vmem:[#allocation2 + $0x18] sm:$0xff] (!%p4730_p9), %v6180_v24 }
  0x2e   : > { %283 = vst [vmem:[#allocation2 + $0x20] sm:$0xff] (!%p4730_p9), %v6180_v24  ;;  %284 = vst [vmem:[#allocation2 + $0x28] sm:$0xff] (!%p4730_p9), %v6180_v24 }
  0x2f   : > { %285 = vst [vmem:[#allocation2 + $0x30] sm:$0xff] (!%p4730_p9), %v6180_v24  ;;  %286 = vst [vmem:[#allocation2 + $0x38] sm:$0xff] (!%p4730_p9), %v6180_v24 }
  0x30   : > { %287 = vst [vmem:[#allocation2 + $0x40] sm:$0xff] (!%p4730_p9), %v6180_v24  ;;  %288 = vst [vmem:[#allocation2 + $0x48] sm:$0xff] (!%p4730_p9), %v6180_v24 }
  0x31   : > { %289 = vst [vmem:[#allocation2 + $0x50] sm:$0xff] %v6180_v24  ;;  %290 = vst [vmem:[#allocation2 + $0x58] sm:$0xff] %v6180_v24 }
  0x32 PF: > { %v5364_v25 = vld [vmem:[%s6302_s10 + $0x4] ss:$16 sps:$4 sm:$0xff]   ;;  %v5366_v26 = vld [vmem:[%s6302_s10 + $0xc] ss:$16 sps:$4 sm:$0xff]   ;;  %v5368_v27 = vld [vmem:[%s6302_s10] ss:$16 sps:$4 sm:$0xff]  }
  0x33   : > { %3535 = vmatprep.subr.bf16.mxu0 %v5364_v25  ;;  %v5369_v28 = vld [vmem:[%s6302_s10 + $0x8] ss:$16 sps:$4 sm:$0xff]   ;;  %3943 = vmatprep.subr.bf16.mxu1 %v5366_v26  ;;  %v5370_v29 = vld [vmem:[%s6302_s10 + $0x24] ss:$16 sps:$4 sm:$0xff]   ;;  %v5372_v30 = vld [vmem:[%s6302_s10 + $0x2c] ss:$16 sps:$4 sm:$0xff]  }
  0x34   : > { %3536 = vmatpush1.bf16.msra.mxu0 %v5368_v27  ;;  %3944 = vmatpush1.bf16.msra.mxu1 %v5369_v28  ;;  %v5374_v31 = vld [vmem:[%s6302_s10 + $0x20] ss:$16 sps:$4 sm:$0xff]   ;;  %v5375_v32 = vld [vmem:[%s6302_s10 + $0x28] ss:$16 sps:$4 sm:$0xff]   ;;  %v5376_v33 = vld [vmem:[%s6302_s10 + $0x44] ss:$16 sps:$4 sm:$0xff]  }
  0x35   : > { %3537 = vmatprep.subr.bf16.mxu0 %v5370_v29  ;;  %3945 = vmatprep.subr.bf16.mxu1 %v5372_v30  ;;  %v5378_v34 = vld [vmem:[%s6302_s10 + $0x4c] ss:$16 sps:$4 sm:$0xff]   ;;  %v5380_v35 = vld [vmem:[%s6302_s10 + $0x40] ss:$16 sps:$4 sm:$0xff]   ;;  %v5381_v36 = vld [vmem:[%s6302_s10 + $0x48] ss:$16 sps:$4 sm:$0xff]  }
  0x36   : > { %v5382_v37 = vld [vmem:[%s6302_s10 + $0x64] ss:$16 sps:$4 sm:$0xff]   ;;  %v5384_v38 = vld [vmem:[%s6302_s10 + $0x6c] ss:$16 sps:$4 sm:$0xff]   ;;  %v5386_v39 = vld [vmem:[%s6302_s10 + $0x60] ss:$16 sps:$4 sm:$0xff]  }
  0x37   : > { %v5387_v40 = vld [vmem:[%s6302_s10 + $0x68] ss:$16 sps:$4 sm:$0xff]   ;;  %v5388_v41 = vld [vmem:[%s6302_s10 + $0x84] ss:$16 sps:$4 sm:$0xff]   ;;  %v5390_v42 = vld [vmem:[%s6302_s10 + $0x8c] ss:$16 sps:$4 sm:$0xff]  }
  0x38   : > { %3538 = vmatpush1.bf16.msra.mxu0 %v5374_v31  ;;  %3946 = vmatpush1.bf16.msra.mxu1 %v5375_v32  ;;  %v5392_v43 = vld [vmem:[%s6302_s10 + $0x80] ss:$16 sps:$4 sm:$0xff]   ;;  %v5393_v44 = vld [vmem:[%s6302_s10 + $0x88] ss:$16 sps:$4 sm:$0xff]   ;;  %v5394_v45 = vld [vmem:[%s6302_s10 + $0xa4] ss:$16 sps:$4 sm:$0xff]  }
  0x39   : > { %3539 = vmatprep.subr.bf16.mxu0 %v5376_v33  ;;  %3947 = vmatprep.subr.bf16.mxu1 %v5378_v34  ;;  %v5396_v46 = vld [vmem:[%s6302_s10 + $0xac] ss:$16 sps:$4 sm:$0xff]   ;;  %v5398_v47 = vld [vmem:[%s6302_s10 + $0xa0] ss:$16 sps:$4 sm:$0xff]   ;;  %v5399_v48 = vld [vmem:[%s6302_s10 + $0xa8] ss:$16 sps:$4 sm:$0xff]  }
  0x3a   : > { %v5400_v49 = vld [vmem:[%s6302_s10 + $0xc4] ss:$16 sps:$4 sm:$0xff]   ;;  %v5402_v50 = vld [vmem:[%s6302_s10 + $0xcc] ss:$16 sps:$4 sm:$0xff]   ;;  %v5404_v51 = vld [vmem:[%s6302_s10 + $0xc0] ss:$16 sps:$4 sm:$0xff]  }
  0x3b   : > { %v5405_v52 = vld [vmem:[%s6302_s10 + $0xc8] ss:$16 sps:$4 sm:$0xff]   ;;  %v5406_v53 = vld [vmem:[%s6302_s10 + $0xe4] ss:$16 sps:$4 sm:$0xff]   ;;  %v5408_v54 = vld [vmem:[%s6302_s10 + $0xec] ss:$16 sps:$4 sm:$0xff]  }
  0x3c   : > { %3540 = vmatpush1.bf16.msra.mxu0 %v5380_v35  ;;  %3948 = vmatpush1.bf16.msra.mxu1 %v5381_v36  ;;  %v5410_v55 = vld [vmem:[%s6302_s10 + $0xe0] ss:$16 sps:$4 sm:$0xff]   ;;  %v5411_v56 = vld [vmem:[%s6302_s10 + $0xe8] ss:$16 sps:$4 sm:$0xff]   ;;  %v5412_v57 = vld [vmem:[%s6302_s10 + $0x104] ss:$16 sps:$4 sm:$0xff]  }
  0x3d   : > { %3541 = vmatprep.subr.bf16.mxu0 %v5382_v37  ;;  %3949 = vmatprep.subr.bf16.mxu1 %v5384_v38  ;;  %v5414_v58 = vld [vmem:[%s6302_s10 + $0x10c] ss:$16 sps:$4 sm:$0xff]   ;;  %v5416_v59 = vld [vmem:[%s6302_s10 + $0x100] ss:$16 sps:$4 sm:$0xff]   ;;  %v5417_v60 = vld [vmem:[%s6302_s10 + $0x108] ss:$16 sps:$4 sm:$0xff]  }
  0x3e   : > { %v5418_v61 = vld [vmem:[%s6302_s10 + $0x124] ss:$16 sps:$4 sm:$0xff]   ;;  %v5420_v62 = vld [vmem:[%s6302_s10 + $0x12c] ss:$16 sps:$4 sm:$0xff]   ;;  %v5422_v63 = vld [vmem:[%s6302_s10 + $0x120] ss:$16 sps:$4 sm:$0xff]  }
  0x3f   : > { %v5423_v0 = vld [vmem:[%s6302_s10 + $0x128] ss:$16 sps:$4 sm:$0xff]   ;;  %v5424_v1 = vld [vmem:[%s6302_s10 + $0x144] ss:$16 sps:$4 sm:$0xff]   ;;  %v5426_v2 = vld [vmem:[%s6302_s10 + $0x14c] ss:$16 sps:$4 sm:$0xff]  }
  0x40   : > { %3542 = vmatpush1.bf16.msra.mxu0 %v5386_v39  ;;  %3950 = vmatpush1.bf16.msra.mxu1 %v5387_v40  ;;  %v5428_v3 = vld [vmem:[%s6302_s10 + $0x140] ss:$16 sps:$4 sm:$0xff]   ;;  %v5429_v4 = vld [vmem:[%s6302_s10 + $0x148] ss:$16 sps:$4 sm:$0xff]   ;;  %v5430_v5 = vld [vmem:[%s6302_s10 + $0x164] ss:$16 sps:$4 sm:$0xff]  }
  0x41   : > { %3543 = vmatprep.subr.bf16.mxu0 %v5388_v41  ;;  %3951 = vmatprep.subr.bf16.mxu1 %v5390_v42  ;;  %v5432_v6 = vld [vmem:[%s6302_s10 + $0x16c] ss:$16 sps:$4 sm:$0xff]   ;;  %v303_v7 = vld [vmem:[%s6304_s11] sm:$0xff]  ;;  %v5435_v10 = vld [vmem:[%s6302_s10 + $0x168] ss:$16 sps:$4 sm:$0xff]   ;;  %p5275_p10 = scmp.ne.s32.totalorder %s6223_s18, 1 }
  0x42   : > { %v311_v8 = vld [vmem:[%s6304_s11 + $0x40] sm:$0xff]  ;;  %v5438_v13 = vld [vmem:[%s6302_s10 + $0x18c] ss:$16 sps:$4 sm:$0xff]   ;;  %v5441_v15 = vld [vmem:[%s6302_s10 + $0x188] ss:$16 sps:$4 sm:$0xff]  }
  0x43   : > { %v5434_v9 = vld [vmem:[%s6302_s10 + $0x160] ss:$16 sps:$4 sm:$0xff]   ;;  %v4732_v11 = vcombine.high %v303_v7, %v311_v8  ;;  %v5436_v12 = vld [vmem:[%s6302_s10 + $0x184] ss:$16 sps:$4 sm:$0xff]   ;;  %v5444_v17 = vld [vmem:[%s6302_s10 + $0x1ac] ss:$16 sps:$4 sm:$0xff]   ;;  %v4731_v30 = vcombine.low %v303_v7, %v311_v8 }
  0x44   : > { %3544 = vmatpush1.bf16.msra.mxu0 %v5392_v43  ;;  %3952 = vmatpush1.bf16.msra.mxu1 %v5393_v44  ;;  %v5440_v14 = vld [vmem:[%s6302_s10 + $0x180] ss:$16 sps:$4 sm:$0xff]   ;;  %v5442_v16 = vld [vmem:[%s6302_s10 + $0x1a4] ss:$16 sps:$4 sm:$0xff]   ;;  %v5447_v19 = vld [vmem:[%s6302_s10 + $0x1a8] ss:$16 sps:$4 sm:$0xff]  }
  0x45   : > { %3545 = vmatprep.subr.bf16.mxu0 %v5394_v45  ;;  %3953 = vmatprep.subr.bf16.mxu1 %v5396_v46  ;;  %v5446_v18 = vld [vmem:[%s6302_s10 + $0x1a0] ss:$16 sps:$4 sm:$0xff]   ;;  %v5448_v20 = vld [vmem:[%s6302_s10 + $0x1c4] ss:$16 sps:$4 sm:$0xff]   ;;  %v5450_v21 = vld [vmem:[%s6302_s10 + $0x1cc] ss:$16 sps:$4 sm:$0xff]  }
  0x46   : > { %3567 = vmatprep.mubr.bf16.mxu0 %v4732_v11  ;;  %3975 = vmatprep.mubr.bf16.mxu1 %v4732_v11  ;;  %v5452_v22 = vld [vmem:[%s6302_s10 + $0x1c0] ss:$16 sps:$4 sm:$0xff]   ;;  %v5453_v23 = vld [vmem:[%s6302_s10 + $0x1c8] ss:$16 sps:$4 sm:$0xff]   ;;  %v5454_v24 = vld [vmem:[%s6302_s10 + $0x1e4] ss:$16 sps:$4 sm:$0xff]  }
  0x47   : > { %v5456_v25 = vld [vmem:[%s6302_s10 + $0x1ec] ss:$16 sps:$4 sm:$0xff]   ;;  %v5458_v26 = vld [vmem:[%s6302_s10 + $0x1e0] ss:$16 sps:$4 sm:$0xff]   ;;  %v5459_v27 = vld [vmem:[%s6302_s10 + $0x1e8] ss:$16 sps:$4 sm:$0xff]  }
  0x48   : > { %3546 = vmatpush1.bf16.msra.mxu0 %v5398_v47  ;;  %3954 = vmatpush1.bf16.msra.mxu1 %v5399_v48  ;;  %v5462_v28 = vld [vmem:[%s6302_s10 + $0x204] ss:$16 sps:$4 sm:$0xff]   ;;  %v5465_v29 = vld [vmem:[%s6302_s10 + $0x20c] ss:$16 sps:$4 sm:$0xff]   ;;  %v5460_v31 = vld [vmem:[%s6302_s10 + $0x200] ss:$16 sps:$4 sm:$0xff]  }
  0x49   : > { %3547 = vmatprep.subr.bf16.mxu0 %v5400_v49  ;;  %3955 = vmatprep.subr.bf16.mxu1 %v5402_v50  ;;  %v5463_v32 = vld [vmem:[%s6302_s10 + $0x208] ss:$16 sps:$4 sm:$0xff]   ;;  %v5468_v33 = vld [vmem:[%s6302_s10 + $0x224] ss:$16 sps:$4 sm:$0xff]   ;;  %v5471_v34 = vld [vmem:[%s6302_s10 + $0x22c] ss:$16 sps:$4 sm:$0xff]  }
  0x4a   : > { %v5466_v35 = vld [vmem:[%s6302_s10 + $0x220] ss:$16 sps:$4 sm:$0xff]   ;;  %v5469_v36 = vld [vmem:[%s6302_s10 + $0x228] ss:$16 sps:$4 sm:$0xff]   ;;  %v5474_v37 = vld [vmem:[%s6302_s10 + $0x244] ss:$16 sps:$4 sm:$0xff]  }
  0x4b   : > { %v5477_v38 = vld [vmem:[%s6302_s10 + $0x24c] ss:$16 sps:$4 sm:$0xff]   ;;  %v5472_v39 = vld [vmem:[%s6302_s10 + $0x240] ss:$16 sps:$4 sm:$0xff]   ;;  %v5475_v40 = vld [vmem:[%s6302_s10 + $0x248] ss:$16 sps:$4 sm:$0xff]  }
  0x4c   : > { %3548 = vmatpush1.bf16.msra.mxu0 %v5404_v51  ;;  %3956 = vmatpush1.bf16.msra.mxu1 %v5405_v52  ;;  %v5480_v41 = vld [vmem:[%s6302_s10 + $0x264] ss:$16 sps:$4 sm:$0xff]   ;;  %v5483_v42 = vld [vmem:[%s6302_s10 + $0x26c] ss:$16 sps:$4 sm:$0xff]   ;;  %v5478_v43 = vld [vmem:[%s6302_s10 + $0x260] ss:$16 sps:$4 sm:$0xff]  }
  0x4d   : > { %3549 = vmatprep.subr.bf16.mxu0 %v5406_v53  ;;  %3957 = vmatprep.subr.bf16.mxu1 %v5408_v54  ;;  %v5481_v44 = vld [vmem:[%s6302_s10 + $0x268] ss:$16 sps:$4 sm:$0xff]   ;;  %v5486_v45 = vld [vmem:[%s6302_s10 + $0x284] ss:$16 sps:$4 sm:$0xff]   ;;  %v5489_v46 = vld [vmem:[%s6302_s10 + $0x28c] ss:$16 sps:$4 sm:$0xff]  }
  0x4e   : > { %v5484_v47 = vld [vmem:[%s6302_s10 + $0x280] ss:$16 sps:$4 sm:$0xff]   ;;  %v5487_v48 = vld [vmem:[%s6302_s10 + $0x288] ss:$16 sps:$4 sm:$0xff]   ;;  %v5492_v49 = vld [vmem:[%s6302_s10 + $0x2a4] ss:$16 sps:$4 sm:$0xff]  }
  0x4f   : > { %v319_v50 = vld [vmem:[%s6304_s11 + $0x80] sm:$0xff]  ;;  %v5495_v51 = vld [vmem:[%s6302_s10 + $0x2ac] ss:$16 sps:$4 sm:$0xff]  }
  0x50   : > { %3550 = vmatpush1.bf16.msra.mxu0 %v5410_v55  ;;  %3958 = vmatpush1.bf16.msra.mxu1 %v5411_v56  ;;  %v4748_v52 = vcombine.high %v319_v50, %v319_v50  ;;  %v4747_v53 = vcombine.low %v319_v50, %v319_v50  ;;  %v5490_v54 = vld [vmem:[%s6302_s10 + $0x2a0] ss:$16 sps:$4 sm:$0xff]   ;;  %v5493_v55 = vld [vmem:[%s6302_s10 + $0x2a8] ss:$16 sps:$4 sm:$0xff]   ;;  %v5498_v56 = vld [vmem:[%s6302_s10 + $0x2c4] ss:$16 sps:$4 sm:$0xff]  }
  0x51   : > { %3551 = vmatprep.subr.bf16.mxu0 %v5412_v57  ;;  %3959 = vmatprep.subr.bf16.mxu1 %v5414_v58  ;;  %v5501_v57 = vld [vmem:[%s6302_s10 + $0x2cc] ss:$16 sps:$4 sm:$0xff]   ;;  %v5516_v7 = vld [vmem:[%s6302_s10 + $0x324] ss:$16 sps:$4 sm:$0xff]  }
  0x52   : > { %v6401_v58 = vld [vmem:[%s6304_s11 + $0x8] sm:$0xff]  ;;  %v5522_v11 = vld [vmem:[%s6302_s10 + $0x344] ss:$16 sps:$4 sm:$0xff]  }
  0x53   : > { %v5519_v8 = vld [vmem:[%s6302_s10 + $0x32c] ss:$16 sps:$4 sm:$0xff]   ;;  %v6461_v50 = vld [vmem:[%s6304_s11 + $0x10] sm:$0xff] }
  0x54   : > { %3552 = vmatpush1.bf16.msra.mxu0 %v5416_v59  ;;  %3960 = vmatpush1.bf16.msra.mxu1 %v5417_v60  ;;  %v6404_v59 = vld [vmem:[%s6304_s11 + $0x48] sm:$0xff]  ;;  %v5496_v60 = vld [vmem:[%s6302_s10 + $0x2c0] ss:$16 sps:$4 sm:$0xff]  }
  0x55   : > { %3553 = vmatprep.subr.bf16.mxu0 %v5418_v61  ;;  %3961 = vmatprep.subr.bf16.mxu1 %v5420_v62  ;;  %v4734_v61 = vcombine.high %v6401_v58, %v6404_v59  ;;  %v5499_v62 = vld [vmem:[%s6302_s10 + $0x2c8] ss:$16 sps:$4 sm:$0xff]  }
  0x58   : > { %3554 = vmatpush1.bf16.msra.mxu0 %v5422_v63  ;;  %3962 = vmatpush1.bf16.msra.mxu1 %v5423_v0  ;;  %v5504_v63 = vld [vmem:[%s6302_s10 + $0x2e4] ss:$16 sps:$4 sm:$0xff]   ;;  %v5507_v0 = vld [vmem:[%s6302_s10 + $0x2ec] ss:$16 sps:$4 sm:$0xff]  }
  0x59   : > { %3555 = vmatprep.subr.bf16.mxu0 %v5424_v1  ;;  %3963 = vmatprep.subr.bf16.mxu1 %v5426_v2  ;;  %v5502_v1 = vld [vmem:[%s6302_s10 + $0x2e0] ss:$16 sps:$4 sm:$0xff]   ;;  %v5505_v2 = vld [vmem:[%s6302_s10 + $0x2e8] ss:$16 sps:$4 sm:$0xff]  }
  0x5c   : > { %3556 = vmatpush1.bf16.msra.mxu0 %v5428_v3  ;;  %3964 = vmatpush1.bf16.msra.mxu1 %v5429_v4  ;;  %v5510_v3 = vld [vmem:[%s6302_s10 + $0x304] ss:$16 sps:$4 sm:$0xff]   ;;  %v5513_v4 = vld [vmem:[%s6302_s10 + $0x30c] ss:$16 sps:$4 sm:$0xff]  }
  0x5d   : > { %3557 = vmatprep.subr.bf16.mxu0 %v5430_v5  ;;  %3965 = vmatprep.subr.bf16.mxu1 %v5432_v6  ;;  %v5508_v5 = vld [vmem:[%s6302_s10 + $0x300] ss:$16 sps:$4 sm:$0xff]   ;;  %v5511_v6 = vld [vmem:[%s6302_s10 + $0x308] ss:$16 sps:$4 sm:$0xff]  }
  0x60   : > { %3558 = vmatpush1.bf16.msra.mxu0 %v5434_v9  ;;  %3966 = vmatpush1.bf16.msra.mxu1 %v5435_v10  ;;  %v5514_v9 = vld [vmem:[%s6302_s10 + $0x320] ss:$16 sps:$4 sm:$0xff]   ;;  %v5517_v10 = vld [vmem:[%s6302_s10 + $0x328] ss:$16 sps:$4 sm:$0xff]  }
  0x61   : > { %3559 = vmatprep.subr.bf16.mxu0 %v5436_v12  ;;  %3967 = vmatprep.subr.bf16.mxu1 %v5438_v13  ;;  %v5525_v12 = vld [vmem:[%s6302_s10 + $0x34c] ss:$16 sps:$4 sm:$0xff]   ;;  %v5520_v13 = vld [vmem:[%s6302_s10 + $0x340] ss:$16 sps:$4 sm:$0xff]  }
  0x64   : > { %3560 = vmatpush1.bf16.msra.mxu0 %v5440_v14  ;;  %3968 = vmatpush1.bf16.msra.mxu1 %v5441_v15  ;;  %v5523_v14 = vld [vmem:[%s6302_s10 + $0x348] ss:$16 sps:$4 sm:$0xff]   ;;  %v5528_v15 = vld [vmem:[%s6302_s10 + $0x364] ss:$16 sps:$4 sm:$0xff]  }
  0x65   : > { %3561 = vmatprep.subr.bf16.mxu0 %v5442_v16  ;;  %3969 = vmatprep.subr.bf16.mxu1 %v5444_v17  ;;  %v5531_v16 = vld [vmem:[%s6302_s10 + $0x36c] ss:$16 sps:$4 sm:$0xff]   ;;  %v5526_v17 = vld [vmem:[%s6302_s10 + $0x360] ss:$16 sps:$4 sm:$0xff]  }
  0x68   : > { %3562 = vmatpush1.bf16.msra.mxu0 %v5446_v18  ;;  %3970 = vmatpush1.bf16.msra.mxu1 %v5447_v19  ;;  %v5529_v18 = vld [vmem:[%s6302_s10 + $0x368] ss:$16 sps:$4 sm:$0xff]   ;;  %v5534_v19 = vld [vmem:[%s6302_s10 + $0x384] ss:$16 sps:$4 sm:$0xff]  }
  0x69   : > { %3563 = vmatprep.subr.bf16.mxu0 %v5448_v20  ;;  %3971 = vmatprep.subr.bf16.mxu1 %v5450_v21  ;;  %v5537_v20 = vld [vmem:[%s6302_s10 + $0x38c] ss:$16 sps:$4 sm:$0xff]   ;;  %v5532_v21 = vld [vmem:[%s6302_s10 + $0x380] ss:$16 sps:$4 sm:$0xff]  }
  0x6c   : > { %3564 = vmatpush1.bf16.msra.mxu0 %v5452_v22  ;;  %3972 = vmatpush1.bf16.msra.mxu1 %v5453_v23  ;;  %v5535_v22 = vld [vmem:[%s6302_s10 + $0x388] ss:$16 sps:$4 sm:$0xff]   ;;  %v5540_v23 = vld [vmem:[%s6302_s10 + $0x3a4] ss:$16 sps:$4 sm:$0xff]  }
  0x6d   : > { %3565 = vmatprep.subr.bf16.mxu0 %v5454_v24  ;;  %3973 = vmatprep.subr.bf16.mxu1 %v5456_v25  ;;  %v5543_v24 = vld [vmem:[%s6302_s10 + $0x3ac] ss:$16 sps:$4 sm:$0xff]   ;;  %v5538_v25 = vld [vmem:[%s6302_s10 + $0x3a0] ss:$16 sps:$4 sm:$0xff]  }
  0x70   : > { %3566 = vmatpush1.bf16.msra.mxu0 %v5458_v26  ;;  %3974 = vmatpush1.bf16.msra.mxu1 %v5459_v27  ;;  %v5541_v26 = vld [vmem:[%s6302_s10 + $0x3a8] ss:$16 sps:$4 sm:$0xff]   ;;  %v5548_v27 = vld [vmem:[%s6302_s10 + $0x3c4] ss:$16 sps:$4 sm:$0xff]  }
  0x71   : > { %3586 = vmatprep.subr.bf16.mxu0 %v5462_v28  ;;  %3994 = vmatprep.subr.bf16.mxu1 %v5465_v29  ;;  %v5551_v28 = vld [vmem:[%s6302_s10 + $0x3cc] ss:$16 sps:$4 sm:$0xff]   ;;  %v5546_v29 = vld [vmem:[%s6302_s10 + $0x3c0] ss:$16 sps:$4 sm:$0xff]  }
  0x73   : > { %3568 = vmatmul.mubr.bf16.vlgmr.msra.gmra.mrb[0].mxu0 %v4731_v30  ;;  %3976 = vmatmul.mubr.bf16.vlgmr.msra.gmra.mrb[0].mxu1 %v4731_v30  ;;  %v5549_v30 = vld [vmem:[%s6302_s10 + $0x3c8] ss:$16 sps:$4 sm:$0xff]  }
  0x74   : > { %3587 = vmatpush1.bf16.msra.mxu0 %v5460_v31  ;;  %3995 = vmatpush1.bf16.msra.mxu1 %v5463_v32  ;;  %v5554_v31 = vld [vmem:[%s6302_s10 + $0x3e4] ss:$16 sps:$4 sm:$0xff]   ;;  %v5557_v32 = vld [vmem:[%s6302_s10 + $0x3ec] ss:$16 sps:$4 sm:$0xff]  }
  0x75   : > { %3588 = vmatprep.subr.bf16.mxu0 %v5468_v33  ;;  %3996 = vmatprep.subr.bf16.mxu1 %v5471_v34  ;;  %v5552_v33 = vld [vmem:[%s6302_s10 + $0x3e0] ss:$16 sps:$4 sm:$0xff]   ;;  %v5555_v34 = vld [vmem:[%s6302_s10 + $0x3e8] ss:$16 sps:$4 sm:$0xff]  }
  0x76   : > { %3577 = vmatprep.mubr.bf16.mxu0 %v4748_v52  ;;  %3985 = vmatprep.mubr.bf16.mxu1 %v4748_v52  ;;  %v5575_v52 = vld [vmem:[%s6302_s10 + $0x448] ss:$16 sps:$4 sm:$0xff]  }
  0x78   : > { %3589 = vmatpush1.bf16.msra.mxu0 %v5466_v35  ;;  %3997 = vmatpush1.bf16.msra.mxu1 %v5469_v36  ;;  %v5560_v35 = vld [vmem:[%s6302_s10 + $0x404] ss:$16 sps:$4 sm:$0xff]   ;;  %v5563_v36 = vld [vmem:[%s6302_s10 + $0x40c] ss:$16 sps:$4 sm:$0xff]  }
  0x79   : > { %3590 = vmatprep.subr.bf16.mxu0 %v5474_v37  ;;  %3998 = vmatprep.subr.bf16.mxu1 %v5477_v38  ;;  %v4733_v37 = vcombine.low %v6401_v58, %v6404_v59  ;;  %v320_v38 = vld [vmem:[%s6304_s11 + $0x88] sm:$0xff]  ;;  %v5586_v58 = vld [vmem:[%s6302_s10 + $0x484] ss:$16 sps:$4 sm:$0xff]  }
  0x7a   : > { %v5589_v59 = vld [vmem:[%s6302_s10 + $0x48c] ss:$16 sps:$4 sm:$0xff]  }
  0x7b   : > { %3578 = vmatmul.mubr.bf16.gmra.mrb[4].mxu0 %v4747_v53  ;;  %3986 = vmatmul.mubr.bf16.gmra.mrb[4].mxu1 %v4747_v53  ;;  %v5580_v53 = vld [vmem:[%s6302_s10 + $0x464] ss:$16 sps:$4 sm:$0xff]  }
  0x7c   : > { %3591 = vmatpush1.bf16.msra.mxu0 %v5472_v39  ;;  %3999 = vmatpush1.bf16.msra.mxu1 %v5475_v40  ;;  %v5558_v39 = vld [vmem:[%s6302_s10 + $0x400] ss:$16 sps:$4 sm:$0xff]   ;;  %v5561_v40 = vld [vmem:[%s6302_s10 + $0x408] ss:$16 sps:$4 sm:$0xff]  }
  0x7d   : > { %3592 = vmatprep.subr.bf16.mxu0 %v5480_v41  ;;  %4000 = vmatprep.subr.bf16.mxu1 %v5483_v42  ;;  %v5566_v41 = vld [vmem:[%s6302_s10 + $0x424] ss:$16 sps:$4 sm:$0xff]   ;;  %v5569_v42 = vld [vmem:[%s6302_s10 + $0x42c] ss:$16 sps:$4 sm:$0xff]  }
  0x7e   : > { %3618 = vmatprep.mubr.bf16.mxu0 %v4734_v61  ;;  %4026 = vmatprep.mubr.bf16.mxu1 %v4734_v61  ;;  %v5587_v61 = vld [vmem:[%s6302_s10 + $0x488] ss:$16 sps:$4 sm:$0xff]  }
  0x80   : > { %3593 = vmatpush1.bf16.msra.mxu0 %v5478_v43  ;;  %4001 = vmatpush1.bf16.msra.mxu1 %v5481_v44  ;;  %v4750_v43 = vcombine.high %v320_v38, %v320_v38  ;;  %v5564_v44 = vld [vmem:[%s6302_s10 + $0x420] ss:$16 sps:$4 sm:$0xff]  }
  0x81   : > { %3594 = vmatprep.subr.bf16.mxu0 %v5486_v45  ;;  %4002 = vmatprep.subr.bf16.mxu1 %v5489_v46  ;;  %v5567_v45 = vld [vmem:[%s6302_s10 + $0x428] ss:$16 sps:$4 sm:$0xff]   ;;  %v5574_v46 = vld [vmem:[%s6302_s10 + $0x444] ss:$16 sps:$4 sm:$0xff]  }
  0x84   : > { %3595 = vmatpush1.bf16.msra.mxu0 %v5484_v47  ;;  %4003 = vmatpush1.bf16.msra.mxu1 %v5487_v48  ;;  %v5577_v47 = vld [vmem:[%s6302_s10 + $0x44c] ss:$16 sps:$4 sm:$0xff]   ;;  %v5572_v48 = vld [vmem:[%s6302_s10 + $0x440] ss:$16 sps:$4 sm:$0xff]  }
  0x85   : > { %3596 = vmatprep.subr.bf16.mxu0 %v5492_v49  ;;  %4004 = vmatprep.subr.bf16.mxu1 %v5495_v51  ;;  %v4749_v49 = vcombine.low %v320_v38, %v320_v38  ;;  %v6464_v51 = vld [vmem:[%s6304_s11 + $0x50] sm:$0xff] }
  0x86   : > { %v5652_v38 = vld [vmem:[%s6302_s10 + $0x5e4] ss:$16 sps:$4 sm:$0xff]  }
  0x88   : > { %3597 = vmatpush1.bf16.msra.mxu0 %v5490_v54  ;;  %4005 = vmatpush1.bf16.msra.mxu1 %v5493_v55  ;;  %v5583_v54 = vld [vmem:[%s6302_s10 + $0x46c] ss:$16 sps:$4 sm:$0xff]   ;;  %v4736_v55 = vcombine.high %v6461_v50, %v6464_v51 }
  0x89   : > { %3598 = vmatprep.subr.bf16.mxu0 %v5498_v56  ;;  %4006 = vmatprep.subr.bf16.mxu1 %v5501_v57  ;;  %v5578_v56 = vld [vmem:[%s6302_s10 + $0x460] ss:$16 sps:$4 sm:$0xff]   ;;  %v5581_v57 = vld [vmem:[%s6302_s10 + $0x468] ss:$16 sps:$4 sm:$0xff]  }
  0x8c   : > { %3599 = vmatpush1.bf16.msra.mxu0 %v5496_v60  ;;  %4007 = vmatpush1.bf16.msra.mxu1 %v5499_v62  ;;  %v5584_v60 = vld [vmem:[%s6302_s10 + $0x480] ss:$16 sps:$4 sm:$0xff]   ;;  %v5592_v62 = vld [vmem:[%s6302_s10 + $0x4a4] ss:$16 sps:$4 sm:$0xff]  }
  0x8d   : > { %3600 = vmatprep.subr.bf16.mxu0 %v5504_v63  ;;  %4008 = vmatprep.subr.bf16.mxu1 %v5507_v0  ;;  %v5595_v63 = vld [vmem:[%s6302_s10 + $0x4ac] ss:$16 sps:$4 sm:$0xff]   ;;  %v5590_v0 = vld [vmem:[%s6302_s10 + $0x4a0] ss:$16 sps:$4 sm:$0xff]  }
  0x90   : > { %3601 = vmatpush1.bf16.msra.mxu0 %v5502_v1  ;;  %4009 = vmatpush1.bf16.msra.mxu1 %v5505_v2  ;;  %v5593_v1 = vld [vmem:[%s6302_s10 + $0x4a8] ss:$16 sps:$4 sm:$0xff]   ;;  %v5598_v2 = vld [vmem:[%s6302_s10 + $0x4c4] ss:$16 sps:$4 sm:$0xff]  }
  0x91   : > { %3602 = vmatprep.subr.bf16.mxu0 %v5510_v3  ;;  %4010 = vmatprep.subr.bf16.mxu1 %v5513_v4  ;;  %v5601_v3 = vld [vmem:[%s6302_s10 + $0x4cc] ss:$16 sps:$4 sm:$0xff]   ;;  %v5596_v4 = vld [vmem:[%s6302_s10 + $0x4c0] ss:$16 sps:$4 sm:$0xff]  }
  0x94   : > { %3603 = vmatpush1.bf16.msra.mxu0 %v5508_v5  ;;  %4011 = vmatpush1.bf16.msra.mxu1 %v5511_v6  ;;  %v5599_v5 = vld [vmem:[%s6302_s10 + $0x4c8] ss:$16 sps:$4 sm:$0xff]   ;;  %v5604_v6 = vld [vmem:[%s6302_s10 + $0x4e4] ss:$16 sps:$4 sm:$0xff]  }
  0x95   : > { %3604 = vmatprep.subr.bf16.mxu0 %v5516_v7  ;;  %4012 = vmatprep.subr.bf16.mxu1 %v5519_v8  ;;  %v5607_v7 = vld [vmem:[%s6302_s10 + $0x4ec] ss:$16 sps:$4 sm:$0xff]   ;;  %v5602_v8 = vld [vmem:[%s6302_s10 + $0x4e0] ss:$16 sps:$4 sm:$0xff]  }
  0x98   : > { %3605 = vmatpush1.bf16.msra.mxu0 %v5514_v9  ;;  %4013 = vmatpush1.bf16.msra.mxu1 %v5517_v10  ;;  %v5605_v9 = vld [vmem:[%s6302_s10 + $0x4e8] ss:$16 sps:$4 sm:$0xff]   ;;  %v5610_v10 = vld [vmem:[%s6302_s10 + $0x504] ss:$16 sps:$4 sm:$0xff]  }
  0x99   : > { %3606 = vmatprep.subr.bf16.mxu0 %v5522_v11  ;;  %4014 = vmatprep.subr.bf16.mxu1 %v5525_v12  ;;  %v5613_v11 = vld [vmem:[%s6302_s10 + $0x50c] ss:$16 sps:$4 sm:$0xff]   ;;  %v5608_v12 = vld [vmem:[%s6302_s10 + $0x500] ss:$16 sps:$4 sm:$0xff]  }
  0x9c   : > { %3607 = vmatpush1.bf16.msra.mxu0 %v5520_v13  ;;  %4015 = vmatpush1.bf16.msra.mxu1 %v5523_v14  ;;  %v5611_v13 = vld [vmem:[%s6302_s10 + $0x508] ss:$16 sps:$4 sm:$0xff]   ;;  %v5616_v14 = vld [vmem:[%s6302_s10 + $0x524] ss:$16 sps:$4 sm:$0xff]  }
  0x9d   : > { %3608 = vmatprep.subr.bf16.mxu0 %v5528_v15  ;;  %4016 = vmatprep.subr.bf16.mxu1 %v5531_v16  ;;  %v5619_v15 = vld [vmem:[%s6302_s10 + $0x52c] ss:$16 sps:$4 sm:$0xff]   ;;  %v5614_v16 = vld [vmem:[%s6302_s10 + $0x520] ss:$16 sps:$4 sm:$0xff]  }
  0xa0   : > { %3609 = vmatpush1.bf16.msra.mxu0 %v5526_v17  ;;  %4017 = vmatpush1.bf16.msra.mxu1 %v5529_v18  ;;  %v5617_v17 = vld [vmem:[%s6302_s10 + $0x528] ss:$16 sps:$4 sm:$0xff]   ;;  %v5622_v18 = vld [vmem:[%s6302_s10 + $0x544] ss:$16 sps:$4 sm:$0xff]  }
  0xa1   : > { %3610 = vmatprep.subr.bf16.mxu0 %v5534_v19  ;;  %4018 = vmatprep.subr.bf16.mxu1 %v5537_v20  ;;  %v5625_v19 = vld [vmem:[%s6302_s10 + $0x54c] ss:$16 sps:$4 sm:$0xff]   ;;  %v5620_v20 = vld [vmem:[%s6302_s10 + $0x540] ss:$16 sps:$4 sm:$0xff]  }
  0xa4   : > { %3611 = vmatpush1.bf16.msra.mxu0 %v5532_v21  ;;  %4019 = vmatpush1.bf16.msra.mxu1 %v5535_v22  ;;  %v5623_v21 = vld [vmem:[%s6302_s10 + $0x548] ss:$16 sps:$4 sm:$0xff]   ;;  %v5628_v22 = vld [vmem:[%s6302_s10 + $0x564] ss:$16 sps:$4 sm:$0xff]  }
  0xa5   : > { %3612 = vmatprep.subr.bf16.mxu0 %v5540_v23  ;;  %4020 = vmatprep.subr.bf16.mxu1 %v5543_v24  ;;  %v5631_v23 = vld [vmem:[%s6302_s10 + $0x56c] ss:$16 sps:$4 sm:$0xff]   ;;  %v5626_v24 = vld [vmem:[%s6302_s10 + $0x560] ss:$16 sps:$4 sm:$0xff]  }
  0xa8   : > { %3613 = vmatpush1.bf16.msra.mxu0 %v5538_v25  ;;  %4021 = vmatpush1.bf16.msra.mxu1 %v5541_v26  ;;  %v5629_v25 = vld [vmem:[%s6302_s10 + $0x568] ss:$16 sps:$4 sm:$0xff]   ;;  %v5634_v26 = vld [vmem:[%s6302_s10 + $0x584] ss:$16 sps:$4 sm:$0xff]  }
  0xa9   : > { %3614 = vmatprep.subr.bf16.mxu0 %v5548_v27  ;;  %4022 = vmatprep.subr.bf16.mxu1 %v5551_v28  ;;  %v5637_v27 = vld [vmem:[%s6302_s10 + $0x58c] ss:$16 sps:$4 sm:$0xff]   ;;  %v5632_v28 = vld [vmem:[%s6302_s10 + $0x580] ss:$16 sps:$4 sm:$0xff]  }
  0xac   : > { %3615 = vmatpush1.bf16.msra.mxu0 %v5546_v29  ;;  %4023 = vmatpush1.bf16.msra.mxu1 %v5549_v30  ;;  %v5635_v29 = vld [vmem:[%s6302_s10 + $0x588] ss:$16 sps:$4 sm:$0xff]   ;;  %v5640_v30 = vld [vmem:[%s6302_s10 + $0x5a4] ss:$16 sps:$4 sm:$0xff]  }
  0xad   : > { %3616 = vmatprep.subr.bf16.mxu0 %v5554_v31  ;;  %4024 = vmatprep.subr.bf16.mxu1 %v5557_v32  ;;  %v5643_v31 = vld [vmem:[%s6302_s10 + $0x5ac] ss:$16 sps:$4 sm:$0xff]   ;;  %v5638_v32 = vld [vmem:[%s6302_s10 + $0x5a0] ss:$16 sps:$4 sm:$0xff]  }
  0xb0   : > { %3617 = vmatpush1.bf16.msra.mxu0 %v5552_v33  ;;  %4025 = vmatpush1.bf16.msra.mxu1 %v5555_v34  ;;  %v5641_v33 = vld [vmem:[%s6302_s10 + $0x5a8] ss:$16 sps:$4 sm:$0xff]   ;;  %v5646_v34 = vld [vmem:[%s6302_s10 + $0x5c4] ss:$16 sps:$4 sm:$0xff]  }
  0xb1   : > { %3637 = vmatprep.subr.bf16.mxu0 %v5560_v35  ;;  %4045 = vmatprep.subr.bf16.mxu1 %v5563_v36  ;;  %v5649_v35 = vld [vmem:[%s6302_s10 + $0x5cc] ss:$16 sps:$4 sm:$0xff]   ;;  %v5644_v36 = vld [vmem:[%s6302_s10 + $0x5c0] ss:$16 sps:$4 sm:$0xff]  }
  0xb3   : > { %3619 = vmatmul.mubr.bf16.vlgmr.msra.gmra.mrb[0].mxu0 %v4733_v37  ;;  %4027 = vmatmul.mubr.bf16.vlgmr.msra.gmra.mrb[0].mxu1 %v4733_v37  ;;  %v5647_v37 = vld [vmem:[%s6302_s10 + $0x5c8] ss:$16 sps:$4 sm:$0xff]  }
  0xb4   : > { %3638 = vmatpush1.bf16.msra.mxu0 %v5558_v39  ;;  %4046 = vmatpush1.bf16.msra.mxu1 %v5561_v40  ;;  %v5655_v39 = vld [vmem:[%s6302_s10 + $0x5ec] ss:$16 sps:$4 sm:$0xff]   ;;  %v5650_v40 = vld [vmem:[%s6302_s10 + $0x5e0] ss:$16 sps:$4 sm:$0xff]  }
  0xb5   : > { %3639 = vmatprep.subr.bf16.mxu0 %v5566_v41  ;;  %4047 = vmatprep.subr.bf16.mxu1 %v5569_v42  ;;  %v5653_v41 = vld [vmem:[%s6302_s10 + $0x5e8] ss:$16 sps:$4 sm:$0xff]   ;;  %v5658_v42 = vld [vmem:[%s6302_s10 + $0x604] ss:$16 sps:$4 sm:$0xff]  }
  0xb6   : > { %3628 = vmatprep.mubr.bf16.mxu0 %v4750_v43  ;;  %4036 = vmatprep.mubr.bf16.mxu1 %v4750_v43  ;;  %v5661_v43 = vld [vmem:[%s6302_s10 + $0x60c] ss:$16 sps:$4 sm:$0xff]  }
  0xb8   : > { %3640 = vmatpush1.bf16.msra.mxu0 %v5564_v44  ;;  %4048 = vmatpush1.bf16.msra.mxu1 %v5567_v45  ;;  %v5656_v44 = vld [vmem:[%s6302_s10 + $0x600] ss:$16 sps:$4 sm:$0xff]   ;;  %v4735_v45 = vcombine.low %v6461_v50, %v6464_v51  ;;  %v5672_v50 = vld [vmem:[%s6302_s10 + $0x644] ss:$16 sps:$4 sm:$0xff]   ;;  %v5675_v51 = vld [vmem:[%s6302_s10 + $0x64c] ss:$16 sps:$4 sm:$0xff]  }
  0xb9   : > { %3641 = vmatprep.subr.bf16.mxu0 %v5574_v46  ;;  %4049 = vmatprep.subr.bf16.mxu1 %v5577_v47  ;;  %v5659_v46 = vld [vmem:[%s6302_s10 + $0x608] ss:$16 sps:$4 sm:$0xff]   ;;  %v321_v47 = vld [vmem:[%s6304_s11 + $0x90] sm:$0xff] }
  0xbb   : > { %3629 = vmatmul.mubr.bf16.gmra.mrb[8].mxu0 %v4749_v49  ;;  %4037 = vmatmul.mubr.bf16.gmra.mrb[8].mxu1 %v4749_v49  ;;  %v5667_v49 = vld [vmem:[%s6302_s10 + $0x62c] ss:$16 sps:$4 sm:$0xff]  }
  0xbc   : > { %3642 = vmatpush1.bf16.msra.mxu0 %v5572_v48  ;;  %4050 = vmatpush1.bf16.msra.mxu1 %v5575_v52  ;;  %v5664_v48 = vld [vmem:[%s6302_s10 + $0x624] ss:$16 sps:$4 sm:$0xff]   ;;  %v4752_v52 = vcombine.high %v321_v47, %v321_v47 }
  0xbd   : > { %3643 = vmatprep.subr.bf16.mxu0 %v5580_v53  ;;  %4051 = vmatprep.subr.bf16.mxu1 %v5583_v54  ;;  %v5662_v53 = vld [vmem:[%s6302_s10 + $0x620] ss:$16 sps:$4 sm:$0xff]   ;;  %v5665_v54 = vld [vmem:[%s6302_s10 + $0x628] ss:$16 sps:$4 sm:$0xff]  }
  0xbe   : > { %3669 = vmatprep.mubr.bf16.mxu0 %v4736_v55  ;;  %4077 = vmatprep.mubr.bf16.mxu1 %v4736_v55  ;;  %v5670_v55 = vld [vmem:[%s6302_s10 + $0x640] ss:$16 sps:$4 sm:$0xff]  }
  0xc0   : > { %3644 = vmatpush1.bf16.msra.mxu0 %v5578_v56  ;;  %4052 = vmatpush1.bf16.msra.mxu1 %v5581_v57  ;;  %v5673_v56 = vld [vmem:[%s6302_s10 + $0x648] ss:$16 sps:$4 sm:$0xff]   ;;  %v4751_v57 = vcombine.low %v321_v47, %v321_v47  ;;  %v5748_v47 = vld [vmem:[%s6302_s10 + $0x7e0] ss:$16 sps:$4 sm:$0xff]  }
  0xc1   : > { %3645 = vmatprep.subr.bf16.mxu0 %v5586_v58  ;;  %4053 = vmatprep.subr.bf16.mxu1 %v5589_v59  ;;  %v6537_v58 = vld [vmem:[%s6304_s11 + $0x18] sm:$0xff] }
  0xc2   : > { %v6540_v59 = vld [vmem:[%s6304_s11 + $0x58] sm:$0xff] }
  0xc4   : > { %3646 = vmatpush1.bf16.msra.mxu0 %v5584_v60  ;;  %4054 = vmatpush1.bf16.msra.mxu1 %v5587_v61  ;;  %v5678_v60 = vld [vmem:[%s6302_s10 + $0x664] ss:$16 sps:$4 sm:$0xff]   ;;  %v5681_v61 = vld [vmem:[%s6302_s10 + $0x66c] ss:$16 sps:$4 sm:$0xff]  }
  0xc5   : > { %3647 = vmatprep.subr.bf16.mxu0 %v5592_v62  ;;  %4055 = vmatprep.subr.bf16.mxu1 %v5595_v63  ;;  %v4738_v62 = vcombine.high %v6537_v58, %v6540_v59  ;;  %v5676_v63 = vld [vmem:[%s6302_s10 + $0x660] ss:$16 sps:$4 sm:$0xff]  }
  0xc8   : > { %3648 = vmatpush1.bf16.msra.mxu0 %v5590_v0  ;;  %4056 = vmatpush1.bf16.msra.mxu1 %v5593_v1  ;;  %v5679_v0 = vld [vmem:[%s6302_s10 + $0x668] ss:$16 sps:$4 sm:$0xff]   ;;  %v5684_v1 = vld [vmem:[%s6302_s10 + $0x684] ss:$16 sps:$4 sm:$0xff]  }
  0xc9   : > { %3649 = vmatprep.subr.bf16.mxu0 %v5598_v2  ;;  %4057 = vmatprep.subr.bf16.mxu1 %v5601_v3  ;;  %v5687_v2 = vld [vmem:[%s6302_s10 + $0x68c] ss:$16 sps:$4 sm:$0xff]   ;;  %v5682_v3 = vld [vmem:[%s6302_s10 + $0x680] ss:$16 sps:$4 sm:$0xff]  }
  0xcc   : > { %3650 = vmatpush1.bf16.msra.mxu0 %v5596_v4  ;;  %4058 = vmatpush1.bf16.msra.mxu1 %v5599_v5  ;;  %v5685_v4 = vld [vmem:[%s6302_s10 + $0x688] ss:$16 sps:$4 sm:$0xff]   ;;  %v5690_v5 = vld [vmem:[%s6302_s10 + $0x6a4] ss:$16 sps:$4 sm:$0xff]  }
  0xcd   : > { %3651 = vmatprep.subr.bf16.mxu0 %v5604_v6  ;;  %4059 = vmatprep.subr.bf16.mxu1 %v5607_v7  ;;  %v5693_v6 = vld [vmem:[%s6302_s10 + $0x6ac] ss:$16 sps:$4 sm:$0xff]   ;;  %v5688_v7 = vld [vmem:[%s6302_s10 + $0x6a0] ss:$16 sps:$4 sm:$0xff]  }
  0xd0   : > { %3652 = vmatpush1.bf16.msra.mxu0 %v5602_v8  ;;  %4060 = vmatpush1.bf16.msra.mxu1 %v5605_v9  ;;  %v5691_v8 = vld [vmem:[%s6302_s10 + $0x6a8] ss:$16 sps:$4 sm:$0xff]   ;;  %v5696_v9 = vld [vmem:[%s6302_s10 + $0x6c4] ss:$16 sps:$4 sm:$0xff]  }
  0xd1   : > { %3653 = vmatprep.subr.bf16.mxu0 %v5610_v10  ;;  %4061 = vmatprep.subr.bf16.mxu1 %v5613_v11  ;;  %v5699_v10 = vld [vmem:[%s6302_s10 + $0x6cc] ss:$16 sps:$4 sm:$0xff]   ;;  %v5694_v11 = vld [vmem:[%s6302_s10 + $0x6c0] ss:$16 sps:$4 sm:$0xff]  }
  0xd4   : > { %3654 = vmatpush1.bf16.msra.mxu0 %v5608_v12  ;;  %4062 = vmatpush1.bf16.msra.mxu1 %v5611_v13  ;;  %v5697_v12 = vld [vmem:[%s6302_s10 + $0x6c8] ss:$16 sps:$4 sm:$0xff]   ;;  %v5702_v13 = vld [vmem:[%s6302_s10 + $0x6e4] ss:$16 sps:$4 sm:$0xff]  }
  0xd5   : > { %3655 = vmatprep.subr.bf16.mxu0 %v5616_v14  ;;  %4063 = vmatprep.subr.bf16.mxu1 %v5619_v15  ;;  %v5705_v14 = vld [vmem:[%s6302_s10 + $0x6ec] ss:$16 sps:$4 sm:$0xff]   ;;  %v5700_v15 = vld [vmem:[%s6302_s10 + $0x6e0] ss:$16 sps:$4 sm:$0xff]  }
  0xd8   : > { %3656 = vmatpush1.bf16.msra.mxu0 %v5614_v16  ;;  %4064 = vmatpush1.bf16.msra.mxu1 %v5617_v17  ;;  %v5703_v16 = vld [vmem:[%s6302_s10 + $0x6e8] ss:$16 sps:$4 sm:$0xff]   ;;  %v5708_v17 = vld [vmem:[%s6302_s10 + $0x704] ss:$16 sps:$4 sm:$0xff]  }
  0xd9   : > { %3657 = vmatprep.subr.bf16.mxu0 %v5622_v18  ;;  %4065 = vmatprep.subr.bf16.mxu1 %v5625_v19  ;;  %v5711_v18 = vld [vmem:[%s6302_s10 + $0x70c] ss:$16 sps:$4 sm:$0xff]   ;;  %v5706_v19 = vld [vmem:[%s6302_s10 + $0x700] ss:$16 sps:$4 sm:$0xff]  }
  0xdc   : > { %3658 = vmatpush1.bf16.msra.mxu0 %v5620_v20  ;;  %4066 = vmatpush1.bf16.msra.mxu1 %v5623_v21  ;;  %v5709_v20 = vld [vmem:[%s6302_s10 + $0x708] ss:$16 sps:$4 sm:$0xff]   ;;  %v5714_v21 = vld [vmem:[%s6302_s10 + $0x724] ss:$16 sps:$4 sm:$0xff]  }
  0xdd   : > { %3659 = vmatprep.subr.bf16.mxu0 %v5628_v22  ;;  %4067 = vmatprep.subr.bf16.mxu1 %v5631_v23  ;;  %v5717_v22 = vld [vmem:[%s6302_s10 + $0x72c] ss:$16 sps:$4 sm:$0xff]   ;;  %v5712_v23 = vld [vmem:[%s6302_s10 + $0x720] ss:$16 sps:$4 sm:$0xff]  }
  0xe0   : > { %3660 = vmatpush1.bf16.msra.mxu0 %v5626_v24  ;;  %4068 = vmatpush1.bf16.msra.mxu1 %v5629_v25  ;;  %v5715_v24 = vld [vmem:[%s6302_s10 + $0x728] ss:$16 sps:$4 sm:$0xff]   ;;  %v5720_v25 = vld [vmem:[%s6302_s10 + $0x744] ss:$16 sps:$4 sm:$0xff]  }
  0xe1   : > { %3661 = vmatprep.subr.bf16.mxu0 %v5634_v26  ;;  %4069 = vmatprep.subr.bf16.mxu1 %v5637_v27  ;;  %v5723_v26 = vld [vmem:[%s6302_s10 + $0x74c] ss:$16 sps:$4 sm:$0xff]   ;;  %v5718_v27 = vld [vmem:[%s6302_s10 + $0x740] ss:$16 sps:$4 sm:$0xff]  }
  0xe4   : > { %3662 = vmatpush1.bf16.msra.mxu0 %v5632_v28  ;;  %4070 = vmatpush1.bf16.msra.mxu1 %v5635_v29  ;;  %v5721_v28 = vld [vmem:[%s6302_s10 + $0x748] ss:$16 sps:$4 sm:$0xff]   ;;  %v5726_v29 = vld [vmem:[%s6302_s10 + $0x764] ss:$16 sps:$4 sm:$0xff]  }
  0xe5   : > { %3663 = vmatprep.subr.bf16.mxu0 %v5640_v30  ;;  %4071 = vmatprep.subr.bf16.mxu1 %v5643_v31  ;;  %v5729_v30 = vld [vmem:[%s6302_s10 + $0x76c] ss:$16 sps:$4 sm:$0xff]   ;;  %v5724_v31 = vld [vmem:[%s6302_s10 + $0x760] ss:$16 sps:$4 sm:$0xff]  }
  0xe8   : > { %3664 = vmatpush1.bf16.msra.mxu0 %v5638_v32  ;;  %4072 = vmatpush1.bf16.msra.mxu1 %v5641_v33  ;;  %v5727_v32 = vld [vmem:[%s6302_s10 + $0x768] ss:$16 sps:$4 sm:$0xff]   ;;  %v5732_v33 = vld [vmem:[%s6302_s10 + $0x784] ss:$16 sps:$4 sm:$0xff]  }
  0xe9   : > { %3665 = vmatprep.subr.bf16.mxu0 %v5646_v34  ;;  %4073 = vmatprep.subr.bf16.mxu1 %v5649_v35  ;;  %v5735_v34 = vld [vmem:[%s6302_s10 + $0x78c] ss:$16 sps:$4 sm:$0xff]   ;;  %v5730_v35 = vld [vmem:[%s6302_s10 + $0x780] ss:$16 sps:$4 sm:$0xff]  }
  0xec   : > { %3666 = vmatpush1.bf16.msra.mxu0 %v5644_v36  ;;  %4074 = vmatpush1.bf16.msra.mxu1 %v5647_v37  ;;  %v5733_v36 = vld [vmem:[%s6302_s10 + $0x788] ss:$16 sps:$4 sm:$0xff]   ;;  %v5738_v37 = vld [vmem:[%s6302_s10 + $0x7a4] ss:$16 sps:$4 sm:$0xff]  }
  0xed   : > { %3667 = vmatprep.subr.bf16.mxu0 %v5652_v38  ;;  %4075 = vmatprep.subr.bf16.mxu1 %v5655_v39  ;;  %v5741_v38 = vld [vmem:[%s6302_s10 + $0x7ac] ss:$16 sps:$4 sm:$0xff]   ;;  %v5736_v39 = vld [vmem:[%s6302_s10 + $0x7a0] ss:$16 sps:$4 sm:$0xff]  }
  0xf0   : > { %3668 = vmatpush1.bf16.msra.mxu0 %v5650_v40  ;;  %4076 = vmatpush1.bf16.msra.mxu1 %v5653_v41  ;;  %v5739_v40 = vld [vmem:[%s6302_s10 + $0x7a8] ss:$16 sps:$4 sm:$0xff]   ;;  %v5744_v41 = vld [vmem:[%s6302_s10 + $0x7c4] ss:$16 sps:$4 sm:$0xff]  }
  0xf1   : > { %3688 = vmatprep.subr.bf16.mxu0 %v5658_v42  ;;  %4096 = vmatprep.subr.bf16.mxu1 %v5661_v43  ;;  %v5747_v42 = vld [vmem:[%s6302_s10 + $0x7cc] ss:$16 sps:$4 sm:$0xff]   ;;  %v5742_v43 = vld [vmem:[%s6302_s10 + $0x7c0] ss:$16 sps:$4 sm:$0xff]  }
  0xf3   : > { %3670 = vmatmul.mubr.bf16.vlgmr.msra.gmra.mrb[0].mxu0 %v4735_v45  ;;  %4078 = vmatmul.mubr.bf16.vlgmr.msra.gmra.mrb[0].mxu1 %v4735_v45  ;;  %v5750_v45 = vld [vmem:[%s6302_s10 + $0x7e4] ss:$16 sps:$4 sm:$0xff]  }
  0xf4   : > { %3689 = vmatpush1.bf16.msra.mxu0 %v5656_v44  ;;  %4097 = vmatpush1.bf16.msra.mxu1 %v5659_v46  ;;  %v5745_v44 = vld [vmem:[%s6302_s10 + $0x7c8] ss:$16 sps:$4 sm:$0xff]   ;;  %v5753_v46 = vld [vmem:[%s6302_s10 + $0x7ec] ss:$16 sps:$4 sm:$0xff]  }
  0xf5   : > { %3690 = vmatprep.subr.bf16.mxu0 %v5664_v48  ;;  %4098 = vmatprep.subr.bf16.mxu1 %v5667_v49  ;;  %v5751_v48 = vld [vmem:[%s6302_s10 + $0x7e8] ss:$16 sps:$4 sm:$0xff]   ;;  %v5756_v49 = vld [vmem:[%s6302_s10 + $0x804] ss:$16 sps:$4 sm:$0xff]  }
  0xf6   : > { %3679 = vmatprep.mubr.bf16.mxu0 %v4752_v52  ;;  %4087 = vmatprep.mubr.bf16.mxu1 %v4752_v52  ;;  %v5759_v52 = vld [vmem:[%s6302_s10 + $0x80c] ss:$16 sps:$4 sm:$0xff]  }
  0xf8   : > { %3691 = vmatpush1.bf16.msra.mxu0 %v5662_v53  ;;  %4099 = vmatpush1.bf16.msra.mxu1 %v5665_v54  ;;  %v4737_v53 = vcombine.low %v6537_v58, %v6540_v59  ;;  %v5754_v54 = vld [vmem:[%s6302_s10 + $0x800] ss:$16 sps:$4 sm:$0xff]   ;;  %v5763_v59 = vld [vmem:[%s6302_s10 + $0x828] ss:$16 sps:$4 sm:$0xff]  }
  0xf9   : > { %3692 = vmatprep.subr.bf16.mxu0 %v5672_v50  ;;  %4100 = vmatprep.subr.bf16.mxu1 %v5675_v51  ;;  %v322_v50 = vld [vmem:[%s6304_s11 + $0x98] sm:$0xff]  ;;  %v5760_v58 = vld [vmem:[%s6302_s10 + $0x820] ss:$16 sps:$4 sm:$0xff]  }
  0xfa   : > { %v5757_v51 = vld [vmem:[%s6302_s10 + $0x808] ss:$16 sps:$4 sm:$0xff]  }
  0xfb   : > { %3680 = vmatmul.mubr.bf16.gmra.mrb[12].mxu0 %v4751_v57  ;;  %4088 = vmatmul.mubr.bf16.gmra.mrb[12].mxu1 %v4751_v57  ;;  %v4754_v57 = vcombine.high %v322_v50, %v322_v50 }
  0xfc   : > { %3693 = vmatpush1.bf16.msra.mxu0 %v5670_v55  ;;  %4101 = vmatpush1.bf16.msra.mxu1 %v5673_v56  ;;  %v5762_v55 = vld [vmem:[%s6302_s10 + $0x824] ss:$16 sps:$4 sm:$0xff]   ;;  %v5765_v56 = vld [vmem:[%s6302_s10 + $0x82c] ss:$16 sps:$4 sm:$0xff]  }
  0xfd   : > { %3694 = vmatprep.subr.bf16.mxu0 %v5678_v60  ;;  %4102 = vmatprep.subr.bf16.mxu1 %v5681_v61  ;;  %v5770_v60 = vld [vmem:[%s6302_s10 + $0x844] ss:$16 sps:$4 sm:$0xff]   ;;  %v5773_v61 = vld [vmem:[%s6302_s10 + $0x84c] ss:$16 sps:$4 sm:$0xff]  }
  0xfe   : > { %3720 = vmatprep.mubr.bf16.mxu0 %v4738_v62  ;;  %4128 = vmatprep.mubr.bf16.mxu1 %v4738_v62  ;;  %v5768_v62 = vld [vmem:[%s6302_s10 + $0x840] ss:$16 sps:$4 sm:$0xff]  }
 0x100   : > { %3695 = vmatpush1.bf16.msra.mxu0 %v5676_v63  ;;  %4103 = vmatpush1.bf16.msra.mxu1 %v5679_v0  ;;  %v6611_v63 = vld [vmem:[%s6304_s11 + $0x20] sm:$0xff]  ;;  %v4753_v0 = vcombine.low %v322_v50, %v322_v50  ;;  %v5839_v50 = vld [vmem:[%s6302_s10 + $0x9ac] ss:$16 sps:$4 sm:$0xff]  }
 0x101   : > { %3696 = vmatprep.subr.bf16.mxu0 %v5684_v1  ;;  %4104 = vmatprep.subr.bf16.mxu1 %v5687_v2  ;;  %v6614_v1 = vld [vmem:[%s6304_s11 + $0x60] sm:$0xff]  ;;  %v5771_v2 = vld [vmem:[%s6302_s10 + $0x848] ss:$16 sps:$4 sm:$0xff]  }
 0x104   : > { %3697 = vmatpush1.bf16.msra.mxu0 %v5682_v3  ;;  %4105 = vmatpush1.bf16.msra.mxu1 %v5685_v4  ;;  %v5776_v3 = vld [vmem:[%s6302_s10 + $0x864] ss:$16 sps:$4 sm:$0xff]   ;;  %v5779_v4 = vld [vmem:[%s6302_s10 + $0x86c] ss:$16 sps:$4 sm:$0xff]  }
 0x105   : > { %3698 = vmatprep.subr.bf16.mxu0 %v5690_v5  ;;  %4106 = vmatprep.subr.bf16.mxu1 %v5693_v6  ;;  %v4740_v5 = vcombine.high %v6611_v63, %v6614_v1  ;;  %v5774_v6 = vld [vmem:[%s6302_s10 + $0x860] ss:$16 sps:$4 sm:$0xff]  }
 0x108   : > { %3699 = vmatpush1.bf16.msra.mxu0 %v5688_v7  ;;  %4107 = vmatpush1.bf16.msra.mxu1 %v5691_v8  ;;  %v5777_v7 = vld [vmem:[%s6302_s10 + $0x868] ss:$16 sps:$4 sm:$0xff]   ;;  %v5782_v8 = vld [vmem:[%s6302_s10 + $0x884] ss:$16 sps:$4 sm:$0xff]  }
 0x109   : > { %3700 = vmatprep.subr.bf16.mxu0 %v5696_v9  ;;  %4108 = vmatprep.subr.bf16.mxu1 %v5699_v10  ;;  %v5785_v9 = vld [vmem:[%s6302_s10 + $0x88c] ss:$16 sps:$4 sm:$0xff]   ;;  %v5780_v10 = vld [vmem:[%s6302_s10 + $0x880] ss:$16 sps:$4 sm:$0xff]  }
 0x10c   : > { %3701 = vmatpush1.bf16.msra.mxu0 %v5694_v11  ;;  %4109 = vmatpush1.bf16.msra.mxu1 %v5697_v12  ;;  %v5783_v11 = vld [vmem:[%s6302_s10 + $0x888] ss:$16 sps:$4 sm:$0xff]   ;;  %v5788_v12 = vld [vmem:[%s6302_s10 + $0x8a4] ss:$16 sps:$4 sm:$0xff]  }
 0x10d   : > { %3702 = vmatprep.subr.bf16.mxu0 %v5702_v13  ;;  %4110 = vmatprep.subr.bf16.mxu1 %v5705_v14  ;;  %v5791_v13 = vld [vmem:[%s6302_s10 + $0x8ac] ss:$16 sps:$4 sm:$0xff]   ;;  %v5786_v14 = vld [vmem:[%s6302_s10 + $0x8a0] ss:$16 sps:$4 sm:$0xff]  }
 0x110   : > { %3703 = vmatpush1.bf16.msra.mxu0 %v5700_v15  ;;  %4111 = vmatpush1.bf16.msra.mxu1 %v5703_v16  ;;  %v5789_v15 = vld [vmem:[%s6302_s10 + $0x8a8] ss:$16 sps:$4 sm:$0xff]   ;;  %v5794_v16 = vld [vmem:[%s6302_s10 + $0x8c4] ss:$16 sps:$4 sm:$0xff]  }
 0x111   : > { %3704 = vmatprep.subr.bf16.mxu0 %v5708_v17  ;;  %4112 = vmatprep.subr.bf16.mxu1 %v5711_v18  ;;  %v5797_v17 = vld [vmem:[%s6302_s10 + $0x8cc] ss:$16 sps:$4 sm:$0xff]   ;;  %v5792_v18 = vld [vmem:[%s6302_s10 + $0x8c0] ss:$16 sps:$4 sm:$0xff]  }
 0x114   : > { %3705 = vmatpush1.bf16.msra.mxu0 %v5706_v19  ;;  %4113 = vmatpush1.bf16.msra.mxu1 %v5709_v20  ;;  %v5795_v19 = vld [vmem:[%s6302_s10 + $0x8c8] ss:$16 sps:$4 sm:$0xff]   ;;  %v5800_v20 = vld [vmem:[%s6302_s10 + $0x8e4] ss:$16 sps:$4 sm:$0xff]  }
 0x115   : > { %3706 = vmatprep.subr.bf16.mxu0 %v5714_v21  ;;  %4114 = vmatprep.subr.bf16.mxu1 %v5717_v22  ;;  %v5803_v21 = vld [vmem:[%s6302_s10 + $0x8ec] ss:$16 sps:$4 sm:$0xff]   ;;  %v5798_v22 = vld [vmem:[%s6302_s10 + $0x8e0] ss:$16 sps:$4 sm:$0xff]  }
 0x118   : > { %3707 = vmatpush1.bf16.msra.mxu0 %v5712_v23  ;;  %4115 = vmatpush1.bf16.msra.mxu1 %v5715_v24  ;;  %v5801_v23 = vld [vmem:[%s6302_s10 + $0x8e8] ss:$16 sps:$4 sm:$0xff]   ;;  %v5806_v24 = vld [vmem:[%s6302_s10 + $0x904] ss:$16 sps:$4 sm:$0xff]  }
 0x119   : > { %3708 = vmatprep.subr.bf16.mxu0 %v5720_v25  ;;  %4116 = vmatprep.subr.bf16.mxu1 %v5723_v26  ;;  %v5809_v25 = vld [vmem:[%s6302_s10 + $0x90c] ss:$16 sps:$4 sm:$0xff]   ;;  %v5804_v26 = vld [vmem:[%s6302_s10 + $0x900] ss:$16 sps:$4 sm:$0xff]  }
 0x11c   : > { %3709 = vmatpush1.bf16.msra.mxu0 %v5718_v27  ;;  %4117 = vmatpush1.bf16.msra.mxu1 %v5721_v28  ;;  %v5807_v27 = vld [vmem:[%s6302_s10 + $0x908] ss:$16 sps:$4 sm:$0xff]   ;;  %v5812_v28 = vld [vmem:[%s6302_s10 + $0x924] ss:$16 sps:$4 sm:$0xff]  }
 0x11d   : > { %3710 = vmatprep.subr.bf16.mxu0 %v5726_v29  ;;  %4118 = vmatprep.subr.bf16.mxu1 %v5729_v30  ;;  %v5815_v29 = vld [vmem:[%s6302_s10 + $0x92c] ss:$16 sps:$4 sm:$0xff]   ;;  %v5810_v30 = vld [vmem:[%s6302_s10 + $0x920] ss:$16 sps:$4 sm:$0xff]  }
 0x120   : > { %3711 = vmatpush1.bf16.msra.mxu0 %v5724_v31  ;;  %4119 = vmatpush1.bf16.msra.mxu1 %v5727_v32  ;;  %v5813_v31 = vld [vmem:[%s6302_s10 + $0x928] ss:$16 sps:$4 sm:$0xff]   ;;  %v5818_v32 = vld [vmem:[%s6302_s10 + $0x944] ss:$16 sps:$4 sm:$0xff]  }
 0x121   : > { %3712 = vmatprep.subr.bf16.mxu0 %v5732_v33  ;;  %4120 = vmatprep.subr.bf16.mxu1 %v5735_v34  ;;  %v5821_v33 = vld [vmem:[%s6302_s10 + $0x94c] ss:$16 sps:$4 sm:$0xff]   ;;  %v5816_v34 = vld [vmem:[%s6302_s10 + $0x940] ss:$16 sps:$4 sm:$0xff]  }
 0x124   : > { %3713 = vmatpush1.bf16.msra.mxu0 %v5730_v35  ;;  %4121 = vmatpush1.bf16.msra.mxu1 %v5733_v36  ;;  %v5819_v35 = vld [vmem:[%s6302_s10 + $0x948] ss:$16 sps:$4 sm:$0xff]   ;;  %v5824_v36 = vld [vmem:[%s6302_s10 + $0x964] ss:$16 sps:$4 sm:$0xff]  }
 0x125   : > { %3714 = vmatprep.subr.bf16.mxu0 %v5738_v37  ;;  %4122 = vmatprep.subr.bf16.mxu1 %v5741_v38  ;;  %v5827_v37 = vld [vmem:[%s6302_s10 + $0x96c] ss:$16 sps:$4 sm:$0xff]  }
 0x128   : > { %3715 = vmatpush1.bf16.msra.mxu0 %v5736_v39  ;;  %4123 = vmatpush1.bf16.msra.mxu1 %v5739_v40 }
 0x129   : > { %3716 = vmatprep.subr.bf16.mxu0 %v5744_v41  ;;  %4124 = vmatprep.subr.bf16.mxu1 %v5747_v42 }
 0x12c   : > { %3717 = vmatpush1.bf16.msra.mxu0 %v5742_v43  ;;  %4125 = vmatpush1.bf16.msra.mxu1 %v5745_v44  ;;  %v5822_v44 = vld [vmem:[%s6302_s10 + $0x960] ss:$16 sps:$4 sm:$0xff]  }
 0x12d   : > { %3718 = vmatprep.subr.bf16.mxu0 %v5750_v45  ;;  %4126 = vmatprep.subr.bf16.mxu1 %v5753_v46  ;;  %v5825_v45 = vld [vmem:[%s6302_s10 + $0x968] ss:$16 sps:$4 sm:$0xff]  }
 0x130   : > { %3719 = vmatpush1.bf16.msra.mxu0 %v5748_v47  ;;  %4127 = vmatpush1.bf16.msra.mxu1 %v5751_v48  ;;  %v5830_v48 = vld [vmem:[%s6302_s10 + $0x984] ss:$16 sps:$4 sm:$0xff]  }
 0x131   : > { %3739 = vmatprep.subr.bf16.mxu0 %v5756_v49  ;;  %4147 = vmatprep.subr.bf16.mxu1 %v5759_v52  ;;  %v5833_v49 = vld [vmem:[%s6302_s10 + $0x98c] ss:$16 sps:$4 sm:$0xff]   ;;  %v5828_v52 = vld [vmem:[%s6302_s10 + $0x980] ss:$16 sps:$4 sm:$0xff]  }
 0x133   : > { %3721 = vmatmul.mubr.bf16.vlgmr.msra.gmra.mrb[0].mxu0 %v4737_v53  ;;  %4129 = vmatmul.mubr.bf16.vlgmr.msra.gmra.mrb[0].mxu1 %v4737_v53  ;;  %v5831_v53 = vld [vmem:[%s6302_s10 + $0x988] ss:$16 sps:$4 sm:$0xff]  }
 0x134   : > { %3740 = vmatpush1.bf16.msra.mxu0 %v5754_v54  ;;  %4148 = vmatpush1.bf16.msra.mxu1 %v5757_v51  ;;  %v5836_v54 = vld [vmem:[%s6302_s10 + $0x9a4] ss:$16 sps:$4 sm:$0xff]   ;;  %v5834_v51 = vld [vmem:[%s6302_s10 + $0x9a0] ss:$16 sps:$4 sm:$0xff]  }
 0x135   : > { %3741 = vmatprep.subr.bf16.mxu0 %v5762_v55  ;;  %4149 = vmatprep.subr.bf16.mxu1 %v5765_v56  ;;  %v5837_v55 = vld [vmem:[%s6302_s10 + $0x9a8] ss:$16 sps:$4 sm:$0xff]   ;;  %v5842_v56 = vld [vmem:[%s6302_s10 + $0x9c4] ss:$16 sps:$4 sm:$0xff]  }
 0x136   : > { %3730 = vmatprep.mubr.bf16.mxu0 %v4754_v57  ;;  %4138 = vmatprep.mubr.bf16.mxu1 %v4754_v57  ;;  %v5845_v57 = vld [vmem:[%s6302_s10 + $0x9cc] ss:$16 sps:$4 sm:$0xff]  }
 0x138   : > { %3742 = vmatpush1.bf16.msra.mxu0 %v5760_v58  ;;  %4150 = vmatpush1.bf16.msra.mxu1 %v5763_v59  ;;  %v5840_v58 = vld [vmem:[%s6302_s10 + $0x9c0] ss:$16 sps:$4 sm:$0xff]   ;;  %v5843_v59 = vld [vmem:[%s6302_s10 + $0x9c8] ss:$16 sps:$4 sm:$0xff]  }
 0x139   : > { %3743 = vmatprep.subr.bf16.mxu0 %v5770_v60  ;;  %4151 = vmatprep.subr.bf16.mxu1 %v5773_v61  ;;  %v5848_v60 = vld [vmem:[%s6302_s10 + $0x9e4] ss:$16 sps:$4 sm:$0xff]   ;;  %v5851_v61 = vld [vmem:[%s6302_s10 + $0x9ec] ss:$16 sps:$4 sm:$0xff]  }
 0x13b   : > { %3731 = vmatmul.mubr.bf16.gmra.mrb[16].mxu0 %v4753_v0  ;;  %4139 = vmatmul.mubr.bf16.gmra.mrb[16].mxu1 %v4753_v0  ;;  %v5849_v0 = vld [vmem:[%s6302_s10 + $0x9e8] ss:$16 sps:$4 sm:$0xff]  }
 0x13c   : > { %3744 = vmatpush1.bf16.msra.mxu0 %v5768_v62  ;;  %4152 = vmatpush1.bf16.msra.mxu1 %v5771_v2  ;;  %v5846_v62 = vld [vmem:[%s6302_s10 + $0x9e0] ss:$16 sps:$4 sm:$0xff]   ;;  %v5854_v2 = vld [vmem:[%s6302_s10 + $0xa04] ss:$16 sps:$4 sm:$0xff]  }
 0x13d   : > { %3745 = vmatprep.subr.bf16.mxu0 %v5776_v3  ;;  %4153 = vmatprep.subr.bf16.mxu1 %v5779_v4  ;;  %v5857_v3 = vld [vmem:[%s6302_s10 + $0xa0c] ss:$16 sps:$4 sm:$0xff]   ;;  %v5852_v4 = vld [vmem:[%s6302_s10 + $0xa00] ss:$16 sps:$4 sm:$0xff]  }
 0x13e   : > { %3771 = vmatprep.mubr.bf16.mxu0 %v4740_v5  ;;  %4179 = vmatprep.mubr.bf16.mxu1 %v4740_v5  ;;  %v4739_v5 = vcombine.low %v6611_v63, %v6614_v1  ;;  %v5861_v63 = vld [vmem:[%s6302_s10 + $0xa28] ss:$16 sps:$4 sm:$0xff]   ;;  %v5868_v1 = vld [vmem:[%s6302_s10 + $0xa44] ss:$16 sps:$4 sm:$0xff]  }
 0x140   : > { %3746 = vmatpush1.bf16.msra.mxu0 %v5774_v6  ;;  %4154 = vmatpush1.bf16.msra.mxu1 %v5777_v7  ;;  %v5855_v6 = vld [vmem:[%s6302_s10 + $0xa08] ss:$16 sps:$4 sm:$0xff]   ;;  %v323_v7 = vld [vmem:[%s6304_s11 + $0xa0] sm:$0xff] }
 0x141   : > { %3747 = vmatprep.subr.bf16.mxu0 %v5782_v8  ;;  %4155 = vmatprep.subr.bf16.mxu1 %v5785_v9  ;;  %v5860_v8 = vld [vmem:[%s6302_s10 + $0xa24] ss:$16 sps:$4 sm:$0xff]   ;;  %v5863_v9 = vld [vmem:[%s6302_s10 + $0xa2c] ss:$16 sps:$4 sm:$0xff]  }
 0x144   : > { %3748 = vmatpush1.bf16.msra.mxu0 %v5780_v10  ;;  %4156 = vmatpush1.bf16.msra.mxu1 %v5783_v11  ;;  %v5858_v10 = vld [vmem:[%s6302_s10 + $0xa20] ss:$16 sps:$4 sm:$0xff]   ;;  %v4756_v11 = vcombine.high %v323_v7, %v323_v7 }
 0x145   : > { %3749 = vmatprep.subr.bf16.mxu0 %v5788_v12  ;;  %4157 = vmatprep.subr.bf16.mxu1 %v5791_v13  ;;  %v5871_v12 = vld [vmem:[%s6302_s10 + $0xa4c] ss:$16 sps:$4 sm:$0xff]  }
 0x146   : > { %v6693_v13 = vld [vmem:[%s6304_s11 + $0x28] sm:$0xff] }
 0x148   : > { %3750 = vmatpush1.bf16.msra.mxu0 %v5786_v14  ;;  %4158 = vmatpush1.bf16.msra.mxu1 %v5789_v15  ;;  %v5866_v14 = vld [vmem:[%s6302_s10 + $0xa40] ss:$16 sps:$4 sm:$0xff]   ;;  %v5869_v15 = vld [vmem:[%s6302_s10 + $0xa48] ss:$16 sps:$4 sm:$0xff]  }
 0x149   : > { %3751 = vmatprep.subr.bf16.mxu0 %v5794_v16  ;;  %4159 = vmatprep.subr.bf16.mxu1 %v5797_v17  ;;  %v4755_v16 = vcombine.low %v323_v7, %v323_v7  ;;  %v6698_v17 = vld [vmem:[%s6304_s11 + $0x68] sm:$0xff]  ;;  %v5926_v7 = vld [vmem:[%s6302_s10 + $0xb80] ss:$16 sps:$4 sm:$0xff]  }
 0x14c   : > { %3752 = vmatpush1.bf16.msra.mxu0 %v5792_v18  ;;  %4160 = vmatpush1.bf16.msra.mxu1 %v5795_v19  ;;  %v5874_v18 = vld [vmem:[%s6302_s10 + $0xa64] ss:$16 sps:$4 sm:$0xff]   ;;  %v5877_v19 = vld [vmem:[%s6302_s10 + $0xa6c] ss:$16 sps:$4 sm:$0xff]  }
 0x14d   : > { %3753 = vmatprep.subr.bf16.mxu0 %v5800_v20  ;;  %4161 = vmatprep.subr.bf16.mxu1 %v5803_v21  ;;  %v4742_v20 = vcombine.high %v6693_v13, %v6698_v17  ;;  %v5872_v21 = vld [vmem:[%s6302_s10 + $0xa60] ss:$16 sps:$4 sm:$0xff]  }
 0x14e   : > { %v6653_v38 = vpop.f32.mrb[4].mxu0  ;;  %v6655_v39 = vpop.f32.mrb[4].mxu1 }
 0x14f   : > { %v6657_v40 = vpop.f32.mrb[5].mxu0  ;;  %v6659_v41 = vpop.f32.mrb[5].mxu1 }
 0x150   : > { %3754 = vmatpush1.bf16.msra.mxu0 %v5798_v22  ;;  %4162 = vmatpush1.bf16.msra.mxu1 %v5801_v23  ;;  %v3583_v42 = vpop.f32.mrb[6].mxu0  ;;  %v3991_v43 = vpop.f32.mrb[6].mxu1  ;;  %v5875_v22 = vld [vmem:[%s6302_s10 + $0xa68] ss:$16 sps:$4 sm:$0xff]   ;;  %v5880_v23 = vld [vmem:[%s6302_s10 + $0xa84] ss:$16 sps:$4 sm:$0xff]  }
 0x151   : > { %3755 = vmatprep.subr.bf16.mxu0 %v5806_v24  ;;  %4163 = vmatprep.subr.bf16.mxu1 %v5809_v25  ;;  %v3584_v46 = vpop.f32.mrb[7].mxu0  ;;  %v3992_v47 = vpop.f32.mrb[7].mxu1  ;;  %v5883_v24 = vld [vmem:[%s6302_s10 + $0xa8c] ss:$16 sps:$4 sm:$0xff]   ;;  %v5878_v25 = vld [vmem:[%s6302_s10 + $0xa80] ss:$16 sps:$4 sm:$0xff]  }
 0x152   : > { %v5899_v42 = vld [vmem:[%s6302_s10 + $0xae8] ss:$16 sps:$4 sm:$0xff]   ;;  %v5904_v43 = vld [vmem:[%s6302_s10 + $0xb04] ss:$16 sps:$4 sm:$0xff]  }
 0x154   : > { %3756 = vmatpush1.bf16.msra.mxu0 %v5804_v26  ;;  %4164 = vmatpush1.bf16.msra.mxu1 %v5807_v27  ;;  %v5881_v26 = vld [vmem:[%s6302_s10 + $0xa88] ss:$16 sps:$4 sm:$0xff]   ;;  %v5886_v27 = vld [vmem:[%s6302_s10 + $0xaa4] ss:$16 sps:$4 sm:$0xff]  }
 0x155   : > { %3757 = vmatprep.subr.bf16.mxu0 %v5812_v28  ;;  %4165 = vmatprep.subr.bf16.mxu1 %v5815_v29  ;;  %v5889_v28 = vld [vmem:[%s6302_s10 + $0xaac] ss:$16 sps:$4 sm:$0xff]   ;;  %v5884_v29 = vld [vmem:[%s6302_s10 + $0xaa0] ss:$16 sps:$4 sm:$0xff]  }
 0x158   : > { %3758 = vmatpush1.bf16.msra.mxu0 %v5810_v30  ;;  %4166 = vmatpush1.bf16.msra.mxu1 %v5813_v31  ;;  %v5887_v30 = vld [vmem:[%s6302_s10 + $0xaa8] ss:$16 sps:$4 sm:$0xff]   ;;  %v5892_v31 = vld [vmem:[%s6302_s10 + $0xac4] ss:$16 sps:$4 sm:$0xff]  }
 0x159   : > { %3759 = vmatprep.subr.bf16.mxu0 %v5818_v32  ;;  %4167 = vmatprep.subr.bf16.mxu1 %v5821_v33  ;;  %v5895_v32 = vld [vmem:[%s6302_s10 + $0xacc] ss:$16 sps:$4 sm:$0xff]   ;;  %v5890_v33 = vld [vmem:[%s6302_s10 + $0xac0] ss:$16 sps:$4 sm:$0xff]  }
 0x15c   : > { %3760 = vmatpush1.bf16.msra.mxu0 %v5816_v34  ;;  %4168 = vmatpush1.bf16.msra.mxu1 %v5819_v35  ;;  %v5893_v34 = vld [vmem:[%s6302_s10 + $0xac8] ss:$16 sps:$4 sm:$0xff]   ;;  %v5898_v35 = vld [vmem:[%s6302_s10 + $0xae4] ss:$16 sps:$4 sm:$0xff]  }
 0x15d   : > { %3761 = vmatprep.subr.bf16.mxu0 %v5824_v36  ;;  %4169 = vmatprep.subr.bf16.mxu1 %v5827_v37  ;;  %v5901_v36 = vld [vmem:[%s6302_s10 + $0xaec] ss:$16 sps:$4 sm:$0xff]   ;;  %v5896_v37 = vld [vmem:[%s6302_s10 + $0xae0] ss:$16 sps:$4 sm:$0xff]  }
 0x160   : > { %3762 = vmatpush1.bf16.msra.mxu0 %v5822_v44  ;;  %4170 = vmatpush1.bf16.msra.mxu1 %v5825_v45  ;;  %v5907_v44 = vld [vmem:[%s6302_s10 + $0xb0c] ss:$16 sps:$4 sm:$0xff]  }
 0x161   : > { %3763 = vmatprep.subr.bf16.mxu0 %v5830_v48  ;;  %4171 = vmatprep.subr.bf16.mxu1 %v5833_v49 }
 0x164   : > { %3764 = vmatpush1.bf16.msra.mxu0 %v5828_v52  ;;  %4172 = vmatpush1.bf16.msra.mxu1 %v5831_v53 }
 0x165   : > { %3765 = vmatprep.subr.bf16.mxu0 %v5836_v54  ;;  %4173 = vmatprep.subr.bf16.mxu1 %v5839_v50  ;;  %v5902_v50 = vld [vmem:[%s6302_s10 + $0xb00] ss:$16 sps:$4 sm:$0xff]  }
 0x168   : > { %3766 = vmatpush1.bf16.msra.mxu0 %v5834_v51  ;;  %4174 = vmatpush1.bf16.msra.mxu1 %v5837_v55  ;;  %v5905_v51 = vld [vmem:[%s6302_s10 + $0xb08] ss:$16 sps:$4 sm:$0xff]  }
 0x169   : > { %3767 = vmatprep.subr.bf16.mxu0 %v5842_v56  ;;  %4175 = vmatprep.subr.bf16.mxu1 %v5845_v57 }
 0x16c   : > { %3768 = vmatpush1.bf16.msra.mxu0 %v5840_v58  ;;  %4176 = vmatpush1.bf16.msra.mxu1 %v5843_v59  ;;  %v5911_v58 = vld [vmem:[%s6302_s10 + $0xb28] ss:$16 sps:$4 sm:$0xff]   ;;  %v5916_v59 = vld [vmem:[%s6302_s10 + $0xb44] ss:$16 sps:$4 sm:$0xff]  }
 0x16d   : > { %3769 = vmatprep.subr.bf16.mxu0 %v5848_v60  ;;  %4177 = vmatprep.subr.bf16.mxu1 %v5851_v61  ;;  %v5919_v60 = vld [vmem:[%s6302_s10 + $0xb4c] ss:$16 sps:$4 sm:$0xff]   ;;  %v5914_v61 = vld [vmem:[%s6302_s10 + $0xb40] ss:$16 sps:$4 sm:$0xff]  }
 0x170   : > { %3770 = vmatpush1.bf16.msra.mxu0 %v5846_v62  ;;  %4178 = vmatpush1.bf16.msra.mxu1 %v5849_v0  ;;  %v5917_v62 = vld [vmem:[%s6302_s10 + $0xb48] ss:$16 sps:$4 sm:$0xff]   ;;  %v5922_v0 = vld [vmem:[%s6302_s10 + $0xb64] ss:$16 sps:$4 sm:$0xff]  }
 0x171   : > { %3790 = vmatprep.subr.bf16.mxu0 %v5854_v2  ;;  %4198 = vmatprep.subr.bf16.mxu1 %v5857_v3  ;;  %v5925_v2 = vld [vmem:[%s6302_s10 + $0xb6c] ss:$16 sps:$4 sm:$0xff]   ;;  %v5920_v3 = vld [vmem:[%s6302_s10 + $0xb60] ss:$16 sps:$4 sm:$0xff]  }
 0x173   : > { %3772 = vmatmul.mubr.bf16.vlgmr.msra.gmra.mrb[0].mxu0 %v4739_v5  ;;  %4180 = vmatmul.mubr.bf16.vlgmr.msra.gmra.mrb[0].mxu1 %v4739_v5  ;;  %v5928_v5 = vld [vmem:[%s6302_s10 + $0xb84] ss:$16 sps:$4 sm:$0xff]  }
 0x174   : > { %3791 = vmatpush1.bf16.msra.mxu0 %v5852_v4  ;;  %4199 = vmatpush1.bf16.msra.mxu1 %v5855_v6  ;;  %v5923_v4 = vld [vmem:[%s6302_s10 + $0xb68] ss:$16 sps:$4 sm:$0xff]   ;;  %v5931_v6 = vld [vmem:[%s6302_s10 + $0xb8c] ss:$16 sps:$4 sm:$0xff]  }
 0x175   : > { %3792 = vmatprep.subr.bf16.mxu0 %v5860_v8  ;;  %4200 = vmatprep.subr.bf16.mxu1 %v5863_v9  ;;  %v5929_v8 = vld [vmem:[%s6302_s10 + $0xb88] ss:$16 sps:$4 sm:$0xff]   ;;  %v5934_v9 = vld [vmem:[%s6302_s10 + $0xba4] ss:$16 sps:$4 sm:$0xff]  }
 0x176   : > { %3781 = vmatprep.mubr.bf16.mxu0 %v4756_v11  ;;  %4189 = vmatprep.mubr.bf16.mxu1 %v4756_v11  ;;  %v5932_v11 = vld [vmem:[%s6302_s10 + $0xba0] ss:$16 sps:$4 sm:$0xff]  }
 0x178   : > { %3793 = vmatpush1.bf16.msra.mxu0 %v5858_v10  ;;  %4201 = vmatpush1.bf16.msra.mxu1 %v5861_v63  ;;  %v5937_v10 = vld [vmem:[%s6302_s10 + $0xbac] ss:$16 sps:$4 sm:$0xff]   ;;  %v5935_v63 = vld [vmem:[%s6302_s10 + $0xba8] ss:$16 sps:$4 sm:$0xff]  }
 0x179   : > { %3794 = vmatprep.subr.bf16.mxu0 %v5868_v1  ;;  %4202 = vmatprep.subr.bf16.mxu1 %v5871_v12  ;;  %v5940_v1 = vld [vmem:[%s6302_s10 + $0xbc4] ss:$16 sps:$4 sm:$0xff]   ;;  %v5943_v12 = vld [vmem:[%s6302_s10 + $0xbcc] ss:$16 sps:$4 sm:$0xff]  }
 0x17b   : > { %3782 = vmatmul.mubr.bf16.gmra.mrb[20].mxu0 %v4755_v16  ;;  %4190 = vmatmul.mubr.bf16.gmra.mrb[20].mxu1 %v4755_v16  ;;  %v5946_v16 = vld [vmem:[%s6302_s10 + $0xbe4] ss:$16 sps:$4 sm:$0xff]  }
 0x17c   : > { %3795 = vmatpush1.bf16.msra.mxu0 %v5866_v14  ;;  %4203 = vmatpush1.bf16.msra.mxu1 %v5869_v15  ;;  %v5938_v14 = vld [vmem:[%s6302_s10 + $0xbc0] ss:$16 sps:$4 sm:$0xff]   ;;  %v5941_v15 = vld [vmem:[%s6302_s10 + $0xbc8] ss:$16 sps:$4 sm:$0xff]  }
 0x17d   : > { %3796 = vmatprep.subr.bf16.mxu0 %v5874_v18  ;;  %4204 = vmatprep.subr.bf16.mxu1 %v5877_v19  ;;  %v5949_v18 = vld [vmem:[%s6302_s10 + $0xbec] ss:$16 sps:$4 sm:$0xff]   ;;  %v5944_v19 = vld [vmem:[%s6302_s10 + $0xbe0] ss:$16 sps:$4 sm:$0xff]  }
 0x17e   : > { %3822 = vmatprep.mubr.bf16.mxu0 %v4742_v20  ;;  %4230 = vmatprep.mubr.bf16.mxu1 %v4742_v20  ;;  %v5947_v20 = vld [vmem:[%s6302_s10 + $0xbe8] ss:$16 sps:$4 sm:$0xff]  }
 0x180   : > { %3797 = vmatpush1.bf16.msra.mxu0 %v5872_v21  ;;  %4205 = vmatpush1.bf16.msra.mxu1 %v5875_v22  ;;  %v5952_v21 = vld [vmem:[%s6302_s10 + $0xc04] ss:$16 sps:$4 sm:$0xff]   ;;  %v5955_v22 = vld [vmem:[%s6302_s10 + $0xc0c] ss:$16 sps:$4 sm:$0xff]  }
 0x181   : > { %3798 = vmatprep.subr.bf16.mxu0 %v5880_v23  ;;  %4206 = vmatprep.subr.bf16.mxu1 %v5883_v24  ;;  %v4741_v23 = vcombine.low %v6693_v13, %v6698_v17  ;;  %v324_v24 = vld [vmem:[%s6304_s11 + $0xa8] sm:$0xff]  ;;  %v5956_v13 = vld [vmem:[%s6302_s10 + $0xc20] ss:$16 sps:$4 sm:$0xff]  }
 0x182   : > { %v5959_v17 = vld [vmem:[%s6302_s10 + $0xc28] ss:$16 sps:$4 sm:$0xff]  }
 0x184   : > { %3799 = vmatpush1.bf16.msra.mxu0 %v5878_v25  ;;  %4207 = vmatpush1.bf16.msra.mxu1 %v5881_v26  ;;  %v5950_v25 = vld [vmem:[%s6302_s10 + $0xc00] ss:$16 sps:$4 sm:$0xff]   ;;  %v5953_v26 = vld [vmem:[%s6302_s10 + $0xc08] ss:$16 sps:$4 sm:$0xff]  }
 0x185   : > { %3800 = vmatprep.subr.bf16.mxu0 %v5886_v27  ;;  %4208 = vmatprep.subr.bf16.mxu1 %v5889_v28  ;;  %v5958_v27 = vld [vmem:[%s6302_s10 + $0xc24] ss:$16 sps:$4 sm:$0xff]   ;;  %v5961_v28 = vld [vmem:[%s6302_s10 + $0xc2c] ss:$16 sps:$4 sm:$0xff]  }
 0x188   : > { %3801 = vmatpush1.bf16.msra.mxu0 %v5884_v29  ;;  %4209 = vmatpush1.bf16.msra.mxu1 %v5887_v30  ;;  %v4758_v29 = vcombine.high %v324_v24, %v324_v24  ;;  %v5966_v30 = vld [vmem:[%s6302_s10 + $0xc44] ss:$16 sps:$4 sm:$0xff]  }
 0x189   : > { %3802 = vmatprep.subr.bf16.mxu0 %v5892_v31  ;;  %4210 = vmatprep.subr.bf16.mxu1 %v5895_v32  ;;  %v5969_v31 = vld [vmem:[%s6302_s10 + $0xc4c] ss:$16 sps:$4 sm:$0xff]   ;;  %v4757_v32 = vcombine.low %v324_v24, %v324_v24  ;;  %v6026_v24 = vld [vmem:[%s6302_s10 + $0xd84] ss:$16 sps:$4 sm:$0xff]  }
 0x18c   : > { %3803 = vmatpush1.bf16.msra.mxu0 %v5890_v33  ;;  %4211 = vmatpush1.bf16.msra.mxu1 %v5893_v34  ;;  %v6780_v33 = vld [vmem:[%s6304_s11 + $0x30] sm:$0xff] }
 0x18d   : > { %3804 = vmatprep.subr.bf16.mxu0 %v5898_v35  ;;  %4212 = vmatprep.subr.bf16.mxu1 %v5901_v36  ;;  %v6783_v34 = vld [vmem:[%s6304_s11 + $0x70] sm:$0xff]  ;;  %v5967_v36 = vld [vmem:[%s6302_s10 + $0xc48] ss:$16 sps:$4 sm:$0xff]  }
 0x18e   : > { %v3630_v45 = vpop.f32.mrb[8].mxu0  ;;  %v4038_v46 = vpop.f32.mrb[8].mxu1  ;;  %v5964_v35 = vld [vmem:[%s6302_s10 + $0xc40] ss:$16 sps:$4 sm:$0xff]  }
 0x18f   : > { %v6725_v47 = vadd.f32 %v3630_v45, %v6653_v38  ;;  %v6728_v48 = vadd.f32 %v4038_v46, %v6655_v39  ;;  %v3632_v49 = vpop.f32.mrb[9].mxu0  ;;  %v4040_v52 = vpop.f32.mrb[9].mxu1  ;;  %v5910_v39 = vld [vmem:[%s6302_s10 + $0xb24] ss:$16 sps:$4 sm:$0xff]   ;;  %v5973_v45 = vld [vmem:[%s6302_s10 + $0xc68] ss:$16 sps:$4 sm:$0xff]  }
 0x190   : > { %v6731_v53 = vadd.f32 %v3632_v49, %v6657_v40  ;;  %v6734_v54 = vadd.f32 %v4040_v52, %v6659_v41  ;;  %3805 = vmatpush1.bf16.msra.mxu0 %v5896_v37  ;;  %4213 = vmatpush1.bf16.msra.mxu1 %v5899_v42  ;;  %v3634_v38 = vpop.f32.mrb[10].mxu0  ;;  %v4042_v55 = vpop.f32.mrb[10].mxu1  ;;  %v5913_v40 = vld [vmem:[%s6302_s10 + $0xb2c] ss:$16 sps:$4 sm:$0xff]   ;;  %v5908_v41 = vld [vmem:[%s6302_s10 + $0xb20] ss:$16 sps:$4 sm:$0xff]  }
 0x191   : > { %3806 = vmatprep.subr.bf16.mxu0 %v5904_v43  ;;  %4214 = vmatprep.subr.bf16.mxu1 %v5907_v44  ;;  %v3635_v56 = vpop.f32.mrb[11].mxu0  ;;  %v4043_v57 = vpop.f32.mrb[11].mxu1  ;;  %v5972_v37 = vld [vmem:[%s6302_s10 + $0xc64] ss:$16 sps:$4 sm:$0xff]   ;;  %v5975_v42 = vld [vmem:[%s6302_s10 + $0xc6c] ss:$16 sps:$4 sm:$0xff]   ;;  %v4744_v43 = vcombine.high %v6780_v33, %v6783_v34 }
 0x192   : > { %v5970_v44 = vld [vmem:[%s6302_s10 + $0xc60] ss:$16 sps:$4 sm:$0xff]   ;;  %v5978_v46 = vld [vmem:[%s6302_s10 + $0xc84] ss:$16 sps:$4 sm:$0xff]   ;;  %v5981_v49 = vld [vmem:[%s6302_s10 + $0xc8c] ss:$16 sps:$4 sm:$0xff]  }
 0x193   : > { %v5976_v52 = vld [vmem:[%s6302_s10 + $0xc80] ss:$16 sps:$4 sm:$0xff]   ;;  %v5987_v38 = vld [vmem:[%s6302_s10 + $0xcac] ss:$16 sps:$4 sm:$0xff]  }
 0x194   : > { %3807 = vmatpush1.bf16.msra.mxu0 %v5902_v50  ;;  %4215 = vmatpush1.bf16.msra.mxu1 %v5905_v51  ;;  %v5979_v50 = vld [vmem:[%s6302_s10 + $0xc88] ss:$16 sps:$4 sm:$0xff]   ;;  %v5984_v51 = vld [vmem:[%s6302_s10 + $0xca4] ss:$16 sps:$4 sm:$0xff]   ;;  %v5982_v55 = vld [vmem:[%s6302_s10 + $0xca0] ss:$16 sps:$4 sm:$0xff]  }
 0x195   : > { %3808 = vmatprep.subr.bf16.mxu0 %v5910_v39  ;;  %4216 = vmatprep.subr.bf16.mxu1 %v5913_v40  ;;  %v5985_v39 = vld [vmem:[%s6302_s10 + $0xca8] ss:$16 sps:$4 sm:$0xff]   ;;  %v5990_v40 = vld [vmem:[%s6302_s10 + $0xcc4] ss:$16 sps:$4 sm:$0xff]   ;;  %v5993_v56 = vld [vmem:[%s6302_s10 + $0xccc] ss:$16 sps:$4 sm:$0xff]  }
 0x196   : > { %v5988_v57 = vld [vmem:[%s6302_s10 + $0xcc0] ss:$16 sps:$4 sm:$0xff]  }
 0x198   : > { %3809 = vmatpush1.bf16.msra.mxu0 %v5908_v41  ;;  %4217 = vmatpush1.bf16.msra.mxu1 %v5911_v58  ;;  %v5991_v41 = vld [vmem:[%s6302_s10 + $0xcc8] ss:$16 sps:$4 sm:$0xff]   ;;  %v5996_v58 = vld [vmem:[%s6302_s10 + $0xce4] ss:$16 sps:$4 sm:$0xff]  }
 0x199   : > { %3810 = vmatprep.subr.bf16.mxu0 %v5916_v59  ;;  %4218 = vmatprep.subr.bf16.mxu1 %v5919_v60  ;;  %v5999_v59 = vld [vmem:[%s6302_s10 + $0xcec] ss:$16 sps:$4 sm:$0xff]   ;;  %v5994_v60 = vld [vmem:[%s6302_s10 + $0xce0] ss:$16 sps:$4 sm:$0xff]  }
 0x19c   : > { %3811 = vmatpush1.bf16.msra.mxu0 %v5914_v61  ;;  %4219 = vmatpush1.bf16.msra.mxu1 %v5917_v62  ;;  %v5997_v61 = vld [vmem:[%s6302_s10 + $0xce8] ss:$16 sps:$4 sm:$0xff]   ;;  %v6002_v62 = vld [vmem:[%s6302_s10 + $0xd04] ss:$16 sps:$4 sm:$0xff]  }
 0x19d   : > { %3812 = vmatprep.subr.bf16.mxu0 %v5922_v0  ;;  %4220 = vmatprep.subr.bf16.mxu1 %v5925_v2  ;;  %v6005_v0 = vld [vmem:[%s6302_s10 + $0xd0c] ss:$16 sps:$4 sm:$0xff]  }
 0x1a0   : > { %3813 = vmatpush1.bf16.msra.mxu0 %v5920_v3  ;;  %4221 = vmatpush1.bf16.msra.mxu1 %v5923_v4 }
 0x1a1   : > { %3814 = vmatprep.subr.bf16.mxu0 %v5928_v5  ;;  %4222 = vmatprep.subr.bf16.mxu1 %v5931_v6 }
 0x1a4   : > { %3815 = vmatpush1.bf16.msra.mxu0 %v5926_v7  ;;  %4223 = vmatpush1.bf16.msra.mxu1 %v5929_v8 }
 0x1a5   : > { %3816 = vmatprep.subr.bf16.mxu0 %v5934_v9  ;;  %4224 = vmatprep.subr.bf16.mxu1 %v5937_v10  ;;  %v6000_v10 = vld [vmem:[%s6302_s10 + $0xd00] ss:$16 sps:$4 sm:$0xff]  }
 0x1a8   : > { %3817 = vmatpush1.bf16.msra.mxu0 %v5932_v11  ;;  %4225 = vmatpush1.bf16.msra.mxu1 %v5935_v63  ;;  %v6003_v11 = vld [vmem:[%s6302_s10 + $0xd08] ss:$16 sps:$4 sm:$0xff]  }
 0x1a9   : > { %3818 = vmatprep.subr.bf16.mxu0 %v5940_v1  ;;  %4226 = vmatprep.subr.bf16.mxu1 %v5943_v12 }
 0x1ac   : > { %3819 = vmatpush1.bf16.msra.mxu0 %v5938_v14  ;;  %4227 = vmatpush1.bf16.msra.mxu1 %v5941_v15  ;;  %v6009_v14 = vld [vmem:[%s6302_s10 + $0xd28] ss:$16 sps:$4 sm:$0xff]   ;;  %v6014_v15 = vld [vmem:[%s6302_s10 + $0xd44] ss:$16 sps:$4 sm:$0xff]  }
 0x1ad   : > { %3820 = vmatprep.subr.bf16.mxu0 %v5946_v16  ;;  %4228 = vmatprep.subr.bf16.mxu1 %v5949_v18  ;;  %v6017_v16 = vld [vmem:[%s6302_s10 + $0xd4c] ss:$16 sps:$4 sm:$0xff]   ;;  %v6012_v18 = vld [vmem:[%s6302_s10 + $0xd40] ss:$16 sps:$4 sm:$0xff]  }
 0x1b0   : > { %3821 = vmatpush1.bf16.msra.mxu0 %v5944_v19  ;;  %4229 = vmatpush1.bf16.msra.mxu1 %v5947_v20  ;;  %v6015_v19 = vld [vmem:[%s6302_s10 + $0xd48] ss:$16 sps:$4 sm:$0xff]   ;;  %v6020_v20 = vld [vmem:[%s6302_s10 + $0xd64] ss:$16 sps:$4 sm:$0xff]  }
 0x1b1   : > { %3841 = vmatprep.subr.bf16.mxu0 %v5952_v21  ;;  %4249 = vmatprep.subr.bf16.mxu1 %v5955_v22  ;;  %v6023_v21 = vld [vmem:[%s6302_s10 + $0xd6c] ss:$16 sps:$4 sm:$0xff]   ;;  %v6018_v22 = vld [vmem:[%s6302_s10 + $0xd60] ss:$16 sps:$4 sm:$0xff]  }
 0x1b3   : > { %3823 = vmatmul.mubr.bf16.vlgmr.msra.gmra.mrb[0].mxu0 %v4741_v23  ;;  %4231 = vmatmul.mubr.bf16.vlgmr.msra.gmra.mrb[0].mxu1 %v4741_v23  ;;  %v6021_v23 = vld [vmem:[%s6302_s10 + $0xd68] ss:$16 sps:$4 sm:$0xff]  }
 0x1b4   : > { %3842 = vmatpush1.bf16.msra.mxu0 %v5950_v25  ;;  %4250 = vmatpush1.bf16.msra.mxu1 %v5953_v26  ;;  %v6029_v25 = vld [vmem:[%s6302_s10 + $0xd8c] ss:$16 sps:$4 sm:$0xff]   ;;  %v6024_v26 = vld [vmem:[%s6302_s10 + $0xd80] ss:$16 sps:$4 sm:$0xff]  }
 0x1b5   : > { %3843 = vmatprep.subr.bf16.mxu0 %v5958_v27  ;;  %4251 = vmatprep.subr.bf16.mxu1 %v5961_v28  ;;  %v6027_v27 = vld [vmem:[%s6302_s10 + $0xd88] ss:$16 sps:$4 sm:$0xff]   ;;  %v6032_v28 = vld [vmem:[%s6302_s10 + $0xda4] ss:$16 sps:$4 sm:$0xff]  }
 0x1b6   : > { %3832 = vmatprep.mubr.bf16.mxu0 %v4758_v29  ;;  %4240 = vmatprep.mubr.bf16.mxu1 %v4758_v29  ;;  %v6035_v29 = vld [vmem:[%s6302_s10 + $0xdac] ss:$16 sps:$4 sm:$0xff]  }
 0x1b8   : > { %3844 = vmatpush1.bf16.msra.mxu0 %v5956_v13  ;;  %4252 = vmatpush1.bf16.msra.mxu1 %v5959_v17  ;;  %v6030_v13 = vld [vmem:[%s6302_s10 + $0xda0] ss:$16 sps:$4 sm:$0xff]   ;;  %v6033_v17 = vld [vmem:[%s6302_s10 + $0xda8] ss:$16 sps:$4 sm:$0xff]  }
 0x1b9   : > { %3845 = vmatprep.subr.bf16.mxu0 %v5966_v30  ;;  %4253 = vmatprep.subr.bf16.mxu1 %v5969_v31  ;;  %v6038_v30 = vld [vmem:[%s6302_s10 + $0xdc4] ss:$16 sps:$4 sm:$0xff]   ;;  %v6041_v31 = vld [vmem:[%s6302_s10 + $0xdcc] ss:$16 sps:$4 sm:$0xff]  }
 0x1bb   : > { %3833 = vmatmul.mubr.bf16.gmra.mrb[24].mxu0 %v4757_v32  ;;  %4241 = vmatmul.mubr.bf16.gmra.mrb[24].mxu1 %v4757_v32  ;;  %v6036_v32 = vld [vmem:[%s6302_s10 + $0xdc0] ss:$16 sps:$4 sm:$0xff]  }
 0x1bc   : > { %3846 = vmatpush1.bf16.msra.mxu0 %v5964_v35  ;;  %4254 = vmatpush1.bf16.msra.mxu1 %v5967_v36  ;;  %v6039_v35 = vld [vmem:[%s6302_s10 + $0xdc8] ss:$16 sps:$4 sm:$0xff]   ;;  %v6044_v36 = vld [vmem:[%s6302_s10 + $0xde4] ss:$16 sps:$4 sm:$0xff]  }
 0x1bd   : > { %3847 = vmatprep.subr.bf16.mxu0 %v5972_v37  ;;  %4255 = vmatprep.subr.bf16.mxu1 %v5975_v42  ;;  %v6047_v37 = vld [vmem:[%s6302_s10 + $0xdec] ss:$16 sps:$4 sm:$0xff]   ;;  %v6042_v42 = vld [vmem:[%s6302_s10 + $0xde0] ss:$16 sps:$4 sm:$0xff]  }
 0x1be   : > { %3873 = vmatprep.mubr.bf16.mxu0 %v4744_v43  ;;  %4281 = vmatprep.mubr.bf16.mxu1 %v4744_v43  ;;  %v6045_v43 = vld [vmem:[%s6302_s10 + $0xde8] ss:$16 sps:$4 sm:$0xff]  }
 0x1c0   : > { %3848 = vmatpush1.bf16.msra.mxu0 %v5970_v44  ;;  %4256 = vmatpush1.bf16.msra.mxu1 %v5973_v45  ;;  %v6050_v44 = vld [vmem:[%s6302_s10 + $0xe04] ss:$16 sps:$4 sm:$0xff]   ;;  %v6053_v45 = vld [vmem:[%s6302_s10 + $0xe0c] ss:$16 sps:$4 sm:$0xff]  }
 0x1c1   : > { %3849 = vmatprep.subr.bf16.mxu0 %v5978_v46  ;;  %4257 = vmatprep.subr.bf16.mxu1 %v5981_v49  ;;  %v4743_v46 = vcombine.low %v6780_v33, %v6783_v34  ;;  %v325_v49 = vld [vmem:[%s6304_s11 + $0xb0] sm:$0xff]  ;;  %v6057_v34 = vld [vmem:[%s6302_s10 + $0xe28] ss:$16 sps:$4 sm:$0xff]  }
 0x1c2   : > { %v6054_v33 = vld [vmem:[%s6302_s10 + $0xe20] ss:$16 sps:$4 sm:$0xff]  }
 0x1c4   : > { %3850 = vmatpush1.bf16.msra.mxu0 %v5976_v52  ;;  %4258 = vmatpush1.bf16.msra.mxu1 %v5979_v50  ;;  %v6048_v52 = vld [vmem:[%s6302_s10 + $0xe00] ss:$16 sps:$4 sm:$0xff]   ;;  %v6051_v50 = vld [vmem:[%s6302_s10 + $0xe08] ss:$16 sps:$4 sm:$0xff]  }
 0x1c5   : > { %3851 = vmatprep.subr.bf16.mxu0 %v5984_v51  ;;  %4259 = vmatprep.subr.bf16.mxu1 %v5987_v38  ;;  %v6056_v51 = vld [vmem:[%s6302_s10 + $0xe24] ss:$16 sps:$4 sm:$0xff]   ;;  %v6059_v38 = vld [vmem:[%s6302_s10 + $0xe2c] ss:$16 sps:$4 sm:$0xff]  }
 0x1c8   : > { %3852 = vmatpush1.bf16.msra.mxu0 %v5982_v55  ;;  %4260 = vmatpush1.bf16.msra.mxu1 %v5985_v39  ;;  %v4760_v55 = vcombine.high %v325_v49, %v325_v49  ;;  %v6064_v39 = vld [vmem:[%s6302_s10 + $0xe44] ss:$16 sps:$4 sm:$0xff]  }
 0x1c9   : > { %3853 = vmatprep.subr.bf16.mxu0 %v5990_v40  ;;  %4261 = vmatprep.subr.bf16.mxu1 %v5993_v56  ;;  %v6067_v40 = vld [vmem:[%s6302_s10 + $0xe4c] ss:$16 sps:$4 sm:$0xff]   ;;  %v4759_v56 = vcombine.low %v325_v49, %v325_v49  ;;  %v6124_v49 = vld [vmem:[%s6302_s10 + $0xf84] ss:$16 sps:$4 sm:$0xff]  }
 0x1cc   : > { %3854 = vmatpush1.bf16.msra.mxu0 %v5988_v57  ;;  %4262 = vmatpush1.bf16.msra.mxu1 %v5991_v41  ;;  %v6867_v57 = vld [vmem:[%s6304_s11 + $0x38] sm:$0xff] }
 0x1cd   : > { %3855 = vmatprep.subr.bf16.mxu0 %v5996_v58  ;;  %4263 = vmatprep.subr.bf16.mxu1 %v5999_v59  ;;  %v6870_v41 = vld [vmem:[%s6304_s11 + $0x78] sm:$0xff]  ;;  %v6062_v58 = vld [vmem:[%s6302_s10 + $0xe40] ss:$16 sps:$4 sm:$0xff]  }
 0x1ce   : > { %v3681_v2 = vpop.f32.mrb[12].mxu0  ;;  %v4089_v3 = vpop.f32.mrb[12].mxu1  ;;  %v6065_v59 = vld [vmem:[%s6302_s10 + $0xe48] ss:$16 sps:$4 sm:$0xff]  }
 0x1cf   : > { %v6812_v4 = vadd.f32 %v3681_v2, %v6725_v47  ;;  %v6815_v5 = vadd.f32 %v4089_v3, %v6728_v48  ;;  %v3683_v6 = vpop.f32.mrb[13].mxu0  ;;  %v4091_v7 = vpop.f32.mrb[13].mxu1  ;;  %v6008_v48 = vld [vmem:[%s6302_s10 + $0xd24] ss:$16 sps:$4 sm:$0xff]   ;;  %v6071_v2 = vld [vmem:[%s6302_s10 + $0xe68] ss:$16 sps:$4 sm:$0xff]  }
 0x1d0   : > { %v6818_v8 = vadd.f32 %v3683_v6, %v6731_v53  ;;  %v6821_v9 = vadd.f32 %v4091_v7, %v6734_v54  ;;  %3856 = vmatpush1.bf16.msra.mxu0 %v5994_v60  ;;  %4264 = vmatpush1.bf16.msra.mxu1 %v5997_v61  ;;  %v3685_v47 = vpop.f32.mrb[14].mxu0  ;;  %v4093_v63 = vpop.f32.mrb[14].mxu1  ;;  %v6011_v53 = vld [vmem:[%s6302_s10 + $0xd2c] ss:$16 sps:$4 sm:$0xff]   ;;  %v6006_v54 = vld [vmem:[%s6302_s10 + $0xd20] ss:$16 sps:$4 sm:$0xff]  }
 0x1d1   : > { %3857 = vmatprep.subr.bf16.mxu0 %v6002_v62  ;;  %4265 = vmatprep.subr.bf16.mxu1 %v6005_v0  ;;  %v3686_v1 = vpop.f32.mrb[15].mxu0  ;;  %v4094_v12 = vpop.f32.mrb[15].mxu1  ;;  %v6070_v60 = vld [vmem:[%s6302_s10 + $0xe64] ss:$16 sps:$4 sm:$0xff]   ;;  %v6073_v61 = vld [vmem:[%s6302_s10 + $0xe6c] ss:$16 sps:$4 sm:$0xff]   ;;  %v4746_v62 = vcombine.high %v6867_v57, %v6870_v41 }
 0x1d2   : > { %v6068_v0 = vld [vmem:[%s6302_s10 + $0xe60] ss:$16 sps:$4 sm:$0xff]   ;;  %v6076_v3 = vld [vmem:[%s6302_s10 + $0xe84] ss:$16 sps:$4 sm:$0xff]   ;;  %v6079_v6 = vld [vmem:[%s6302_s10 + $0xe8c] ss:$16 sps:$4 sm:$0xff]  }
 0x1d3   : > { %v6074_v7 = vld [vmem:[%s6302_s10 + $0xe80] ss:$16 sps:$4 sm:$0xff]   ;;  %v6085_v47 = vld [vmem:[%s6302_s10 + $0xeac] ss:$16 sps:$4 sm:$0xff]  }
 0x1d4   : > { %3858 = vmatpush1.bf16.msra.mxu0 %v6000_v10  ;;  %4266 = vmatpush1.bf16.msra.mxu1 %v6003_v11  ;;  %v6077_v10 = vld [vmem:[%s6302_s10 + $0xe88] ss:$16 sps:$4 sm:$0xff]   ;;  %v6082_v11 = vld [vmem:[%s6302_s10 + $0xea4] ss:$16 sps:$4 sm:$0xff]   ;;  %v6080_v63 = vld [vmem:[%s6302_s10 + $0xea0] ss:$16 sps:$4 sm:$0xff]  }
 0x1d5   : > { %3859 = vmatprep.subr.bf16.mxu0 %v6008_v48  ;;  %4267 = vmatprep.subr.bf16.mxu1 %v6011_v53  ;;  %v6083_v48 = vld [vmem:[%s6302_s10 + $0xea8] ss:$16 sps:$4 sm:$0xff]   ;;  %v6088_v53 = vld [vmem:[%s6302_s10 + $0xec4] ss:$16 sps:$4 sm:$0xff]   ;;  %v6091_v1 = vld [vmem:[%s6302_s10 + $0xecc] ss:$16 sps:$4 sm:$0xff]  }
 0x1d6   : > { %v6086_v12 = vld [vmem:[%s6302_s10 + $0xec0] ss:$16 sps:$4 sm:$0xff]  }
 0x1d8   : > { %3860 = vmatpush1.bf16.msra.mxu0 %v6006_v54  ;;  %4268 = vmatpush1.bf16.msra.mxu1 %v6009_v14  ;;  %v6089_v54 = vld [vmem:[%s6302_s10 + $0xec8] ss:$16 sps:$4 sm:$0xff]   ;;  %v6094_v14 = vld [vmem:[%s6302_s10 + $0xee4] ss:$16 sps:$4 sm:$0xff]  }
 0x1d9   : > { %3861 = vmatprep.subr.bf16.mxu0 %v6014_v15  ;;  %4269 = vmatprep.subr.bf16.mxu1 %v6017_v16  ;;  %v6097_v15 = vld [vmem:[%s6302_s10 + $0xeec] ss:$16 sps:$4 sm:$0xff]   ;;  %v6092_v16 = vld [vmem:[%s6302_s10 + $0xee0] ss:$16 sps:$4 sm:$0xff]  }
 0x1dc   : > { %3862 = vmatpush1.bf16.msra.mxu0 %v6012_v18  ;;  %4270 = vmatpush1.bf16.msra.mxu1 %v6015_v19  ;;  %v6095_v18 = vld [vmem:[%s6302_s10 + $0xee8] ss:$16 sps:$4 sm:$0xff]   ;;  %v6100_v19 = vld [vmem:[%s6302_s10 + $0xf04] ss:$16 sps:$4 sm:$0xff]  }
 0x1dd   : > { %3863 = vmatprep.subr.bf16.mxu0 %v6020_v20  ;;  %4271 = vmatprep.subr.bf16.mxu1 %v6023_v21  ;;  %v6103_v20 = vld [vmem:[%s6302_s10 + $0xf0c] ss:$16 sps:$4 sm:$0xff]  }
 0x1e0   : > { %3864 = vmatpush1.bf16.msra.mxu0 %v6018_v22  ;;  %4272 = vmatpush1.bf16.msra.mxu1 %v6021_v23 }
 0x1e1   : > { %3865 = vmatprep.subr.bf16.mxu0 %v6026_v24  ;;  %4273 = vmatprep.subr.bf16.mxu1 %v6029_v25 }
 0x1e4   : > { %3866 = vmatpush1.bf16.msra.mxu0 %v6024_v26  ;;  %4274 = vmatpush1.bf16.msra.mxu1 %v6027_v27 }
 0x1e5   : > { %3867 = vmatprep.subr.bf16.mxu0 %v6032_v28  ;;  %4275 = vmatprep.subr.bf16.mxu1 %v6035_v29  ;;  %v6098_v29 = vld [vmem:[%s6302_s10 + $0xf00] ss:$16 sps:$4 sm:$0xff]  }
 0x1e8   : > { %3868 = vmatpush1.bf16.msra.mxu0 %v6030_v13  ;;  %4276 = vmatpush1.bf16.msra.mxu1 %v6033_v17  ;;  %v6101_v13 = vld [vmem:[%s6302_s10 + $0xf08] ss:$16 sps:$4 sm:$0xff]  }
 0x1e9   : > { %3869 = vmatprep.subr.bf16.mxu0 %v6038_v30  ;;  %4277 = vmatprep.subr.bf16.mxu1 %v6041_v31 }
 0x1ec   : > { %3870 = vmatpush1.bf16.msra.mxu0 %v6036_v32  ;;  %4278 = vmatpush1.bf16.msra.mxu1 %v6039_v35  ;;  %v6107_v32 = vld [vmem:[%s6302_s10 + $0xf28] ss:$16 sps:$4 sm:$0xff]   ;;  %v6112_v35 = vld [vmem:[%s6302_s10 + $0xf44] ss:$16 sps:$4 sm:$0xff]  }
 0x1ed   : > { %3871 = vmatprep.subr.bf16.mxu0 %v6044_v36  ;;  %4279 = vmatprep.subr.bf16.mxu1 %v6047_v37  ;;  %v6115_v36 = vld [vmem:[%s6302_s10 + $0xf4c] ss:$16 sps:$4 sm:$0xff]   ;;  %v6110_v37 = vld [vmem:[%s6302_s10 + $0xf40] ss:$16 sps:$4 sm:$0xff]  }
 0x1f0   : > { %3872 = vmatpush1.bf16.msra.mxu0 %v6042_v42  ;;  %4280 = vmatpush1.bf16.msra.mxu1 %v6045_v43  ;;  %v6113_v42 = vld [vmem:[%s6302_s10 + $0xf48] ss:$16 sps:$4 sm:$0xff]   ;;  %v6118_v43 = vld [vmem:[%s6302_s10 + $0xf64] ss:$16 sps:$4 sm:$0xff]  }
 0x1f1   : > { %3892 = vmatprep.subr.bf16.mxu0 %v6050_v44  ;;  %4300 = vmatprep.subr.bf16.mxu1 %v6053_v45  ;;  %v6121_v44 = vld [vmem:[%s6302_s10 + $0xf6c] ss:$16 sps:$4 sm:$0xff]   ;;  %v6116_v45 = vld [vmem:[%s6302_s10 + $0xf60] ss:$16 sps:$4 sm:$0xff]  }
 0x1f3   : > { %3874 = vmatmul.mubr.bf16.vlgmr.msra.gmra.mrb[0].mxu0 %v4743_v46  ;;  %4282 = vmatmul.mubr.bf16.vlgmr.msra.gmra.mrb[0].mxu1 %v4743_v46  ;;  %v6119_v46 = vld [vmem:[%s6302_s10 + $0xf68] ss:$16 sps:$4 sm:$0xff]  }
 0x1f4   : > { %3893 = vmatpush1.bf16.msra.mxu0 %v6048_v52  ;;  %4301 = vmatpush1.bf16.msra.mxu1 %v6051_v50  ;;  %v6127_v52 = vld [vmem:[%s6302_s10 + $0xf8c] ss:$16 sps:$4 sm:$0xff]   ;;  %v6122_v50 = vld [vmem:[%s6302_s10 + $0xf80] ss:$16 sps:$4 sm:$0xff]  }
 0x1f5   : > { %3894 = vmatprep.subr.bf16.mxu0 %v6056_v51  ;;  %4302 = vmatprep.subr.bf16.mxu1 %v6059_v38  ;;  %v6125_v51 = vld [vmem:[%s6302_s10 + $0xf88] ss:$16 sps:$4 sm:$0xff]   ;;  %v6130_v38 = vld [vmem:[%s6302_s10 + $0xfa4] ss:$16 sps:$4 sm:$0xff]  }
 0x1f6   : > { %3883 = vmatprep.mubr.bf16.mxu0 %v4760_v55  ;;  %4291 = vmatprep.mubr.bf16.mxu1 %v4760_v55  ;;  %v6133_v55 = vld [vmem:[%s6302_s10 + $0xfac] ss:$16 sps:$4 sm:$0xff]  }
 0x1f8   : > { %3895 = vmatpush1.bf16.msra.mxu0 %v6054_v33  ;;  %4303 = vmatpush1.bf16.msra.mxu1 %v6057_v34  ;;  %v6128_v33 = vld [vmem:[%s6302_s10 + $0xfa0] ss:$16 sps:$4 sm:$0xff]   ;;  %v6131_v34 = vld [vmem:[%s6302_s10 + $0xfa8] ss:$16 sps:$4 sm:$0xff]  }
 0x1f9   : > { %3896 = vmatprep.subr.bf16.mxu0 %v6064_v39  ;;  %4304 = vmatprep.subr.bf16.mxu1 %v6067_v40  ;;  %v6136_v39 = vld [vmem:[%s6302_s10 + $0xfc4] ss:$16 sps:$4 sm:$0xff]   ;;  %v6139_v40 = vld [vmem:[%s6302_s10 + $0xfcc] ss:$16 sps:$4 sm:$0xff]  }
 0x1fb   : > { %3884 = vmatmul.mubr.bf16.gmra.mrb[28].mxu0 %v4759_v56  ;;  %4292 = vmatmul.mubr.bf16.gmra.mrb[28].mxu1 %v4759_v56  ;;  %v6134_v56 = vld [vmem:[%s6302_s10 + $0xfc0] ss:$16 sps:$4 sm:$0xff]  }
 0x1fc   : > { %3897 = vmatpush1.bf16.msra.mxu0 %v6062_v58  ;;  %4305 = vmatpush1.bf16.msra.mxu1 %v6065_v59  ;;  %v6137_v58 = vld [vmem:[%s6302_s10 + $0xfc8] ss:$16 sps:$4 sm:$0xff]   ;;  %v6142_v59 = vld [vmem:[%s6302_s10 + $0xfe4] ss:$16 sps:$4 sm:$0xff]  }
 0x1fd   : > { %3898 = vmatprep.subr.bf16.mxu0 %v6070_v60  ;;  %4306 = vmatprep.subr.bf16.mxu1 %v6073_v61  ;;  %v6145_v60 = vld [vmem:[%s6302_s10 + $0xfec] ss:$16 sps:$4 sm:$0xff]   ;;  %v6140_v61 = vld [vmem:[%s6302_s10 + $0xfe0] ss:$16 sps:$4 sm:$0xff]  }
 0x1fe   : > { %3924 = vmatprep.mubr.bf16.mxu0 %v4746_v62  ;;  %4332 = vmatprep.mubr.bf16.mxu1 %v4746_v62  ;;  %v6143_v62 = vld [vmem:[%s6302_s10 + $0xfe8] ss:$16 sps:$4 sm:$0xff]  }
 0x200   : > { %3899 = vmatpush1.bf16.msra.mxu0 %v6068_v0  ;;  %4307 = vmatpush1.bf16.msra.mxu1 %v6071_v2  ;;  %v326_v0 = vld [vmem:[%s6304_s11 + $0xb8] sm:$0xff]  ;;  %v4745_v2 = vcombine.low %v6867_v57, %v6870_v41 }
 0x201   : > { %3900 = vmatprep.subr.bf16.mxu0 %v6076_v3  ;;  %4308 = vmatprep.subr.bf16.mxu1 %v6079_v6  ;;  %v4762_v3 = vcombine.high %v326_v0, %v326_v0  ;;  %v4761_v6 = vcombine.low %v326_v0, %v326_v0  ;;  %v299_v0 = vld [vmem:[#allocation2 + $0x40] sm:$0xff] }
 0x204   : > { %3901 = vmatpush1.bf16.msra.mxu0 %v6074_v7  ;;  %4309 = vmatpush1.bf16.msra.mxu1 %v6077_v10 }
 0x205   : > { %3902 = vmatprep.subr.bf16.mxu0 %v6082_v11  ;;  %4310 = vmatprep.subr.bf16.mxu1 %v6085_v47 }
 0x208   : > { %3903 = vmatpush1.bf16.msra.mxu0 %v6080_v63  ;;  %4311 = vmatpush1.bf16.msra.mxu1 %v6083_v48 }
 0x209   : > { %3904 = vmatprep.subr.bf16.mxu0 %v6088_v53  ;;  %4312 = vmatprep.subr.bf16.mxu1 %v6091_v1 }
 0x20c   : > { %3905 = vmatpush1.bf16.msra.mxu0 %v6086_v12  ;;  %4313 = vmatpush1.bf16.msra.mxu1 %v6089_v54 }
 0x20d   : > { %3906 = vmatprep.subr.bf16.mxu0 %v6094_v14  ;;  %4314 = vmatprep.subr.bf16.mxu1 %v6097_v15 }
 0x20e   : > { %v3732_v21 = vpop.f32.mrb[16].mxu0  ;;  %v4140_v22 = vpop.f32.mrb[16].mxu1 }
 0x20f   : > { %v6899_v23 = vadd.f32 %v3732_v21, %v6812_v4  ;;  %v6902_v24 = vadd.f32 %v4140_v22, %v6815_v5  ;;  %v3734_v25 = vpop.f32.mrb[17].mxu0  ;;  %v4142_v26 = vpop.f32.mrb[17].mxu1  ;;  %v6106_v5 = vld [vmem:[%s6302_s10 + $0xf24] ss:$16 sps:$4 sm:$0xff]  }
 0x210   : > { %v6905_v27 = vadd.f32 %v3734_v25, %v6818_v8  ;;  %v6908_v28 = vadd.f32 %v4142_v26, %v6821_v9  ;;  %3907 = vmatpush1.bf16.msra.mxu0 %v6092_v16  ;;  %4315 = vmatpush1.bf16.msra.mxu1 %v6095_v18  ;;  %v3736_v4 = vpop.f32.mrb[18].mxu0  ;;  %v4144_v17 = vpop.f32.mrb[18].mxu1  ;;  %v6109_v8 = vld [vmem:[%s6302_s10 + $0xf2c] ss:$16 sps:$4 sm:$0xff]   ;;  %v6104_v9 = vld [vmem:[%s6302_s10 + $0xf20] ss:$16 sps:$4 sm:$0xff]  }
 0x211   : > { %3908 = vmatprep.subr.bf16.mxu0 %v6100_v19  ;;  %4316 = vmatprep.subr.bf16.mxu1 %v6103_v20  ;;  %v3737_v30 = vpop.f32.mrb[19].mxu0  ;;  %v4145_v31 = vpop.f32.mrb[19].mxu1 }
 0x214   : > { %3909 = vmatpush1.bf16.msra.mxu0 %v6098_v29  ;;  %4317 = vmatpush1.bf16.msra.mxu1 %v6101_v13 }
 0x215   : > { %3910 = vmatprep.subr.bf16.mxu0 %v6106_v5  ;;  %4318 = vmatprep.subr.bf16.mxu1 %v6109_v8 }
 0x218   : > { %3911 = vmatpush1.bf16.msra.mxu0 %v6104_v9  ;;  %4319 = vmatpush1.bf16.msra.mxu1 %v6107_v32 }
 0x219   : > { %3912 = vmatprep.subr.bf16.mxu0 %v6112_v35  ;;  %4320 = vmatprep.subr.bf16.mxu1 %v6115_v36  ;;  %v291_v35 = vld [vmem:[#allocation2] sm:$0xff]  ;;  %v293_v36 = vld [vmem:[#allocation2 + $0x10] sm:$0xff] }
 0x21c   : > { %3913 = vmatpush1.bf16.msra.mxu0 %v6110_v37  ;;  %4321 = vmatpush1.bf16.msra.mxu1 %v6113_v42  ;;  %v292_v37 = vld [vmem:[#allocation2 + $0x8] sm:$0xff]  ;;  %v294_v42 = vld [vmem:[#allocation2 + $0x18] sm:$0xff] }
 0x21d   : > { %3914 = vmatprep.subr.bf16.mxu0 %v6118_v43  ;;  %4322 = vmatprep.subr.bf16.mxu1 %v6121_v44 }
 0x220   : > { %3915 = vmatpush1.bf16.msra.mxu0 %v6116_v45  ;;  %4323 = vmatpush1.bf16.msra.mxu1 %v6119_v46  ;;  %v295_v45 = vld [vmem:[#allocation2 + $0x20] sm:$0xff]  ;;  %v297_v46 = vld [vmem:[#allocation2 + $0x30] sm:$0xff] }
 0x221   : > { %3916 = vmatprep.subr.bf16.mxu0 %v6124_v49  ;;  %4324 = vmatprep.subr.bf16.mxu1 %v6127_v52 }
 0x224   : > { %3917 = vmatpush1.bf16.msra.mxu0 %v6122_v50  ;;  %4325 = vmatpush1.bf16.msra.mxu1 %v6125_v51 }
 0x225   : > { %3918 = vmatprep.subr.bf16.mxu0 %v6130_v38  ;;  %4326 = vmatprep.subr.bf16.mxu1 %v6133_v55  ;;  %v296_v38 = vld [vmem:[#allocation2 + $0x28] sm:$0xff]  ;;  %v298_v55 = vld [vmem:[#allocation2 + $0x38] sm:$0xff] }
 0x228   : > { %3919 = vmatpush1.bf16.msra.mxu0 %v6128_v33  ;;  %4327 = vmatpush1.bf16.msra.mxu1 %v6131_v34 }
 0x229   : > { %3920 = vmatprep.subr.bf16.mxu0 %v6136_v39  ;;  %4328 = vmatprep.subr.bf16.mxu1 %v6139_v40 }
 0x22c   : > { %3921 = vmatpush1.bf16.msra.mxu0 %v6134_v56  ;;  %4329 = vmatpush1.bf16.msra.mxu1 %v6137_v58 }
 0x22d   : > { %3922 = vmatprep.subr.bf16.mxu0 %v6142_v59  ;;  %4330 = vmatprep.subr.bf16.mxu1 %v6145_v60 }
 0x230   : > { %3923 = vmatpush1.bf16.msra.mxu0 %v6140_v61  ;;  %4331 = vmatpush1.bf16.msra.mxu1 %v6143_v62 }
 0x233   : > { %3925 = vmatmul.mubr.bf16.vlgmr.msra.gmra.mrb[0].mxu0 %v4745_v2  ;;  %4333 = vmatmul.mubr.bf16.vlgmr.msra.gmra.mrb[0].mxu1 %v4745_v2 }
 0x234   : > { %3934 = vmatprep.mubr.bf16.mxu0 %v4762_v3  ;;  %4342 = vmatprep.mubr.bf16.mxu1 %v4762_v3  ;;  %v301_v3 = vld [vmem:[#allocation2 + $0x50] sm:$0xff] }
 0x23b   : > { %3935 = vmatmul.mubr.bf16.gmra.mrb[32].mxu0 %v4761_v6  ;;  %4343 = vmatmul.mubr.bf16.gmra.mrb[32].mxu1 %v4761_v6 }
 0x24e   : > { %v3783_v7 = vpop.f32.mrb[20].mxu0  ;;  %v4191_v10 = vpop.f32.mrb[20].mxu1 }
 0x24f   : > { %v3784_v11 = vadd.f32 %v3783_v7, %v6899_v23  ;;  %v4192_v47 = vadd.f32 %v4191_v10, %v6902_v24  ;;  %v3785_v63 = vpop.f32.mrb[21].mxu0  ;;  %v4193_v48 = vpop.f32.mrb[21].mxu1 }
 0x250   : > { %v3786_v57 = vadd.f32 %v3785_v63, %v6905_v27  ;;  %v4194_v41 = vadd.f32 %v4193_v48, %v6908_v28  ;;  %v3787_v53 = vpop.f32.mrb[22].mxu0  ;;  %v4195_v1 = vpop.f32.mrb[22].mxu1  ;;  %v302_v63 = vld [vmem:[#allocation2 + $0x58] sm:$0xff] }
 0x251   : > { %v3788_v12 = vpop.f32.mrb[23].mxu0  ;;  %v4196_v54 = vpop.f32.mrb[23].mxu1 }
 0x28e   : > { %v3834_v14 = vpop.f32.mrb[24].mxu0  ;;  %v4242_v15 = vpop.f32.mrb[24].mxu1 }
 0x28f   : > { %v3835_v16 = vadd.f32 %v3834_v14, %v3784_v11  ;;  %v4243_v18 = vadd.f32 %v4242_v15, %v4192_v47  ;;  %v3836_v19 = vpop.f32.mrb[25].mxu0  ;;  %v4244_v20 = vpop.f32.mrb[25].mxu1  ;;  %v300_v11 = vld [vmem:[#allocation2 + $0x48] sm:$0xff] }
 0x290   : > { %v3837_v21 = vadd.f32 %v3836_v19, %v3786_v57  ;;  %v4245_v22 = vadd.f32 %v4244_v20, %v4194_v41  ;;  %v3838_v23 = vpop.f32.mrb[26].mxu0  ;;  %v4246_v24 = vpop.f32.mrb[26].mxu1 }
 0x291   : > { %v3839_v25 = vpop.f32.mrb[27].mxu0  ;;  %v4247_v26 = vpop.f32.mrb[27].mxu1 }
 0x2ce   : > { %v3885_v29 = vpop.f32.mrb[28].mxu0  ;;  %v4293_v27 = vpop.f32.mrb[28].mxu1 }
 0x2cf   : > { %v3886_v13 = vadd.f32 %v3885_v29, %v3835_v16  ;;  %v4294_v28 = vadd.f32 %v4293_v27, %v4243_v18  ;;  %v3887_v4 = vpop.f32.mrb[29].mxu0  ;;  %v4295_v17 = vpop.f32.mrb[29].mxu1 }
 0x2d0   : > { %v3888_v5 = vadd.f32 %v3887_v4, %v3837_v21  ;;  %v4296_v8 = vadd.f32 %v4295_v17, %v4245_v22  ;;  %v3889_v30 = vpop.f32.mrb[30].mxu0  ;;  %v4297_v31 = vpop.f32.mrb[30].mxu1 }
 0x2d1   : > { %v3890_v9 = vpop.f32.mrb[31].mxu0  ;;  %v4298_v32 = vpop.f32.mrb[31].mxu1 }
 0x306   : > { %v3926_v43 = vpop.f32.mrb[0].mxu0  ;;  %v4334_v44 = vpop.f32.mrb[0].mxu1 }
 0x307   : > { %v4351_v49 = vadd.f32 %v3926_v43, %v291_v35  ;;  %v4353_v52 = vadd.f32 %v4334_v44, %v293_v36  ;;  %v3928_v50 = vpop.f32.mrb[1].mxu0  ;;  %v4336_v51 = vpop.f32.mrb[1].mxu1 }
 0x308   : > { %v4352_v33 = vadd.f32 %v3928_v50, %v292_v37  ;;  %v4354_v34 = vadd.f32 %v4336_v51, %v294_v42  ;;  %v3930_v39 = vpop.f32.mrb[2].mxu0  ;;  %v4338_v40 = vpop.f32.mrb[2].mxu1 }
 0x309   : > { %4363 = vst [vmem:[#allocation2] sm:$0xff] %v4351_v49  ;;  %4365 = vst [vmem:[#allocation2 + $0x10] sm:$0xff] %v4353_v52  ;;  %v4355_v56 = vadd.f32 %v3930_v39, %v295_v45  ;;  %v4357_v58 = vadd.f32 %v4338_v40, %v297_v46  ;;  %v3932_v59 = vpop.f32.mrb[3].mxu0  ;;  %v4340_v60 = vpop.f32.mrb[3].mxu1 }
 0x30a   : > { %4364 = vst [vmem:[#allocation2 + $0x8] sm:$0xff] %v4352_v33  ;;  %4366 = vst [vmem:[#allocation2 + $0x18] sm:$0xff] %v4354_v34  ;;  %v4356_v61 = vadd.f32 %v3932_v59, %v296_v38  ;;  %v4358_v62 = vadd.f32 %v4340_v60, %v298_v55 }
 0x30b   : > { %4367 = vst [vmem:[#allocation2 + $0x20] sm:$0xff] %v4355_v56  ;;  %4369 = vst [vmem:[#allocation2 + $0x30] sm:$0xff] %v4357_v58 }
 0x30c   : > { %4368 = vst [vmem:[#allocation2 + $0x28] sm:$0xff] %v4356_v61  ;;  %4370 = vst [vmem:[#allocation2 + $0x38] sm:$0xff] %v4358_v62 }
 0x30e   : > { %v3936_v2 = vpop.f32.mrb[32].mxu0  ;;  %v4344_v6 = vpop.f32.mrb[32].mxu1  ;;  %4378 = sbr.rel (%p5275_p10) target bundleno = 874 (0x36a), region = 67 }
 0x30f   : > { %v3937_v7 = vadd.f32 %v3936_v2, %v3886_v13  ;;  %v4345_v10 = vadd.f32 %v4344_v6, %v4294_v28  ;;  %v3938_v47 = vpop.f32.mrb[33].mxu0  ;;  %v4346_v48 = vpop.f32.mrb[33].mxu1 }
 0x310   : > { %v3939_v57 = vadd.f32 %v3938_v47, %v3888_v5  ;;  %v4347_v41 = vadd.f32 %v4346_v48, %v4296_v8  ;;  %v3940_v53 = vpop.f32.mrb[34].mxu0  ;;  %v4348_v1 = vpop.f32.mrb[34].mxu1  ;;  %v6948_v19 = vld [vmem:[#allocation2] sm:$0xff] (!%p5275_p10)  ;;  %v6952_v21 = vld [vmem:[#allocation2 + $0x10] sm:$0xff] (!%p5275_p10) }
 0x311   : > { %v4359_v12 = vadd.f32 %v3937_v7, %v299_v0  ;;  %v4361_v54 = vadd.f32 %v4345_v10, %v301_v3  ;;  %v3941_v14 = vpop.f32.mrb[35].mxu0  ;;  %v4349_v15 = vpop.f32.mrb[35].mxu1  ;;  %v6950_v20 = vld [vmem:[#allocation2 + $0x8] sm:$0xff] (!%p5275_p10)  ;;  %v6954_v22 = vld [vmem:[#allocation2 + $0x18] sm:$0xff] (!%p5275_p10)  ;;  %v4423_v25 = vmul.f32 (!%p5275_p10), %v6948_v19, %v6948_v19  ;;  %v4425_v29 = vmul.f32 (!%p5275_p10), %v6952_v21, %v6952_v21 }
 0x312   : > { %v4360_v16 = vadd.f32 %v3939_v57, %v300_v11  ;;  %v4362_v18 = vadd.f32 %v4347_v41, %v302_v63  ;;  %v6956_v23 = vld [vmem:[#allocation2 + $0x20] sm:$0xff] (!%p5275_p10)  ;;  %v4424_v26 = vmul.f32 (!%p5275_p10), %v6950_v20, %v6950_v20  ;;  %v6966_v27 = vld [vmem:[#allocation2 + $0x30] sm:$0xff] (!%p5275_p10)  ;;  %v4426_v5 = vmul.f32 (!%p5275_p10), %v6954_v22, %v6954_v22 }
 0x313   : > { %4371 = vst [vmem:[#allocation2 + $0x40] sm:$0xff] %v4359_v12  ;;  %4373 = vst [vmem:[#allocation2 + $0x50] sm:$0xff] %v4361_v54  ;;  %v6958_v24 = vld [vmem:[#allocation2 + $0x28] sm:$0xff] (!%p5275_p10)  ;;  %v6968_v13 = vld [vmem:[#allocation2 + $0x38] sm:$0xff] (!%p5275_p10)  ;;  %v4391_v4 = vadd.f32 (!%p5275_p10), %v6956_v23, %v6948_v19  ;;  %v4427_v8 = vmul.f32 (!%p5275_p10), %v6956_v23, %v6956_v23  ;;  %v4407_v32 = vadd.f32 (!%p5275_p10), %v6966_v27, %v6952_v21 }
 0x314   : > { %4372 = vst [vmem:[#allocation2 + $0x48] sm:$0xff] %v4360_v16  ;;  %4374 = vst [vmem:[#allocation2 + $0x58] sm:$0xff] %v4362_v18  ;;  %v4399_v17 = vadd.f32 (!%p5275_p10), %v6958_v24, %v6950_v20  ;;  %v4415_v35 = vadd.f32 (!%p5275_p10), %v6968_v13, %v6954_v22  ;;  %v4428_v36 = vmul.f32 (!%p5275_p10), %v6958_v24, %v6958_v24 }
 0x315   : > { %v4429_v37 = vmul.f32 %v6966_v27, %v6966_v27  ;;  %v4430_v44 = vmul.f32 %v6968_v13, %v6968_v13  ;;  %v4435_v33 = vadd.f32 %v4427_v8, %v4423_v25 }
 0x316   : > { %v4443_v40 = vadd.f32 %v4428_v36, %v4424_v26 }
 0x317   : > { %v4451_v56 = vadd.f32 %v4429_v37, %v4425_v29  ;;  %v4459_v61 = vadd.f32 %v4430_v44, %v4426_v5 }
 0x31a   : > { %v6970_v28 = vld [vmem:[#allocation2 + $0x40] sm:$0xff]  ;;  %v6982_v31 = vld [vmem:[#allocation2 + $0x50] sm:$0xff] }
 0x31b   : > { %v6980_v30 = vld [vmem:[#allocation2 + $0x48] sm:$0xff]  ;;  %v6984_v9 = vld [vmem:[#allocation2 + $0x58] sm:$0xff]  ;;  %v4392_v42 = vadd.f32 %v4391_v4, %v6970_v28  ;;  %v4431_v45 = vmul.f32 %v6970_v28, %v6970_v28  ;;  %v4408_v46 = vadd.f32 %v4407_v32, %v6982_v31  ;;  %v4433_v50 = vmul.f32 %v6982_v31, %v6982_v31 }
 0x31c   : > { %v4400_v43 = vadd.f32 %v4399_v17, %v6980_v30  ;;  %v4416_v49 = vadd.f32 %v4415_v35, %v6984_v9  ;;  %v4432_v52 = vmul.f32 %v6980_v30, %v6980_v30  ;;  %v4434_v55 = vmul.f32 %v6984_v9, %v6984_v9 }
 0x31d   : > { %v4393_v51 = vrot.slane %v4392_v42, 4  ;;  %v4409_v34 = vrot.slane %v4408_v46, 4  ;;  %v4436_v60 = vadd.f32 %v4435_v33, %v4431_v45  ;;  %v4452_v3 = vadd.f32 %v4451_v56, %v4433_v50 }
 0x31e   : > { %v4401_v38 = vrot.slane %v4400_v43, 4  ;;  %v4417_v39 = vrot.slane %v4416_v49, 4  ;;  %v4444_v2 = vadd.f32 %v4443_v40, %v4432_v52  ;;  %v4460_v11 = vadd.f32 %v4459_v61, %v4434_v55 }
 0x31f   : > { %v4394_v58 = vadd.f32 %v4393_v51, %v4392_v42  ;;  %v4410_v62 = vadd.f32 %v4409_v34, %v4408_v46  ;;  %v4437_v10 = vrot.slane %v4436_v60, 4  ;;  %v4453_v57 = vrot.slane %v4452_v3, 4 }
 0x320   : > { %v4402_v59 = vadd.f32 %v4401_v38, %v4400_v43  ;;  %v4418_v0 = vadd.f32 %v4417_v39, %v4416_v49  ;;  %v4445_v48 = vrot.slane %v4444_v2, 4  ;;  %v4461_v12 = vrot.slane %v4460_v11, 4 }
 0x321   : > { %v4395_v6 = vrot.slane %v4394_v58, 2  ;;  %v4411_v47 = vrot.slane %v4410_v62, 2  ;;  %v4438_v1 = vadd.f32 %v4437_v10, %v4436_v60  ;;  %v4454_v16 = vadd.f32 %v4453_v57, %v4452_v3 }
 0x322   : > { %v4403_v7 = vrot.slane %v4402_v59, 2  ;;  %v4419_v63 = vrot.slane %v4418_v0, 2  ;;  %v4446_v15 = vadd.f32 %v4445_v48, %v4444_v2  ;;  %v4462_v29 = vadd.f32 %v4461_v12, %v4460_v11 }
 0x323   : > { %v4396_v41 = vadd.f32 %v4395_v6, %v4394_v58  ;;  %v4412_v54 = vadd.f32 %v4411_v47, %v4410_v62  ;;  %v4439_v26 = vrot.slane %v4438_v1, 2  ;;  %v4455_v8 = vrot.slane %v4454_v16, 2 }
 0x324   : > { %v4404_v53 = vadd.f32 %v4403_v7, %v4402_v59  ;;  %v4420_v14 = vadd.f32 %v4419_v63, %v4418_v0  ;;  %v4447_v5 = vrot.slane %v4446_v15, 2  ;;  %v4463_v37 = vrot.slane %v4462_v29, 2 }
 0x325   : > { %v4397_v18 = vrot.slane %v4396_v41, 1  ;;  %v4413_v4 = vrot.slane %v4412_v54, 1  ;;  %v4440_v36 = vadd.f32 %v4439_v26, %v4438_v1  ;;  %v4456_v45 = vadd.f32 %v4455_v8, %v4454_v16 }
 0x326   : > { %v4405_v25 = vrot.slane %v4404_v53, 1  ;;  %v4421_v17 = vrot.slane %v4420_v14, 1  ;;  %v4448_v44 = vadd.f32 %v4447_v5, %v4446_v15  ;;  %v4464_v49 = vadd.f32 %v4463_v37, %v4462_v29 }
 0x327   : > { %v4398_v32 = vadd.f32 %v4397_v18, %v4396_v41  ;;  %v4414_v42 = vadd.f32 %v4413_v4, %v4412_v54  ;;  %v4441_v46 = vrot.slane %v4440_v36, 1  ;;  %v4457_v38 = vrot.slane %v4456_v45, 1 }
 0x328   : > { %v4406_v35 = vadd.f32 %v4405_v25, %v4404_v53  ;;  %v4422_v43 = vadd.f32 %v4421_v17, %v4420_v14  ;;  %v4449_v51 = vrot.slane %v4448_v44, 1  ;;  %v4465_v39 = vrot.slane %v4464_v49, 1 }
 0x329   : > { %v4467_v52 = vmul.f32 0.055555556, %v4398_v32  ;;  %v4469_v55 = vmul.f32 0.055555556, %v4414_v42  ;;  %v4442_v34 = vadd.f32 %v4441_v46, %v4440_v36  ;;  %v4458_v58 = vadd.f32 %v4457_v38, %v4456_v45  ;;  %v4487_v42 = vld [vmem:[%s7074_s2] sm:$0xf] }
 0x32a   : > { %v4468_v50 = vmul.f32 0.055555556, %v4406_v35  ;;  %v4470_v33 = vmul.f32 0.055555556, %v4422_v43  ;;  %v4450_v56 = vadd.f32 %v4449_v51, %v4448_v44  ;;  %v4466_v61 = vadd.f32 %v4465_v39, %v4464_v49 }
 0x32b   : > { %v4475_v40 = vmul.f32 %v4467_v52, %v4467_v52  ;;  %v4477_v60 = vmul.f32 %v4469_v55, %v4469_v55  ;;  %v4471_v62 = vmul.f32 0.055555556, %v4442_v34  ;;  %v4473_v3 = vmul.f32 0.055555556, %v4458_v58 }
 0x32c   : > { %v4476_v59 = vmul.f32 %v4468_v50, %v4468_v50  ;;  %v4478_v0 = vmul.f32 %v4470_v33, %v4470_v33  ;;  %v4472_v2 = vmul.f32 0.055555556, %v4450_v56  ;;  %v4474_v6 = vmul.f32 0.055555556, %v4466_v61 }
 0x32d   : > { %v4479_v7 = vsub.f32 %v4471_v62, %v4475_v40  ;;  %v4481_v11 = vsub.f32 %v4473_v3, %v4477_v60  ;;  %v6181_v14 = vmov 1966171168   ;;  %v4505_v16 = vlaneseq }
 0x32e   : > { %v4480_v10 = vsub.f32 %v4472_v2, %v4476_v59  ;;  %v4482_v47 = vsub.f32 %v4474_v6, %v4478_v0  ;;  %v4503_v15 = vunpack.c.l.s4 %v6181_v14  ;;  %v4526_v6 = vld [vmem:[%s7075_s3] sm:$0xf] }
 0x32f   : > { %v4483_v63 = vmax.f32 %v4479_v7, 0.0  ;;  %v4485_v57 = vmax.f32 %v4481_v11, 0.0  ;;  %v4506_v25 = vshrl.u32 %v4505_v16, 7 }
 0x330   : > { %v4484_v48 = vmax.f32 %v4480_v10, 0.0  ;;  %v4486_v41 = vmax.f32 %v4482_v47, 0.0  ;;  %v4504_v18 = vunpack.c.0.s8 %v4503_v15 }
 0x331   : > { %v4488_v53 = vadd.f32 1e-05, %v4483_v63  ;;  %v4490_v12 = vadd.f32 1e-05, %v4485_v57  ;;  %v4530_v43 = vsub.s32 0, %v4506_v25  ;;  %v4534_v45 = vsub.s32 1, %v4506_v25 }
 0x332   : > { %v4489_v1 = vadd.f32 1e-05, %v4484_v48  ;;  %v4491_v54 = vadd.f32 1e-05, %v4486_v41  ;;  %v4507_v29 = vsub.s32 %v4504_v18, %v4506_v25  ;;  %v4538_v46 = vsub.s32 2, %v4506_v25 }
 0x333   : > { %6148 = vrsqrt.f32 %v4488_v53  ;;  %v4542_v49 = vsub.s32 3, %v4506_v25 }
 0x334   : > { %6150 = vrsqrt.f32 %v4489_v1 }
 0x335   : > { %6152 = vrsqrt.f32 %v4490_v12 }
 0x336   : > { %6154 = vrsqrt.f32 %v4491_v54 }
 0x33d   : > { %v6149_v26 = vpop.eup %6148 }
 0x33e   : > { %v6151_v4 = vpop.eup %6150 }
 0x33f   : > { %v6153_v17 = vpop.eup %6152  ;;  %v4500_v5 = vcombine.low %v6149_v26, %v6151_v4 }
 0x340   : > { %v6155_v8 = vpop.eup %6154 }
 0x341   : > { %v4501_v32 = vcombine.low %v6153_v17, %v6155_v8  ;;  %v4508_v35 = vrot.slane %v4500_v5, %v4507_v29 }
 0x343   : > { %v4515_v36 = vrot.slane %v4501_v32, %v4507_v29 }
 0x345   : > { %v4516_v37 = vcombine.low %v4508_v35, %v4515_v36 }
 0x347   : > { %v4523_v44 = vrot.slane %v4516_v37, %v4507_v29 }
 0x349   : > { %v4525_v51 = vmul.f32 %v4523_v44, %v4487_v42 }
 0x34b   : > { %v4531_v38 = vrot.slane %v4525_v51, %v4530_v43  ;;  %v4535_v34 = vrot.slane %v4525_v51, %v4534_v45  ;;  %v4539_v39 = vrot.slane %v4525_v51, %v4538_v46  ;;  %v4543_v40 = vrot.slane %v4525_v51, %v4542_v49 }
 0x34d   : > { %v4548_v56 = vmul.f32 %v4531_v38, %v4467_v52  ;;  %v4549_v58 = vmul.f32 %v4535_v34, %v4468_v50  ;;  %v4550_v59 = vmul.f32 %v4539_v39, %v4469_v55  ;;  %v4551_v60 = vmul.f32 %v4543_v40, %v4470_v33 }
 0x34e   : > { %v4582_v10 = vmul.f32 %v4531_v38, %v6948_v19  ;;  %v4583_v47 = vmul.f32 %v4535_v34, %v6950_v20  ;;  %v4584_v52 = vmul.f32 %v4539_v39, %v6952_v21  ;;  %v4585_v50 = vmul.f32 %v4543_v40, %v6954_v22 }
 0x34f   : > { %v4556_v61 = vcombine.low %v4548_v56, %v4549_v58  ;;  %v4557_v62 = vcombine.low %v4550_v59, %v4551_v60  ;;  %v4586_v55 = vmul.f32 %v4531_v38, %v6956_v23  ;;  %v4587_v33 = vmul.f32 %v4535_v34, %v6958_v24 }
 0x350   : > { %v4588_v63 = vmul.f32 %v4539_v39, %v6966_v27  ;;  %v4589_v48 = vmul.f32 %v4543_v40, %v6968_v13  ;;  %v4590_v19 = vmul.f32 %v4531_v38, %v6970_v28  ;;  %v4591_v20 = vmul.f32 %v4535_v34, %v6980_v30 }
 0x351   : > { %v4564_v0 = vrot.slane %v4556_v61, %v4507_v29  ;;  %v4571_v2 = vrot.slane %v4557_v62, %v4507_v29  ;;  %v4592_v21 = vmul.f32 %v4539_v39, %v6982_v31  ;;  %v4593_v22 = vmul.f32 %v4543_v40, %v6984_v9 }
 0x353   : > { %v4572_v3 = vcombine.low %v4564_v0, %v4571_v2 }
 0x355   : > { %v4579_v7 = vrot.slane %v4572_v3, %v4507_v29 }
 0x357   : > { %v4581_v11 = vsub.f32 %v4526_v6, %v4579_v7 }
 0x359   : > { %v4598_v57 = vrot.slane %v4581_v11, %v4530_v43  ;;  %v4602_v41 = vrot.slane %v4581_v11, %v4534_v45  ;;  %v4606_v53 = vrot.slane %v4581_v11, %v4538_v46  ;;  %v4610_v1 = vrot.slane %v4581_v11, %v4542_v49 }
 0x35b   : > { %v4615_v12 = vadd.f32 %v4598_v57, %v4582_v10  ;;  %v4616_v23 = vadd.f32 %v4602_v41, %v4583_v47  ;;  %v4617_v54 = vadd.f32 %v4606_v53, %v4584_v52  ;;  %v4618_v24 = vadd.f32 %v4610_v1, %v4585_v50 }
 0x35c   : > { %v4619_v14 = vadd.f32 %v4598_v57, %v4586_v55  ;;  %v4620_v27 = vadd.f32 %v4602_v41, %v4587_v33  ;;  %v4621_v15 = vadd.f32 %v4606_v53, %v4588_v63  ;;  %v4622_v13 = vadd.f32 %v4610_v1, %v4589_v48 }
 0x35d   : > { %vm4627_vm0 = vcmp.ge.f32.partialorder %v4615_v12, 0.0  ;;  %v4639_v16 = vmul.f32 0.2, %v4615_v12  ;;  %vm4628_vm1 = vcmp.ge.f32.partialorder %v4616_v23, 0.0  ;;  %v4640_v18 = vmul.f32 0.2, %v4616_v23 }
 0x35e   : > { %vm4629_vm2 = vcmp.ge.f32.partialorder %v4617_v54, 0.0  ;;  %v4641_v28 = vmul.f32 0.2, %v4617_v54  ;;  %vm4630_vm3 = vcmp.ge.f32.partialorder %v4618_v24, 0.0  ;;  %v4642_v30 = vmul.f32 0.2, %v4618_v24 }
 0x35f   : > { %v4651_v25 = vsel %vm4627_vm0, %v4615_v12, %v4639_v16  ;;  %v4652_v31 = vsel %vm4628_vm1, %v4616_v23, %v4640_v18  ;;  %vm4631_vm4 = vcmp.ge.f32.partialorder %v4619_v14, 0.0  ;;  %v4643_v9 = vmul.f32 0.2, %v4619_v14 }
 0x360   : > { %4663 = vst [vmem:[%s7076_s4] sm:$0xff] %v4651_v25  ;;  %4664 = vst [vmem:[%s7076_s4 + $0x8] sm:$0xff] %v4652_v31  ;;  %v4653_v26 = vsel %vm4629_vm2, %v4617_v54, %v4641_v28  ;;  %v4654_v29 = vsel %vm4630_vm3, %v4618_v24, %v4642_v30  ;;  %vm4632_vm5 = vcmp.ge.f32.partialorder %v4620_v27, 0.0  ;;  %v4644_v4 = vmul.f32 0.2, %v4620_v27 }
 0x361   : > { %4665 = vst [vmem:[%s7076_s4 + $0x10] sm:$0xff] %v4653_v26  ;;  %4666 = vst [vmem:[%s7076_s4 + $0x18] sm:$0xff] %v4654_v29  ;;  %v4655_v17 = vsel %vm4631_vm4, %v4619_v14, %v4643_v9  ;;  %vm4633_vm6 = vcmp.ge.f32.partialorder %v4621_v15, 0.0  ;;  %v4645_v5 = vmul.f32 0.2, %v4621_v15  ;;  %vm4634_vm7 = vcmp.ge.f32.partialorder %v4622_v13, 0.0 }
 0x362   : > { %4667 = vst [vmem:[%s7076_s4 + $0x20] sm:$0xff] %v4655_v17  ;;  %v4656_v8 = vsel %vm4632_vm5, %v4620_v27, %v4644_v4  ;;  %v4646_v32 = vmul.f32 0.2, %v4622_v13  ;;  %v4623_v35 = vadd.f32 %v4598_v57, %v4590_v19  ;;  %v4624_v36 = vadd.f32 %v4602_v41, %v4591_v20 }
 0x363   : > { %4668 = vst [vmem:[%s7076_s4 + $0x28] sm:$0xff] %v4656_v8  ;;  %v4657_v37 = vsel %vm4633_vm6, %v4621_v15, %v4645_v5  ;;  %v4625_v42 = vadd.f32 %v4606_v53, %v4592_v21  ;;  %v4626_v43 = vadd.f32 %v4610_v1, %v4593_v22 }
 0x364   : > { %4669 = vst [vmem:[%s7076_s4 + $0x30] sm:$0xff] %v4657_v37  ;;  %v4658_v44 = vsel %vm4634_vm7, %v4622_v13, %v4646_v32  ;;  %vm4635_vm8 = vcmp.ge.f32.partialorder %v4623_v35, 0.0  ;;  %v4647_v45 = vmul.f32 0.2, %v4623_v35  ;;  %vm4636_vm9 = vcmp.ge.f32.partialorder %v4624_v36, 0.0 }
 0x365   : > { %4670 = vst [vmem:[%s7076_s4 + $0x38] sm:$0xff] %v4658_v44  ;;  %v4648_v46 = vmul.f32 0.2, %v4624_v36  ;;  %vm4637_vm10 = vcmp.ge.f32.partialorder %v4625_v42, 0.0  ;;  %v4649_v49 = vmul.f32 0.2, %v4625_v42 }
 0x366   : > { %vm4638_vm11 = vcmp.ge.f32.partialorder %v4626_v43, 0.0  ;;  %v4659_v51 = vsel %vm4635_vm8, %v4623_v35, %v4647_v45  ;;  %v4650_v38 = vmul.f32 0.2, %v4626_v43 }
 0x367   : > { %4671 = vst [vmem:[%s7076_s4 + $0x40] sm:$0xff] %v4659_v51  ;;  %v4660_v34 = vsel %vm4636_vm9, %v4624_v36, %v4648_v46  ;;  %v4661_v39 = vsel %vm4637_vm10, %v4625_v42, %v4649_v49 }
 0x368   : > { %4672 = vst [vmem:[%s7076_s4 + $0x48] sm:$0xff] %v4660_v34  ;;  %4673 = vst [vmem:[%s7076_s4 + $0x50] sm:$0xff] %v4661_v39  ;;  %v4662_v40 = vsel %vm4638_vm11, %v4626_v43, %v4650_v38 }
 0x369   : > { %4674 = vst [vmem:[%s7076_s4 + $0x58] sm:$0xff] %v4662_v40 }
 0x36a PF: > { %p11_p11 = scmp.ge.s32.totalorder %s6226_s19, 4   ;;  %s7077_s15 = smov %s6174_s16 }
 0x36b   : > { %s7078_s16 = smov %s6235_s22  ;;  %s7079_s17 = smov %s6226_s19 }
 0x36c   :  { %13 = sbr.rel (!%p11_p11) target bundleno = 2 (0x2), region = 101 }

// kernel: discriminator_forward.9
= control target key start
LH: loop header
LB: loop body
LE: loop exit
PB: predicated region body
PF: predicated region fallthrough
CT: control target
= control target key end

     0   :  { %s2207_s15 = smov 0   ;;  %s2376_s0 = inlined_call_operand.vmem [shape: bf16[8,8192], index: 0, kind: input, shape index: {}]   ;;  %s2377_s1 = inlined_call_operand.vmem [shape: bf16[8192,128], index: 1, kind: input, shape index: {}]   ;;  %s2378_s2 = inlined_call_operand.vmem [shape: f32[1,128], index: 2, kind: input, shape index: {}]   ;;  %s2379_s3 = inlined_call_operand.vmem [shape: f32[1,128], index: 3, kind: input, shape index: {}]   ;;  %s2380_s4 = inlined_call_operand.vmem [shape: f32[8,128], index: 4, kind: output, shape index: {}]  }
   0x1 LB: > { %s2213_s16 = sadd.s32 4294967295, %s2179_s15   ;;  %p1686_p0 = scmp.ge.s32.totalorder %s2179_s15, 1  ;;  %s2179_s15 = sphi %s2207_s15, %s14_s15  }
   0x2   : > { %p169_p1 = scmp.lt.s32.totalorder %s2179_s15, 5 }
   0x4   : > { %p170_p2 = pnand %p1686_p0, %p169_p1 }
   0x5   : > { %s1687_s2 = sshll.u32 (!%p170_p2), %s2213_s16, 4  ;;  %s1689_s17 = sshll.u32 (!%p170_p2), %s2213_s16, 8 }
   0x6   : > { %173 = sbr.rel (%p170_p2) target bundleno = 413 (0x19d), region = 36  ;;  %p196_p3 = scmp.lt.s32.totalorder (!%p170_p2), %s1687_s2, 63 }
   0x7   : > { %p202_p4 = scmp.lt.s32.totalorder (!%p170_p2), %s1689_s17, 1023  ;;  %p1691_p5 = scmp.ne.s32.totalorder (!%p170_p2), %s2213_s16, 0 }
   0xd   : > { %s2382_s2 = smov (!%p196_p3, %s1687_s2), 63  ;;  %s2384_s17 = smov (!%p202_p4, %s1689_s17), 1023 }
   0xe   : > { %s1688_s18 = sshll.u32 %s2382_s2, 2  ;;  %s1690_s22 = sshll.u32 %s2384_s17, 2  ;;  %v2181_v0 = vmov (!%p1691_p5), 0.0  }
   0xf   : > { %s2222_s21 = scalar_lea.vmem %s2376_s0, %s1688_s18  ;;  %s2227_s25 = scalar_lea.vmem %s2377_s1, %s1690_s22  ;;  %212 = vst [vmem:[#allocation2] sm:$0xff] (!%p1691_p5), %v2181_v0 }
  0x10   : > { %211 = sbr.rel (%p1691_p5) target bundleno = 23 (0x17), region = 40 }
  0x17 PF: > { %v2025_v1 = vld [vmem:[%s2227_s25 + $0x40] sm:$0xff]   ;;  %v2029_v5 = vld [vmem:[%s2227_s25 + $0x48] sm:$0xff]   ;;  %v2033_v9 = vld [vmem:[%s2227_s25 + $0x50] sm:$0xff]   ;;  %p1836_p6 = scmp.ne.s32.totalorder %s2213_s16, 3 }
  0x18   : > { %v2026_v2 = vld [vmem:[%s2227_s25 + $0xc0] sm:$0xff]   ;;  %1840 = vmatprep.subr.bf16.mxu0 %v2025_v1  ;;  %v2030_v6 = vld [vmem:[%s2227_s25 + $0xc8] sm:$0xff]   ;;  %v2034_v10 = vld [vmem:[%s2227_s25 + $0xd0] sm:$0xff]  }
  0x19   : > { %v2027_v3 = vld [vmem:[%s2227_s25] sm:$0xff]   ;;  %1862 = vmatprep.subr.bf16.mxu1 %v2026_v2  ;;  %v2031_v7 = vld [vmem:[%s2227_s25 + $0x8] sm:$0xff]   ;;  %v2035_v11 = vld [vmem:[%s2227_s25 + $0x10] sm:$0xff]  }
  0x1a   : > { %v2028_v4 = vld [vmem:[%s2227_s25 + $0x80] sm:$0xff]   ;;  %1841 = vmatpush3.bf16.msra.mxu0 %v2027_v3  ;;  %v2032_v8 = vld [vmem:[%s2227_s25 + $0x88] sm:$0xff]   ;;  %v2036_v12 = vld [vmem:[%s2227_s25 + $0x90] sm:$0xff]  }
  0x1b   : > { %1863 = vmatpush3.bf16.msra.mxu1 %v2028_v4  ;;  %1842 = vmatprep.subr.bf16.mxu0 %v2029_v5  ;;  %v2037_v13 = vld [vmem:[%s2227_s25 + $0x58] sm:$0xff]   ;;  %v2041_v17 = vld [vmem:[%s2227_s25 + $0x60] sm:$0xff]   ;;  %v2045_v21 = vld [vmem:[%s2227_s25 + $0x68] sm:$0xff]  }
  0x1c   : > { %1864 = vmatprep.subr.bf16.mxu1 %v2030_v6  ;;  %v2038_v14 = vld [vmem:[%s2227_s25 + $0xd8] sm:$0xff]   ;;  %v2042_v18 = vld [vmem:[%s2227_s25 + $0xe0] sm:$0xff]   ;;  %v2046_v22 = vld [vmem:[%s2227_s25 + $0xe8] sm:$0xff]  }
  0x1d   : > { %v2039_v15 = vld [vmem:[%s2227_s25 + $0x18] sm:$0xff]   ;;  %v2043_v19 = vld [vmem:[%s2227_s25 + $0x20] sm:$0xff]   ;;  %v2047_v23 = vld [vmem:[%s2227_s25 + $0x28] sm:$0xff]  }
  0x1e   : > { %1843 = vmatpush3.bf16.msra.mxu0 %v2031_v7  ;;  %v2040_v16 = vld [vmem:[%s2227_s25 + $0x98] sm:$0xff]   ;;  %v2044_v20 = vld [vmem:[%s2227_s25 + $0xa0] sm:$0xff]   ;;  %v2048_v24 = vld [vmem:[%s2227_s25 + $0xa8] sm:$0xff]  }
  0x1f   : > { %1865 = vmatpush3.bf16.msra.mxu1 %v2032_v8  ;;  %1844 = vmatprep.subr.bf16.mxu0 %v2033_v9  ;;  %v2049_v25 = vld [vmem:[%s2227_s25 + $0x70] sm:$0xff]   ;;  %v2053_v29 = vld [vmem:[%s2227_s25 + $0x78] sm:$0xff]   ;;  %v214_v33 = vld [vmem:[%s2222_s21] sm:$0xff] }
  0x20   : > { %1866 = vmatprep.subr.bf16.mxu1 %v2034_v10  ;;  %v2050_v26 = vld [vmem:[%s2227_s25 + $0xf0] sm:$0xff]   ;;  %v2054_v30 = vld [vmem:[%s2227_s25 + $0xf8] sm:$0xff]   ;;  %v215_v34 = vld [vmem:[%s2222_s21 + $0x8] sm:$0xff]  ;;  %v1692_v35 = vcombine.low %v214_v33, %v214_v33  ;;  %v1693_v36 = vcombine.high %v214_v33, %v214_v33 }
  0x21   : > { %v2051_v27 = vld [vmem:[%s2227_s25 + $0x30] sm:$0xff]   ;;  %v2055_v31 = vld [vmem:[%s2227_s25 + $0x38] sm:$0xff]   ;;  %v1694_v37 = vcombine.low %v215_v34, %v215_v34  ;;  %v1695_v38 = vcombine.high %v215_v34, %v215_v34  ;;  %v2061_v39 = vld [vmem:[%s2227_s25 + $0x140] sm:$0xff]  }
  0x22   : > { %1845 = vmatpush3.bf16.msra.mxu0 %v2035_v11  ;;  %v2052_v28 = vld [vmem:[%s2227_s25 + $0xb0] sm:$0xff]   ;;  %v2056_v32 = vld [vmem:[%s2227_s25 + $0xb8] sm:$0xff]   ;;  %v2062_v40 = vld [vmem:[%s2227_s25 + $0x1c0] sm:$0xff]   ;;  %1334 = vmatprep.mubr.bf16.mxu0 %v1693_v36 }
  0x23   : > { %1867 = vmatpush3.bf16.msra.mxu1 %v2036_v12  ;;  %1846 = vmatprep.subr.bf16.mxu0 %v2037_v13  ;;  %v2063_v41 = vld [vmem:[%s2227_s25 + $0x100] sm:$0xff]   ;;  %v2065_v43 = vld [vmem:[%s2227_s25 + $0x148] sm:$0xff]   ;;  %v2069_v47 = vld [vmem:[%s2227_s25 + $0x150] sm:$0xff]  }
  0x24   : > { %1868 = vmatprep.subr.bf16.mxu1 %v2038_v14  ;;  %1374 = vmatprep.mubr.bf16.mxu1 %v1695_v38  ;;  %v2064_v42 = vld [vmem:[%s2227_s25 + $0x180] sm:$0xff]   ;;  %v2066_v44 = vld [vmem:[%s2227_s25 + $0x1c8] sm:$0xff]   ;;  %v2070_v48 = vld [vmem:[%s2227_s25 + $0x1d0] sm:$0xff]  }
  0x25   : > { %v2067_v45 = vld [vmem:[%s2227_s25 + $0x108] sm:$0xff]   ;;  %v2071_v49 = vld [vmem:[%s2227_s25 + $0x110] sm:$0xff]   ;;  %v2073_v51 = vld [vmem:[%s2227_s25 + $0x158] sm:$0xff]  }
  0x26   : > { %1847 = vmatpush3.bf16.msra.mxu0 %v2039_v15  ;;  %v2068_v46 = vld [vmem:[%s2227_s25 + $0x188] sm:$0xff]   ;;  %v2072_v50 = vld [vmem:[%s2227_s25 + $0x190] sm:$0xff]   ;;  %v2074_v52 = vld [vmem:[%s2227_s25 + $0x1d8] sm:$0xff]  }
  0x27   : > { %1869 = vmatpush3.bf16.msra.mxu1 %v2040_v16  ;;  %1848 = vmatprep.subr.bf16.mxu0 %v2041_v17  ;;  %v2075_v53 = vld [vmem:[%s2227_s25 + $0x118] sm:$0xff]   ;;  %v2077_v55 = vld [vmem:[%s2227_s25 + $0x160] sm:$0xff]   ;;  %v2081_v59 = vld [vmem:[%s2227_s25 + $0x168] sm:$0xff]  }
  0x28   : > { %1870 = vmatprep.subr.bf16.mxu1 %v2042_v18  ;;  %v2076_v54 = vld [vmem:[%s2227_s25 + $0x198] sm:$0xff]   ;;  %v2078_v56 = vld [vmem:[%s2227_s25 + $0x1e0] sm:$0xff]   ;;  %v2082_v60 = vld [vmem:[%s2227_s25 + $0x1e8] sm:$0xff]  }
  0x29   : > { %v2079_v57 = vld [vmem:[%s2227_s25 + $0x120] sm:$0xff]   ;;  %v2083_v61 = vld [vmem:[%s2227_s25 + $0x128] sm:$0xff]   ;;  %v2085_v63 = vld [vmem:[%s2227_s25 + $0x170] sm:$0xff]  }
  0x2a   : > { %1849 = vmatpush3.bf16.msra.mxu0 %v2043_v19  ;;  %v2080_v58 = vld [vmem:[%s2227_s25 + $0x1a0] sm:$0xff]   ;;  %v2084_v62 = vld [vmem:[%s2227_s25 + $0x1a8] sm:$0xff]   ;;  %v2086_v0 = vld [vmem:[%s2227_s25 + $0x1f0] sm:$0xff]  }
  0x2b   : > { %1871 = vmatpush3.bf16.msra.mxu1 %v2044_v20  ;;  %1850 = vmatprep.subr.bf16.mxu0 %v2045_v21  ;;  %v2087_v1 = vld [vmem:[%s2227_s25 + $0x130] sm:$0xff]   ;;  %v2089_v3 = vld [vmem:[%s2227_s25 + $0x178] sm:$0xff]   ;;  %v2097_v13 = vld [vmem:[%s2227_s25 + $0x240] sm:$0xff]  }
  0x2c   : > { %1872 = vmatprep.subr.bf16.mxu1 %v2046_v22  ;;  %v2088_v2 = vld [vmem:[%s2227_s25 + $0x1b0] sm:$0xff]   ;;  %v2090_v4 = vld [vmem:[%s2227_s25 + $0x1f8] sm:$0xff]   ;;  %v2098_v14 = vld [vmem:[%s2227_s25 + $0x2c0] sm:$0xff]  }
  0x2d   : > { %v2091_v5 = vld [vmem:[%s2227_s25 + $0x138] sm:$0xff]   ;;  %v216_v7 = vld [vmem:[%s2222_s21 + $0x10] sm:$0xff]  ;;  %v2099_v15 = vld [vmem:[%s2227_s25 + $0x200] sm:$0xff]  }
  0x2e   : > { %1851 = vmatpush3.bf16.msra.mxu0 %v2047_v23  ;;  %v2092_v6 = vld [vmem:[%s2227_s25 + $0x1b8] sm:$0xff]   ;;  %v1696_v8 = vcombine.low %v216_v7, %v216_v7  ;;  %v1697_v9 = vcombine.high %v216_v7, %v216_v7  ;;  %v2100_v16 = vld [vmem:[%s2227_s25 + $0x280] sm:$0xff]   ;;  %v2101_v17 = vld [vmem:[%s2227_s25 + $0x248] sm:$0xff]  }
  0x2f   : > { %1873 = vmatpush3.bf16.msra.mxu1 %v2048_v24  ;;  %1852 = vmatprep.subr.bf16.mxu0 %v2049_v25  ;;  %v217_v10 = vld [vmem:[%s2222_s21 + $0x18] sm:$0xff]  ;;  %v2102_v18 = vld [vmem:[%s2227_s25 + $0x2c8] sm:$0xff]   ;;  %v2105_v21 = vld [vmem:[%s2227_s25 + $0x250] sm:$0xff]  }
  0x30   : > { %1874 = vmatprep.subr.bf16.mxu1 %v2050_v26  ;;  %v1698_v11 = vcombine.low %v217_v10, %v217_v10  ;;  %v1699_v12 = vcombine.high %v217_v10, %v217_v10  ;;  %v2103_v19 = vld [vmem:[%s2227_s25 + $0x208] sm:$0xff]   ;;  %v2106_v22 = vld [vmem:[%s2227_s25 + $0x2d0] sm:$0xff]   ;;  %v2109_v25 = vld [vmem:[%s2227_s25 + $0x258] sm:$0xff]  }
  0x31   : > { %v2104_v20 = vld [vmem:[%s2227_s25 + $0x288] sm:$0xff]   ;;  %v2107_v23 = vld [vmem:[%s2227_s25 + $0x210] sm:$0xff]   ;;  %v2110_v26 = vld [vmem:[%s2227_s25 + $0x2d8] sm:$0xff]  }
  0x32   : > { %1853 = vmatpush3.bf16.msra.mxu0 %v2051_v27  ;;  %v2108_v24 = vld [vmem:[%s2227_s25 + $0x290] sm:$0xff]   ;;  %v2111_v27 = vld [vmem:[%s2227_s25 + $0x218] sm:$0xff]   ;;  %v2117_v33 = vld [vmem:[%s2227_s25 + $0x268] sm:$0xff]  }
  0x33   : > { %1875 = vmatpush3.bf16.msra.mxu1 %v2052_v28  ;;  %1854 = vmatprep.subr.bf16.mxu0 %v2053_v29  ;;  %v2112_v28 = vld [vmem:[%s2227_s25 + $0x298] sm:$0xff]   ;;  %v2113_v29 = vld [vmem:[%s2227_s25 + $0x260] sm:$0xff]   ;;  %v2118_v34 = vld [vmem:[%s2227_s25 + $0x2e8] sm:$0xff]  }
  0x34   : > { %1876 = vmatprep.subr.bf16.mxu1 %v2054_v30  ;;  %v2114_v30 = vld [vmem:[%s2227_s25 + $0x2e0] sm:$0xff]   ;;  %v2120_v36 = vld [vmem:[%s2227_s25 + $0x2a8] sm:$0xff]   ;;  %v2122_v38 = vld [vmem:[%s2227_s25 + $0x2f0] sm:$0xff]  }
  0x35   : > { %v2153_v7 = vld [vmem:[%s2227_s25 + $0x368] sm:$0xff]  }
  0x36   : > { %1855 = vmatpush3.bf16.msra.mxu0 %v2055_v31  ;;  %v2115_v31 = vld [vmem:[%s2227_s25 + $0x220] sm:$0xff]   ;;  %v2156_v10 = vld [vmem:[%s2227_s25 + $0x3a8] sm:$0xff]  }
  0x37   : > { %1877 = vmatpush3.bf16.msra.mxu1 %v2056_v32  ;;  %1884 = vmatprep.subr.bf16.mxu0 %v2061_v39  ;;  %v2116_v32 = vld [vmem:[%s2227_s25 + $0x2a0] sm:$0xff]   ;;  %v2123_v39 = vld [vmem:[%s2227_s25 + $0x230] sm:$0xff]  }
  0x38   : > { %1906 = vmatprep.subr.bf16.mxu1 %v2062_v40  ;;  %v2124_v40 = vld [vmem:[%s2227_s25 + $0x2b0] sm:$0xff]  }
  0x39   : > { %1335 = vmatmul.mubr.bf16.vlgmr.msra.gmra.mrb[0].mxu0 %v1692_v35  ;;  %v2119_v35 = vld [vmem:[%s2227_s25 + $0x228] sm:$0xff]  }
  0x3a   : > { %1375 = vmatmul.mubr.bf16.vlgmr.msra.gmra.mrb[0].mxu1 %v1694_v37  ;;  %1885 = vmatpush3.bf16.msra.mxu0 %v2063_v41  ;;  %v2121_v37 = vld [vmem:[%s2227_s25 + $0x270] sm:$0xff]   ;;  %v2125_v41 = vld [vmem:[%s2227_s25 + $0x278] sm:$0xff]  }
  0x3b   : > { %1907 = vmatpush3.bf16.msra.mxu1 %v2064_v42  ;;  %1886 = vmatprep.subr.bf16.mxu0 %v2065_v43  ;;  %v2126_v42 = vld [vmem:[%s2227_s25 + $0x2f8] sm:$0xff]  }
  0x3c   : > { %1908 = vmatprep.subr.bf16.mxu1 %v2066_v44  ;;  %1414 = vmatprep.mubr.bf16.mxu0 %v1697_v9  ;;  %v2127_v43 = vld [vmem:[%s2227_s25 + $0x238] sm:$0xff]   ;;  %v2155_v9 = vld [vmem:[%s2227_s25 + $0x328] sm:$0xff]  }
  0x3d   : > { %1454 = vmatprep.mubr.bf16.mxu1 %v1699_v12  ;;  %v2128_v44 = vld [vmem:[%s2227_s25 + $0x2b8] sm:$0xff]   ;;  %v2158_v12 = vld [vmem:[%s2227_s25 + $0x3f0] sm:$0xff]  }
  0x3e   : > { %1887 = vmatpush3.bf16.msra.mxu0 %v2067_v45  ;;  %v218_v45 = vld [vmem:[%s2222_s21 + $0x20] sm:$0xff] }
  0x3f   : > { %1909 = vmatpush3.bf16.msra.mxu1 %v2068_v46  ;;  %1888 = vmatprep.subr.bf16.mxu0 %v2069_v47  ;;  %v219_v46 = vld [vmem:[%s2222_s21 + $0x28] sm:$0xff]  ;;  %v1700_v47 = vcombine.low %v218_v45, %v218_v45 }
  0x40   : > { %1910 = vmatprep.subr.bf16.mxu1 %v2070_v48  ;;  %v1701_v48 = vcombine.high %v218_v45, %v218_v45 }
  0x42   : > { %1889 = vmatpush3.bf16.msra.mxu0 %v2071_v49  ;;  %v1702_v49 = vcombine.low %v219_v46, %v219_v46 }
  0x43   : > { %1911 = vmatpush3.bf16.msra.mxu1 %v2072_v50  ;;  %1890 = vmatprep.subr.bf16.mxu0 %v2073_v51  ;;  %v1703_v50 = vcombine.high %v219_v46, %v219_v46  ;;  %v2133_v51 = vld [vmem:[%s2227_s25 + $0x340] sm:$0xff]  }
  0x44   : > { %1912 = vmatprep.subr.bf16.mxu1 %v2074_v52  ;;  %v2134_v52 = vld [vmem:[%s2227_s25 + $0x3c0] sm:$0xff]  }
  0x46   : > { %1891 = vmatpush3.bf16.msra.mxu0 %v2075_v53  ;;  %v2135_v53 = vld [vmem:[%s2227_s25 + $0x300] sm:$0xff]  }
  0x47   : > { %1913 = vmatpush3.bf16.msra.mxu1 %v2076_v54  ;;  %1892 = vmatprep.subr.bf16.mxu0 %v2077_v55  ;;  %v2136_v54 = vld [vmem:[%s2227_s25 + $0x380] sm:$0xff]   ;;  %v2137_v55 = vld [vmem:[%s2227_s25 + $0x348] sm:$0xff]  }
  0x48   : > { %1914 = vmatprep.subr.bf16.mxu1 %v2078_v56  ;;  %v2138_v56 = vld [vmem:[%s2227_s25 + $0x3c8] sm:$0xff]  }
  0x4a   : > { %1893 = vmatpush3.bf16.msra.mxu0 %v2079_v57  ;;  %v2139_v57 = vld [vmem:[%s2227_s25 + $0x308] sm:$0xff]  }
  0x4b   : > { %1915 = vmatpush3.bf16.msra.mxu1 %v2080_v58  ;;  %1894 = vmatprep.subr.bf16.mxu0 %v2081_v59  ;;  %v2140_v58 = vld [vmem:[%s2227_s25 + $0x388] sm:$0xff]   ;;  %v2141_v59 = vld [vmem:[%s2227_s25 + $0x350] sm:$0xff]  }
  0x4c   : > { %1916 = vmatprep.subr.bf16.mxu1 %v2082_v60  ;;  %v2142_v60 = vld [vmem:[%s2227_s25 + $0x3d0] sm:$0xff]  }
  0x4e   : > { %1895 = vmatpush3.bf16.msra.mxu0 %v2083_v61  ;;  %v2143_v61 = vld [vmem:[%s2227_s25 + $0x310] sm:$0xff]  }
  0x4f   : > { %1917 = vmatpush3.bf16.msra.mxu1 %v2084_v62  ;;  %1896 = vmatprep.subr.bf16.mxu0 %v2085_v63  ;;  %v2144_v62 = vld [vmem:[%s2227_s25 + $0x390] sm:$0xff]   ;;  %v2145_v63 = vld [vmem:[%s2227_s25 + $0x358] sm:$0xff]  }
  0x50   : > { %1918 = vmatprep.subr.bf16.mxu1 %v2086_v0  ;;  %v2146_v0 = vld [vmem:[%s2227_s25 + $0x3d8] sm:$0xff]  }
  0x52   : > { %1897 = vmatpush3.bf16.msra.mxu0 %v2087_v1  ;;  %v2147_v1 = vld [vmem:[%s2227_s25 + $0x318] sm:$0xff]  }
  0x53   : > { %1919 = vmatpush3.bf16.msra.mxu1 %v2088_v2  ;;  %1898 = vmatprep.subr.bf16.mxu0 %v2089_v3  ;;  %v2148_v2 = vld [vmem:[%s2227_s25 + $0x398] sm:$0xff]   ;;  %v2149_v3 = vld [vmem:[%s2227_s25 + $0x360] sm:$0xff]  }
  0x54   : > { %1920 = vmatprep.subr.bf16.mxu1 %v2090_v4  ;;  %v2150_v4 = vld [vmem:[%s2227_s25 + $0x3e0] sm:$0xff]  }
  0x56   : > { %1899 = vmatpush3.bf16.msra.mxu0 %v2091_v5  ;;  %v2151_v5 = vld [vmem:[%s2227_s25 + $0x320] sm:$0xff]  }
  0x57   : > { %1921 = vmatpush3.bf16.msra.mxu1 %v2092_v6  ;;  %1928 = vmatprep.subr.bf16.mxu0 %v2097_v13  ;;  %v2152_v6 = vld [vmem:[%s2227_s25 + $0x3a0] sm:$0xff]   ;;  %v2159_v13 = vld [vmem:[%s2227_s25 + $0x330] sm:$0xff]  }
  0x58   : > { %1950 = vmatprep.subr.bf16.mxu1 %v2098_v14  ;;  %v2160_v14 = vld [vmem:[%s2227_s25 + $0x3b0] sm:$0xff]  }
  0x59   : > { %1415 = vmatmul.mubr.bf16.vlgmr.msra.gmra.mrb[4].mxu0 %v1696_v8  ;;  %v2154_v8 = vld [vmem:[%s2227_s25 + $0x3e8] sm:$0xff]  }
  0x5a   : > { %1455 = vmatmul.mubr.bf16.vlgmr.msra.gmra.mrb[4].mxu1 %v1698_v11  ;;  %1929 = vmatpush3.bf16.msra.mxu0 %v2099_v15  ;;  %v2157_v11 = vld [vmem:[%s2227_s25 + $0x370] sm:$0xff]   ;;  %v2161_v15 = vld [vmem:[%s2227_s25 + $0x378] sm:$0xff]  }
  0x5b   : > { %1951 = vmatpush3.bf16.msra.mxu1 %v2100_v16  ;;  %1930 = vmatprep.subr.bf16.mxu0 %v2101_v17  ;;  %v2162_v16 = vld [vmem:[%s2227_s25 + $0x3f8] sm:$0xff]  }
  0x5c   : > { %1952 = vmatprep.subr.bf16.mxu1 %v2102_v18  ;;  %1494 = vmatprep.mubr.bf16.mxu0 %v1701_v48  ;;  %v2163_v17 = vld [vmem:[%s2227_s25 + $0x338] sm:$0xff]  }
  0x5d   : > { %1534 = vmatprep.mubr.bf16.mxu1 %v1703_v50  ;;  %v2164_v18 = vld [vmem:[%s2227_s25 + $0x3b8] sm:$0xff]  }
  0x5e   : > { %1931 = vmatpush3.bf16.msra.mxu0 %v2103_v19  ;;  %v220_v19 = vld [vmem:[%s2222_s21 + $0x30] sm:$0xff] }
  0x5f   : > { %1953 = vmatpush3.bf16.msra.mxu1 %v2104_v20  ;;  %1932 = vmatprep.subr.bf16.mxu0 %v2105_v21  ;;  %v221_v20 = vld [vmem:[%s2222_s21 + $0x38] sm:$0xff]  ;;  %v1704_v21 = vcombine.low %v220_v19, %v220_v19 }
  0x60   : > { %1954 = vmatprep.subr.bf16.mxu1 %v2106_v22  ;;  %v1705_v22 = vcombine.high %v220_v19, %v220_v19 }
  0x62   : > { %1933 = vmatpush3.bf16.msra.mxu0 %v2107_v23  ;;  %v1706_v23 = vcombine.low %v221_v20, %v221_v20 }
  0x63   : > { %1955 = vmatpush3.bf16.msra.mxu1 %v2108_v24  ;;  %1934 = vmatprep.subr.bf16.mxu0 %v2109_v25  ;;  %v1707_v24 = vcombine.high %v221_v20, %v221_v20 }
  0x64   : > { %1956 = vmatprep.subr.bf16.mxu1 %v2110_v26 }
  0x66   : > { %1935 = vmatpush3.bf16.msra.mxu0 %v2111_v27 }
  0x67   : > { %1957 = vmatpush3.bf16.msra.mxu1 %v2112_v28  ;;  %1936 = vmatprep.subr.bf16.mxu0 %v2113_v29 }
  0x68   : > { %1958 = vmatprep.subr.bf16.mxu1 %v2114_v30 }
  0x6a   : > { %1937 = vmatpush3.bf16.msra.mxu0 %v2115_v31 }
  0x6b   : > { %1959 = vmatpush3.bf16.msra.mxu1 %v2116_v32  ;;  %1938 = vmatprep.subr.bf16.mxu0 %v2117_v33 }
  0x6c   : > { %1960 = vmatprep.subr.bf16.mxu1 %v2118_v34 }
  0x6e   : > { %1939 = vmatpush3.bf16.msra.mxu0 %v2119_v35 }
  0x6f   : > { %1961 = vmatpush3.bf16.msra.mxu1 %v2120_v36  ;;  %1940 = vmatprep.subr.bf16.mxu0 %v2121_v37 }
  0x70   : > { %1962 = vmatprep.subr.bf16.mxu1 %v2122_v38 }
  0x72   : > { %1941 = vmatpush3.bf16.msra.mxu0 %v2123_v39 }
  0x73   : > { %1963 = vmatpush3.bf16.msra.mxu1 %v2124_v40  ;;  %1942 = vmatprep.subr.bf16.mxu0 %v2125_v41 }
  0x74   : > { %1964 = vmatprep.subr.bf16.mxu1 %v2126_v42 }
  0x76   : > { %1943 = vmatpush3.bf16.msra.mxu0 %v2127_v43 }
  0x77   : > { %1965 = vmatpush3.bf16.msra.mxu1 %v2128_v44  ;;  %1972 = vmatprep.subr.bf16.mxu0 %v2133_v51 }
  0x78   : > { %1994 = vmatprep.subr.bf16.mxu1 %v2134_v52 }
  0x79   : > { %1495 = vmatmul.mubr.bf16.vlgmr.msra.gmra.mrb[8].mxu0 %v1700_v47 }
  0x7a   : > { %1535 = vmatmul.mubr.bf16.vlgmr.msra.gmra.mrb[8].mxu1 %v1702_v49  ;;  %1973 = vmatpush3.bf16.msra.mxu0 %v2135_v53 }
  0x7b   : > { %1995 = vmatpush3.bf16.msra.mxu1 %v2136_v54  ;;  %1974 = vmatprep.subr.bf16.mxu0 %v2137_v55 }
  0x7c   : > { %1996 = vmatprep.subr.bf16.mxu1 %v2138_v56  ;;  %1574 = vmatprep.mubr.bf16.mxu0 %v1705_v22 }
  0x7d   : > { %1614 = vmatprep.mubr.bf16.mxu1 %v1707_v24 }
  0x7e   : > { %1975 = vmatpush3.bf16.msra.mxu0 %v2139_v57 }
  0x7f   : > { %1997 = vmatpush3.bf16.msra.mxu1 %v2140_v58  ;;  %1976 = vmatprep.subr.bf16.mxu0 %v2141_v59 }
  0x80   : > { %1998 = vmatprep.subr.bf16.mxu1 %v2142_v60 }
  0x82   : > { %1977 = vmatpush3.bf16.msra.mxu0 %v2143_v61 }
  0x83   : > { %1999 = vmatpush3.bf16.msra.mxu1 %v2144_v62  ;;  %1978 = vmatprep.subr.bf16.mxu0 %v2145_v63 }
  0x84   : > { %2000 = vmatprep.subr.bf16.mxu1 %v2146_v0 }
  0x86   : > { %1979 = vmatpush3.bf16.msra.mxu0 %v2147_v1 }
  0x87   : > { %2001 = vmatpush3.bf16.msra.mxu1 %v2148_v2  ;;  %1980 = vmatprep.subr.bf16.mxu0 %v2149_v3 }
  0x88   : > { %2002 = vmatprep.subr.bf16.mxu1 %v2150_v4 }
  0x8a   : > { %1981 = vmatpush3.bf16.msra.mxu0 %v2151_v5 }
  0x8b   : > { %2003 = vmatpush3.bf16.msra.mxu1 %v2152_v6  ;;  %1982 = vmatprep.subr.bf16.mxu0 %v2153_v7  ;;  %v213_v7 = vld [vmem:[#allocation2] sm:$0xff] }
  0x8c   : > { %2004 = vmatprep.subr.bf16.mxu1 %v2154_v8 }
  0x8e   : > { %1983 = vmatpush3.bf16.msra.mxu0 %v2155_v9 }
  0x8f   : > { %2005 = vmatpush3.bf16.msra.mxu1 %v2156_v10  ;;  %1984 = vmatprep.subr.bf16.mxu0 %v2157_v11  ;;  %v1837_v11 = vld [vmem:[%s2379_s3] ss:$0 sm:$0xff] (!%p1836_p6) }
  0x90   : > { %2006 = vmatprep.subr.bf16.mxu1 %v2158_v12 }
  0x92   : > { %1985 = vmatpush3.bf16.msra.mxu0 %v2159_v13 }
  0x93   : > { %2007 = vmatpush3.bf16.msra.mxu1 %v2160_v14  ;;  %1986 = vmatprep.subr.bf16.mxu0 %v2161_v15 }
  0x94   : > { %2008 = vmatprep.subr.bf16.mxu1 %v2162_v16 }
  0x96   : > { %1987 = vmatpush3.bf16.msra.mxu0 %v2163_v17 }
  0x97   : > { %2009 = vmatpush3.bf16.msra.mxu1 %v2164_v18 }
  0x99   : > { %1575 = vmatmul.mubr.bf16.vlgmr.msra.gmra.mrb[12].mxu0 %v1704_v21 }
  0x9a   : > { %1615 = vmatmul.mubr.bf16.vlgmr.msra.gmra.mrb[12].mxu1 %v1706_v23 }
 0x10c   : > { %v1856_v25 = vpop.f32.mrb[0].mxu0 }
 0x10d   : > { %v1878_v26 = vpop.f32.mrb[0].mxu1  ;;  %v1857_v27 = vpop.f32.mrb[1].mxu0 }
 0x10e   : > { %v1879_v28 = vpop.f32.mrb[1].mxu1  ;;  %v1858_v29 = vadd.f32 %v1857_v27, %v1856_v25  ;;  %v1859_v31 = vpop.f32.mrb[2].mxu0 }
 0x10f   : > { %v1880_v30 = vadd.f32 %v1879_v28, %v1878_v26  ;;  %v1881_v32 = vpop.f32.mrb[2].mxu1  ;;  %v1860_v33 = vpop.f32.mrb[3].mxu0 }
 0x110   : > { %v1882_v34 = vpop.f32.mrb[3].mxu1 }
 0x111   : > { %v1377_v35 = vadd.f32 %v1880_v30, %v1858_v29 }
 0x12c   : > { %v1900_v36 = vpop.f32.mrb[4].mxu0 }
 0x12d   : > { %v1922_v37 = vpop.f32.mrb[4].mxu1  ;;  %v1901_v38 = vpop.f32.mrb[5].mxu0 }
 0x12e   : > { %v1923_v39 = vpop.f32.mrb[5].mxu1  ;;  %v1902_v40 = vadd.f32 %v1901_v38, %v1900_v36  ;;  %v1903_v42 = vpop.f32.mrb[6].mxu0 }
 0x12f   : > { %v1924_v41 = vadd.f32 %v1923_v39, %v1922_v37  ;;  %v1925_v43 = vpop.f32.mrb[6].mxu1  ;;  %v1904_v44 = vpop.f32.mrb[7].mxu0 }
 0x130   : > { %v1926_v45 = vpop.f32.mrb[7].mxu1  ;;  %v1417_v46 = vadd.f32 %v1902_v40, %v1377_v35 }
 0x132   : > { %v1457_v47 = vadd.f32 %v1924_v41, %v1417_v46 }
 0x14c   : > { %v1944_v48 = vpop.f32.mrb[8].mxu0 }
 0x14d   : > { %v1966_v49 = vpop.f32.mrb[8].mxu1  ;;  %v1945_v50 = vpop.f32.mrb[9].mxu0 }
 0x14e   : > { %v1946_v51 = vadd.f32 %v1945_v50, %v1944_v48  ;;  %v1967_v52 = vpop.f32.mrb[9].mxu1  ;;  %v1947_v53 = vpop.f32.mrb[10].mxu0 }
 0x14f   : > { %v1968_v54 = vadd.f32 %v1967_v52, %v1966_v49  ;;  %v1969_v55 = vpop.f32.mrb[10].mxu1  ;;  %v1948_v56 = vpop.f32.mrb[11].mxu0 }
 0x150   : > { %v1497_v57 = vadd.f32 %v1946_v51, %v1457_v47  ;;  %v1970_v58 = vpop.f32.mrb[11].mxu1 }
 0x152   : > { %v1537_v59 = vadd.f32 %v1968_v54, %v1497_v57 }
 0x16c   : > { %v1988_v60 = vpop.f32.mrb[12].mxu0 }
 0x16d   : > { %v2010_v61 = vpop.f32.mrb[12].mxu1  ;;  %v1989_v62 = vpop.f32.mrb[13].mxu0 }
 0x16e   : > { %v1990_v63 = vadd.f32 %v1989_v62, %v1988_v60  ;;  %v2011_v0 = vpop.f32.mrb[13].mxu1  ;;  %v1991_v1 = vpop.f32.mrb[14].mxu0 }
 0x16f   : > { %v2012_v2 = vadd.f32 %v2011_v0, %v2010_v61  ;;  %v2013_v3 = vpop.f32.mrb[14].mxu1  ;;  %v1992_v4 = vpop.f32.mrb[15].mxu0 }
 0x170   : > { %v1577_v5 = vadd.f32 %v1990_v63, %v1537_v59  ;;  %v2014_v6 = vpop.f32.mrb[15].mxu1  ;;  %1627 = sbr.rel (%p1836_p6) target bundleno = 413 (0x19d), region = 44 }
 0x172   : > { %v1617_v8 = vadd.f32 %v2012_v2, %v1577_v5 }
 0x174   : > { %v1622_v9 = vadd.f32 %v1617_v8, %v213_v7 }
 0x176   : > { %1623 = vst [vmem:[#allocation2] sm:$0xff] %v1622_v9 }
 0x17d   : > { %v1628_v10 = vld [vmem:[#allocation2] sm:$0xff] }
 0x17e   : > { %v1636_v12 = vadd.f32 %v1837_v11, %v1628_v10 }
 0x180   : > { %v1637_v13 = vsub.f32 0.0, %v1636_v12 }
 0x182   : > { %v1638_v14 = vmul.f32 1.442695, %v1637_v13 }
 0x184   : > { %2169 = vpow2.f32 %v1638_v14 }
 0x18e   : > { %v2170_v15 = vpop.eup %2169 }
 0x18f   : > { %v1640_v16 = vadd.f32 1.0, %v2170_v15 }
 0x191   : > { %2171 = vrcp.f32 %v1640_v16 }
 0x19b   : > { %v2172_v17 = vpop.eup %2171 }
 0x19c   : > { %1642 = vst [vmem:[%s2380_s4] sm:$0xff] %v2172_v17 }
 0x19d PF: > { %s14_s15 = sadd.s32 1, %s2179_s15  }
 0x19e   : > { %p11_p7 = scmp.ge.s32.totalorder %s14_s15, 6  }
 0x1a0   :  { %13 = sbr.rel (!%p11_p7) target bundleno = 1 (0x1), region = 73 }

</bundles_post_ra>
